<compile_context>
chip_gen: v5e
topology: v5e:2x2
jax: 0.10.0
libtpu: 0.0.40
codegen_flags: <defaults>
</compile_context>

<pallas_src>
import math
from functools import partial

import numpy as np
import jax
import jax.numpy as jnp
from jax.experimental import pallas as pl
from jax.experimental.pallas import tpu as pltpu

# ----------------------------- hyper-parameters ------------------------------
NUM_ELEMENTS = 7                      # nr_of_supported_elements

RADIAL_MAX = 0.51                     # nm
RADIAL_MIN = 0.08                     # nm
N_RBF = 16                            # number_of_radial_basis_functions

ANGULAR_MAX = 0.35                    # nm
ANGULAR_MIN = 0.08                    # nm
ANG_DIST_DIV = 8                      # angular_dist_divisions
ANGLE_SECTIONS = 4                    # angle_sections

ETA_R = 19.7 * 100.0                  # nm^-2
ETA_A = 12.5 * 100.0                  # nm^-2
ZETA = 32.0                           # power of two -> repeated squaring
assert ZETA == 32.0

RADIAL_SUBLEN = N_RBF                                   # 16
RADIAL_LEN = NUM_ELEMENTS * RADIAL_SUBLEN               # 112
RADIAL_LANES = 128                                      # 112 padded to 128
ANGULAR_SUBLEN = ANG_DIST_DIV * ANGLE_SECTIONS          # 32
NUM_SPECIES_PAIRS = NUM_ELEMENTS * (NUM_ELEMENTS + 1) // 2   # 28
ANGULAR_LEN = NUM_SPECIES_PAIRS * ANGULAR_SUBLEN        # 896 (multiple of 128)
ANGULAR_LANES = ANGULAR_LEN
NARROW_LANES = 128                                      # 32-entry table tiled 4x

PAD_DIST = 1.0e3    # padded pairs/triples: far outside cutoff -> fc == exp == 0 exactly

VMEM_LIMIT_BYTES = 48 * 1024 * 1024   # fits v7x's 64 MiB; raises v5e's 16 MiB default
RADIAL_ATILE_CAP = 8192               # accumulator 8192*128*4B = 4 MiB
ANGULAR_ATILE_CAP = 4096              # accumulator 4096*896*4B = 14.7 MiB

# radial basis centers (linspace(min, max, n+1)[:-1], as in AniRadialBasisFunction)
RADIAL_CENTERS = np.linspace(RADIAL_MIN, RADIAL_MAX, N_RBF + 1, dtype=np.float32)[:-1]
# angular shifts
SHF_A = np.linspace(ANGULAR_MIN, ANGULAR_MAX, ANG_DIST_DIV + 1, dtype=np.float32)[:-1]
SHF_Z = (np.linspace(0.0, math.pi, ANGLE_SECTIONS + 1, dtype=np.float32)
         + math.pi / (2 * ANGLE_SECTIONS))[:-1]
# flattened (ShfA outer, ShfZ inner) — matches torchani/modelforge flatten order
SHFA_FLAT = np.repeat(SHF_A, ANGLE_SECTIONS).astype(np.float32)      # (32,)
SHFZ_FLAT = np.tile(SHF_Z, ANG_DIST_DIV).astype(np.float32)          # (32,)
COSZ_FLAT = np.cos(SHFZ_FLAT).astype(np.float32)
SINZ_FLAT = np.sin(SHFZ_FLAT).astype(np.float32)

# ---- radial lane-expanded constants (species slot folded into the lane axis) ----
RADIAL_CENTERS_LANES = np.full((RADIAL_LANES,), PAD_DIST, np.float32)
RADIAL_CENTERS_LANES[:RADIAL_LEN] = np.tile(RADIAL_CENTERS, NUM_ELEMENTS)
RADIAL_SLOT_LANES = (np.arange(RADIAL_LANES) // RADIAL_SUBLEN).astype(np.int32)

# ---- angular narrow (128-lane) constants: 32-entry table tiled 4x (finite everywhere;
#      lanes 32..127 are dropped by the zero rows of the replication matrix) ----
SHFA_128 = np.tile(SHFA_FLAT, NARROW_LANES // ANGULAR_SUBLEN).astype(np.float32)
COSZ_128 = np.tile(COSZ_FLAT, NARROW_LANES // ANGULAR_SUBLEN).astype(np.float32)
SINZ_128 = np.tile(SINZ_FLAT, NARROW_LANES // ANGULAR_SUBLEN).astype(np.float32)

# lane -> triu slot index over the 896-lane angular layout
ANGULAR_SLOT_LANES = (np.arange(ANGULAR_LANES) // ANGULAR_SUBLEN).astype(np.int32)

# constant replication matrix: (128, 896), EXPAND[j, 32*s + j] = 1 for j<32, s<28
EXPAND_MAT = np.zeros((NARROW_LANES, ANGULAR_LANES), np.float32)
_j = np.arange(ANGULAR_SUBLEN)
for _s in range(NUM_SPECIES_PAIRS):
    EXPAND_MAT[_j, _s * ANGULAR_SUBLEN + _j] = 1.0


def _round_up(x: int, m: int) -> int:
    return ((x + m - 1) // m) * m


# ------------------------------ host index glue -------------------------------
def triu_index_np(n: int) -> np.ndarray:
    s1, s2 = np.triu_indices(n)
    pair_index = np.arange(s1.shape[0], dtype=np.int64)
    ret = np.zeros((n, n), dtype=np.int64)
    ret[s1, s2] = pair_index
    ret[s2, s1] = pair_index
    return ret


TRIU_INDEX = triu_index_np(NUM_ELEMENTS)


def triple_by_molecule_np(atom_pairs: np.ndarray):
    """Exact numpy port of ANIRepresentation.triple_by_molecule (dynamic shapes)."""
    # TODO(synk): dynamic-shape index bookkeeping (sort/unique_consecutive/nonzero)
    # has no clean Pallas equivalent; done on host, outside the hot path.
    ai1 = atom_pairs.reshape(-1)
    rev_indices = np.argsort(ai1, kind="stable")
    sorted_ai1 = ai1[rev_indices]
    uniq, counts = np.unique(sorted_ai1, return_counts=True)
    pair_sizes = counts * (counts - 1) // 2
    pair_indices = np.repeat(np.arange(len(counts)), pair_sizes)
    central_atom_index = uniq[pair_indices]
    m = int(counts.max()) if counts.size > 0 else 0
    n_groups = pair_sizes.shape[0]
    tril = np.stack(np.tril_indices(m, -1)).astype(np.int64)          # (2, M)
    M = tril.shape[1]
    intra = np.broadcast_to(tril[:, None, :], (2, n_groups, M))
    mask = (np.arange(M)[None, :] < pair_sizes[:, None]).reshape(-1)
    sorted_local_index12 = intra.reshape(2, -1)[:, mask]
    cumsum = np.zeros_like(counts)
    if counts.shape[0] > 1:
        cumsum[1:] = np.cumsum(counts[:-1])
    sorted_local_index12 = sorted_local_index12 + cumsum[pair_indices]
    local_index12 = rev_indices[sorted_local_index12]
    n = atom_pairs.shape[1]
    sign12 = (local_index12 < n).astype(np.int8) * 2 - 1
    return central_atom_index, local_index12 % n, sign12


# -------------------------------- Pallas kernels ------------------------------
def _radial_kernel(d_ref, spec_ref, atoms_ref, centers_ref, slot_ref, out_ref,
                   *, eta, rcut, a_tile):
    # (a_tile, 128) accumulator is resident across the pair-tile (last) grid axis.
    @pl.when(pl.program_id(2) == 0)
    def _init():
        out_ref[...] = jnp.zeros_like(out_ref)

    d = d_ref[...]                                  # (p_tile, 1) f32
    centers = centers_ref[...]                      # (1, 128)  species-tiled centers
    diff = d - centers                              # (p_tile, 128) — lane-dense
    rbf = 0.25 * jnp.exp(-eta * diff * diff)
    fc = jnp.where(d <= rcut, 0.5 * (jnp.cos((jnp.pi / rcut) * d) + 1.0), 0.0)
    feat = rbf * fc                                 # padded pairs -> exactly 0

    spec = spec_ref[...]                            # (p_tile, 2) int32 neighbor species
    slot = slot_ref[...]                            # (1, 128)   int32 lane -> species slot
    feat0 = jnp.where(slot == spec[:, 0:1], feat, 0.0).astype(jnp.bfloat16)
    feat1 = jnp.where(slot == spec[:, 1:2], feat, 0.0).astype(jnp.bfloat16)
    # fuse the two scatter matmuls into a single dot with K = 2*p_tile
    feat_cat = jnp.concatenate([feat0, feat1], axis=0)          # (2*p_tile, 128) bf16

    atoms = atoms_ref[...]                          # (2, p_tile) int32 central atoms
    p_tile = d.shape[0]
    atoms_cat = jnp.concatenate([atoms[0:1, :], atoms[1:2, :]], axis=1)   # (1, 2*p_tile)
    row_base = pl.program_id(0) * a_tile
    rows = jax.lax.broadcasted_iota(jnp.int32, (a_tile, 2 * p_tile), 0) + row_base
    oh = jnp.where(rows == atoms_cat, 1.0, 0.0).astype(jnp.bfloat16)      # exact in bf16

    # scatter-add == one-hot matmul (duplicate indices sum, index_add_ semantics)
    out_ref[...] += jnp.dot(oh, feat_cat, preferred_element_type=jnp.float32)


def _angular_kernel(geo_ref, triu_ref, central_ref, shfa_ref, cosz_ref, sinz_ref,
                    slot_ref, expand_ref, out_ref, *, eta, rca, a_tile):
    @pl.when(pl.program_id(2) == 0)
    def _init():
        out_ref[...] = jnp.zeros_like(out_ref)

    geo = geo_ref[...]                              # (t_tile, 3): [d1, d2, dot]
    d1 = geo[:, 0:1]
    d2 = geo[:, 1:2]
    dotv = geo[:, 2:3]
    # EUP approximate reciprocal + one Newton step (keeps ~f32 accuracy, frees VALU)
    prod = jnp.maximum(d1 * d2, 1e-8)
    inv = pl.reciprocal(prod, approx=True)
    inv = inv * (2.0 - prod * inv)
    cos_t = 0.95 * dotv * inv
    sin_t = jnp.sqrt(jnp.maximum(1.0 - cos_t * cos_t, 0.0))

    # ---- narrow 128-lane block (32-entry table tiled 4x; lanes 32..127 dropped
    #      later by the zero rows of the replication matrix) ----
    cos_dt = cos_t * cosz_ref[...] + sin_t * sinz_ref[...]      # (t_tile, 128)
    base = 0.5 * (1.0 + cos_dt)
    f1 = base                                       # base ** 32 (ZETA) via squaring
    for _ in range(5):
        f1 = f1 * f1
    davg = 0.5 * (d1 + d2)
    adiff = davg - shfa_ref[...]
    f2 = jnp.exp(-eta * adiff * adiff)
    fc1 = jnp.where(d1 <= rca, 0.5 * (jnp.cos((jnp.pi / rca) * d1) + 1.0), 0.0)
    fc2 = jnp.where(d2 <= rca, 0.5 * (jnp.cos((jnp.pi / rca) * d2) + 1.0), 0.0)
    terms = ((2.0 * f1) * f2 * (fc1 * fc2)).astype(jnp.bfloat16)   # padded triples -> 0

    # ---- expand 32-lane block to the 896-lane triu layout with a constant 0/1
    #      matmul (MXU has slack); exact selection so no extra rounding ----
    expanded = jnp.dot(terms, expand_ref[...],
                       preferred_element_type=jnp.float32)      # (t_tile, 896)
    slot = slot_ref[...]                            # (1, 896) lane -> triu slot
    masked = jnp.where(slot == triu_ref[...], expanded, 0.0).astype(jnp.bfloat16)

    t_tile = geo.shape[0]
    row_base = pl.program_id(0) * a_tile
    rows = jax.lax.broadcasted_iota(jnp.int32, (a_tile, t_tile), 0) + row_base
    oh = jnp.where(rows == central_ref[...], 1.0, 0.0).astype(jnp.bfloat16)
    out_ref[...] += jnp.dot(oh, masked, preferred_element_type=jnp.float32)


# ------------------------------ Pallas wrappers --------------------------------
def radial_aev(d, atoms, spec, num_atoms, *, p_tile=256, a_tile=None, num_cores=1):
    """d: (P,), atoms: (2, P) int, spec: (P, 2) int (neighbor species per direction)."""
    assert p_tile % 128 == 0
    P = int(d.shape[0])
    P_pad = _round_up(max(P, 1), p_tile * num_cores)         # fixed-size buckets
    a_pad = _round_up(max(num_atoms, 1), 8)
    if a_tile is None:
        a_tile = min(a_pad, RADIAL_ATILE_CAP)                # single atom tile if it fits
    a_pad = _round_up(a_pad, a_tile)

    d_pad = np.full((P_pad, 1), PAD_DIST, np.float32)
    d_pad[:P, 0] = np.asarray(d, np.float32)
    atoms_pad = np.zeros((2, P_pad), np.int32)
    atoms_pad[:, :P] = np.asarray(atoms, np.int32)
    spec_pad = np.zeros((P_pad, 2), np.int32)
    spec_pad[:P] = np.asarray(spec, np.int32)

    n_pt = P_pad // (num_cores * p_tile)                     # pair tiles per core
    kernel = partial(_radial_kernel, eta=ETA_R, rcut=RADIAL_MAX, a_tile=a_tile)
    grid = (a_pad // a_tile, num_cores, n_pt)
    out = pl.pallas_call(
        kernel,
        out_shape=jax.ShapeDtypeStruct((num_cores, a_pad, RADIAL_LANES), jnp.float32),
        grid=grid,
        in_specs=[
            pl.BlockSpec((p_tile, 1), lambda a, c, p: (c * n_pt + p, 0)),
            pl.BlockSpec((p_tile, 2), lambda a, c, p: (c * n_pt + p, 0)),
            pl.BlockSpec((2, p_tile), lambda a, c, p: (0, c * n_pt + p)),
            pl.BlockSpec((1, RADIAL_LANES), lambda a, c, p: (0, 0)),
            pl.BlockSpec((1, RADIAL_LANES), lambda a, c, p: (0, 0)),
        ],
        out_specs=pl.BlockSpec((None, a_tile, RADIAL_LANES), lambda a, c, p: (c, a, 0)),
        compiler_params=pltpu.CompilerParams(
            dimension_semantics=("parallel", "parallel", "arbitrary"),
            vmem_limit_bytes=VMEM_LIMIT_BYTES),
    )(jnp.asarray(d_pad), jnp.asarray(spec_pad), jnp.asarray(atoms_pad),
      jnp.asarray(RADIAL_CENTERS_LANES).reshape(1, RADIAL_LANES),
      jnp.asarray(RADIAL_SLOT_LANES).reshape(1, RADIAL_LANES))
    return jnp.sum(out, axis=0)[:num_atoms, :RADIAL_LEN]


def angular_aev(geo, central, triu_slot, num_atoms, *, t_tile=256, a_tile=None,
                num_cores=1):
    """geo: (T, 3) = [d1, d2, dot], central: (T,) int, triu_slot: (T,) int."""
    assert t_tile % 128 == 0
    T = int(geo.shape[0])
    T_pad = _round_up(max(T, 1), t_tile * num_cores)
    a_pad = _round_up(max(num_atoms, 1), 8)
    if a_tile is None:
        a_tile = min(a_pad, ANGULAR_ATILE_CAP)               # single atom tile if it fits
    a_pad = _round_up(a_pad, a_tile)

    geo_pad = np.zeros((T_pad, 3), np.float32)
    geo_pad[:, 0] = PAD_DIST
    geo_pad[:, 1] = PAD_DIST                      # padded triples -> fc1*fc2 = 0 exactly
    geo_pad[:T] = np.asarray(geo, np.float32)
    central_pad = np.zeros((1, T_pad), np.int32)
    central_pad[0, :T] = np.asarray(central, np.int32)
    triu_pad = np.zeros((T_pad, 1), np.int32)
    triu_pad[:T, 0] = np.asarray(triu_slot, np.int32)

    n_tt = T_pad // (num_cores * t_tile)                     # triple tiles per core
    kernel = partial(_angular_kernel, eta=ETA_A, rca=ANGULAR_MAX, a_tile=a_tile)
    grid = (a_pad // a_tile, num_cores, n_tt)
    out = pl.pallas_call(
        kernel,
        out_shape=jax.ShapeDtypeStruct((num_cores, a_pad, ANGULAR_LANES), jnp.float32),
        grid=grid,
        in_specs=[
            pl.BlockSpec((t_tile, 3), lambda a, c, p: (c * n_tt + p, 0)),
            pl.BlockSpec((t_tile, 1), lambda a, c, p: (c * n_tt + p, 0)),
            pl.BlockSpec((1, t_tile), lambda a, c, p: (0, c * n_tt + p)),
            pl.BlockSpec((1, NARROW_LANES), lambda a, c, p: (0, 0)),
            pl.BlockSpec((1, NARROW_LANES), lambda a, c, p: (0, 0)),
            pl.BlockSpec((1, NARROW_LANES), lambda a, c, p: (0, 0)),
            pl.BlockSpec((1, ANGULAR_LANES), lambda a, c, p: (0, 0)),
            pl.BlockSpec((NARROW_LANES, ANGULAR_LANES), lambda a, c, p: (0, 0)),
        ],
        out_specs=pl.BlockSpec((None, a_tile, ANGULAR_LANES), lambda a, c, p: (c, a, 0)),
        compiler_params=pltpu.CompilerParams(
            dimension_semantics=("parallel", "parallel", "arbitrary"),
            vmem_limit_bytes=VMEM_LIMIT_BYTES),
    )(jnp.asarray(geo_pad), jnp.asarray(triu_pad), jnp.asarray(central_pad),
      jnp.asarray(SHFA_128).reshape(1, NARROW_LANES),
      jnp.asarray(COSZ_128).reshape(1, NARROW_LANES),
      jnp.asarray(SINZ_128).reshape(1, NARROW_LANES),
      jnp.asarray(ANGULAR_SLOT_LANES).reshape(1, ANGULAR_LANES),
      jnp.asarray(EXPAND_MAT, jnp.bfloat16))
    return jnp.sum(out, axis=0)[:num_atoms, :]


# ------------------------------ forward (module) --------------------------------
def ani_representation_forward(species, pair_indices, d_ij, r_ij, *, a_tile=None,
                               num_cores=1):
    """Mirrors ANIRepresentation.forward; returns (atom_index, aevs)."""
    # TODO(synk): for production, keep fixed-size buckets device-resident and jit the
    # padding so host numpy + H2D copies don't serialize with the kernels.
    num_atoms = int(species.shape[0])
    species_np = np.asarray(species, dtype=np.int64)
    pair_np = np.asarray(pair_indices, dtype=np.int64)           # (2, P)
    d_np = np.asarray(d_ij, dtype=np.float32).reshape(-1)        # (P,)
    r_np = np.asarray(r_ij, dtype=np.float32)                    # (P, 3)

    species12 = species_np[pair_np]                              # (2, P)

    # ---------- radial AEV (scatter-add of rbf*cutoff, on TPU) ----------
    atoms_2P = pair_np.astype(np.int32)                          # (2, P) scatter rows
    spec_P2 = np.stack([species12[1], species12[0]], axis=1).astype(np.int32)
    radial = radial_aev(d_np, atoms_2P, spec_P2, num_atoms, a_tile=a_tile,
                        num_cores=num_cores)

    # ---------- angular preprocessing (host: dynamic shapes) ----------
    # TODO(synk): the `close` filter + triple_by_molecule bookkeeping run on host
    # (dynamic shapes); only static-shaped, bucketed arrays are shipped to TPU.
    close = np.nonzero(d_np <= ANGULAR_MAX)[0]
    pair_c = pair_np[:, close]
    spec_c = species12[:, close]
    r_c = r_np[close]

    central, pair_idx12, sign12 = triple_by_molecule_np(pair_c)
    if central.shape[0] > 0:
        sp_small = spec_c[:, pair_idx12]                         # (2, T)
        r12 = (r_c[pair_idx12.reshape(-1)].reshape(2, -1, 3)
               * sign12[..., None].astype(np.float32))           # (2, T, 3)
        sp_ = np.where(sign12 == 1, sp_small[1], sp_small[0])
        triu_slot = TRIU_INDEX[sp_[0], sp_[1]].astype(np.int32)  # (T,)
        d1 = np.linalg.norm(r12[0], axis=-1)
        d2 = np.linalg.norm(r12[1], axis=-1)
        dotv = np.sum(r12[0] * r12[1], axis=-1)
        geo = np.stack([d1, d2, dotv], axis=1).astype(np.float32)   # (T, 3)
    else:
        geo = np.zeros((0, 3), np.float32)
        central = np.zeros((0,), np.int64)
        triu_slot = np.zeros((0,), np.int32)
    angular = angular_aev(geo, central.astype(np.int32), triu_slot, num_atoms,
                          a_tile=a_tile, num_cores=num_cores)

    # TODO(synk): writing radial+angular into one lane-offset output buffer would
    # save one HBM round-trip; the module needs a contiguous 1008-lane AEV, so the
    # final concat/slice is kept here.
    aevs = jnp.concatenate([radial, angular], axis=-1)           # (A, 1008)
    return jnp.asarray(species, dtype=jnp.int32), aevs


# ------------------------------ numpy reference ---------------------------------
def reference_aev(species, pair_np, d_np, r_np, num_atoms):
    species = np.asarray(species, np.int64)
    pair_np = np.asarray(pair_np, np.int64)
    d_np = np.asarray(d_np, np.float32).reshape(-1)
    r_np = np.asarray(r_np, np.float32)
    species12 = species[pair_np]

    rbf = 0.25 * np.exp(-ETA_R * (d_np[:, None] - RADIAL_CENTERS[None, :]) ** 2)
    fc = np.where(d_np <= RADIAL_MAX, 0.5 * (np.cos(np.pi * d_np / RADIAL_MAX) + 1.0), 0.0)
    feat = (rbf * fc[:, None]).astype(np.float32)
    radial = np.zeros((num_atoms * NUM_ELEMENTS, N_RBF), np.float32)
    index12 = pair_np * NUM_ELEMENTS + species12[::-1]
    np.add.at(radial, index12[0], feat)
    np.add.at(radial, index12[1], feat)
    radial = radial.reshape(num_atoms, RADIAL_LEN)

    angular = np.zeros((num_atoms * NUM_SPECIES_PAIRS, ANGULAR_SUBLEN), np.float32)
    close = np.nonzero(d_np <= ANGULAR_MAX)[0]
    central, pair_idx12, sign12 = triple_by_molecule_np(pair_np[:, close])
    if central.shape[0] > 0:
        spec_c = species12[:, close][:, pair_idx12]
        r12 = (r_np[close][pair_idx12.reshape(-1)].reshape(2, -1, 3)
               * sign12[..., None].astype(np.float32))
        sp_ = np.where(sign12 == 1, spec_c[1], spec_c[0])
        d1 = np.linalg.norm(r12[0], axis=-1)
        d2 = np.linalg.norm(r12[1], axis=-1)
        dotv = np.sum(r12[0] * r12[1], axis=-1)
        cos_t = 0.95 * dotv / np.maximum(d1 * d2, 1e-8)
        sin_t = np.sqrt(np.maximum(1.0 - cos_t * cos_t, 0.0))
        cos_dt = cos_t[:, None] * COSZ_FLAT[None, :] + sin_t[:, None] * SINZ_FLAT[None, :]
        f1 = (0.5 * (1.0 + cos_dt)) ** ZETA
        f2 = np.exp(-ETA_A * (0.5 * (d1 + d2)[:, None] - SHFA_FLAT[None, :]) ** 2)
        fc1 = np.where(d1 <= ANGULAR_MAX, 0.5 * (np.cos(np.pi * d1 / ANGULAR_MAX) + 1.0), 0.0)
        fc2 = np.where(d2 <= ANGULAR_MAX, 0.5 * (np.cos(np.pi * d2 / ANGULAR_MAX) + 1.0), 0.0)
        terms = 2.0 * f1 * f2 * (fc1 * fc2)[:, None]
        idx = central * NUM_SPECIES_PAIRS + TRIU_INDEX[sp_[0], sp_[1]]
        np.add.at(angular, idx, terms.astype(np.float32))
    angular = angular.reshape(num_atoms, ANGULAR_LEN)
    return np.concatenate([radial, angular], axis=-1)


# ----------------------------------- main ---------------------------------------
if __name__ == "__main__":
    key = jax.random.PRNGKey(0)
    kpos, ksp = jax.random.split(key)

    num_atoms = 20
    # positions in a 0.2 nm box -> every pair within both cutoffs (dense test case)
    positions = np.asarray(jax.random.uniform(kpos, (num_atoms, 3),
                                              dtype=jnp.float32)) * 0.2
    species = np.asarray(jax.random.randint(ksp, (num_atoms,), 0, NUM_ELEMENTS))

    # pairlist (forward() input in the original module): unique i<j within cutoff
    i_idx, j_idx = np.triu_indices(num_atoms, 1)
    rij = (positions[j_idx] - positions[i_idx]).astype(np.float32)
    dij = np.linalg.norm(rij, axis=-1)
    keep = dij <= RADIAL_MAX
    pair_indices = np.stack([i_idx[keep], j_idx[keep]]).astype(np.int64)   # (2, P)
    r_ij = rij[keep]                                                        # (P, 3)
    d_ij = dij[keep].astype(np.float32).reshape(-1, 1)                      # (P, 1)

    # num_cores=2 exercises the reduction-axis split (per-core partial accumulators,
    # summed afterwards) -> maps to megacore on v7x, runs sequentially elsewhere.
    atom_index, aevs = ani_representation_forward(species, pair_indices, d_ij, r_ij,
                                                  num_cores=2)
    aevs = jax.block_until_ready(aevs)

    ref = reference_aev(species, pair_indices, d_ij, r_ij, num_atoms)
    aevs_np = np.asarray(aevs)

    assert aevs_np.shape == (num_atoms, RADIAL_LEN + ANGULAR_LEN), aevs_np.shape
    assert aevs_np.dtype == np.float32
    assert np.isfinite(aevs_np).all()
    # bf16 feature/one-hot matmul (f32 accumulate) -> ~0.4% worst-case relative error
    assert np.allclose(aevs_np, ref, rtol=2e-2, atol=1e-3), \
        float(np.max(np.abs(aevs_np - ref)))
    print("KERNEL_OK")
</pallas_src>

<mosaic_0001>
module attributes {stable_mosaic.version = 11 : i64} {
  func.func @_radial_kernel(%arg0: i32, %arg1: i32, %arg2: i32, %arg3: memref<256x1xf32, #tpu.memory_space<vmem>>, %arg4: memref<256x2xi32, #tpu.memory_space<vmem>>, %arg5: memref<2x256xi32, #tpu.memory_space<vmem>>, %arg6: memref<1x128xf32, #tpu.memory_space<vmem>>, %arg7: memref<1x128xi32, #tpu.memory_space<vmem>>, %arg8: memref<1x24x128xf32, #tpu.memory_space<vmem>>) attributes {dimension_semantics = [#tpu.dimension_semantics<parallel>, #tpu.dimension_semantics<parallel>, #tpu.dimension_semantics<arbitrary>], iteration_bounds = array<i64: 1, 2, 1>, scalar_prefetch = 0 : i64, scratch_operands = 0 : i64, tpu.core_type = #tpu.core_type<tc>, window_params = [{transform_indices = @transform_0, window_bounds = array<i64: 256, 1>}, {transform_indices = @transform_1, window_bounds = array<i64: 256, 2>}, {transform_indices = @transform_2, window_bounds = array<i64: 2, 256>}, {pipeline_mode = #tpu.pipeline_mode<synchronous>, transform_indices = @transform_3, window_bounds = array<i64: 1, 128>}, {pipeline_mode = #tpu.pipeline_mode<synchronous>, transform_indices = @transform_4, window_bounds = array<i64: 1, 128>}, {transform_indices = @transform_5, window_bounds = array<i64: 1, 24, 128>}]} {
    %c0_i32 = arith.constant 0 : i32
    %0 = arith.cmpi eq, %arg2, %c0_i32 : i32
    %1 = arith.extui %0 : i1 to i32
    %c0_i32_0 = arith.constant 0 : i32
    %2 = arith.cmpi ne, %1, %c0_i32_0 : i32
    scf.if %2 {
      %cst_27 = arith.constant 0.000000e+00 : f32
      %65 = vector.broadcast %cst_27 : f32 to vector<24x128xf32>
      %c0_28 = arith.constant 0 : index
      %c0_29 = arith.constant 0 : index
      %c0_30 = arith.constant 0 : index
      %66 = vector.load %arg8[%c0_28, %c0_29, %c0_30] : memref<1x24x128xf32, #tpu.memory_space<vmem>>, vector<1x24x128xf32>
      %67 = vector.shape_cast %66 : vector<1x24x128xf32> to vector<24x128xf32>
      %68 = vector.shape_cast %65 : vector<24x128xf32> to vector<1x24x128xf32>
      tpu.vector_store %arg8[%c0_28, %c0_29, %c0_30], %68 {strides = array<i32>} : memref<1x24x128xf32, #tpu.memory_space<vmem>>, vector<1x24x128xf32>,
    } else {
    }
    %c0 = arith.constant 0 : index
    %c0_1 = arith.constant 0 : index
    %3 = vector.load %arg3[%c0, %c0_1] : memref<256x1xf32, #tpu.memory_space<vmem>>, vector<256x1xf32>
    %c0_2 = arith.constant 0 : index
    %c0_3 = arith.constant 0 : index
    %4 = vector.load %arg6[%c0_2, %c0_3] : memref<1x128xf32, #tpu.memory_space<vmem>>, vector<1x128xf32>
    %5 = vector.broadcast %3 : vector<256x1xf32> to vector<256x128xf32>
    %6 = vector.broadcast %4 : vector<1x128xf32> to vector<256x128xf32>
    %7 = arith.subf %5, %6 : vector<256x128xf32>
    %cst = arith.constant -1.970000e+03 : f32
    %8 = vector.broadcast %cst : f32 to vector<256x128xf32>
    %9 = arith.mulf %8, %7 : vector<256x128xf32>
    %10 = arith.mulf %9, %7 : vector<256x128xf32>
    %11 = math.exp %10 : vector<256x128xf32>
    %cst_4 = arith.constant 2.500000e-01 : f32
    %12 = vector.broadcast %cst_4 : f32 to vector<256x128xf32>
    %13 = arith.mulf %12, %11 : vector<256x128xf32>
    %cst_5 = arith.constant 5.100000e-01 : f32
    %14 = vector.broadcast %cst_5 : f32 to vector<256x1xf32>
    %15 = arith.cmpf ole, %3, %14 : vector<256x1xf32>
    %cst_6 = arith.constant 6.15998554 : f32
    %16 = vector.broadcast %cst_6 : f32 to vector<256x1xf32>
    %17 = arith.mulf %16, %3 : vector<256x1xf32>
    %18 = math.cos %17 : vector<256x1xf32>
    %cst_7 = arith.constant 1.000000e+00 : f32
    %19 = vector.broadcast %cst_7 : f32 to vector<256x1xf32>
    %20 = arith.addf %18, %19 : vector<256x1xf32>
    %cst_8 = arith.constant 5.000000e-01 : f32
    %21 = vector.broadcast %cst_8 : f32 to vector<256x1xf32>
    %22 = arith.mulf %21, %20 : vector<256x1xf32>
    %cst_9 = arith.constant 0.000000e+00 : f32
    %23 = vector.broadcast %cst_9 : f32 to vector<256x1xf32>
    %24 = arith.select %15, %22, %23 : vector<256x1xi1>, vector<256x1xf32>
    %25 = vector.broadcast %24 : vector<256x1xf32> to vector<256x128xf32>
    %26 = arith.mulf %13, %25 : vector<256x128xf32>
    %c0_10 = arith.constant 0 : index
    %c0_11 = arith.constant 0 : index
    %27 = vector.load %arg4[%c0_10, %c0_11] : memref<256x2xi32, #tpu.memory_space<vmem>>, vector<256x2xi32>
    %c0_12 = arith.constant 0 : index
    %c0_13 = arith.constant 0 : index
    %28 = vector.load %arg7[%c0_12, %c0_13] : memref<1x128xi32, #tpu.memory_space<vmem>>, vector<1x128xi32>
    %29 = vector.extract_strided_slice %27 {offsets = [0, 0], sizes = [256, 1], strides = [1, 1]} : vector<256x2xi32> to vector<256x1xi32>
    %30 = vector.broadcast %28 : vector<1x128xi32> to vector<256x128xi32>
    %31 = vector.broadcast %29 : vector<256x1xi32> to vector<256x128xi32>
    %32 = arith.cmpi eq, %30, %31 : vector<256x128xi32>
    %cst_14 = arith.constant 0.000000e+00 : f32
    %33 = vector.broadcast %cst_14 : f32 to vector<256x128xf32>
    %34 = arith.select %32, %26, %33 : vector<256x128xi1>, vector<256x128xf32>
    %35 = arith.truncf %34 : vector<256x128xf32> to vector<256x128xbf16>
    %36 = vector.extract_strided_slice %27 {offsets = [0, 1], sizes = [256, 1], strides = [1, 1]} : vector<256x2xi32> to vector<256x1xi32>
    %37 = vector.broadcast %28 : vector<1x128xi32> to vector<256x128xi32>
    %38 = vector.broadcast %36 : vector<256x1xi32> to vector<256x128xi32>
    %39 = arith.cmpi eq, %37, %38 : vector<256x128xi32>
    %cst_15 = arith.constant 0.000000e+00 : f32
    %40 = vector.broadcast %cst_15 : f32 to vector<256x128xf32>
    %41 = arith.select %39, %26, %40 : vector<256x128xi1>, vector<256x128xf32>
    %42 = arith.truncf %41 : vector<256x128xf32> to vector<256x128xbf16>
    %43 = tpu.concatenate %35, %42 in 0 : vector<256x128xbf16>, vector<256x128xbf16> -> vector<512x128xbf16>
    %c0_16 = arith.constant 0 : index
    %c0_17 = arith.constant 0 : index
    %44 = vector.load %arg5[%c0_16, %c0_17] : memref<2x256xi32, #tpu.memory_space<vmem>>, vector<2x256xi32>
    %45 = vector.extract_strided_slice %44 {offsets = [0, 0], sizes = [1, 256], strides = [1, 1]} : vector<2x256xi32> to vector<1x256xi32>
    %46 = vector.extract_strided_slice %44 {offsets = [1, 0], sizes = [1, 256], strides = [1, 1]} : vector<2x256xi32> to vector<1x256xi32>
    %47 = tpu.concatenate %45, %46 in 1 : vector<1x256xi32>, vector<1x256xi32> -> vector<1x512xi32>
    %c24_i32 = arith.constant 24 : i32
    %48 = arith.muli %arg0, %c24_i32 : i32
    %49 = tpu.iota {dimensions = array<i32: 0>} : vector<24x512xi32>
    %50 = vector.broadcast %48 : i32 to vector<24x512xi32>
    %51 = arith.addi %49, %50 : vector<24x512xi32>
    %52 = vector.broadcast %47 : vector<1x512xi32> to vector<24x512xi32>
    %53 = arith.cmpi eq, %51, %52 : vector<24x512xi32>
    %cst_18 = arith.constant 1.000000e+00 : f32
    %cst_19 = arith.constant 0.000000e+00 : f32
    %54 = vector.broadcast %cst_18 : f32 to vector<24x512xf32>
    %55 = vector.broadcast %cst_19 : f32 to vector<24x512xf32>
    %56 = arith.select %53, %54, %55 : vector<24x512xi1>, vector<24x512xf32>
    %57 = arith.truncf %56 : vector<24x512xf32> to vector<24x512xbf16>
    %c0_20 = arith.constant 0 : index
    %c0_21 = arith.constant 0 : index
    %c0_22 = arith.constant 0 : index
    %58 = vector.load %arg8[%c0_20, %c0_21, %c0_22] : memref<1x24x128xf32, #tpu.memory_space<vmem>>, vector<1x24x128xf32>
    %59 = vector.shape_cast %58 : vector<1x24x128xf32> to vector<24x128xf32>
    %cst_23 = arith.constant dense<0.000000e+00> : vector<24x128xf32>
    %60 = tpu.matmul %57, %43, %cst_23 {dimension_numbers = #tpu.dot_dimension_numbers<[1], [0], [0], [1], [0, 0, 1, 1], [], []>} : vector<24x512xbf16>, vector<512x128xbf16>, vector<24x128xf32> -> vector<24x128xf32>
    %61 = arith.addf %59, %60 : vector<24x128xf32>
    %c0_24 = arith.constant 0 : index
    %c0_25 = arith.constant 0 : index
    %c0_26 = arith.constant 0 : index
    %62 = vector.load %arg8[%c0_24, %c0_25, %c0_26] : memref<1x24x128xf32, #tpu.memory_space<vmem>>, vector<1x24x128xf32>
    %63 = vector.shape_cast %62 : vector<1x24x128xf32> to vector<24x128xf32>
    %64 = vector.shape_cast %61 : vector<24x128xf32> to vector<1x24x128xf32>
    tpu.vector_store %arg8[%c0_24, %c0_25, %c0_26], %64 {strides = array<i32>} : memref<1x24x128xf32, #tpu.memory_space<vmem>>, vector<1x24x128xf32>,
    return
  }
  func.func @transform_0(%arg0: i32, %arg1: i32, %arg2: i32) -> (i32, i32) {
    %c1_i32 = arith.constant 1 : i32
    %0 = arith.muli %arg1, %c1_i32 : i32
    %1 = arith.addi %0, %arg2 : i32
    %c0_i32 = arith.constant 0 : i32
    %c0_i32_0 = arith.constant 0 : i32
    return %1, %c0_i32 : i32, i32
  }
  func.func @transform_1(%arg0: i32, %arg1: i32, %arg2: i32) -> (i32, i32) {
    %c1_i32 = arith.constant 1 : i32
    %0 = arith.muli %arg1, %c1_i32 : i32
    %1 = arith.addi %0, %arg2 : i32
    %c0_i32 = arith.constant 0 : i32
    %c0_i32_0 = arith.constant 0 : i32
    return %1, %c0_i32 : i32, i32
  }
  func.func @transform_2(%arg0: i32, %arg1: i32, %arg2: i32) -> (i32, i32) {
    %c1_i32 = arith.constant 1 : i32
    %0 = arith.muli %arg1, %c1_i32 : i32
    %1 = arith.addi %0, %arg2 : i32
    %c0_i32 = arith.constant 0 : i32
    %c0_i32_0 = arith.constant 0 : i32
    return %c0_i32, %1 : i32, i32
  }
  func.func @transform_3(%arg0: i32, %arg1: i32, %arg2: i32) -> (i32, i32) {
    %c0_i32 = arith.constant 0 : i32
    %c0_i32_0 = arith.constant 0 : i32
    %c0_i32_1 = arith.constant 0 : i32
    return %c0_i32, %c0_i32_0 : i32, i32
  }
  func.func @transform_4(%arg0: i32, %arg1: i32, %arg2: i32) -> (i32, i32) {
    %c0_i32 = arith.constant 0 : i32
    %c0_i32_0 = arith.constant 0 : i32
    %c0_i32_1 = arith.constant 0 : i32
    return %c0_i32, %c0_i32_0 : i32, i32
  }
  func.func @transform_5(%arg0: i32, %arg1: i32, %arg2: i32) -> (i32, i32, i32) {
    %c0_i32 = arith.constant 0 : i32
    %c0_i32_0 = arith.constant 0 : i32
    return %arg1, %arg0, %c0_i32 : i32, i32, i32
  }
}

</mosaic_0001>

<bundles_post_ra>
// kernel: tpu_custom_call.1
= control target key start
LH: loop header
LB: loop body
LE: loop exit
PB: predicated region body
PF: predicated region fallthrough
CT: control target
= control target key end

     0   :  { %10 = vsyncpa [#allocation3], 0  ;;  %s13468_s0 = inlined_call_operand.vmem [shape: f32[512,1], index: 0, kind: input, shape index: {}]   ;;  %s13469_s1 = inlined_call_operand.vmem [shape: s32[512,2], index: 1, kind: input, shape index: {}]   ;;  %s13470_s2 = inlined_call_operand.vmem [shape: s32[2,512], index: 2, kind: input, shape index: {}]   ;;  %s13471_s3 = inlined_call_operand.vmem [shape: f32[1,128], index: 3, kind: input, shape index: {}]   ;;  %s13472_s4 = inlined_call_operand.vmem [shape: s32[1,128], index: 4, kind: input, shape index: {}]   ;;  %s13473_s5 = inlined_call_operand.hbm [shape: f32[2,24,128], index: 5, kind: output, shape index: {}]  }
   0x1   :  { %12 = vsyncpa [#allocation3 + $0x1], 0  ;;  %s7287_s18 = smov 0   ;;  %s7289_s19 = smov 0  }
   0x2   :  { %s7291_s20 = smov 0   ;;  %s7293_s21 = smov 0  }
   0x3   :  { %s7295_s22 = smov 0   ;;  %s7297_s23 = smov 0  }
   0x4 LB: > { %s6846_s24 = sadd.s32 4294967295, %s7244_s23   ;;  %s6847_s25 = sadd.s32 4294967294, %s7244_s23   ;;  %s7244_s23 = sphi %s7297_s23, %s18_s23   ;;  %s7240_s22 = sphi %s7295_s22, %s14290_s22   ;;  %s7236_s21 = sphi %s7293_s21, %s14289_s21   ;;  %s7232_s20 = sphi %s7291_s20, %s14288_s20   ;;  %s7228_s19 = sphi %s7289_s19, %s14287_s19   ;;  %s7224_s18 = sphi %s7287_s18, %s14286_s18  }
   0x5   : > { %s33_s26 = sadd.s32 1, %s7240_s22  ;;  %s172_s27 = sadd.s32 1, %s7232_s20 }
   0x6   : > { %p35_p0 = scmp.ge.s32.totalorder %s33_s26, 2  ;;  %p182_p1 = scmp.ne.s32.totalorder %s7232_s20, %s7228_s19 }
   0x7   : > { %p183_p2 = scmp.eq.s32.totalorder %s6846_s24, 1  ;;  %p188_p3 = scmp.ne.s32.totalorder %s7228_s19, %s7224_s18 }
   0x8   : > { %s14292_s26 = smov (%p35_p0, %s33_s26), 0  ;;  %p189_p5 = scmp.eq.s32.totalorder %s6847_s25, 1 }
   0x9   : > { %p7327_p4 = por %p183_p2, %p182_p1  ;;  %s167_s29 = ssub.s32 %s7240_s22, %s14292_s26 }
   0xa   : > { %p6850_p6 = scmp.ge.s32.totalorder %s7244_s23, 1  ;;  %p170_p7 = scmp.eq.s32.totalorder %s167_s29, 0 }
   0xb   : > { %p7334_p8 = por %p189_p5, %p188_p3  ;;  %p246_p9 = scmp.lt.s32.totalorder %s7244_s23, 3 }
   0xc   : > { %s7340_s6 = scalar_select %p170_p7, %s7232_s20, %s172_s27  }
   0xd   : > { %p247_p10 = pnand %p6850_p6, %p246_p9 }
   0xf   : > { %250 = sbr.rel (%p247_p10) target bundleno = 1799 (0x707), region = 40 }
  0x14   : > { %s6851_s7 = sshll.u32 %s7236_s21, 5  ;;  %v13474_v0 = vmov 0   ;;  %s6855_s29 = sshll.u32 %s7236_s21, 1 }
  0x15   : > { %7043 = vset.pattern.permute.xlu2 %v13474_v0  ;;  %7042 = vset.pattern.permute.xlu1 %v13474_v0  ;;  %p289_p11 = scmp.lt.s32.totalorder %s6851_s7, 63  ;;  %p305_p12 = scmp.lt.s32.totalorder %s6855_s29, 3 }
  0x16   : > { %7041 = vset.pattern.permute.xlu0 %v13474_v0  ;;  %s7186_s9 = scalar_lea.hbm %s13473_s5, 48 }
  0x17   : > { %s14294_s7 = smov (!%p289_p11, %s6851_s7), 63  ;;  %s14296_s29 = smov (!%p305_p12, %s6855_s29), 3 }
  0x18   : > { %s6852_s8 = sshll.u32 %s14294_s7, 3  ;;  %s6856_s7 = sshll.u32 %s14296_s29, 1 }
  0x19   : > { %s7354_s11 = scalar_lea.vmem %s13468_s0, %s6852_s8  ;;  %s12550_s14 = scalar_lea.vmem %s13469_s1, %s6852_s8 }
  0x1a   : > { %v323_v1 = vld [vmem:[%s7354_s11 + $0x20] sm:$0xff]  ;;  %v321_v2 = vld [vmem:[%s7354_s11 + $0x10] sm:$0xff]  ;;  %v324_v4 = vld [vmem:[%s7354_s11 + $0x28] sm:$0xff]  ;;  %s308_s10 = scalar_lea.vmem %s13470_s2, %s6856_s7 }
  0x1b   : > { %v319_v3 = vld [vmem:[%s7354_s11] sm:$0xff]  ;;  %374 = vperm.xlu2 %7043, %v323_v1   ;;  %364 = vperm.xlu1 %7042, %v321_v2   ;;  %v322_v5 = vld [vmem:[%s7354_s11 + $0x18] sm:$0xff]  ;;  %v320_v6 = vld [vmem:[%s7354_s11 + $0x8] sm:$0xff]  ;;  %v7407_v19 = vmul.f32 6.1599855, %v323_v1 }
  0x1c   : > { %354 = vperm.xlu0 %7041, %v319_v3   ;;  %v327_v7 = vld [vmem:[%s7354_s11 + $0x40] sm:$0xff]  ;;  %v7364_v8 = vld [vmem:[%s7354_s11 + $0x38] sm:$0xff]  ;;  %v7367_v9 = vld [vmem:[%s7354_s11 + $0x30] sm:$0xff]  ;;  %v7415_v22 = vmul.f32 6.1599855, %v321_v2 }
  0x1d   : > { %v7372_v10 = vld [vmem:[%s7354_s11 + $0x58] sm:$0xff]  ;;  %v7375_v11 = vld [vmem:[%s7354_s11 + $0x50] sm:$0xff]  ;;  %v7378_v12 = vld [vmem:[%s7354_s11 + $0x48] sm:$0xff]  ;;  %13759 = vst [vmem:[#allocation5_spill] sm:$0xff] %v7407_v19  ;;  %v1390_v23 = vand.u32 2139095040, %v7407_v19 }
  0x1e   : > { %v7384_v13 = vld [vmem:[%s7354_s11 + $0x70] sm:$0xff]  ;;  %v7387_v14 = vld [vmem:[%s7354_s11 + $0x68] sm:$0xff]  ;;  %v7390_v15 = vld [vmem:[%s7354_s11 + $0x60] sm:$0xff]  ;;  %v1082_v25 = vand.u32 2139095040, %v7415_v22  ;;  %v7424_v26 = vmul.f32 6.1599855, %v319_v3 }
  0x1f   : > { %v7396_v16 = vld [vmem:[%s7354_s11 + $0x88] sm:$0xff]  ;;  %v7399_v17 = vld [vmem:[%s7354_s11 + $0x80] sm:$0xff]  ;;  %v7402_v18 = vld [vmem:[%s7354_s11 + $0x78] sm:$0xff]  ;;  %v1391_v27 = vshrl.u32 %v1390_v23, 23  ;;  %v7428_v30 = vmul.f32 6.1599855, %v324_v4 }
  0x20   : > { %v7410_v20 = vld [vmem:[%s7354_s11 + $0xa0] sm:$0xff]  ;;  %v7413_v21 = vld [vmem:[%s7354_s11 + $0x98] sm:$0xff]  ;;  %v7421_v24 = vld [vmem:[%s7354_s11 + $0x90] sm:$0xff]  ;;  %v1083_v28 = vshrl.u32 %v1082_v25, 23  ;;  %v774_v29 = vand.u32 2139095040, %v7424_v26 }
  0x21   : > { %13760 = vst [vmem:[#allocation6_spill] sm:$0xff] %v7428_v30  ;;  %v6869_v31 = vadd.s32 4294967169, %v1391_v27  ;;  %v7430_v34 = vmul.f32 6.1599855, %v322_v5  ;;  %v1544_v35 = vand.u32 2139095040, %v7428_v30  ;;  %v7435_v40 = vld [vmem:[%s7354_s11 + $0xb8] sm:$0xff] }
  0x22   : > { %v6863_v32 = vadd.s32 4294967169, %v1083_v28  ;;  %v775_v33 = vshrl.u32 %v774_v29, 23  ;;  %v7438_v41 = vld [vmem:[%s7354_s11 + $0xb0] sm:$0xff]  ;;  %v340_v42 = vld [vmem:[%s7354_s11 + $0xa8] sm:$0xff]  ;;  %v7443_v44 = vmul.f32 6.1599855, %v320_v6 }
  0x23   : > { %379 = vperm.xlu2 %7043, %v324_v4   ;;  %369 = vperm.xlu1 %7042, %v322_v5   ;;  %13761 = vst [vmem:[#allocation7_spill] sm:$0xff] %v7430_v34  ;;  %v1397_v36 = vadd.s32 1, %v6869_v31  ;;  %v1236_v39 = vand.u32 2139095040, %v7430_v34  ;;  %v1545_v43 = vshrl.u32 %v1544_v35, 23  ;;  %v7445_v47 = vmul.f32 6.1599855, %v327_v7 }
  0x24   : > { %359 = vperm.xlu0 %7041, %v320_v6   ;;  %v1089_v37 = vadd.s32 1, %v6863_v32  ;;  %v6857_v38 = vadd.s32 4294967169, %v775_v33  ;;  %v928_v52 = vand.u32 2139095040, %v7443_v44  ;;  %v345_v58 = vld [vmem:[%s7354_s11 + $0xd0] sm:$0xff]  ;;  %v344_v59 = vld [vmem:[%s7354_s11 + $0xc8] sm:$0xff]  ;;  %v346_v0 = vld [vmem:[%s7354_s11 + $0xd8] sm:$0xff] }
  0x25   : > { %vm1398_vm0 = vcmp.gt.s32.totalorder %v1397_v36, 0  ;;  %v1237_v46 = vshrl.u32 %v1236_v39, 23  ;;  %13762 = vst [vmem:[#allocation8_spill] sm:$0xff] %v7445_v47  ;;  %v6872_v49 = vadd.s32 4294967169, %v1545_v43  ;;  %v2006_v53 = vand.u32 2139095040, %v7445_v47 }
  0x26   : > { %vm1090_vm1 = vcmp.gt.s32.totalorder %v1089_v37, 0  ;;  %v781_v45 = vadd.s32 1, %v6857_v38  ;;  %v1399_v48 = vsel %vm1398_vm0, %v1397_v36, 0  ;;  %v929_v61 = vshrl.u32 %v928_v52, 23 }
  0x27   : > { %v1091_v50 = vsel %vm1090_vm1, %v1089_v37, 0  ;;  %v6866_v51 = vadd.s32 4294967169, %v1237_v46  ;;  %v7449_v54 = vand.u32 31, %v1399_v48  ;;  %v1551_v56 = vadd.s32 1, %v6872_v49 }
  0x28   : > { %vm782_vm2 = vcmp.gt.s32.totalorder %v781_v45, 0  ;;  %v7451_v55 = vand.u32 31, %v1091_v50  ;;  %v2007_v62 = vshrl.u32 %v2006_v53, 23  ;;  %v7464_v3 = vmul.f32 6.1599855, %v7364_v8 }
  0x29   : > { %13763 = vst [vmem:[#allocation9_spill] sm:$0xff] %v7449_v54  ;;  %v783_v57 = vsel %vm782_vm2, %v781_v45, 0  ;;  %v1243_v60 = vadd.s32 1, %v6866_v51  ;;  %v7456_v63 = vsub.s32 32, %v7449_v54  ;;  %vm1552_vm3 = vcmp.gt.s32.totalorder %v1551_v56, 0 }
  0x2a   : > { %v7459_v1 = vsub.s32 32, %v7451_v55  ;;  %v7461_v2 = vand.u32 31, %v783_v57  ;;  %13765 = vst [vmem:[#allocation11_spill] sm:$0xff] %v7464_v3  ;;  %v7466_v4 = vshrl.u32 %v1399_v48, 5  ;;  %v6860_v5 = vadd.s32 4294967169, %v929_v61 }
  0x2b   : > { %394 = vperm.xlu2 %7043, %v327_v7   ;;  %389 = vperm.xlu1 %7042, %v7364_v8   ;;  %13764 = vst [vmem:[#allocation10_spill] sm:$0xff] %v7456_v63  ;;  %vm1244_vm4 = vcmp.gt.s32.totalorder %v1243_v60, 0  ;;  %v6881_v6 = vadd.s32 4294967169, %v2007_v62  ;;  %v343_v7 = vld [vmem:[%s7354_s11 + $0xc0] sm:$0xff]  ;;  %v13478_v23 = vmov 2102212464  }
  0x2c   : > { %384 = vperm.xlu0 %7041, %v7367_v9   ;;  %13766 = vst [vmem:[#allocation12_spill] sm:$0xff] %v7466_v4  ;;  %v1413_v25 = vshll.u32 %v13478_v23, %v7449_v54  ;;  %v13480_v27 = vmov 920167782   ;;  %v1553_v31 = vsel %vm1552_vm3, %v1551_v56, 0  ;;  %v13476_v8 = vmov 1326507024  }
  0x2d   : > { %v1414_v28 = vshrl.u32 %v13480_v27, %v7456_v63  ;;  %v1416_v29 = vshll.u32 %v13480_v27, %v7449_v54  ;;  %v1417_v32 = vshrl.u32 %v13476_v8, %v7456_v63  ;;  %v1105_v33 = vshll.u32 %v13478_v23, %v7451_v55 }
  0x2e   : > { %v1106_v35 = vshrl.u32 %v13480_v27, %v7459_v1  ;;  %v7482_v36 = vsub.s32 32, %v7461_v2  ;;  %v7484_v37 = vshrl.u32 %v1091_v50, 5  ;;  %v1108_v38 = vshll.u32 %v13480_v27, %v7451_v55 }
  0x2f   : > { %v1109_v39 = vshrl.u32 %v13476_v8, %v7459_v1  ;;  %vm1422_vm5 = vcmp.lt.s32.totalorder %v7466_v4, 4  ;;  %v7494_v43 = vand.u32 31, %v1553_v31  ;;  %v1852_v45 = vand.u32 2139095040, %v7464_v3 }
  0x30   : > { %v7497_v46 = vor.u32 %v1414_v28, %v1413_v25  ;;  %v797_v48 = vshll.u32 %v13478_v23, %v7461_v2  ;;  %v1245_v49 = vsel %vm1244_vm4, %v1243_v60, 0  ;;  %v935_v50 = vadd.s32 1, %v6860_v5 }
  0x31   : > { %13768 = vst [vmem:[#allocation14_spill] sm:$0xff] %v7494_v43  ;;  %v1418_v51 = vor.u32 %v1417_v32, %v1416_v29  ;;  %v7502_v52 = vor.u32 %v1106_v35, %v1105_v33  ;;  %v2013_v53 = vadd.s32 1, %v6881_v6  ;;  %v1110_v56 = vor.u32 %v1109_v39, %v1108_v38  ;;  %v348_v33 = vld [vmem:[%s7354_s11 + $0xe8] sm:$0xff]  ;;  %v347_v35 = vld [vmem:[%s7354_s11 + $0xe0] sm:$0xff] }
  0x32   : > { %13769 = vst [vmem:[#allocation15_spill] sm:$0xff] %v7497_v46  ;;  %vm1114_vm6 = vcmp.lt.s32.totalorder %v7484_v37, 4  ;;  %v800_v61 = vshll.u32 %v13480_v27, %v7461_v2  ;;  %v7513_v60 = vsub.s32 32, %v7494_v43  ;;  %v7515_v62 = vand.u32 31, %v1245_v49 }
  0x33   : > { %409 = vperm.xlu2 %7043, %v7372_v10   ;;  %404 = vperm.xlu1 %7042, %v7375_v11   ;;  %v1853_v5 = vshrl.u32 %v1852_v45, 23  ;;  %v7520_v6 = vsel %vm1422_vm5, %v7497_v46, 920167782  ;;  %vm936_vm7 = vcmp.gt.s32.totalorder %v935_v50, 0  ;;  %v7529_v25 = vsel %vm1422_vm5, %v1418_v51, 1326507024 }
  0x34   : > { %399 = vperm.xlu0 %7041, %v7378_v12   ;;  %13770 = vst [vmem:[#allocation16_spill] sm:$0xff] %v7513_v60  ;;  %v7534_v28 = vsel %vm1114_vm6, %v7502_v52, 920167782  ;;  %vm2014_vm8 = vcmp.gt.s32.totalorder %v2013_v53, 0  ;;  %v7540_v32 = vsel %vm1114_vm6, %v1110_v56, 1326507024  ;;  %v1567_v38 = vshll.u32 %v13478_v23, %v7494_v43 }
  0x35   : > { %13771 = vst [vmem:[#allocation17_spill] sm:$0xff] %v7515_v62  ;;  %v1568_v39 = vshrl.u32 %v13480_v27, %v7513_v60  ;;  %v7550_v45 = vsub.s32 32, %v7515_v62  ;;  %v7552_v51 = vshrl.u32 %v1553_v31, 5  ;;  %v6878_v56 = vadd.s32 4294967169, %v1853_v5 }
  0x36   : > { %13772 = vst [vmem:[#allocation18_spill] sm:$0xff] %v7520_v6  ;;  %v13777_v31 = vmov 920167782   ;;  %v7582_v47 = vmul.f32 6.1599855, %v7378_v12 }
  0x37   : > { %13774 = vst [vmem:[#allocation20_spill] sm:$0xff] %v7529_v25  ;;  %vm1576_vm10 = vcmp.lt.s32.totalorder %v7552_v51, 4 }
  0x38   : > { %13775 = vst [vmem:[#allocation21_spill] sm:$0xff] %v7550_v45 }
  0x39   : > { %13782 = vst [vmem:[#allocation25_spill] sm:$0xff] %v7582_v47 }
  0x3b   : > { %424 = vperm.xlu2 %7043, %v7384_v13   ;;  %419 = vperm.xlu1 %7042, %v7387_v14  }
  0x3c   : > { %414 = vperm.xlu0 %7041, %v7390_v15  }
  0x43   : > { %439 = vperm.xlu2 %7043, %v7396_v16   ;;  %434 = vperm.xlu1 %7042, %v7399_v17  }
  0x44   : > { %429 = vperm.xlu0 %7041, %v7402_v18  }
  0x4b   : > { %454 = vperm.xlu2 %7043, %v7410_v20   ;;  %449 = vperm.xlu1 %7042, %v7413_v21  }
  0x4c   : > { %444 = vperm.xlu0 %7041, %v7421_v24  }
  0x53   : > { %469 = vperm.xlu2 %7043, %v7435_v40   ;;  %464 = vperm.xlu1 %7042, %v7438_v41  }
  0x54   : > { %459 = vperm.xlu0 %7041, %v340_v42   ;;  %v7491_v42 = vmul.f32 6.1599855, %v7367_v9  ;;  %v798_v9 = vshrl.u32 %v13480_v27, %v7482_v36  ;;  %v7561_v27 = vshrl.u32 %v1245_v49, 5  ;;  %v1260_v49 = vshrl.u32 %v13777_v31, %v7550_v45 }
  0x56   : > { %13767 = vst [vmem:[#allocation13_spill] sm:$0xff] %v7491_v42  ;;  %v7536_v29 = vor.u32 %v798_v9, %v797_v48  ;;  %v937_v48 = vsel %vm936_vm7, %v935_v50, 0  ;;  %v2015_v9 = vsel %vm2014_vm8, %v2013_v53, 0  ;;  %v1570_v50 = vshll.u32 %v13777_v31, %v7494_v43 }
  0x57   : > { %v13778_v53 = vmov 1326507024   ;;  %vm1268_vm11 = vcmp.lt.s32.totalorder %v7561_v27, 4 }
  0x58   : > { %v1571_v5 = vshrl.u32 %v13778_v53, %v7513_v60  ;;  %v1263_v46 = vshrl.u32 %v13778_v53, %v7550_v45 }
  0x5a   : > { %v1572_v34 = vor.u32 %v1571_v5, %v1570_v50  ;;  %v7609_v50 = vshrl.u32 %v2015_v9, 5 }
  0x5b   : > { %484 = vperm.xlu2 %7043, %v345_v58   ;;  %479 = vperm.xlu1 %7042, %v344_v59   ;;  %v7507_v58 = vshrl.u32 %v783_v57, 5  ;;  %v1698_v59 = vand.u32 2139095040, %v7491_v42  ;;  %v801_v57 = vshrl.u32 %v13476_v8, %v7482_v36  ;;  %v7564_v42 = vmul.f32 6.1599855, %v7375_v11 }
  0x5c   : > { %474 = vperm.xlu0 %7041, %v343_v7   ;;  %v7525_v7 = vmul.f32 6.1599855, %v7372_v10  ;;  %v7578_v11 = vand.u32 31, %v2015_v9  ;;  %13786 = vst [vmem:[#allocation29_spill] sm:$0xff] %v7609_v50  ;;  %v7633_v4 = vsel %vm1576_vm10, %v1572_v34, 1326507024 }
  0x5d   : > { %vm806_vm9 = vcmp.lt.s32.totalorder %v7507_v58, 4  ;;  %v1699_v10 = vshrl.u32 %v1698_v59, 23  ;;  %v802_v8 = vor.u32 %v801_v57, %v800_v61  ;;  %13776 = vst [vmem:[#allocation22_spill] sm:$0xff] %v7564_v42  ;;  %v7572_v57 = vor.u32 %v1568_v39, %v1567_v38 }
  0x5e   : > { %13773 = vst [vmem:[#allocation19_spill] sm:$0xff] %v7525_v7  ;;  %v2468_v59 = vand.u32 2139095040, %v7525_v7  ;;  %v7559_v23 = vsel %vm806_vm9, %v7536_v29, 920167782  ;;  %v1262_v38 = vshll.u32 %v13777_v31, %v7515_v62  ;;  %v2314_v39 = vand.u32 2139095040, %v7564_v42 }
  0x5f   : > { %v6875_v61 = vadd.s32 4294967169, %v1699_v10  ;;  %13779 = vst [vmem:[#allocation23_spill] sm:$0xff] %v7572_v57  ;;  %v7586_v10 = vsel %vm806_vm9, %v802_v8, 1326507024  ;;  %v7600_v8 = vsel %vm1576_vm10, %v7572_v57, 920167782  ;;  %v2032_v6 = vshll.u32 %v13777_v31, %v7578_v11 }
  0x60   : > { %13781 = vst [vmem:[#allocation24_spill] sm:$0xff] %v7578_v11  ;;  %v2469_v3 = vshrl.u32 %v2468_v59, 23  ;;  %v7607_v25 = vsub.s32 32, %v7578_v11  ;;  %v2160_v42 = vand.u32 2139095040, %v7582_v47  ;;  %v1264_v63 = vor.u32 %v1263_v46, %v1262_v38  ;;  %v349_v57 = vld [vmem:[%s7354_s11 + $0xf0] sm:$0xff] }
  0x61   : > { %v1705_v12 = vadd.s32 1, %v6875_v61  ;;  %13783 = vst [vmem:[#allocation26_spill] sm:$0xff] %v7600_v8  ;;  %v350_v8 = vld [vmem:[%s7354_s11 + $0xf8] sm:$0xff]  ;;  %vm2038_vm15 = vcmp.lt.s32.totalorder %v7609_v50, 4 }
  0x62   : > { %13785 = vst [vmem:[#allocation28_spill] sm:$0xff] %v7607_v25  ;;  %v6890_v5 = vadd.s32 4294967169, %v2469_v3  ;;  %v2030_v47 = vshrl.u32 %v13777_v31, %v7607_v25  ;;  %v2161_v19 = vshrl.u32 %v2160_v42, 23  ;;  %v7648_v42 = vmul.f32 6.1599855, %v7387_v14 }
  0x63   : > { %499 = vperm.xlu2 %7043, %v348_v33   ;;  %494 = vperm.xlu1 %7042, %v347_v35   ;;  %v7570_v33 = vand.u32 31, %v937_v48  ;;  %v13780_v35 = vmov 2102212464   ;;  %vm1706_vm13 = vcmp.gt.s32.totalorder %v1705_v12, 0 }
  0x64   : > { %489 = vperm.xlu0 %7041, %v346_v0   ;;  %v1259_v7 = vshll.u32 %v13780_v35, %v7515_v62  ;;  %v1859_v0 = vadd.s32 1, %v6878_v56  ;;  %v7604_v62 = vshrl.u32 %v937_v48, 5  ;;  %v7617_v48 = vmul.f32 6.1599855, %v7384_v13  ;;  %13790 = vst [vmem:[#allocation33_spill] sm:$0xff] %v7648_v42 }
  0x65   : > { %v7595_v56 = vsub.s32 32, %v7570_v33  ;;  %v951_v61 = vshll.u32 %v13780_v35, %v7570_v33  ;;  %v954_v45 = vshll.u32 %v13777_v31, %v7570_v33  ;;  %v2033_v13 = vshrl.u32 %v13778_v53, %v7607_v25 }
  0x66   : > { %v7602_v59 = vor.u32 %v1260_v49, %v1259_v7  ;;  %vm1860_vm12 = vcmp.gt.s32.totalorder %v1859_v0, 0  ;;  %v2315_v7 = vshrl.u32 %v2314_v39, 23  ;;  %13787 = vst [vmem:[#allocation30_spill] sm:$0xff] %v7617_v48  ;;  %v2029_v49 = vshll.u32 %v13780_v35, %v7578_v11 }
  0x67   : > { %v952_v9 = vshrl.u32 %v13777_v31, %v7595_v56  ;;  %v955_v3 = vshrl.u32 %v13778_v53, %v7595_v56  ;;  %v1861_v39 = vsel %vm1860_vm12, %v1859_v0, 0  ;;  %v2475_v54 = vadd.s32 1, %v6890_v5 }
  0x68   : > { %13784 = vst [vmem:[#allocation27_spill] sm:$0xff] %v7602_v59  ;;  %v7640_v60 = vsel %vm1268_vm11, %v7602_v59, 920167782  ;;  %v1707_v43 = vsel %vm1706_vm13, %v1705_v12, 0  ;;  %v6887_v11 = vadd.s32 4294967169, %v2315_v7  ;;  %v2930_v30 = vand.u32 2139095040, %v7617_v48 }
  0x69   : > { %13788 = vst [vmem:[#allocation31_spill] sm:$0xff] %v7640_v60  ;;  %v7643_v0 = vor.u32 %v952_v9, %v951_v61  ;;  %v956_v34 = vor.u32 %v955_v3, %v954_v45  ;;  %v7645_v25 = vand.u32 31, %v1861_v39  ;;  %vm960_vm14 = vcmp.lt.s32.totalorder %v7604_v62, 4 }
  0x6a   : > { %v7651_v46 = vor.u32 %v2030_v47, %v2029_v49  ;;  %v2034_v38 = vor.u32 %v2033_v13, %v2032_v6  ;;  %v7654_v12 = vand.u32 31, %v1707_v43  ;;  %vm2476_vm0 = vcmp.gt.s32.totalorder %v2475_v54, 0 }
  0x6b   : > { %509 = vperm.xlu1 %7042, %v350_v8   ;;  %13789 = vst [vmem:[#allocation32_spill] sm:$0xff] %v7645_v25  ;;  %v6884_v8 = vadd.s32 4294967169, %v2161_v19  ;;  %v7661_v45 = vsel %vm1268_vm11, %v1264_v63, 1326507024  ;;  %v2321_v14 = vadd.s32 1, %v6887_v11  ;;  %v2931_v5 = vshrl.u32 %v2930_v30, 23 }
  0x6c   : > { %504 = vperm.xlu0 %7041, %v349_v57   ;;  %13791 = vst [vmem:[#allocation34_spill] sm:$0xff] %v7651_v46  ;;  %v7657_v57 = vmul.f32 6.1599855, %v7390_v15  ;;  %v7664_v61 = vmul.f32 6.1599855, %v7396_v16  ;;  %v7676_v15 = vsub.s32 32, %v7645_v25  ;;  %v1875_v7 = vshll.u32 %v13780_v35, %v7645_v25 }
  0x6d   : > { %13792 = vst [vmem:[#allocation35_spill] sm:$0xff] %v7654_v12  ;;  %v7669_v47 = vsel %vm960_vm14, %v7643_v0, 920167782  ;;  %v7673_v19 = vsel %vm960_vm14, %v956_v34, 1326507024  ;;  %v2776_v63 = vand.u32 2139095040, %v7648_v42  ;;  %v1878_v13 = vshll.u32 %v13777_v31, %v7645_v25 }
  0x6e   : > { %13793 = vst [vmem:[#allocation36_spill] sm:$0xff] %v7657_v57  ;;  %v7682_v30 = vsel %vm2038_vm15, %v7651_v46, 920167782  ;;  %v7686_v16 = vsel %vm2038_vm15, %v2034_v38, 1326507024  ;;  %v7688_v6 = vshrl.u32 %v1861_v39, 5  ;;  %v1876_v39 = vshrl.u32 %v13777_v31, %v7676_v15 }
  0x6f   : > { %13794 = vst [vmem:[#allocation37_spill] sm:$0xff] %v7661_v45  ;;  %v2477_v11 = vsel %vm2476_vm0, %v2475_v54, 0  ;;  %v7693_v9 = vsub.s32 32, %v7654_v12  ;;  %v2167_v3 = vadd.s32 1, %v6884_v8  ;;  %v2622_v49 = vand.u32 2139095040, %v7657_v57 }
  0x70   : > { %13795 = vst [vmem:[#allocation38_spill] sm:$0xff] %v7664_v61  ;;  %vm2322_vm1 = vcmp.gt.s32.totalorder %v2321_v14, 0  ;;  %v6899_v34 = vadd.s32 4294967169, %v2931_v5  ;;  %v3392_v38 = vand.u32 2139095040, %v7664_v61  ;;  %v1879_v54 = vshrl.u32 %v13778_v53, %v7676_v15 }
  0x71   : > { %13796 = vst [vmem:[#allocation39_spill] sm:$0xff] %v7676_v15  ;;  %v7703_v42 = vand.u32 31, %v2477_v11  ;;  %v2777_v48 = vshrl.u32 %v2776_v63, 23  ;;  %vm1884_vm2 = vcmp.lt.s32.totalorder %v7688_v6, 4  ;;  %v7706_v8 = vshrl.u32 %v1707_v43, 5 }
  0x72   : > { %13797 = vst [vmem:[#allocation40_spill] sm:$0xff] %v7682_v30  ;;  %v1721_v57 = vshll.u32 %v13780_v35, %v7654_v12  ;;  %v7711_v5 = vmul.f32 6.1599855, %v7399_v17  ;;  %v1722_v61 = vshrl.u32 %v13777_v31, %v7693_v9  ;;  %v2323_v25 = vsel %vm2322_vm1, %v2321_v14, 0 }
  0x73   : > { %13798 = vst [vmem:[#allocation41_spill] sm:$0xff] %v7686_v16  ;;  %vm2168_vm3 = vcmp.gt.s32.totalorder %v2167_v3, 0  ;;  %v2623_v30 = vshrl.u32 %v2622_v49, 23  ;;  %v1724_v15 = vshll.u32 %v13777_v31, %v7654_v12  ;;  %v1725_v63 = vshrl.u32 %v13778_v53, %v7693_v9 }
  0x74   : > { %13799 = vst [vmem:[#allocation42_spill] sm:$0xff] %v7688_v6  ;;  %v2937_v43 = vadd.s32 1, %v6899_v34  ;;  %v3393_v46 = vshrl.u32 %v3392_v38, 23  ;;  %v7719_v16 = vor.u32 %v1876_v39, %v1875_v7  ;;  %v1880_v50 = vor.u32 %v1879_v54, %v1878_v13 }
  0x75   : > { %13800 = vst [vmem:[#allocation43_spill] sm:$0xff] %v7693_v9  ;;  %v7722_v17 = vsub.s32 32, %v7703_v42  ;;  %v6896_v60 = vadd.s32 4294967169, %v2777_v48  ;;  %vm1730_vm4 = vcmp.lt.s32.totalorder %v7706_v8, 4  ;;  %v7725_v14 = vand.u32 31, %v2323_v25 }
  0x76   : > { %13801 = vst [vmem:[#allocation44_spill] sm:$0xff] %v7703_v42  ;;  %v2169_v49 = vsel %vm2168_vm3, %v2167_v3, 0  ;;  %v3238_v59 = vand.u32 2139095040, %v7711_v5  ;;  %v7728_v12 = vor.u32 %v1722_v61, %v1721_v57  ;;  %v7730_v45 = vshrl.u32 %v2477_v11, 5 }
  0x77   : > { %13802 = vst [vmem:[#allocation45_spill] sm:$0xff] %v7706_v8  ;;  %v2491_v7 = vshll.u32 %v13780_v35, %v7703_v42  ;;  %v6893_v34 = vadd.s32 4294967169, %v2623_v30  ;;  %v1726_v13 = vor.u32 %v1725_v63, %v1724_v15  ;;  %v2494_v38 = vshll.u32 %v13777_v31, %v7703_v42 }
  0x78   : > { %13803 = vst [vmem:[#allocation46_spill] sm:$0xff] %v7711_v5  ;;  %vm2938_vm7 = vcmp.gt.s32.totalorder %v2937_v43, 0  ;;  %v6908_v48 = vadd.s32 4294967169, %v3393_v46  ;;  %v2492_v39 = vshrl.u32 %v13777_v31, %v7722_v17  ;;  %v2495_v3 = vshrl.u32 %v13778_v53, %v7722_v17 }
  0x79   : > { %13804 = vst [vmem:[#allocation47_spill] sm:$0xff] %v7719_v16  ;;  %v7740_v57 = vand.u32 31, %v2169_v49  ;;  %v2783_v61 = vadd.s32 1, %v6896_v60  ;;  %v7745_v11 = vsel %vm1884_vm2, %v7719_v16, 920167782  ;;  %v7752_v46 = vsub.s32 32, %v7725_v14 }
  0x7a   : > { %13805 = vst [vmem:[#allocation48_spill] sm:$0xff] %v7722_v17  ;;  %v7749_v15 = vsel %vm1884_vm2, %v1880_v50, 1326507024  ;;  %v3239_v30 = vshrl.u32 %v3238_v59, 23  ;;  %v7757_v54 = vsel %vm1730_vm4, %v7728_v12, 920167782  ;;  %v7769_v59 = vor.u32 %v2492_v39, %v2491_v7 }
  0x7b   : > { %13806 = vst [vmem:[#allocation49_spill] sm:$0xff] %v7725_v14  ;;  %v7759_v63 = vshrl.u32 %v2323_v25, 5  ;;  %v2939_v60 = vsel %vm2938_vm7, %v2937_v43, 0  ;;  %v2629_v5 = vadd.s32 1, %v6893_v34  ;;  %v7763_v17 = vsel %vm1730_vm4, %v1726_v13, 1326507024 }
  0x7c   : > { %13807 = vst [vmem:[#allocation50_spill] sm:$0xff] %v7728_v12  ;;  %vm13635_vm8 = vcmp.lt.s32.totalorder %v7730_v45, 4  ;;  %v3399_v50 = vadd.s32 1, %v6908_v48  ;;  %v7767_v42 = vmul.f32 6.1599855, %v7402_v18  ;;  %v2496_v9 = vor.u32 %v2495_v3, %v2494_v38 }
  0x7d   : > { %13808 = vst [vmem:[#allocation51_spill] sm:$0xff] %v7730_v45  ;;  %v7772_v12 = vsub.s32 32, %v7740_v57  ;;  %vm2784_vm12 = vcmp.gt.s32.totalorder %v2783_v61, 0  ;;  %v2337_v25 = vshll.u32 %v13780_v35, %v7725_v14  ;;  %v2338_v43 = vshrl.u32 %v13777_v31, %v7752_v46 }
  0x7e   : > { %13809 = vst [vmem:[#allocation52_spill] sm:$0xff] %v7740_v57  ;;  %v7778_v34 = vand.u32 31, %v2939_v60  ;;  %v6905_v13 = vadd.s32 4294967169, %v3239_v30  ;;  %v2340_v18 = vshll.u32 %v13777_v31, %v7725_v14  ;;  %v2341_v7 = vshrl.u32 %v13778_v53, %v7752_v46 }
  0x7f   : > { %13810 = vst [vmem:[#allocation53_spill] sm:$0xff] %v7745_v11  ;;  %vm13629_vm13 = vcmp.lt.s32.totalorder %v7759_v63, 4  ;;  %vm2630_vm0 = vcmp.gt.s32.totalorder %v2629_v5, 0  ;;  %v7785_v38 = vshrl.u32 %v2169_v49, 5  ;;  %v2785_v48 = vsel %vm2784_vm12, %v2783_v61, 0 }
  0x80   : > { %13811 = vst [vmem:[#allocation54_spill] sm:$0xff] %v7749_v15  ;;  %vm3400_vm1 = vcmp.gt.s32.totalorder %v3399_v50, 0  ;;  %v3084_v39 = vand.u32 2139095040, %v7767_v42  ;;  %v2183_v3 = vshll.u32 %v13780_v35, %v7740_v57  ;;  %v2184_v30 = vshrl.u32 %v13777_v31, %v7772_v12 }
  0x81   : > { %13812 = vst [vmem:[#allocation55_spill] sm:$0xff] %v7752_v46  ;;  %v2186_v14 = vshll.u32 %v13777_v31, %v7740_v57  ;;  %v2187_v46 = vshrl.u32 %v13778_v53, %v7772_v12  ;;  %v7799_v49 = vsub.s32 32, %v7778_v34  ;;  %v2631_v61 = vsel %vm2630_vm0, %v2629_v5, 0 }
  0x82   : > { %13813 = vst [vmem:[#allocation56_spill] sm:$0xff] %v7757_v54  ;;  %v7796_v54 = vor.u32 %v2338_v43, %v2337_v25  ;;  %v7801_v8 = vand.u32 31, %v2785_v48  ;;  %v3401_v11 = vsel %vm3400_vm1, %v3399_v50, 0  ;;  %v7804_v16 = vmul.f32 6.1599855, %v7410_v20 }
  0x83   : > { %13814 = vst [vmem:[#allocation57_spill] sm:$0xff] %v7759_v63  ;;  %vm13626_vm3 = vcmp.lt.s32.totalorder %v7785_v38, 4  ;;  %v7807_v57 = vshrl.u32 %v2939_v60, 5  ;;  %v2953_v25 = vshll.u32 %v13780_v35, %v7778_v34  ;;  %v3085_v43 = vshrl.u32 %v3084_v39, 23 }
  0x84   : > { %13815 = vst [vmem:[#allocation58_spill] sm:$0xff] %v7763_v17  ;;  %v3245_v17 = vadd.s32 1, %v6905_v13  ;;  %v2188_v15 = vor.u32 %v2187_v46, %v2186_v14  ;;  %v2956_v5 = vshll.u32 %v13777_v31, %v7778_v34  ;;  %v7815_v13 = vand.u32 31, %v2631_v61 }
  0x85   : > { %13816 = vst [vmem:[#allocation59_spill] sm:$0xff] %v7767_v42  ;;  %v2342_v42 = vor.u32 %v2341_v7, %v2340_v18  ;;  %v2954_v20 = vshrl.u32 %v13777_v31, %v7799_v49  ;;  %v2957_v50 = vshrl.u32 %v13778_v53, %v7799_v49  ;;  %v7821_v60 = vand.u32 31, %v3401_v11 }
  0x86   : > { %13817 = vst [vmem:[#allocation60_spill] sm:$0xff] %v7769_v59  ;;  %vm3246_vm7 = vcmp.gt.s32.totalorder %v3245_v17, 0  ;;  %v7826_v18 = vsel %vm13635_vm8, %v7769_v59, 920167782  ;;  %v7830_v14 = vsel %vm13635_vm8, %v2496_v9, 1326507024 }
  0x87   : > { %13818 = vst [vmem:[#allocation61_spill] sm:$0xff] %v7772_v12  ;;  %v7811_v12 = vor.u32 %v2184_v30, %v2183_v3  ;;  %v7833_v46 = vsub.s32 32, %v7801_v8  ;;  %v3854_v7 = vand.u32 2139095040, %v7804_v16  ;;  %v7839_v39 = vsel %vm13629_vm13, %v7796_v54, 920167782 }
  0x88   : > { %13819 = vst [vmem:[#allocation62_spill] sm:$0xff] %v7778_v34  ;;  %v7843_v3 = vsel %vm13629_vm13, %v2342_v42, 1326507024  ;;  %vm13586_vm12 = vcmp.lt.s32.totalorder %v7807_v57, 4  ;;  %v6902_v30 = vadd.s32 4294967169, %v3085_v43  ;;  %v3247_v34 = vsel %vm3246_vm7, %v3245_v17, 0 }
  0x89   : > { %13820 = vst [vmem:[#allocation63_spill] sm:$0xff] %v7785_v38  ;;  %v7849_v9 = vsel %vm13626_vm3, %v7811_v12, 920167782  ;;  %v2958_v42 = vor.u32 %v2957_v50, %v2956_v5  ;;  %v7863_v43 = vsub.s32 32, %v7821_v60  ;;  %v2803_v17 = vshrl.u32 %v13778_v53, %v7833_v46 }
  0x8a   : > { %13821 = vst [vmem:[#allocation64_spill] sm:$0xff] %v7796_v54  ;;  %v7860_v54 = vshrl.u32 %v2785_v48, 5  ;;  %v7875_v48 = vand.u32 31, %v3247_v34  ;;  %v3091_v5 = vadd.s32 1, %v6902_v30  ;;  %v2648_v38 = vshll.u32 %v13777_v31, %v7815_v13 }
  0x8b   : > { %13822 = vst [vmem:[#allocation65_spill] sm:$0xff] %v7799_v49  ;;  %v7856_v49 = vsub.s32 32, %v7815_v13  ;;  %v3418_v30 = vshll.u32 %v13777_v31, %v7821_v60  ;;  %v13868_v45 = vmov 0  }
  0x8c   : > { %13823 = vst [vmem:[#allocation66_spill] sm:$0xff] %v7801_v8  ;;  %vm13587_vm0 = vcmp.lt.s32.totalorder %v7860_v54, 4  ;;  %vm3092_vm1 = vcmp.gt.s32.totalorder %v3091_v5, 0 }
  0x8d   : > { %13824 = vst [vmem:[#allocation67_spill] sm:$0xff] %v7804_v16  ;;  %v7853_v16 = vsel %vm13626_vm3, %v2188_v15, 1326507024  ;;  %v2802_v15 = vshll.u32 %v13777_v31, %v7801_v8  ;;  %v2646_v50 = vshrl.u32 %v13777_v31, %v7856_v49 }
  0x8e   : > { %13825 = vst [vmem:[#allocation68_spill] sm:$0xff] %v7807_v57 }
  0x8f   : > { %13826 = vst [vmem:[#allocation69_spill] sm:$0xff] %v7811_v12  ;;  %v2799_v12 = vshll.u32 %v13780_v35, %v7801_v8  ;;  %v3419_v8 = vshrl.u32 %v13778_v53, %v7863_v43 }
  0x90   : > { %13827 = vst [vmem:[#allocation70_spill] sm:$0xff] %v7815_v13 }
  0x91   : > { %13828 = vst [vmem:[#allocation71_spill] sm:$0xff] %v7821_v60 }
  0x92   : > { %13829 = vst [vmem:[#allocation72_spill] sm:$0xff] %v7826_v18  ;;  %v7904_v18 = vsel %vm13586_vm12, %v2958_v42, 1326507024 }
  0x93   : > { %13830 = vst [vmem:[#allocation73_spill] sm:$0xff] %v7830_v14 }
  0x94   : > { %13831 = vst [vmem:[#allocation74_spill] sm:$0xff] %v7833_v46 }
  0x95   : > { %13832 = vst [vmem:[#allocation75_spill] sm:$0xff] %v7839_v39  ;;  %v7858_v39 = vor.u32 %v2954_v20, %v2953_v25  ;;  %v7873_v25 = vshrl.u32 %v2631_v61, 5  ;;  %v2645_v20 = vshll.u32 %v13780_v35, %v7815_v13  ;;  %v3416_v61 = vshrl.u32 %v13777_v31, %v7863_v43 }
  0x96   : > { %13833 = vst [vmem:[#allocation76_spill] sm:$0xff] %v7843_v3 }
  0x97   : > { %13834 = vst [vmem:[#allocation77_spill] sm:$0xff] %v7849_v9  ;;  %v2800_v9 = vshrl.u32 %v13777_v31, %v7833_v46  ;;  %v3415_v46 = vshll.u32 %v13780_v35, %v7821_v60  ;;  %v7896_v3 = vsel %vm13586_vm12, %v7858_v39, 920167782  ;;  %v7908_v60 = vsub.s32 32, %v7875_v48 }
  0x98   : > { %13835 = vst [vmem:[#allocation78_spill] sm:$0xff] %v7853_v16  ;;  %v3855_v16 = vshrl.u32 %v3854_v7, 23  ;;  %v2649_v7 = vshrl.u32 %v13778_v53, %v7856_v49  ;;  %v7910_v59 = vor.u32 %v2646_v50, %v2645_v20  ;;  %vm13623_vm7 = vcmp.lt.s32.totalorder %v7873_v25, 4 }
  0x99   : > { %13836 = vst [vmem:[#allocation79_spill] sm:$0xff] %v7856_v49  ;;  %v7898_v13 = vor.u32 %v2800_v9, %v2799_v12  ;;  %v7900_v49 = vshrl.u32 %v3401_v11, 5  ;;  %v7913_v12 = vmul.f32 6.1599855, %v7413_v21  ;;  %v3420_v11 = vor.u32 %v3419_v8, %v3418_v30 }
  0x9a   : > { %13837 = vst [vmem:[#allocation80_spill] sm:$0xff] %v7858_v39  ;;  %v6917_v63 = vadd.s32 4294967169, %v3855_v16  ;;  %v2650_v39 = vor.u32 %v2649_v7, %v2648_v38  ;;  %v7916_v16 = vor.u32 %v3416_v61, %v3415_v46  ;;  %v7918_v9 = vshrl.u32 %v3247_v34, 5 }
  0x9b   : > { %13838 = vst [vmem:[#allocation81_spill] sm:$0xff] %v7860_v54  ;;  %v7923_v42 = vsel %vm13587_vm0, %v7898_v13, 920167782  ;;  %vm13606_vm12 = vcmp.lt.s32.totalorder %v7900_v49, 4  ;;  %v3261_v21 = vshll.u32 %v13780_v35, %v7875_v48  ;;  %v3262_v38 = vshrl.u32 %v13777_v31, %v7908_v60 }
  0x9c   : > { %13839 = vst [vmem:[#allocation82_spill] sm:$0xff] %v7863_v43  ;;  %v2804_v43 = vor.u32 %v2803_v17, %v2802_v15  ;;  %v3093_v15 = vsel %vm3092_vm1, %v3091_v5, 0  ;;  %v3861_v17 = vadd.s32 1, %v6917_v63  ;;  %v3264_v8 = vshll.u32 %v13777_v31, %v7875_v48 }
  0x9d   : > { %13840 = vst [vmem:[#allocation83_spill] sm:$0xff] %v7873_v25  ;;  %v3265_v34 = vshrl.u32 %v13778_v53, %v7908_v60  ;;  %v7941_v63 = vsel %vm13623_vm7, %v7910_v59, 920167782  ;;  %v7945_v5 = vsel %vm13623_vm7, %v2650_v39, 1326507024  ;;  %vm13605_vm1 = vcmp.lt.s32.totalorder %v7918_v9, 4 }
  0x9e   : > { %13841 = vst [vmem:[#allocation84_spill] sm:$0xff] %v7875_v48  ;;  %v7936_v46 = vsel %vm13587_vm0, %v2804_v43, 1326507024  ;;  %v7950_v20 = vsel %vm13606_vm12, %v7916_v16, 920167782  ;;  %v7957_v43 = vand.u32 31, %v3093_v15  ;;  %v7965_v30 = vor.u32 %v3262_v38, %v3261_v21 }
  0x9f   : > { %13842 = vst [vmem:[#allocation85_spill] sm:$0xff] %v7896_v3  ;;  %v7954_v50 = vsel %vm13606_vm12, %v3420_v11, 1326507024  ;;  %v7959_v7 = vshrl.u32 %v3093_v15, 5  ;;  %vm3862_vm0 = vcmp.gt.s32.totalorder %v3861_v17, 0  ;;  %v3700_v61 = vand.u32 2139095040, %v7913_v12 }
  0xa0   : > { %13843 = vst [vmem:[#allocation86_spill] sm:$0xff] %v7898_v13  ;;  %v7963_v39 = vmul.f32 6.1599855, %v7421_v24  ;;  %v7968_v48 = vmul.f32 6.1599855, %v7435_v40  ;;  %v7976_v15 = vshll.u32 %v13780_v35, %v7957_v43  ;;  %v3863_v24 = vsel %vm3862_vm0, %v3861_v17, 0 }
  0xa1   : > { %13844 = vst [vmem:[#allocation87_spill] sm:$0xff] %v7900_v49  ;;  %v13595_v11 = vand.u32 2147483647, %v7415_v22  ;;  %v3701_v21 = vshrl.u32 %v3700_v61, 23  ;;  %v13596_v40 = vmov 683565275  }
  0xa2   : > { %13845 = vst [vmem:[#allocation88_spill] sm:$0xff] %v7904_v18  ;;  %vm1111_vm0 = vcmp.lt.s32.totalorder %v7484_v37, 1  ;;  %vm1113_vm12 = vcmp.lt.s32.totalorder %v7484_v37, 3 }
  0xa3   : > { %13846 = vst [vmem:[#allocation89_spill] sm:$0xff] %v7908_v60  ;;  %v3266_v60 = vor.u32 %v3265_v34, %v3264_v8  ;;  %v1086_v38 = vand.u32 8388607, %v13595_v11  ;;  %v1096_v8 = vshll.u32 %v13596_v40, %v7451_v55  ;;  %v13603_v34 = vmov 2475754826  }
  0xa4   : > { %13847 = vst [vmem:[#allocation90_spill] sm:$0xff] %v7910_v59  ;;  %v1099_v61 = vshll.u32 %v13603_v34, %v7451_v55  ;;  %v13607_v11 = vmov 2131351028  }
  0xa5   : > { %13848 = vst [vmem:[#allocation91_spill] sm:$0xff] %v7913_v12  ;;  %v7980_v12 = vshll.u32 %v13777_v31, %v7957_v43  ;;  %v7995_v17 = vsel %vm13605_vm1, %v3266_v60, 1326507024  ;;  %v1100_v40 = vshrl.u32 %v13607_v11, %v7459_v1 }
  0xa6   : > { %13849 = vst [vmem:[#allocation92_spill] sm:$0xff] %v7916_v16  ;;  %v1097_v16 = vshrl.u32 %v13603_v34, %v7459_v1 }
  0xa7   : > { %13850 = vst [vmem:[#allocation93_spill] sm:$0xff] %v7918_v9  ;;  %v1101_v34 = vor.u32 %v1100_v40, %v1099_v61  ;;  %v1125_v40 = vsel %vm1113_vm12, %v7502_v52, %v7540_v32 }
  0xa8   : > { %13851 = vst [vmem:[#allocation94_spill] sm:$0xff] %v7923_v42  ;;  %v1098_v49 = vor.u32 %v1097_v16, %v1096_v8 }
  0xa9   : > { %13852 = vst [vmem:[#allocation95_spill] sm:$0xff] %v7936_v46 }
  0xaa   : > { %13853 = vst [vmem:[#allocation96_spill] sm:$0xff] %v7941_v63  ;;  %v1102_v63 = vshll.u32 %v13607_v11, %v7451_v55  ;;  %v13865_v55 = vmov 683565275   ;;  %v1119_v8 = vsel %vm1111_vm0, %v1098_v49, %v1101_v34 }
  0xab   : > { %13854 = vst [vmem:[#allocation97_spill] sm:$0xff] %v7945_v5 }
  0xac   : > { %13855 = vst [vmem:[#allocation98_spill] sm:$0xff] %v7950_v20  ;;  %v7972_v20 = vsub.s32 32, %v7957_v43 }
  0xad   : > { %13856 = vst [vmem:[#allocation99_spill] sm:$0xff] %v7954_v50  ;;  %v7991_v50 = vsel %vm13605_vm1, %v7965_v30, 920167782  ;;  %vm1112_vm1 = vcmp.lt.s32.totalorder %v7484_v37, 2 }
  0xae   : > { %13857 = vst [vmem:[#allocation100_spill] sm:$0xff] %v7957_v43  ;;  %v1087_v43 = vor.u32 8388608, %v1086_v38  ;;  %v8011_v60 = vshrl.u32 %v13778_v53, %v7972_v20  ;;  %v1095_v38 = vshrl.u32 %v13865_v55, %v7459_v1 }
  0xaf   : > { %13858 = vst [vmem:[#allocation101_spill] sm:$0xff] %v7963_v39 }
  0xb0   : > { %13859 = vst [vmem:[#allocation102_spill] sm:$0xff] %v7965_v30  ;;  %v1103_v30 = vshrl.u32 %v13780_v35, %v7459_v1  ;;  %v8026_v61 = vshll.u32 %v1087_v43, 8  ;;  %v8043_v43 = vadd.s32 4294967169, %v3701_v21 }
  0xb1   : > { %13860 = vst [vmem:[#allocation103_spill] sm:$0xff] %v7968_v48 }
  0xb2   : > { %13861 = vst [vmem:[#allocation104_spill] sm:$0xff] %v7972_v20  ;;  %v1104_v16 = vor.u32 %v1103_v30, %v1102_v63  ;;  %v1128_v32 = vand.u32 65535, %v8026_v61  ;;  %v1129_v59 = vshrl.u32 %v8026_v61, 16 }
  0xb3   : > { %13862 = vst [vmem:[#allocation105_spill] sm:$0xff] %v7991_v50  ;;  %v8007_v50 = vshrl.u32 %v13777_v31, %v7972_v20  ;;  %v8036_v20 = vand.u32 31, %v3863_v24 }
  0xb4   : > { %13863 = vst [vmem:[#allocation106_spill] sm:$0xff] %v7995_v17  ;;  %v8014_v17 = vshrl.u32 %v3863_v24, 5  ;;  %v1116_v63 = vsel %vm1114_vm6, %v1104_v16, 2102212464  ;;  %v1121_v30 = vsel %vm1113_vm12, %v1104_v16, %v7534_v28  ;;  %v1123_v1 = vsel %vm1111_vm0, %v1101_v34, %v1104_v16 }
  0xb5   : > { %13866 = vst [vmem:[#allocation108_spill] sm:$0xff] %v8036_v20  ;;  %v1122_v9 = vsel %vm1112_vm1, %v1119_v8, %v1121_v30  ;;  %v1126_v52 = vsel %vm1112_vm1, %v1123_v1, %v1125_v40  ;;  %v1115_v16 = vsel %vm1111_vm0, %v1095_v38, %v1098_v49  ;;  %v1117_v24 = vsel %vm1113_vm12, %v1101_v34, %v1116_v63 }
  0xb6   : > { %13864 = vst [vmem:[#allocation107_spill] sm:$0xff] %v8014_v17  ;;  %v1130_v28 = vand.u32 65535, %v1126_v52  ;;  %v1131_v5 = vshrl.u32 %v1126_v52, 16  ;;  %v1152_v11 = vand.u32 65535, %v1122_v9  ;;  %v1153_v25 = vshrl.u32 %v1122_v9, 16 }
  0xb7   : > { %v13867_v40 = vand.u32 2147483647, %v7443_v44 }
  0xb8   : > { %v1132_v8 = vmul.u32 %v1130_v28, %v1128_v32  ;;  %v1133_v30 = vmul.u32 %v1131_v5, %v1128_v32  ;;  %v1134_v13 = vmul.u32 %v1130_v28, %v1129_v59  ;;  %v1135_v21 = vmul.u32 %v1131_v5, %v1129_v59 }
  0xb9   : > { %v932_v1 = vand.u32 8388607, %v13867_v40  ;;  %v1154_v46 = vmul.u32 %v1152_v11, %v1128_v32  ;;  %v1155_v42 = vmul.u32 %v1153_v25, %v1128_v32  ;;  %v1156_v54 = vmul.u32 %v1152_v11, %v1129_v59 }
  0xba   : > { %v1136_v3 = vshll.u32 %v1133_v30, 16  ;;  %v1137_v52 = vshrl.u32 %v1133_v30, 16  ;;  %v1138_v18 = vshll.u32 %v1134_v13, 16  ;;  %v1157_v57 = vmul.u32 %v1153_v25, %v1129_v59 }
  0xbb   : > { %v1139_v49 = vshrl.u32 %v1134_v13, 16  ;;  %v1158_v38 = vshll.u32 %v1155_v42, 16  ;;  %v1159_v14 = vshrl.u32 %v1155_v42, 16  ;;  %v1160_v34 = vshll.u32 %v1156_v54, 16 }
  0xbc   : > { %vm1140_vm6 = vc.u32 %v1132_v8, %v1136_v3  ;;  %v1142_v9 = vadd.s32 %v1136_v3, %v1132_v8  ;;  %v1161_v63 = vshrl.u32 %v1156_v54, 16  ;;  %v942_v28 = vshll.u32 %v13865_v55, %v7570_v33 }
  0xbd   : > { %v1141_v40 = vsel %vm1140_vm6, 1, %v13868_v45  ;;  %vm1162_vm12 = vc.u32 %v1154_v46, %v1158_v38  ;;  %v1164_v5 = vadd.s32 %v1158_v38, %v1154_v46  ;;  %v13869_v11 = vmov 2475754826  }
  0xbe   : > { %v943_v32 = vshrl.u32 %v13869_v11, %v7595_v56  ;;  %v1143_v30 = vadd.s32 %v1141_v40, %v1135_v21  ;;  %vm1144_vm0 = vc.u32 %v1142_v9, %v1138_v18  ;;  %v1163_v59 = vsel %vm1162_vm12, 1, %v13868_v45 }
  0xbf   : > { %v945_v13 = vshll.u32 %v13869_v11, %v7570_v33  ;;  %v1145_v3 = vsel %vm1144_vm0, 1, %v13868_v45  ;;  %v1165_v54 = vadd.s32 %v1163_v59, %v1157_v57  ;;  %vm1166_vm7 = vc.u32 %v1164_v5, %v1160_v34 }
  0xc0   : > { %v933_v25 = vor.u32 8388608, %v932_v1  ;;  %v1147_v42 = vadd.s32 %v1145_v3, %v1143_v30  ;;  %v1167_v8 = vsel %vm1166_vm7, 1, %v13868_v45  ;;  %v8062_v6 = vor.u32 %v943_v32, %v942_v28 }
  0xc1   : > { %v13870_v46 = vmov 2131351028   ;;  %v1169_v21 = vadd.s32 %v1167_v8, %v1165_v54  ;;  %v949_v9 = vshrl.u32 %v13780_v35, %v7595_v56  ;;  %vm957_vm6 = vcmp.lt.s32.totalorder %v7604_v62, 1 }
  0xc2   : > { %v946_v38 = vshrl.u32 %v13870_v46, %v7595_v56  ;;  %v948_v18 = vshll.u32 %v13870_v46, %v7570_v33  ;;  %v1148_v57 = vadd.s32 %v1147_v42, %v1137_v52  ;;  %v8071_v40 = vadd.s32 %v1164_v5, %v1160_v34 }
  0xc3   : > { %vm959_vm7 = vcmp.lt.s32.totalorder %v7604_v62, 3  ;;  %vm13634_vm12 = vcmp.lt.s32.totalorder %v7959_v7, 4  ;;  %v1118_v28 = vsel %vm1112_vm1, %v1115_v16, %v1117_v24  ;;  %v1170_v32 = vadd.s32 %v1169_v21, %v1159_v14 }
  0xc4   : > { %v8073_v1 = vor.u32 %v946_v38, %v945_v13  ;;  %v950_v30 = vor.u32 %v949_v9, %v948_v18  ;;  %vm958_vm0 = vcmp.lt.s32.totalorder %v7604_v62, 2  ;;  %v8080_v33 = vadd.s32 %v1148_v57, %v1139_v49 }
  0xc5   : > { %v971_v34 = vsel %vm959_vm7, %v7643_v0, %v7673_v19  ;;  %v8090_v5 = vshll.u32 %v933_v25, 8  ;;  %v1171_v14 = vadd.s32 %v1170_v32, %v1161_v63  ;;  %v8101_v49 = vor.u32 %v8007_v50, %v7976_v15 }
  0xc6   : > { %v965_v52 = vsel %vm957_vm6, %v8062_v6, %v8073_v1  ;;  %v967_v16 = vsel %vm959_vm7, %v950_v30, %v7669_v47  ;;  %v969_v24 = vsel %vm957_vm6, %v8073_v1, %v950_v30  ;;  %v1172_v59 = vmul.u32 %v8026_v61, %v1118_v28 }
  0xc7   : > { %13871 = vst [vmem:[#allocation109_spill] sm:$0xff] %v8101_v49  ;;  %vm1174_vm1 = vc.u32 %v8080_v33, %v8071_v40  ;;  %v968_v0 = vsel %vm958_vm0, %v965_v52, %v967_v16  ;;  %v1175_v47 = vadd.s32 1, %v1171_v14  ;;  %v972_v63 = vsel %vm958_vm0, %v969_v24, %v971_v34 }
  0xc8   : > { %v974_v13 = vand.u32 65535, %v8090_v5  ;;  %v975_v50 = vshrl.u32 %v8090_v5, 16  ;;  %v976_v15 = vand.u32 65535, %v972_v63  ;;  %v977_v3 = vshrl.u32 %v972_v63, 16 }
  0xc9   : > { %v998_v61 = vand.u32 65535, %v968_v0  ;;  %v8116_v25 = vmul.f32 6.1599855, %v7438_v41  ;;  %v1176_v42 = vsel %vm1174_vm1, %v1175_v47, %v1171_v14  ;;  %v999_v8 = vshrl.u32 %v968_v0, 16 }
  0xca   : > { %v1177_v38 = vadd.s32 %v1176_v42, %v1172_v59  ;;  %v978_v21 = vmul.u32 %v976_v15, %v974_v13  ;;  %v979_v18 = vmul.u32 %v977_v3, %v974_v13  ;;  %v980_v9 = vmul.u32 %v976_v15, %v975_v50 }
  0xcb   : > { %13872 = vst [vmem:[#allocation110_spill] sm:$0xff] %v8116_v25  ;;  %v8119_v57 = vsub.s32 32, %v8036_v20  ;;  %v8123_v28 = vshll.u32 %v13780_v35, %v8036_v20  ;;  %v1001_v32 = vmul.u32 %v999_v8, %v974_v13  ;;  %v1002_v52 = vmul.u32 %v998_v61, %v975_v50 }
  0xcc   : > { %v1178_v34 = vadd.s32 536870912, %v1177_v38  ;;  %v981_v16 = vmul.u32 %v977_v3, %v975_v50  ;;  %v982_v24 = vshll.u32 %v979_v18, 16  ;;  %v984_v41 = vshll.u32 %v980_v9, 16 }
  0xcd   : > { %13873 = vst [vmem:[#allocation111_spill] sm:$0xff] %v8119_v57  ;;  %v8127_v14 = vshll.u32 %v13777_v31, %v8036_v20  ;;  %v941_v59 = vshrl.u32 %v13865_v55, %v7595_v56  ;;  %v1000_v0 = vmul.u32 %v998_v61, %v974_v13  ;;  %v1004_v47 = vshll.u32 %v1001_v32, 16 }
  0xce   : > { %v8134_v63 = vsel %vm13634_vm12, %v8101_v49, 920167782  ;;  %v8136_v15 = vshrl.u32 %v1178_v34, 30  ;;  %vm986_vm1 = vc.u32 %v978_v21, %v982_v24  ;;  %v988_v3 = vadd.s32 %v982_v24, %v978_v21 }
  0xcf   : > { %13874 = vst [vmem:[#allocation112_spill] sm:$0xff] %v8134_v63  ;;  %v962_v42 = vsel %vm960_vm14, %v950_v30, 2102212464  ;;  %v987_v54 = vsel %vm986_vm1, 1, %v13868_v45  ;;  %v1003_v37 = vmul.u32 %v999_v8, %v975_v50  ;;  %v1006_v19 = vshll.u32 %v1002_v52, 16 }
  0xd0   : > { %v1180_v56 = vshll.u32 %v8136_v15, 30  ;;  %v983_v13 = vshrl.u32 %v979_v18, 16  ;;  %v989_v61 = vadd.s32 %v987_v54, %v981_v16  ;;  %vm990_vm3 = vc.u32 %v988_v3, %v984_v41 }
  0xd1   : > { %v961_v20 = vsel %vm957_vm6, %v941_v59, %v8062_v6  ;;  %v991_v34 = vsel %vm990_vm3, 1, %v13868_v45  ;;  %vm1008_vm13 = vc.u32 %v1000_v0, %v1004_v47  ;;  %v1010_v21 = vadd.s32 %v1004_v47, %v1000_v0 }
  0xd2   : > { %v1181_v24 = vsub.s32 %v1177_v38, %v1180_v56  ;;  %v963_v30 = vsel %vm959_vm7, %v8073_v1, %v962_v42  ;;  %v993_v50 = vadd.s32 %v991_v34, %v989_v61  ;;  %v1009_v8 = vsel %vm1008_vm13, 1, %v13868_v45 }
  0xd3   : > { %v985_v49 = vshrl.u32 %v980_v9, 16  ;;  %v1005_v18 = vshrl.u32 %v1001_v32, 16  ;;  %v1011_v54 = vadd.s32 %v1009_v8, %v1003_v37  ;;  %vm1012_vm14 = vc.u32 %v1010_v21, %v1006_v19 }
  0xd4   : > { %vm1182_vm1 = vcmp.lt.s32.totalorder %v1181_v24, 0  ;;  %v1183_v16 = vsub.s32 0, %v1181_v24  ;;  %v994_v41 = vadd.s32 %v993_v50, %v983_v13  ;;  %v1013_v6 = vsel %vm1012_vm14, 1, %v13868_v45 }
  0xd5   : > { %v964_v59 = vsel %vm958_vm0, %v961_v20, %v963_v30  ;;  %v1007_v38 = vshrl.u32 %v1002_v52, 16  ;;  %v1015_v0 = vadd.s32 %v1013_v6, %v1011_v54  ;;  %v13631_v47 = vand.u32 2147483647, %v7424_v26 }
  0xd6   : > { %v1184_v1 = vsel %vm1182_vm1, %v1183_v16, %v1181_v24  ;;  %v8154_v3 = vadd.s32 %v1010_v21, %v1006_v19  ;;  %v791_v9 = vshll.u32 %v13869_v11, %v7461_v2  ;;  %v792_v37 = vshrl.u32 %v13870_v46, %v7482_v36 }
  0xd7   : > { %v1185_v32 = vclz %v1184_v1  ;;  %v8160_v42 = vadd.s32 %v994_v41, %v985_v49  ;;  %v1016_v56 = vadd.s32 %v1015_v0, %v1005_v18  ;;  %v794_v62 = vshll.u32 %v13870_v46, %v7461_v2 }
  0xd8   : > { %v13875_v20 = vor.u32 %v8011_v60, %v7980_v12  ;;  %v788_v52 = vshll.u32 %v13865_v55, %v7461_v2  ;;  %v789_v13 = vshrl.u32 %v13869_v11, %v7482_v36  ;;  %v795_v49 = vshrl.u32 %v13780_v35, %v7482_v36 }
  0xd9   : > { %v8178_v61 = vadd.s32 1, %v8043_v43  ;;  %v1173_v34 = vadd.s32 %v8071_v40, %v8080_v33  ;;  %v6864_v12 = vadd.s32 4294967294, %v1185_v32  ;;  %v1017_v60 = vadd.s32 %v1016_v56, %v1007_v38 }
  0xda   : > { %v8169_v19 = vsel %vm13634_vm12, %v13875_v20, 1326507024  ;;  %v1018_v21 = vmul.u32 %v8090_v5, %v964_v59  ;;  %v778_v30 = vand.u32 8388607, %v13631_v47  ;;  %v8185_v2 = vor.u32 %v792_v37, %v791_v9 }
  0xdb   : > { %13876 = vst [vmem:[#allocation113_spill] sm:$0xff] %v8169_v19  ;;  %v796_v50 = vor.u32 %v795_v49, %v794_v62  ;;  %vm6865_vm13 = vcmp.lt.s32.totalorder %v6864_v12, 0  ;;  %vm1020_vm3 = vc.u32 %v8160_v42, %v8154_v3  ;;  %v1021_v8 = vadd.s32 1, %v1017_v60 }
  0xdc   : > { %vm803_vm6 = vcmp.lt.s32.totalorder %v7507_v58, 1  ;;  %v8192_v43 = vshrl.u32 %v13777_v31, %v8119_v57  ;;  %v13877_v40 = vand.u32 2139095040, %v7963_v39  ;;  %v1188_v5 = vsel %vm6865_vm13, 0, %v6864_v12 }
  0xdd   : > { %v790_v18 = vor.u32 %v789_v13, %v788_v52  ;;  %v1189_v54 = vsub.s32 32, %v1188_v5  ;;  %v1190_v16 = vshll.u32 %v1181_v24, %v1188_v5  ;;  %v1193_v41 = vsub.s32 4294967266, %v1188_v5 }
  0xde   : > { %v8196_v33 = vshrl.u32 %v13877_v40, 23  ;;  %vm805_vm7 = vcmp.lt.s32.totalorder %v7507_v58, 3  ;;  %v1022_v6 = vsel %vm1020_vm3, %v1021_v8, %v1017_v60  ;;  %v779_v59 = vor.u32 8388608, %v778_v30 }
  0xdf   : > { %vm804_vm0 = vcmp.lt.s32.totalorder %v7507_v58, 2  ;;  %v815_v38 = vsel %vm803_vm6, %v8185_v2, %v796_v50  ;;  %v8205_v0 = vshrl.u32 %v13778_v53, %v8119_v57  ;;  %v1191_v1 = vshrl.u32 %v1173_v34, %v1189_v54 }
  0xe0   : > { %v1194_v9 = vadd.s32 127, %v1193_v41  ;;  %v1023_v37 = vadd.s32 %v1022_v6, %v1018_v21  ;;  %v1203_v24 = vsub.s32 4, %v8136_v15  ;;  %v811_v32 = vsel %vm803_vm6, %v790_v18, %v8185_v2 }
  0xe1   : > { %v813_v56 = vsel %vm805_vm7, %v796_v50, %v7559_v23  ;;  %v817_v62 = vsel %vm805_vm7, %v7536_v29, %v7586_v10  ;;  %v1192_v20 = vor.u32 %v1191_v1, %v1190_v16  ;;  %v13878_v34 = vand.u32 2139095040, %v7968_v48 }
  0xe2   : > { %v1195_v52 = vshll.u32 %v1194_v9, 23  ;;  %v1024_v13 = vadd.s32 536870912, %v1023_v37  ;;  %v818_v49 = vsel %vm804_vm0, %v815_v38, %v817_v62  ;;  %v8224_v60 = vshll.u32 %v779_v59, 8 }
  0xe3   : > { %v8222_v12 = vshrl.u32 %v13878_v34, 23  ;;  %v822_v21 = vand.u32 65535, %v818_v49  ;;  %v823_v30 = vshrl.u32 %v818_v49, 16  ;;  %v1199_v8 = vcvt.s32.f32 %v1192_v20 }
  0xe4   : > { %v1196_v23 = vor.u32 4788187, %v1195_v52  ;;  %v8226_v40 = vshrl.u32 %v1024_v13, 30  ;;  %v814_v29 = vsel %vm804_vm0, %v811_v32, %v813_v56  ;;  %v13879_v10 = vand.u32 2147483647, %v7415_v22 }
  0xe5   : > { %vm1081_vm1 = vcmp.lt.s32.totalorder %v7415_v22, 0  ;;  %v820_v54 = vand.u32 65535, %v8224_v60  ;;  %v821_v16 = vshrl.u32 %v8224_v60, 16  ;;  %v787_v38 = vshrl.u32 %v13865_v55, %v7482_v36 }
  0xe6   : > { %vm8232_vm14 = vcmp.le.f32.partialorder %v13879_v10, 0.7853982  ;;  %v1197_v41 = vand.u32 2147483647, %v1196_v23  ;;  %v1204_v6 = vsel %vm1081_vm1, %v1203_v24, %v8136_v15  ;;  %v1026_v59 = vshll.u32 %v8226_v40, 30 }
  0xe7   : > { %v824_v1 = vmul.u32 %v822_v21, %v820_v54  ;;  %v8245_v9 = vmul.u32 %v823_v30, %v820_v54  ;;  %v8247_v32 = vmul.u32 %v822_v21, %v821_v16  ;;  %v845_v56 = vshrl.u32 %v814_v29, 16 }
  0xe8   : > { %v1200_v62 = vmul.f32 %v1199_v8, %v1197_v41  ;;  %v8249_v20 = vsub.s32 %v1023_v37, %v1026_v59  ;;  %v808_v52 = vsel %vm806_vm9, %v796_v50, 2102212464  ;;  %v844_v13 = vand.u32 65535, %v814_v29 }
  0xe9   : > { %v1206_v15 = vsel %vm8232_vm14, 0, %v1204_v6  ;;  %v827_v24 = vmul.u32 %v823_v30, %v821_v16  ;;  %v828_v49 = vshll.u32 %v8245_v9, 16  ;;  %v830_v36 = vshll.u32 %v8247_v32, 16 }
  0xea   : > { %v1201_v34 = vxor.u32 2147483648, %v1200_v62  ;;  %vm1028_vm13 = vcmp.lt.s32.totalorder %v8249_v20, 0  ;;  %v1029_v21 = vsub.s32 0, %v8249_v20  ;;  %v807_v37 = vsel %vm803_vm6, %v787_v38, %v790_v18 }
  0xeb   : > { %v809_v50 = vsel %vm805_vm7, %v8185_v2, %v808_v52  ;;  %vm832_vm9 = vc.u32 %v824_v1, %v828_v49  ;;  %v834_v23 = vadd.s32 %v828_v49, %v824_v1  ;;  %v8264_v8 = vmul.u32 %v845_v56, %v820_v54 }
  0xec   : > { %v1202_v30 = vsel %vm1081_vm1, %v1201_v34, %v1200_v62  ;;  %v1030_v29 = vsel %vm1028_vm13, %v1029_v21, %v8249_v20  ;;  %v833_v10 = vsel %vm832_vm9, 1, %v13868_v45  ;;  %v846_v41 = vmul.u32 %v844_v13, %v820_v54  ;;  %v13882_v34 = vld [vmem:[#allocation6_spill] sm:$0xff] }
  0xed   : > { %v8273_v18 = vsel %vm8232_vm14, %v7415_v22, %v1202_v30  ;;  %v1031_v6 = vclz %v1030_v29  ;;  %v835_v59 = vadd.s32 %v833_v10, %v827_v24  ;;  %vm836_vm3 = vc.u32 %v834_v23, %v830_v36 }
  0xee   : > { %v1207_v2 = vmul.f32 %v8273_v18, %v8273_v18  ;;  %v837_v38 = vsel %vm836_vm3, 1, %v13868_v45  ;;  %v8278_v1 = vmul.u32 %v844_v13, %v821_v16  ;;  %v850_v62 = vshll.u32 %v8264_v8, 16 }
  0xef   : > { %v8281_v52 = vand.u32 3, %v1206_v15  ;;  %vm927_vm6 = vcmp.lt.s32.totalorder %v7443_v44, 0  ;;  %v1019_v5 = vadd.s32 %v8154_v3, %v8160_v42  ;;  %v6861_v54 = vadd.s32 4294967294, %v1031_v6 }
  0xf0   : > { %v8288_v24 = vsel %vm804_vm0, %v807_v37, %v809_v50  ;;  %v1208_v49 = vmul.f32 -0.001358992, %v1207_v2  ;;  %v1215_v36 = vmul.f32 -0.00019511016, %v1207_v2  ;;  %vm854_vm7 = vc.u32 %v846_v41, %v850_v62 }
  0xf1   : > { %vm6862_vm14 = vcmp.lt.s32.totalorder %v6861_v54, 0  ;;  %v829_v21 = vshrl.u32 %v8245_v9, 16  ;;  %v839_v15 = vadd.s32 %v837_v38, %v835_v59  ;;  %v849_v23 = vmul.u32 %v845_v56, %v821_v16  ;;  %v13883_v9 = vld [vmem:[#allocation14_spill] sm:$0xff] }
  0xf2   : > { %v1209_v30 = vadd.f32 0.041655596, %v1208_v49  ;;  %v1216_v29 = vadd.f32 0.008332121, %v1215_v36  ;;  %v1034_v10 = vsel %vm6862_vm14, 0, %v6861_v54  ;;  %v852_v3 = vshll.u32 %v8278_v1, 16 }
  0xf3   : > { %vm1228_vm1 = vcmp.eq.s32.totalorder %v8281_v52, 2  ;;  %v1035_v58 = vsub.s32 32, %v1034_v10  ;;  %v1036_v42 = vshll.u32 %v8249_v20, %v1034_v10  ;;  %v1039_v37 = vsub.s32 4294967266, %v1034_v10 }
  0xf4   : > { %v855_v50 = vsel %vm854_vm7, 1, %v13868_v45  ;;  %v1210_v6 = vmul.f32 %v1209_v30, %v1207_v2  ;;  %v1217_v47 = vmul.f32 %v1216_v29, %v1207_v2  ;;  %v1049_v13 = vsub.s32 4, %v8226_v40 }
  0xf5   : > { %v1558_v16 = vshll.u32 %v13865_v55, %v13883_v9  ;;  %vm1225_vm0 = vcmp.eq.s32.totalorder %v8281_v52, 0  ;;  %v1037_v56 = vshrl.u32 %v1019_v5, %v1035_v58  ;;  %v1040_v59 = vadd.s32 127, %v1039_v37 }
  0xf6   : > { %v831_v38 = vshrl.u32 %v8247_v32, 16  ;;  %v856_v54 = vadd.s32 %v850_v62, %v846_v41  ;;  %v1211_v49 = vadd.f32 -0.4999988, %v1210_v6  ;;  %v1218_v36 = vadd.f32 -0.16666654, %v1217_v47 }
  0xf7   : > { %vm1224_vm13 = vcmp.lt.s32.totalorder %v8281_v52, 2  ;;  %v13884_v20 = vand.u32 2147483647, %v7443_v44  ;;  %v840_v29 = vadd.s32 %v839_v15, %v829_v21  ;;  %v857_v10 = vadd.s32 %v855_v50, %v849_v23 }
  0xf8   : > { %vm1222_vm3 = vweird.f32 %v7415_v22  ;;  %v1038_v48 = vor.u32 %v1037_v56, %v1036_v42  ;;  %v1041_v5 = vshll.u32 %v1040_v59, 23  ;;  %v851_v58 = vshrl.u32 %v8264_v8, 16 }
  0xf9   : > { %vm8304_vm9 = vcmp.le.f32.partialorder %v13884_v20, 0.7853982  ;;  %vm858_vm7 = vc.u32 %v856_v54, %v852_v3  ;;  %v1212_v32 = vmul.f32 %v1211_v49, %v1207_v2  ;;  %v1219_v41 = vmul.f32 %v1218_v36, %v1207_v2  ;;  %v13888_v36 = vld [vmem:[#allocation16_spill] sm:$0xff] }
  0xfa   : > { %v1050_v47 = vsel %vm927_vm6, %v1049_v13, %v8226_v40  ;;  %v859_v62 = vsel %vm858_vm7, 1, %v13868_v45  ;;  %v1042_v37 = vor.u32 4788187, %v1041_v5  ;;  %v1045_v6 = vcvt.s32.f32 %v1038_v48 }
  0xfb   : > { %v853_v21 = vshrl.u32 %v8278_v1, 16  ;;  %v861_v15 = vadd.s32 %v859_v62, %v857_v10  ;;  %v1213_v23 = vadd.f32 1.0, %v1212_v32  ;;  %v1220_v50 = vadd.f32 1.0, %v1219_v41 }
  0xfc   : > { %v8315_v42 = vadd.s32 %v840_v29, %v831_v38  ;;  %v8317_v56 = vadd.s32 %v856_v54, %v852_v3  ;;  %v1043_v8 = vand.u32 2147483647, %v1042_v37  ;;  %v13887_v2 = vand.u32 2147483647, %v13882_v34 }
  0xfd   : > { %v862_v59 = vadd.s32 %v861_v15, %v851_v58  ;;  %v1559_v40 = vshrl.u32 %v13869_v11, %v13888_v36  ;;  %v1221_v13 = vmul.f32 %v1220_v50, %v8273_v18  ;;  %v1229_v48 = vxor.u32 2147483648, %v1213_v23  ;;  %v7121_v50 = vld [vmem:[%s7354_s11 + $0x10] sm:$0xff] }
  0xfe   : > { %v1548_v49 = vand.u32 8388607, %v13887_v2  ;;  %v1561_v1 = vshll.u32 %v13869_v11, %v13883_v9  ;;  %v1562_v38 = vshrl.u32 %v13870_v46, %v13888_v36  ;;  %v1046_v20 = vmul.f32 %v1045_v6, %v1043_v8 }
  0xff   : > { %v863_v3 = vadd.s32 %v862_v59, %v853_v21  ;;  %v864_v54 = vmul.u32 %v8224_v60, %v8288_v24  ;;  %v1564_v29 = vshll.u32 %v13870_v46, %v13883_v9  ;;  %v1226_v10 = vxor.u32 2147483648, %v1221_v13 }
 0x100   : > { %v1230_v5 = vsel %vm1228_vm1, %v1229_v48, %v1221_v13  ;;  %vm866_vm14 = vc.u32 %v8315_v42, %v8317_v56  ;;  %v1565_v18 = vshrl.u32 %v13780_v35, %v13888_v36  ;;  %v1047_v58 = vxor.u32 2147483648, %v1046_v20  ;;  %v13889_v48 = vld [vmem:[#allocation23_spill] sm:$0xff] }
 0x101   : > { %v1052_v32 = vsel %vm8304_vm9, 0, %v1050_v47  ;;  %v867_v41 = vadd.s32 1, %v863_v3  ;;  %v1549_v60 = vor.u32 8388608, %v1548_v49  ;;  %v1227_v24 = vsel %vm1225_vm0, %v1213_v23, %v1226_v10 }
 0x102   : > { %v8342_v9 = vor.u32 %v1559_v40, %v1558_v16  ;;  %v8344_v62 = vor.u32 %v1562_v38, %v1561_v1  ;;  %v8346_v37 = vor.u32 %v1565_v18, %v1564_v29  ;;  %v1231_v6 = vsel %vm1224_vm13, %v1227_v24, %v1230_v5 }
 0x103   : > { %v1048_v21 = vsel %vm927_vm6, %v1047_v58, %v1046_v20  ;;  %v868_v15 = vsel %vm866_vm14, %v867_v41, %v863_v3  ;;  %vm1573_vm1 = vcmp.lt.s32.totalorder %v7552_v51, 1  ;;  %v1232_v47 = vsel %vm1222_vm3, nan, %v1231_v6  ;;  %v13890_v20 = vld [vmem:[#allocation26_spill] sm:$0xff] }
 0x104   : > { %v8358_v16 = vsel %vm8304_vm9, %v7443_v44, %v1048_v21  ;;  %v869_v23 = vadd.s32 %v868_v15, %v864_v54  ;;  %vm1575_vm0 = vcmp.lt.s32.totalorder %v7552_v51, 3  ;;  %vm709_vm7 = vcmp.le.f32.partialorder %v7121_v50, 0.51  ;;  %v7122_v50 = vld [vmem:[%s7354_s11 + $0xa8] sm:$0xff] }
 0x105   : > { %v5701_v52 = vadd.f32 1.0, %v1232_v47  ;;  %v1053_v8 = vmul.f32 %v8358_v16, %v8358_v16  ;;  %vm1574_vm6 = vcmp.lt.s32.totalorder %v7552_v51, 2  ;;  %v8365_v59 = vand.u32 3, %v1052_v32 }
 0x106   : > { %v870_v22 = vadd.s32 536870912, %v869_v23  ;;  %v1581_v30 = vsel %vm1573_vm1, %v8342_v9, %v8344_v62  ;;  %v1585_v2 = vsel %vm1573_vm1, %v8344_v62, %v8346_v37  ;;  %v1587_v1 = vsel %vm1575_vm0, %v13889_v48, %v7633_v4 }
 0x107   : > { %v5733_v49 = vmul.f32 0.5, %v5701_v52  ;;  %v1054_v40 = vmul.f32 -0.001358992, %v1053_v8  ;;  %v1061_v13 = vmul.f32 -0.00019511016, %v1053_v8  ;;  %v1583_v3 = vsel %vm1575_vm0, %v8346_v37, %v13890_v20 }
 0x108   : > { %v8379_v38 = vshrl.u32 %v870_v22, 30  ;;  %v1588_v54 = vsel %vm1574_vm6, %v1585_v2, %v1587_v1  ;;  %v8387_v29 = vshll.u32 %v1549_v60, 8  ;;  %v1584_v60 = vsel %vm1574_vm6, %v1581_v30, %v1583_v3 }
 0x109   : > { %v5765_v10 = vsel %vm709_vm7, %v5733_v49, 0.0  ;;  %v1055_v5 = vadd.f32 0.041655596, %v1054_v40  ;;  %v1062_v18 = vadd.f32 0.008332121, %v1061_v13  ;;  %v1592_v58 = vand.u32 65535, %v1588_v54 }
 0x10a   : > { %5807 = vperm.xlu1 %7042, %v5765_v10   ;;  %v872_v32 = vshll.u32 %v8379_v38, 30  ;;  %v1590_v41 = vand.u32 65535, %v8387_v29  ;;  %v1591_v24 = vshrl.u32 %v8387_v29, 16  ;;  %v1593_v15 = vshrl.u32 %v1588_v54, 16 }
 0x10b   : > { %v1056_v6 = vmul.f32 %v1055_v5, %v1053_v8  ;;  %v1063_v21 = vmul.f32 %v1062_v18, %v1053_v8  ;;  %v8397_v47 = vadd.s32 4294967169, %v8196_v33  ;;  %v8400_v52 = vmul.f32 6.1599855, %v7122_v50 }
 0x10c   : > { %vm1071_vm13 = vcmp.eq.s32.totalorder %v8365_v59, 0  ;;  %v873_v22 = vsub.s32 %v869_v23, %v872_v32  ;;  %vm1070_vm9 = vcmp.lt.s32.totalorder %v8365_v59, 2  ;;  %v1594_v40 = vmul.u32 %v1592_v58, %v1590_v41 }
 0x10d   : > { %13891 = vst [vmem:[#allocation6_spill] sm:$0xff] %v8400_v52  ;;  %v1057_v2 = vadd.f32 -0.4999988, %v1056_v6  ;;  %v1064_v49 = vadd.f32 -0.16666654, %v1063_v21  ;;  %v8404_v13 = vmul.u32 %v1593_v15, %v1590_v41  ;;  %vm1068_vm3 = vweird.f32 %v7443_v44 }
 0x10e   : > { %vm874_vm14 = vcmp.lt.s32.totalorder %v873_v22, 0  ;;  %v875_v30 = vsub.s32 0, %v873_v22  ;;  %v8407_v48 = vmul.u32 %v1592_v58, %v1591_v24  ;;  %v1615_v33 = vshrl.u32 %v1584_v60, 16 }
 0x10f   : > { %v1058_v1 = vmul.f32 %v1057_v2, %v1053_v8  ;;  %v1065_v20 = vmul.f32 %v1064_v49, %v1053_v8  ;;  %v1557_v23 = vshrl.u32 %v13865_v55, %v13888_v36  ;;  %v1598_v3 = vshll.u32 %v8404_v13, 16  ;;  %v7123_v2 = vld [vmem:[%s7354_s11 + $0x8] sm:$0xff] }
 0x110   : > { %v876_v54 = vsel %vm874_vm14, %v875_v30, %v873_v22  ;;  %v1597_v10 = vmul.u32 %v1593_v15, %v1591_v24  ;;  %v1600_v5 = vshll.u32 %v8407_v48, 16  ;;  %v1614_v18 = vand.u32 65535, %v1584_v60 }
 0x111   : > { %v1059_v32 = vadd.f32 1.0, %v1058_v1  ;;  %v1066_v6 = vadd.f32 1.0, %v1065_v20  ;;  %v877_v21 = vclz %v876_v54  ;;  %vm1602_vm7 = vc.u32 %v1594_v40, %v1598_v3 }
 0x112   : > { %vm1074_vm12 = vcmp.eq.s32.totalorder %v8365_v59, 2  ;;  %v1603_v58 = vsel %vm1602_vm7, 1, %v13868_v45  ;;  %v1604_v50 = vadd.s32 %v1598_v3, %v1594_v40  ;;  %v8415_v8 = vmul.u32 %v1615_v33, %v1590_v41 }
 0x113   : > { %vm708_vm8 = vcmp.le.f32.partialorder %v7123_v2, 0.51  ;;  %v1067_v36 = vmul.f32 %v1066_v6, %v8358_v16  ;;  %v1075_v49 = vxor.u32 2147483648, %v1059_v32  ;;  %v865_v15 = vadd.s32 %v8317_v56, %v8315_v42 }
 0x114   : > { %v6858_v60 = vadd.s32 4294967294, %v877_v21  ;;  %v1577_v30 = vsel %vm1573_vm1, %v1557_v23, %v8342_v9  ;;  %v1578_v1 = vsel %vm1576_vm10, %v8346_v37, 2102212464  ;;  %vm1606_vm14 = vc.u32 %v1604_v50, %v1600_v5 }
 0x115   : > { %v1616_v40 = vmul.u32 %v1614_v18, %v1590_v41  ;;  %v1072_v20 = vxor.u32 2147483648, %v1067_v36  ;;  %v1076_v3 = vsel %vm1074_vm12, %v1075_v49, %v1067_v36  ;;  %v1605_v54 = vadd.s32 %v1603_v58, %v1597_v10 }
 0x116   : > { %vm6859_vm7 = vcmp.lt.s32.totalorder %v6858_v60, 0  ;;  %v1607_v6 = vsel %vm1606_vm14, 1, %v13868_v45  ;;  %v1618_v4 = vmul.u32 %v1614_v18, %v1591_v24  ;;  %v1620_v42 = vshll.u32 %v8415_v8, 16 }
 0x117   : > { %v880_v16 = vsel %vm6859_vm7, 0, %v6858_v60  ;;  %v1073_v56 = vsel %vm1071_vm13, %v1059_v32, %v1072_v20  ;;  %v1579_v41 = vsel %vm1575_vm0, %v8344_v62, %v1578_v1  ;;  %v1599_v10 = vshrl.u32 %v8404_v13, 16 }
 0x118   : > { %v881_v9 = vsub.s32 32, %v880_v16  ;;  %v882_v23 = vshll.u32 %v873_v22, %v880_v16  ;;  %v885_v21 = vsub.s32 4294967266, %v880_v16  ;;  %v1077_v37 = vsel %vm1070_vm9, %v1073_v56, %v1076_v3  ;;  %v13893_v16 = vld [vmem:[#allocation5_spill] sm:$0xff] }
 0x119   : > { %v1619_v5 = vmul.u32 %v1615_v33, %v1591_v24  ;;  %v1078_v18 = vsel %vm1068_vm3, nan, %v1077_v37  ;;  %v1609_v32 = vadd.s32 %v1607_v6, %v1605_v54  ;;  %v895_v22 = vsub.s32 4, %v8379_v38 }
 0x11a   : > { %v883_v58 = vshrl.u32 %v865_v15, %v881_v9  ;;  %v886_v50 = vadd.s32 127, %v885_v21  ;;  %v5700_v36 = vadd.f32 1.0, %v1078_v18  ;;  %v1622_v49 = vshll.u32 %v1618_v4, 16  ;;  %v7124_v15 = vld [vmem:[%s7354_s11 + $0xd0] sm:$0xff]  ;;  %v13896_v18 = vld [vmem:[#allocation10_spill] sm:$0xff] }
 0x11b   : > { %vm1624_vm10 = vc.u32 %v1616_v40, %v1620_v42  ;;  %v1601_v20 = vshrl.u32 %v8407_v48, 16  ;;  %vm3708_vm12 = vcmp.gt.s32.totalorder %v8178_v61, 0  ;;  %v1610_v44 = vadd.s32 %v1609_v32, %v1599_v10 }
 0x11c   : > { %v884_v59 = vor.u32 %v883_v58, %v882_v23  ;;  %v887_v60 = vshll.u32 %v886_v50, 23  ;;  %v1625_v62 = vsel %vm1624_vm10, 1, %v13868_v45  ;;  %v5732_v24 = vmul.f32 0.5, %v5700_v36 }
 0x11d   : > { %v1626_v13 = vadd.s32 %v1620_v42, %v1616_v40  ;;  %v1627_v33 = vadd.s32 %v1625_v62, %v1619_v5  ;;  %v8444_v1 = vmul.f32 6.1599855, %v7124_v15  ;;  %v13637_v6 = vand.u32 2147483647, %v13893_v16  ;;  %v13895_v5 = vld [vmem:[#allocation9_spill] sm:$0xff] }
 0x11e   : > { %v888_v3 = vor.u32 4788187, %v887_v60  ;;  %v891_v54 = vcvt.s32.f32 %v884_v59  ;;  %v8449_v56 = vor.u32 %v8192_v43, %v8123_v28  ;;  %v5764_v48 = vsel %vm708_vm8, %v5732_v24, 0.0 }
 0x11f   : > { %13892 = vst [vmem:[#allocation14_spill] sm:$0xff] %v8444_v1  ;;  %v1621_v9 = vshrl.u32 %v8415_v8, 16  ;;  %vm1628_vm1 = vc.u32 %v1626_v13, %v1622_v49  ;;  %5802 = vperm.xlu0 %7041, %v5764_v48   ;;  %vm773_vm0 = vcmp.lt.s32.totalorder %v7424_v26, 0  ;;  %v1580_v42 = vsel %vm1574_vm6, %v1577_v30, %v1579_v41 }
 0x120   : > { %13894 = vst [vmem:[#allocation16_spill] sm:$0xff] %v8449_v56  ;;  %v889_v40 = vand.u32 2147483647, %v888_v3  ;;  %v1629_v23 = vsel %vm1628_vm1, 1, %v13868_v45  ;;  %v896_v21 = vsel %vm773_vm0, %v895_v22, %v8379_v38  ;;  %v8460_v28 = vadd.s32 %v1610_v44, %v1601_v20  ;;  %v13900_v44 = vld [vmem:[#allocation12_spill] sm:$0xff] }
 0x121   : > { %v1623_v43 = vshrl.u32 %v1618_v4, 16  ;;  %v1631_v2 = vadd.s32 %v1629_v23, %v1627_v33  ;;  %v8462_v8 = vadd.s32 %v1626_v13, %v1622_v49  ;;  %v1394_v10 = vand.u32 8388607, %v13637_v6 }
 0x122   : > { %v892_v37 = vmul.f32 %v891_v54, %v889_v40  ;;  %v1407_v51 = vshll.u32 %v13869_v11, %v13895_v5  ;;  %v1404_v41 = vshll.u32 %v13865_v55, %v13895_v5  ;;  %v1405_v38 = vshrl.u32 %v13869_v11, %v13896_v18 }
 0x123   : > { %v1632_v30 = vadd.s32 %v1631_v2, %v1621_v9  ;;  %v1408_v4 = vshrl.u32 %v13870_v46, %v13896_v18  ;;  %v13897_v58 = vand.u32 2147483647, %v7424_v26  ;;  %v1410_v36 = vshll.u32 %v13870_v46, %v13895_v5  ;;  %v13903_v5 = vld [vmem:[#allocation15_spill] sm:$0xff] }
 0x124   : > { %v893_v32 = vxor.u32 2147483648, %v892_v37  ;;  %v1411_v22 = vshrl.u32 %v13780_v35, %v13896_v18  ;;  %v1634_v60 = vmul.u32 %v8387_v29, %v1580_v42  ;;  %vm1636_vm6 = vc.u32 %v8460_v28, %v8462_v8 }
 0x125   : > { %vm8476_vm8 = vcmp.le.f32.partialorder %v13897_v58, 0.7853982  ;;  %v1633_v59 = vadd.s32 %v1632_v30, %v1623_v43  ;;  %v8487_v20 = vor.u32 %v1408_v4, %v1407_v51  ;;  %vm1419_vm13 = vcmp.lt.s32.totalorder %v13900_v44, 1 }
 0x126   : > { %v898_v49 = vsel %vm8476_vm8, 0, %v896_v21  ;;  %v894_v62 = vsel %vm773_vm0, %v893_v32, %v892_v37  ;;  %v8493_v24 = vor.u32 %v1411_v22, %v1410_v36  ;;  %v1395_v15 = vor.u32 8388608, %v1394_v10  ;;  %v13902_v10 = vld [vmem:[#allocation20_spill] sm:$0xff] }
 0x127   : > { %v897_v13 = vsel %vm8476_vm8, %v7424_v26, %v894_v62  ;;  %v1637_v33 = vadd.s32 1, %v1633_v59  ;;  %v8499_v3 = vor.u32 %v1405_v38, %v1404_v41  ;;  %v8506_v54 = vsel %vm3708_vm12, %v8178_v61, 0 }
 0x128   : > { %v899_v48 = vmul.f32 %v897_v13, %v897_v13  ;;  %vm1421_vm9 = vcmp.lt.s32.totalorder %v13900_v44, 3  ;;  %v8510_v9 = vadd.s32 4294967169, %v8222_v12  ;;  %vm1420_vm3 = vcmp.lt.s32.totalorder %v13900_v44, 2  ;;  %v13901_v12 = vld [vmem:[#allocation18_spill] sm:$0xff] }
 0x129   : > { %v1638_v40 = vsel %vm1636_vm6, %v1637_v33, %v1633_v59  ;;  %v1431_v42 = vsel %vm1419_vm13, %v8487_v20, %v8493_v24  ;;  %v8517_v43 = vand.u32 3, %v898_v49  ;;  %v1427_v2 = vsel %vm1419_vm13, %v8499_v3, %v8487_v20 }
 0x12a   : > { %v900_v23 = vmul.f32 -0.001358992, %v899_v48  ;;  %v907_v21 = vmul.f32 -0.00019511016, %v899_v48  ;;  %v1639_v61 = vadd.s32 %v1638_v40, %v1634_v60  ;;  %v1429_v37 = vsel %vm1421_vm9, %v8493_v24, %v13901_v12 }
 0x12b   : > { %v1433_v51 = vsel %vm1421_vm9, %v13903_v5, %v13902_v10  ;;  %v8531_v30 = vshll.u32 %v1395_v15, 8  ;;  %v1430_v62 = vsel %vm1420_vm3, %v1427_v2, %v1429_v37  ;;  %v8542_v33 = vshrl.u32 %v8506_v54, 5 }
 0x12c   : > { %v901_v41 = vadd.f32 0.041655596, %v900_v23  ;;  %v908_v38 = vadd.f32 0.008332121, %v907_v21  ;;  %v1640_v4 = vadd.s32 536870912, %v1639_v61  ;;  %v1434_v58 = vsel %vm1420_vm3, %v1431_v42, %v1433_v51 }
 0x12d   : > { %v1436_v50 = vand.u32 65535, %v8531_v30  ;;  %v1437_v32 = vshrl.u32 %v8531_v30, 16  ;;  %v1438_v36 = vand.u32 65535, %v1434_v58  ;;  %v1439_v22 = vshrl.u32 %v1434_v58, 16  ;;  %13904 = vst [vmem:[#allocation23_spill] sm:$0xff] %v8542_v33 }
 0x12e   : > { %v902_v49 = vmul.f32 %v901_v41, %v899_v48  ;;  %v909_v59 = vmul.f32 %v908_v38, %v899_v48  ;;  %v8537_v60 = vshrl.u32 %v1640_v4, 30  ;;  %vm916_vm14 = vcmp.lt.s32.totalorder %v8517_v43, 2 }
 0x12f   : > { %v1440_v15 = vmul.u32 %v1438_v36, %v1436_v50  ;;  %v8544_v40 = vmul.u32 %v1439_v22, %v1436_v50  ;;  %v8546_v42 = vmul.u32 %v1438_v36, %v1437_v32  ;;  %v1460_v51 = vand.u32 65535, %v1430_v62 }
 0x130   : > { %v903_v23 = vadd.f32 -0.4999988, %v902_v49  ;;  %v910_v21 = vadd.f32 -0.16666654, %v909_v59  ;;  %v1642_v12 = vshll.u32 %v8537_v60, 30  ;;  %v1461_v2 = vshrl.u32 %v1430_v62, 16 }
 0x131   : > { %v1444_v10 = vshll.u32 %v8544_v40, 16  ;;  %v1446_v5 = vshll.u32 %v8546_v42, 16  ;;  %v1443_v4 = vmul.u32 %v1439_v22, %v1437_v32  ;;  %vm920_vm7 = vcmp.eq.s32.totalorder %v8517_v43, 2  ;;  %v7125_v22 = vld [vmem:[%s7354_s11] sm:$0xff] }
 0x132   : > { %v904_v37 = vmul.f32 %v903_v23, %v899_v48  ;;  %v911_v41 = vmul.f32 %v910_v21, %v899_v48  ;;  %v8552_v38 = vsub.s32 %v1639_v61, %v1642_v12  ;;  %v1403_v58 = vshrl.u32 %v13865_v55, %v13896_v18 }
 0x133   : > { %vm1448_vm10 = vc.u32 %v1440_v15, %v1444_v10  ;;  %v1450_v36 = vadd.s32 %v1444_v10, %v1440_v15  ;;  %v1462_v48 = vmul.u32 %v1460_v51, %v1436_v50  ;;  %v8560_v61 = vmul.u32 %v1461_v2, %v1436_v50 }
 0x134   : > { %v905_v49 = vadd.f32 1.0, %v904_v37  ;;  %v912_v59 = vadd.f32 1.0, %v911_v41  ;;  %vm1644_vm12 = vcmp.lt.s32.totalorder %v8552_v38, 0  ;;  %v1645_v29 = vsub.s32 0, %v8552_v38 }
 0x135   : > { %v1449_v62 = vsel %vm1448_vm10, 1, %v13868_v45  ;;  %vm1452_vm1 = vc.u32 %v1450_v36, %v1446_v5  ;;  %vm707_vm0 = vcmp.le.f32.partialorder %v7125_v22, 0.51  ;;  %vm917_vm8 = vcmp.eq.s32.totalorder %v8517_v43, 0  ;;  %v13906_v22 = vld [vmem:[#allocation17_spill] sm:$0xff] }
 0x136   : > { %v913_v23 = vmul.f32 %v912_v59, %v897_v13  ;;  %v921_v21 = vxor.u32 2147483648, %v905_v49  ;;  %v1646_v18 = vsel %vm1644_vm12, %v1645_v29, %v8552_v38  ;;  %v1451_v12 = vadd.s32 %v1449_v62, %v1443_v4 }
 0x137   : > { %v1647_v15 = vclz %v1646_v18  ;;  %v1453_v10 = vsel %vm1452_vm1, 1, %v13868_v45  ;;  %v1466_v37 = vshll.u32 %v8560_v61, 16  ;;  %v1424_v50 = vsel %vm1422_vm5, %v8493_v24, 2102212464 }
 0x138   : > { %v918_v41 = vxor.u32 2147483648, %v913_v23  ;;  %v922_v5 = vsel %vm920_vm7, %v921_v21, %v913_v23  ;;  %v1464_v13 = vmul.u32 %v1460_v51, %v1437_v32  ;;  %vm914_vm6 = vweird.f32 %v7424_v26 }
 0x139   : > { %v1635_v29 = vadd.s32 %v8462_v8, %v8460_v28  ;;  %v6873_v4 = vadd.s32 4294967294, %v1647_v15  ;;  %v1423_v36 = vsel %vm1419_vm13, %v1403_v58, %v8499_v3  ;;  %v1445_v62 = vshrl.u32 %v8544_v40, 16 }
 0x13a   : > { %v919_v59 = vsel %vm917_vm8, %v905_v49, %v918_v41  ;;  %v1455_v18 = vadd.s32 %v1453_v10, %v1451_v12  ;;  %vm1470_vm7 = vc.u32 %v1462_v48, %v1466_v37  ;;  %v1425_v26 = vsel %vm1421_vm9, %v8487_v20, %v1424_v50 }
 0x13b   : > { %v923_v23 = vsel %vm916_vm14, %v919_v59, %v922_v5  ;;  %vm6874_vm5 = vcmp.lt.s32.totalorder %v6873_v4, 0  ;;  %v1465_v24 = vmul.u32 %v1461_v2, %v1437_v32  ;;  %v1468_v51 = vshll.u32 %v1464_v13, 16 }
 0x13c   : > { %v924_v28 = vsel %vm914_vm6, nan, %v923_v23  ;;  %v1650_v8 = vsel %vm6874_vm5, 0, %v6873_v4  ;;  %v1471_v21 = vsel %vm1470_vm7, 1, %v13868_v45  ;;  %v1426_v43 = vsel %vm1420_vm3, %v1423_v36, %v1425_v26 }
 0x13d   : > { %v5699_v3 = vadd.f32 1.0, %v924_v28  ;;  %v1651_v58 = vsub.s32 32, %v1650_v8  ;;  %v1652_v40 = vshll.u32 %v8552_v38, %v1650_v8  ;;  %v1655_v49 = vsub.s32 4294967266, %v1650_v8  ;;  %v13905_v38 = vld [vmem:[#allocation7_spill] sm:$0xff]  ;;  %v13907_v8 = vld [vmem:[#allocation21_spill] sm:$0xff] }
 0x13e   : > { %v1447_v12 = vshrl.u32 %v8546_v42, 16  ;;  %v1456_v15 = vadd.s32 %v1455_v18, %v1445_v62  ;;  %v1472_v10 = vadd.s32 %v1466_v37, %v1462_v48  ;;  %v1473_v2 = vadd.s32 %v1471_v21, %v1465_v24 }
 0x13f   : > { %v5731_v41 = vmul.f32 0.5, %v5699_v3  ;;  %v1653_v20 = vshrl.u32 %v1635_v29, %v1651_v58  ;;  %v1656_v32 = vadd.s32 127, %v1655_v49  ;;  %vm1543_vm13 = vcmp.lt.s32.totalorder %v13882_v34, 0 }
 0x140   : > { %v1665_v5 = vsub.s32 4, %v8537_v60  ;;  %v1467_v50 = vshrl.u32 %v8560_v61, 16  ;;  %vm1474_vm9 = vc.u32 %v1472_v10, %v1468_v51  ;;  %v13636_v4 = vand.u32 2147483647, %v13905_v38 }
 0x141   : > { %v5763_v44 = vsel %vm707_vm0, %v5731_v41, 0.0  ;;  %v1654_v36 = vor.u32 %v1653_v20, %v1652_v40  ;;  %v1657_v59 = vshll.u32 %v1656_v32, 23  ;;  %v1475_v42 = vsel %vm1474_vm9, 1, %v13868_v45 }
 0x142   : > { %5797 = vperm.xlu2 %7043, %v5763_v44   ;;  %v8595_v48 = vadd.s32 %v1456_v15, %v1447_v12  ;;  %v1469_v37 = vshrl.u32 %v1464_v13, 16  ;;  %v1477_v29 = vadd.s32 %v1475_v42, %v1473_v2  ;;  %v1240_v62 = vand.u32 8388607, %v13636_v4  ;;  %v13911_v44 = vld [vmem:[#allocation37_spill] sm:$0xff] }
 0x143   : > { %vm3886_vm3 = vcmp.lt.s32.totalorder %v8014_v17, 4  ;;  %v1658_v61 = vor.u32 4788187, %v1657_v59  ;;  %v1661_v18 = vcvt.s32.f32 %v1654_v36  ;;  %v8600_v23 = vadd.s32 %v1472_v10, %v1468_v51  ;;  %v13912_v36 = vld [vmem:[#allocation27_spill] sm:$0xff] }
 0x144   : > { %v1250_v26 = vshll.u32 %v13865_v55, %v13906_v22  ;;  %v1478_v24 = vadd.s32 %v1477_v29, %v1467_v50  ;;  %v1480_v28 = vmul.u32 %v8531_v30, %v1426_v43  ;;  %v1251_v21 = vshrl.u32 %v13869_v11, %v13907_v8 }
 0x145   : > { %v1253_v13 = vshll.u32 %v13869_v11, %v13906_v22  ;;  %v1659_v3 = vand.u32 2147483647, %v1658_v61  ;;  %v1241_v58 = vor.u32 8388608, %v1240_v62  ;;  %v1254_v40 = vshrl.u32 %v13870_v46, %v13907_v8  ;;  %v13914_v62 = vld [vmem:[#allocation31_spill] sm:$0xff] }
 0x146   : > { %v1256_v51 = vshll.u32 %v13870_v46, %v13906_v22  ;;  %v1479_v49 = vadd.s32 %v1478_v24, %v1469_v37  ;;  %v1252_v12 = vor.u32 %v1251_v21, %v1250_v26  ;;  %v1257_v15 = vshrl.u32 %v13780_v35, %v13907_v8 }
 0x147   : > { %vm1265_vm14 = vcmp.lt.s32.totalorder %v7561_v27, 1  ;;  %v1662_v30 = vmul.f32 %v1661_v18, %v1659_v3  ;;  %vm1482_vm10 = vc.u32 %v8595_v48, %v8600_v23  ;;  %v1255_v43 = vor.u32 %v1254_v40, %v1253_v13 }
 0x148   : > { %vm1267_vm12 = vcmp.lt.s32.totalorder %v7561_v27, 3  ;;  %v13908_v10 = vand.u32 2147483647, %v13882_v34  ;;  %v1483_v20 = vadd.s32 1, %v1479_v49  ;;  %v1258_v32 = vor.u32 %v1257_v15, %v1256_v51 }
 0x149   : > { %vm1266_vm0 = vcmp.lt.s32.totalorder %v7561_v27, 2  ;;  %v1663_v2 = vxor.u32 2147483648, %v1662_v30  ;;  %v1273_v50 = vsel %vm1265_vm14, %v1252_v12, %v1255_v43  ;;  %v1279_v59 = vsel %vm1267_vm12, %v13912_v36, %v13911_v44 }
 0x14a   : > { %vm8621_vm1 = vcmp.le.f32.partialorder %v13908_v10, 0.7853982  ;;  %v8632_v42 = vshll.u32 %v1241_v58, 8  ;;  %v8635_v37 = vand.u32 31, %v8506_v54  ;;  %v1484_v29 = vsel %vm1482_vm10, %v1483_v20, %v1479_v49 }
 0x14b   : > { %v1275_v61 = vsel %vm1267_vm12, %v1258_v32, %v13914_v62  ;;  %v1277_v18 = vsel %vm1265_vm14, %v1255_v43, %v1258_v32  ;;  %v8643_v22 = vadd.s32 1, %v8397_v47  ;;  %v1664_v26 = vsel %vm1543_vm13, %v1663_v2, %v1662_v30 }
 0x14c   : > { %13913 = vst [vmem:[#allocation26_spill] sm:$0xff] %v8635_v37  ;;  %v1666_v24 = vsel %vm1543_vm13, %v1665_v5, %v8537_v60  ;;  %v1485_v54 = vadd.s32 %v1484_v29, %v1480_v28  ;;  %v8653_v21 = vsel %vm8621_vm1, %v13882_v34, %v1664_v26  ;;  %v8657_v13 = vsel %vm1266_vm0, %v1273_v50, %v1275_v61 }
 0x14d   : > { %v1280_v47 = vsel %vm1266_vm0, %v1277_v18, %v1279_v59  ;;  %v1282_v3 = vand.u32 65535, %v8632_v42  ;;  %v1669_v58 = vmul.f32 %v8653_v21, %v8653_v21  ;;  %v8665_v60 = vshrl.u32 %v8632_v42, 16 }
 0x14e   : > { %v1486_v40 = vadd.s32 536870912, %v1485_v54  ;;  %v1284_v5 = vand.u32 65535, %v1280_v47  ;;  %v8670_v28 = vsel %vm3886_vm3, %v8449_v56, 920167782  ;;  %v13916_v51 = vand.u32 2139095040, %v8116_v25 }
 0x14f   : > { %13915 = vst [vmem:[#allocation5_spill] sm:$0xff] %v8670_v28  ;;  %v1668_v15 = vsel %vm8621_vm1, 0, %v1666_v24  ;;  %v1285_v30 = vshrl.u32 %v1280_v47, 16  ;;  %v1670_v10 = vmul.f32 -0.001358992, %v1669_v58  ;;  %v1249_v50 = vshrl.u32 %v13865_v55, %v13907_v8 }
 0x150   : > { %v8674_v49 = vshrl.u32 %v13916_v51, 23  ;;  %v1677_v20 = vmul.f32 -0.00019511016, %v1669_v58  ;;  %v8678_v2 = vshrl.u32 %v1486_v40, 30  ;;  %v1286_v44 = vmul.u32 %v1284_v5, %v1282_v3 }
 0x151   : > { %v8682_v36 = vmul.u32 %v1285_v30, %v1282_v3  ;;  %v8685_v59 = vmul.u32 %v1284_v5, %v8665_v60  ;;  %v1307_v29 = vshrl.u32 %v8657_v13, 16  ;;  %v1671_v62 = vadd.f32 0.041655596, %v1670_v10 }
 0x152   : > { %v1678_v61 = vadd.f32 0.008332121, %v1677_v20  ;;  %v8688_v41 = vand.u32 3, %v1668_v15  ;;  %v1488_v18 = vshll.u32 %v8678_v2, 30  ;;  %v1270_v26 = vsel %vm1268_vm11, %v1258_v32, 2102212464 }
 0x153   : > { %v1290_v24 = vshll.u32 %v8682_v36, 16  ;;  %v1292_v8 = vshll.u32 %v8685_v59, 16  ;;  %v1306_v47 = vand.u32 65535, %v8657_v13  ;;  %v1672_v40 = vmul.f32 %v1671_v62, %v1669_v58 }
 0x154   : > { %v1679_v5 = vmul.f32 %v1678_v61, %v1669_v58  ;;  %v8696_v51 = vsub.s32 %v1485_v54, %v1488_v18  ;;  %v1289_v10 = vmul.u32 %v1285_v30, %v8665_v60  ;;  %v1269_v15 = vsel %vm1265_vm14, %v1249_v50, %v1252_v12 }
 0x155   : > { %vm1294_vm8 = vc.u32 %v1286_v44, %v1290_v24  ;;  %v1296_v20 = vadd.s32 %v1290_v24, %v1286_v44  ;;  %v8701_v4 = vmul.u32 %v1307_v29, %v1282_v3  ;;  %v1673_v32 = vadd.f32 -0.4999988, %v1672_v40 }
 0x156   : > { %v1680_v6 = vadd.f32 -0.16666654, %v1679_v5  ;;  %vm1686_vm11 = vcmp.lt.s32.totalorder %v8688_v41, 2  ;;  %vm1490_vm6 = vcmp.lt.s32.totalorder %v8696_v51, 0  ;;  %v1491_v13 = vsub.s32 0, %v8696_v51 }
 0x157   : > { %vm1684_vm7 = vweird.f32 %v13882_v34  ;;  %v1271_v54 = vsel %vm1267_vm12, %v1255_v43, %v1270_v26  ;;  %v1295_v30 = vsel %vm1294_vm8, 1, %v13868_v45  ;;  %vm1298_vm5 = vc.u32 %v1296_v20, %v1292_v8  ;;  %v13917_v26 = vld [vmem:[#allocation8_spill] sm:$0xff] }
 0x158   : > { %v1308_v12 = vmul.u32 %v1306_v47, %v1282_v3  ;;  %v1674_v50 = vmul.f32 %v1673_v32, %v1669_v58  ;;  %v1681_v44 = vmul.f32 %v1680_v6, %v1669_v58  ;;  %v1492_v62 = vsel %vm1490_vm6, %v1491_v13, %v8696_v51 }
 0x159   : > { %v1297_v61 = vadd.s32 %v1295_v30, %v1289_v10  ;;  %v1493_v18 = vclz %v1492_v62  ;;  %v1299_v24 = vsel %vm1298_vm5, 1, %v13868_v45  ;;  %v8713_v40 = vmul.u32 %v1306_v47, %v8665_v60  ;;  %v7126_v47 = vld [vmem:[%s7354_s11 + $0x28] sm:$0xff] }
 0x15a   : > { %v1312_v5 = vshll.u32 %v8701_v4, 16  ;;  %v1675_v25 = vadd.f32 1.0, %v1674_v50  ;;  %v1682_v43 = vadd.f32 1.0, %v1681_v44  ;;  %vm1687_vm13 = vcmp.eq.s32.totalorder %v8688_v41, 0 }
 0x15b   : > { %vm1690_vm9 = vcmp.eq.s32.totalorder %v8688_v41, 2  ;;  %v1481_v6 = vadd.s32 %v8600_v23, %v8595_v48  ;;  %v6870_v3 = vadd.s32 4294967294, %v1493_v18  ;;  %v8722_v58 = vsel %vm1266_vm0, %v1269_v15, %v1271_v54 }
 0x15c   : > { %v13640_v8 = vand.u32 2147483647, %v13917_v26  ;;  %vm712_vm14 = vcmp.le.f32.partialorder %v7126_v47, 0.51  ;;  %v1683_v10 = vmul.f32 %v1682_v43, %v8653_v21  ;;  %v1691_v20 = vxor.u32 2147483648, %v1675_v25 }
 0x15d   : > { %v1291_v32 = vshrl.u32 %v8682_v36, 16  ;;  %v1301_v13 = vadd.s32 %v1299_v24, %v1297_v61  ;;  %vm6871_vm10 = vcmp.lt.s32.totalorder %v6870_v3, 0  ;;  %v1311_v30 = vmul.u32 %v1307_v29, %v8665_v60 }
 0x15e   : > { %v1314_v48 = vshll.u32 %v8713_v40, 16  ;;  %vm1316_vm12 = vc.u32 %v1308_v12, %v1312_v5  ;;  %v1688_v23 = vxor.u32 2147483648, %v1683_v10  ;;  %v1692_v27 = vsel %vm1690_vm9, %v1691_v20, %v1683_v10 }
 0x15f   : > { %v1496_v15 = vsel %vm6871_vm10, 0, %v6870_v3  ;;  %v1318_v54 = vadd.s32 %v1312_v5, %v1308_v12  ;;  %v1326_v36 = vmul.u32 %v8632_v42, %v8722_v58  ;;  %v1293_v60 = vshrl.u32 %v8685_v59, 16 }
 0x160   : > { %v1497_v50 = vsub.s32 32, %v1496_v15  ;;  %v1498_v44 = vshll.u32 %v8696_v51, %v1496_v15  ;;  %v1501_v21 = vsub.s32 4294967266, %v1496_v15  ;;  %v1689_v62 = vsel %vm1687_vm13, %v1675_v25, %v1688_v23  ;;  %v13921_v15 = vld [vmem:[#allocation24_spill] sm:$0xff] }
 0x161   : > { %v1302_v29 = vadd.s32 %v1301_v13, %v1291_v32  ;;  %v1317_v61 = vsel %vm1316_vm12, 1, %v13868_v45  ;;  %v1693_v18 = vsel %vm1686_vm11, %v1689_v62, %v1692_v27  ;;  %vm1389_vm1 = vcmp.lt.s32.totalorder %v13893_v16, 0 }
 0x162   : > { %v1499_v12 = vshrl.u32 %v1481_v6, %v1497_v50  ;;  %v1502_v24 = vadd.s32 127, %v1501_v21  ;;  %v1319_v51 = vadd.s32 %v1317_v61, %v1311_v30  ;;  %v1694_v5 = vsel %vm1684_vm7, nan, %v1693_v18 }
 0x163   : > { %v1313_v42 = vshrl.u32 %v8701_v4, 16  ;;  %vm1320_vm0 = vc.u32 %v1318_v54, %v1314_v48  ;;  %v2010_v25 = vand.u32 8388607, %v13640_v8  ;;  %v5704_v59 = vadd.f32 1.0, %v1694_v5 }
 0x164   : > { %v13918_v43 = vand.u32 2147483647, %v13893_v16  ;;  %v1500_v3 = vor.u32 %v1499_v12, %v1498_v44  ;;  %v1503_v6 = vshll.u32 %v1502_v24, 23  ;;  %v1321_v58 = vsel %vm1320_vm0, 1, %v13868_v45  ;;  %v13922_v44 = vld [vmem:[#allocation28_spill] sm:$0xff] }
 0x165   : > { %v8754_v10 = vadd.s32 %v1302_v29, %v1293_v60  ;;  %v1315_v34 = vshrl.u32 %v8713_v40, 16  ;;  %v8757_v4 = vadd.s32 %v1318_v54, %v1314_v48  ;;  %v1323_v20 = vadd.s32 %v1321_v58, %v1319_v51  ;;  %v13923_v51 = vld [vmem:[#allocation29_spill] sm:$0xff] }
 0x166   : > { %vm8749_vm8 = vcmp.le.f32.partialorder %v13918_v43, 0.7853982  ;;  %v5736_v32 = vmul.f32 0.5, %v5704_v59  ;;  %v1504_v13 = vor.u32 4788187, %v1503_v6  ;;  %v1507_v30 = vcvt.s32.f32 %v1500_v3  ;;  %v13924_v43 = vld [vmem:[#allocation41_spill] sm:$0xff] }
 0x167   : > { %v1511_v23 = vsub.s32 4, %v8678_v2  ;;  %v1324_v27 = vadd.s32 %v1323_v20, %v1313_v42  ;;  %v2020_v50 = vshll.u32 %v13865_v55, %v13921_v15  ;;  %v2021_v21 = vshrl.u32 %v13869_v11, %v13922_v44  ;;  %v13925_v3 = vld [vmem:[#allocation34_spill] sm:$0xff] }
 0x168   : > { %v2023_v62 = vshll.u32 %v13869_v11, %v13921_v15  ;;  %v5768_v40 = vsel %vm712_vm14, %v5736_v32, 0.0  ;;  %v1505_v48 = vand.u32 2147483647, %v1504_v13  ;;  %v2011_v54 = vor.u32 8388608, %v2010_v25 }
 0x169   : > { %v2024_v60 = vshrl.u32 %v13870_v46, %v13922_v44  ;;  %5822 = vperm.xlu1 %7042, %v5768_v40   ;;  %v1325_v29 = vadd.s32 %v1324_v27, %v1315_v34  ;;  %vm1328_vm11 = vc.u32 %v8754_v10, %v8757_v4  ;;  %v2026_v61 = vshll.u32 %v13870_v46, %v13921_v15  ;;  %v13928_v27 = vld [vmem:[#allocation40_spill] sm:$0xff] }
 0x16a   : > { %v2027_v18 = vshrl.u32 %v13780_v35, %v13922_v44  ;;  %v1508_v12 = vmul.f32 %v1507_v30, %v1505_v48  ;;  %v8775_v24 = vor.u32 %v2021_v21, %v2020_v50  ;;  %vm2035_vm6 = vcmp.lt.s32.totalorder %v13923_v51, 1 }
 0x16b   : > { %v8777_v47 = vor.u32 %v2024_v60, %v2023_v62  ;;  %v1512_v5 = vsel %vm1389_vm1, %v1511_v23, %v8678_v2  ;;  %v1329_v42 = vadd.s32 1, %v1325_v29  ;;  %vm2037_vm7 = vcmp.lt.s32.totalorder %v13923_v51, 3 }
 0x16c   : > { %v8783_v25 = vor.u32 %v2027_v18, %v2026_v61  ;;  %v1509_v59 = vxor.u32 2147483648, %v1508_v12  ;;  %vm2036_vm5 = vcmp.lt.s32.totalorder %v13923_v51, 2  ;;  %v2049_v6 = vsel %vm2037_vm7, %v13925_v3, %v13924_v43 }
 0x16d   : > { %v8791_v58 = vshll.u32 %v2011_v54, 8  ;;  %v13926_v34 = vor.u32 %v8205_v0, %v8127_v14  ;;  %v8801_v20 = vadd.s32 1, %v8510_v9  ;;  %v1330_v32 = vsel %vm1328_vm11, %v1329_v42, %v1325_v29 }
 0x16e   : > { %v2047_v13 = vsel %vm2035_vm6, %v8777_v47, %v8783_v25  ;;  %v1510_v30 = vsel %vm1389_vm1, %v1509_v59, %v1508_v12  ;;  %v1514_v14 = vsel %vm8749_vm8, 0, %v1512_v5  ;;  %v1331_v0 = vadd.s32 %v1330_v32, %v1326_v36 }
 0x16f   : > { %v8798_v2 = vsel %vm3886_vm3, %v13926_v34, 1326507024  ;;  %v2043_v9 = vsel %vm2035_vm6, %v8775_v24, %v8777_v47  ;;  %v8821_v23 = vsel %vm8749_vm8, %v13893_v16, %v1510_v30  ;;  %v2045_v15 = vsel %vm2037_vm7, %v8783_v25, %v13928_v27 }
 0x170   : > { %13927 = vst [vmem:[#allocation9_spill] sm:$0xff] %v8798_v2  ;;  %v2050_v50 = vsel %vm2036_vm5, %v2047_v13, %v2049_v6  ;;  %v2052_v36 = vand.u32 65535, %v8791_v58  ;;  %v1515_v21 = vmul.f32 %v8821_v23, %v8821_v23  ;;  %v1332_v62 = vadd.s32 536870912, %v1331_v0 }
 0x171   : > { %v8833_v40 = vshrl.u32 %v8791_v58, 16  ;;  %v2054_v41 = vand.u32 65535, %v2050_v50  ;;  %v8836_v48 = vsub.s32 32, %v8635_v37  ;;  %v8840_v54 = vshll.u32 %v13780_v35, %v8635_v37 }
 0x172   : > { %v2055_v29 = vshrl.u32 %v2050_v50, 16  ;;  %v1516_v61 = vmul.f32 -0.001358992, %v1515_v21  ;;  %v1523_v18 = vmul.f32 -0.00019511016, %v1515_v21  ;;  %v8843_v12 = vshrl.u32 %v1332_v62, 30 }
 0x173   : > { %13929 = vst [vmem:[#allocation10_spill] sm:$0xff] %v8836_v48  ;;  %v2046_v5 = vsel %vm2036_vm5, %v2043_v9, %v2045_v15  ;;  %v8847_v42 = vand.u32 3, %v1514_v14  ;;  %v2056_v59 = vmul.u32 %v2054_v41, %v2052_v36  ;;  %v8852_v3 = vmul.u32 %v2054_v41, %v8833_v40 }
 0x174   : > { %v8849_v43 = vmul.u32 %v2055_v29, %v2052_v36  ;;  %v8856_v6 = vshll.u32 %v13777_v31, %v8635_v37  ;;  %v1517_v34 = vadd.f32 0.041655596, %v1516_v61  ;;  %v1524_v32 = vadd.f32 0.008332121, %v1523_v18 }
 0x175   : > { %v1334_v13 = vshll.u32 %v8843_v12, 30  ;;  %v8860_v30 = vadd.s32 4294967169, %v8674_v49  ;;  %v2076_v9 = vand.u32 65535, %v2046_v5  ;;  %v2077_v27 = vshrl.u32 %v2046_v5, 16 }
 0x176   : > { %v2060_v14 = vshll.u32 %v8849_v43, 16  ;;  %v1518_v15 = vmul.f32 %v1517_v34, %v1515_v21  ;;  %v1525_v50 = vmul.f32 %v1524_v32, %v1515_v21  ;;  %v2059_v41 = vmul.u32 %v2055_v29, %v8833_v40 }
 0x177   : > { %v8863_v62 = vsub.s32 %v1331_v0, %v1334_v13  ;;  %vm1533_vm13 = vcmp.eq.s32.totalorder %v8847_v42, 0  ;;  %vm1536_vm9 = vcmp.eq.s32.totalorder %v8847_v42, 2  ;;  %v2062_v61 = vshll.u32 %v8852_v3, 16 }
 0x178   : > { %vm2064_vm14 = vc.u32 %v2056_v59, %v2060_v14  ;;  %v1519_v18 = vadd.f32 -0.4999988, %v1518_v15  ;;  %v1526_v49 = vadd.f32 -0.16666654, %v1525_v50  ;;  %vm1532_vm10 = vcmp.lt.s32.totalorder %v8847_v42, 2 }
 0x179   : > { %vm1336_vm12 = vcmp.lt.s32.totalorder %v8863_v62, 0  ;;  %v1337_v5 = vsub.s32 0, %v8863_v62  ;;  %vm1530_vm1 = vweird.f32 %v13893_v16  ;;  %v2065_v0 = vsel %vm2064_vm14, 1, %v13868_v45 }
 0x17a   : > { %v2066_v29 = vadd.s32 %v2060_v14, %v2056_v59  ;;  %v2078_v34 = vmul.u32 %v2076_v9, %v2052_v36  ;;  %v8874_v32 = vmul.u32 %v2077_v27, %v2052_v36  ;;  %v1520_v13 = vmul.f32 %v1519_v18, %v1515_v21 }
 0x17b   : > { %v1527_v8 = vmul.f32 %v1526_v49, %v1515_v21  ;;  %v1338_v60 = vsel %vm1336_vm12, %v1337_v5, %v8863_v62  ;;  %v2067_v15 = vadd.s32 %v2065_v0, %v2059_v41  ;;  %v8878_v39 = vmul.u32 %v2076_v9, %v8833_v40 }
 0x17c   : > { %v1339_v50 = vclz %v1338_v60  ;;  %vm2068_vm0 = vc.u32 %v2066_v29, %v2062_v61  ;;  %v2082_v37 = vshll.u32 %v8874_v32, 16  ;;  %v1521_v28 = vadd.f32 1.0, %v1520_v13 }
 0x17d   : > { %v1528_v56 = vadd.f32 1.0, %v1527_v8  ;;  %v1327_v59 = vadd.s32 %v8757_v4, %v8754_v10  ;;  %v2069_v36 = vsel %vm2068_vm0, 1, %v13868_v45  ;;  %v2019_v21 = vshrl.u32 %v13865_v55, %v13922_v44 }
 0x17e   : > { %v6867_v14 = vadd.s32 4294967294, %v1339_v50  ;;  %v2040_v60 = vsel %vm2038_vm15, %v8783_v25, 2102212464  ;;  %v2061_v9 = vshrl.u32 %v8849_v43, 16  ;;  %vm3554_vm8 = vcmp.gt.s32.totalorder %v8643_v22, 0  ;;  %v7127_v50 = vld [vmem:[%s7354_s11 + $0x20] sm:$0xff] }
 0x17f   : > { %vm4324_vm11 = vcmp.gt.s32.totalorder %v8801_v20, 0  ;;  %v1529_v8 = vmul.f32 %v1528_v56, %v8821_v23  ;;  %v1537_v41 = vxor.u32 2147483648, %v1521_v28  ;;  %v2071_v10 = vadd.s32 %v2069_v36, %v2067_v15 }
 0x180   : > { %vm2086_vm14 = vc.u32 %v2078_v34, %v2082_v37  ;;  %vm6868_vm12 = vcmp.lt.s32.totalorder %v6867_v14, 0  ;;  %v2081_v4 = vmul.u32 %v2077_v27, %v8833_v40  ;;  %v2084_v44 = vshll.u32 %v8878_v39, 16 }
 0x181   : > { %v2088_v61 = vadd.s32 %v2082_v37, %v2078_v34  ;;  %v1534_v18 = vxor.u32 2147483648, %v1529_v8  ;;  %v1538_v25 = vsel %vm1536_vm9, %v1537_v41, %v1529_v8  ;;  %v1342_v43 = vsel %vm6868_vm12, 0, %v6867_v14 }
 0x182   : > { %v2087_v49 = vsel %vm2086_vm14, 1, %v13868_v45  ;;  %v1343_v5 = vsub.s32 32, %v1342_v43  ;;  %v1344_v56 = vshll.u32 %v8863_v62, %v1342_v43  ;;  %v1347_v23 = vsub.s32 4294967266, %v1342_v43 }
 0x183   : > { %v2039_v0 = vsel %vm2035_vm6, %v2019_v21, %v8775_v24  ;;  %v1535_v40 = vsel %vm1533_vm13, %v1521_v28, %v1534_v18  ;;  %v2041_v37 = vsel %vm2037_vm7, %v8777_v47, %v2040_v60  ;;  %v2063_v27 = vshrl.u32 %v8852_v3, 16 }
 0x184   : > { %v2072_v29 = vadd.s32 %v2071_v10, %v2061_v9  ;;  %v1539_v34 = vsel %vm1532_vm10, %v1535_v40, %v1538_v25  ;;  %v1345_v13 = vshrl.u32 %v1327_v59, %v1343_v5  ;;  %v1348_v62 = vadd.s32 127, %v1347_v23  ;;  %v13931_v5 = vld [vmem:[#allocation11_spill] sm:$0xff] }
 0x185   : > { %v2089_v15 = vadd.s32 %v2087_v49, %v2081_v4  ;;  %vm711_vm15 = vcmp.le.f32.partialorder %v7127_v50, 0.51  ;;  %v1540_v24 = vsel %vm1530_vm1, nan, %v1539_v34  ;;  %v2083_v28 = vshrl.u32 %v8874_v32, 16 }
 0x186   : > { %vm2090_vm6 = vc.u32 %v2088_v61, %v2084_v44  ;;  %v5703_v36 = vadd.f32 1.0, %v1540_v24  ;;  %v1346_v14 = vor.u32 %v1345_v13, %v1344_v56  ;;  %v1349_v47 = vshll.u32 %v1348_v62, 23 }
 0x187   : > { %v2091_v3 = vsel %vm2090_vm6, 1, %v13868_v45  ;;  %v2042_v42 = vsel %vm2036_vm5, %v2039_v0, %v2041_v37  ;;  %v8917_v21 = vadd.s32 %v2072_v29, %v2063_v27  ;;  %v2085_v59 = vshrl.u32 %v8878_v39, 16  ;;  %v13933_v37 = vld [vmem:[#allocation39_spill] sm:$0xff] }
 0x188   : > { %v2093_v60 = vadd.s32 %v2091_v3, %v2089_v15  ;;  %v5735_v9 = vmul.f32 0.5, %v5703_v36  ;;  %v1350_v8 = vor.u32 4788187, %v1349_v47  ;;  %v1353_v16 = vcvt.s32.f32 %v1346_v14 }
 0x189   : > { %v8920_v41 = vadd.s32 %v2088_v61, %v2084_v44  ;;  %v3724_v32 = vshrl.u32 %v13777_v31, %v8836_v48  ;;  %v8926_v10 = vshrl.u32 %v13778_v53, %v8836_v48  ;;  %v13930_v51 = vand.u32 2139095040, %v8400_v52 }
 0x18a   : > { %v2094_v18 = vadd.s32 %v2093_v60, %v2083_v28  ;;  %v3555_v39 = vsel %vm3554_vm8, %v8643_v22, 0  ;;  %v4325_v44 = vsel %vm4324_vm11, %v8801_v20, 0  ;;  %v5767_v61 = vsel %vm711_vm15, %v5735_v9, 0.0  ;;  %v13932_v22 = vld [vmem:[#allocation32_spill] sm:$0xff] }
 0x18b   : > { %v4009_v4 = vshrl.u32 %v13930_v51, 23  ;;  %v1351_v25 = vand.u32 2147483647, %v1350_v8  ;;  %5817 = vperm.xlu0 %7041, %v5767_v61   ;;  %vm1235_vm7 = vcmp.lt.s32.totalorder %v13905_v38, 0  ;;  %v2096_v49 = vmul.u32 %v8791_v58, %v2042_v42 }
 0x18c   : > { %v2095_v43 = vadd.s32 %v2094_v18, %v2085_v59  ;;  %v13646_v56 = vand.u32 2147483647, %v13931_v5  ;;  %v1357_v0 = vsub.s32 4, %v8843_v12  ;;  %vm2098_vm5 = vc.u32 %v8917_v21, %v8920_v41 }
 0x18d   : > { %v1354_v23 = vmul.f32 %v1353_v16, %v1351_v25  ;;  %v1869_v20 = vshll.u32 %v13869_v11, %v13932_v22  ;;  %v1870_v27 = vshrl.u32 %v13870_v46, %v13933_v37  ;;  %v1872_v29 = vshll.u32 %v13870_v46, %v13932_v22 }
 0x18e   : > { %v2099_v40 = vadd.s32 1, %v2095_v43  ;;  %v1873_v58 = vshrl.u32 %v13780_v35, %v13933_v37  ;;  %v8951_v34 = vshrl.u32 %v3555_v39, 5  ;;  %v8953_v13 = vand.u32 31, %v3555_v39  ;;  %v13940_v39 = vld [vmem:[#allocation42_spill] sm:$0xff] }
 0x18f   : > { %v13935_v62 = vand.u32 2147483647, %v13905_v38  ;;  %v1355_v50 = vxor.u32 2147483648, %v1354_v23  ;;  %v1856_v28 = vand.u32 8388607, %v13646_v56  ;;  %v1866_v36 = vshll.u32 %v13865_v55, %v13932_v22 }
 0x190   : > { %13934 = vst [vmem:[#allocation12_spill] sm:$0xff] %v8953_v13  ;;  %v2100_v24 = vsel %vm2098_vm5, %v2099_v40, %v2095_v43  ;;  %v1867_v14 = vshrl.u32 %v13869_v11, %v13933_v37  ;;  %v8967_v47 = vshrl.u32 %v4325_v44, 5  ;;  %v1358_v42 = vsel %vm1235_vm7, %v1357_v0, %v8843_v12  ;;  %v13942_v40 = vld [vmem:[#allocation54_spill] sm:$0xff] }
 0x191   : > { %vm8957_vm13 = vcmp.le.f32.partialorder %v13935_v62, 0.7853982  ;;  %v1356_v3 = vsel %vm1235_vm7, %v1355_v50, %v1354_v23  ;;  %v2101_v59 = vadd.s32 %v2100_v24, %v2096_v49  ;;  %v8974_v60 = vand.u32 31, %v4325_v44 }
 0x192   : > { %13938 = vst [vmem:[#allocation18_spill] sm:$0xff] %v8967_v47  ;;  %v8979_v9 = vsel %vm8957_vm13, %v13905_v38, %v1356_v3  ;;  %v8981_v8 = vor.u32 %v1870_v27, %v1869_v20  ;;  %v8983_v16 = vor.u32 %v1873_v58, %v1872_v29  ;;  %vm1881_vm9 = vcmp.lt.s32.totalorder %v13940_v39, 1  ;;  %v13943_v27 = vld [vmem:[#allocation47_spill] sm:$0xff] }
 0x193   : > { %13939 = vst [vmem:[#allocation20_spill] sm:$0xff] %v8974_v60  ;;  %v1361_v51 = vmul.f32 %v8979_v9, %v8979_v9  ;;  %v2102_v18 = vadd.s32 536870912, %v2101_v59  ;;  %vm1883_vm10 = vcmp.lt.s32.totalorder %v13940_v39, 3  ;;  %v1360_v12 = vsel %vm8957_vm13, 0, %v1358_v42 }
 0x194   : > { %v1857_v44 = vor.u32 8388608, %v1856_v28  ;;  %v1868_v61 = vor.u32 %v1867_v14, %v1866_v36  ;;  %vm1882_vm1 = vcmp.lt.s32.totalorder %v13940_v39, 2  ;;  %v8993_v25 = vor.u32 %v3724_v32, %v8840_v54 }
 0x195   : > { %v1362_v49 = vmul.f32 -0.001358992, %v1361_v51  ;;  %v1369_v23 = vmul.f32 -0.00019511016, %v1361_v51  ;;  %v8998_v0 = vadd.s32 1, %v8860_v30  ;;  %v9000_v22 = vshrl.u32 %v2102_v18, 30 }
 0x196   : > { %13941 = vst [vmem:[#allocation15_spill] sm:$0xff] %v8993_v25  ;;  %v1893_v20 = vsel %vm1881_vm9, %v8981_v8, %v8983_v16  ;;  %v1895_v54 = vsel %vm1883_vm10, %v13943_v27, %v13942_v40  ;;  %v9010_v58 = vand.u32 3, %v1360_v12  ;;  %v9014_v62 = vadd.s32 4294967169, %v4009_v4  ;;  %v13944_v18 = vld [vmem:[#allocation53_spill] sm:$0xff] }
 0x197   : > { %v1363_v32 = vadd.f32 0.041655596, %v1362_v49  ;;  %v1370_v29 = vadd.f32 0.008332121, %v1369_v23  ;;  %v1896_v30 = vsel %vm1882_vm1, %v1893_v20, %v1895_v54  ;;  %v2104_v15 = vshll.u32 %v9000_v22, 30 }
 0x198   : > { %v1889_v50 = vsel %vm1881_vm9, %v1868_v61, %v8981_v8  ;;  %v9020_v24 = vshll.u32 %v1857_v44, 8  ;;  %v1900_v14 = vand.u32 65535, %v1896_v30  ;;  %v1901_v3 = vshrl.u32 %v1896_v30, 16 }
 0x199   : > { %v1364_v28 = vmul.f32 %v1363_v32, %v1361_v51  ;;  %v1371_v36 = vmul.f32 %v1370_v29, %v1361_v51  ;;  %v9022_v42 = vsub.s32 %v2101_v59, %v2104_v15  ;;  %v1891_v4 = vsel %vm1883_vm10, %v8983_v16, %v13944_v18 }
 0x19a   : > { %v1898_v12 = vand.u32 65535, %v9020_v24  ;;  %v1899_v49 = vshrl.u32 %v9020_v24, 16  ;;  %vm1378_vm0 = vcmp.lt.s32.totalorder %v9010_v58, 2  ;;  %vm1379_vm8 = vcmp.eq.s32.totalorder %v9010_v58, 0 }
 0x19b   : > { %v1365_v23 = vadd.f32 -0.4999988, %v1364_v28  ;;  %v1372_v20 = vadd.f32 -0.16666654, %v1371_v36  ;;  %v1865_v44 = vshrl.u32 %v13865_v55, %v13933_v37  ;;  %vm1376_vm11 = vweird.f32 %v13905_v38 }
 0x19c   : > { %vm2106_vm14 = vcmp.lt.s32.totalorder %v9022_v42, 0  ;;  %v2107_v59 = vsub.s32 0, %v9022_v42  ;;  %v1902_v40 = vmul.u32 %v1900_v14, %v1898_v12  ;;  %v1903_v27 = vmul.u32 %v1901_v3, %v1898_v12 }
 0x19d   : > { %v1366_v54 = vmul.f32 %v1365_v23, %v1361_v51  ;;  %v1373_v32 = vmul.f32 %v1372_v20, %v1361_v51  ;;  %v1892_v29 = vsel %vm1882_vm1, %v1889_v50, %v1891_v4  ;;  %v9039_v30 = vmul.u32 %v1900_v14, %v1899_v49  ;;  %v7128_v50 = vld [vmem:[%s7354_s11 + $0x18] sm:$0xff] }
 0x19e   : > { %vm1382_vm12 = vcmp.eq.s32.totalorder %v9010_v58, 2  ;;  %v2097_v37 = vadd.s32 %v8920_v41, %v8917_v21  ;;  %v2108_v15 = vsel %vm2106_vm14, %v2107_v59, %v9022_v42  ;;  %v1906_v28 = vshll.u32 %v1903_v27, 16 }
 0x19f   : > { %v1367_v36 = vadd.f32 1.0, %v1366_v54  ;;  %v1374_v18 = vadd.f32 1.0, %v1373_v32  ;;  %v2109_v56 = vclz %v2108_v15  ;;  %v1908_v23 = vshll.u32 %v9039_v30, 16 }
 0x1a0   : > { %v1905_v43 = vmul.u32 %v1901_v3, %v1899_v49  ;;  %vm1910_vm15 = vc.u32 %v1902_v40, %v1906_v28  ;;  %v1912_v51 = vadd.s32 %v1906_v28, %v1902_v40  ;;  %v1923_v20 = vshrl.u32 %v1892_v29, 16 }
 0x1a1   : > { %vm710_vm6 = vcmp.le.f32.partialorder %v7128_v50, 0.51  ;;  %v1375_v14 = vmul.f32 %v1374_v18, %v8979_v9  ;;  %v1383_v4 = vxor.u32 2147483648, %v1367_v36  ;;  %v6882_v52 = vadd.s32 4294967294, %v2109_v56 }
 0x1a2   : > { %v1885_v21 = vsel %vm1881_vm9, %v1865_v44, %v1868_v61  ;;  %v1886_v41 = vsel %vm1884_vm2, %v8983_v16, 2102212464  ;;  %v1911_v59 = vsel %vm1910_vm15, 1, %v13868_v45  ;;  %vm1914_vm7 = vc.u32 %v1912_v51, %v1908_v23 }
 0x1a3   : > { %v1922_v3 = vand.u32 65535, %v1892_v29  ;;  %v1380_v54 = vxor.u32 2147483648, %v1375_v14  ;;  %v1384_v40 = vsel %vm1382_vm12, %v1383_v4, %v1375_v14  ;;  %vm6883_vm5 = vcmp.lt.s32.totalorder %v6882_v52, 0 }
 0x1a4   : > { %v1907_v32 = vshrl.u32 %v1903_v27, 16  ;;  %v2112_v9 = vsel %vm6883_vm5, 0, %v6882_v52  ;;  %v1913_v15 = vadd.s32 %v1911_v59, %v1905_v43  ;;  %v1915_v56 = vsel %vm1914_vm7, 1, %v13868_v45 }
 0x1a5   : > { %v1925_v28 = vmul.u32 %v1923_v20, %v1898_v12  ;;  %v1381_v61 = vsel %vm1379_vm8, %v1367_v36, %v1380_v54  ;;  %v2113_v44 = vsub.s32 32, %v2112_v9  ;;  %v2114_v16 = vshll.u32 %v9022_v42, %v2112_v9 }
 0x1a6   : > { %v2117_v18 = vsub.s32 4294967266, %v2112_v9  ;;  %v1385_v29 = vsel %vm1378_vm0, %v1381_v61, %v1384_v40  ;;  %v2127_v23 = vsub.s32 4, %v9000_v22  ;;  %v1887_v52 = vsel %vm1883_vm10, %v8981_v8, %v1886_v41 }
 0x1a7   : > { %v1924_v43 = vmul.u32 %v1922_v3, %v1898_v12  ;;  %v1386_v27 = vsel %vm1376_vm11, nan, %v1385_v29  ;;  %v13945_v51 = vand.u32 2147483647, %v13917_v26  ;;  %v2115_v42 = vshrl.u32 %v2097_v37, %v2113_v44 }
 0x1a8   : > { %v2118_v14 = vadd.s32 127, %v2117_v18  ;;  %v1917_v58 = vadd.s32 %v1915_v56, %v1913_v15  ;;  %v5702_v4 = vadd.f32 1.0, %v1386_v27  ;;  %v1926_v59 = vmul.u32 %v1922_v3, %v1899_v49 }
 0x1a9   : > { %vm9070_vm2 = vcmp.le.f32.partialorder %v13945_v51, 0.7853982  ;;  %v1927_v54 = vmul.u32 %v1923_v20, %v1899_v49  ;;  %v1928_v40 = vshll.u32 %v1925_v28, 16  ;;  %v2116_v9 = vor.u32 %v2115_v42, %v2114_v16  ;;  %v13948_v16 = vld [vmem:[#allocation13_spill] sm:$0xff] }
 0x1aa   : > { %v2119_v61 = vshll.u32 %v2118_v14, 23  ;;  %v1909_v8 = vshrl.u32 %v9039_v30, 16  ;;  %v1918_v12 = vadd.s32 %v1917_v58, %v1907_v32  ;;  %v5734_v38 = vmul.f32 0.5, %v5702_v4 }
 0x1ab   : > { %vm2005_vm13 = vcmp.lt.s32.totalorder %v13917_v26, 0  ;;  %v1930_v41 = vshll.u32 %v1926_v59, 16  ;;  %vm1932_vm9 = vc.u32 %v1924_v43, %v1928_v40  ;;  %v2123_v51 = vcvt.s32.f32 %v2116_v9 }
 0x1ac   : > { %v2120_v29 = vor.u32 4788187, %v2119_v61  ;;  %v1888_v37 = vsel %vm1882_vm1, %v1885_v21, %v1887_v52  ;;  %v1933_v15 = vsel %vm1932_vm9, 1, %v13868_v45  ;;  %v5766_v49 = vsel %vm710_vm6, %v5734_v38, 0.0  ;;  %v13949_v21 = vld [vmem:[#allocation35_spill] sm:$0xff] }
 0x1ad   : > { %v2128_v20 = vsel %vm2005_vm13, %v2127_v23, %v9000_v22  ;;  %v1934_v30 = vadd.s32 %v1928_v40, %v1924_v43  ;;  %v1935_v3 = vadd.s32 %v1933_v15, %v1927_v54  ;;  %5812 = vperm.xlu2 %7043, %v5766_v49   ;;  %v9083_v56 = vadd.s32 %v1918_v12, %v1909_v8  ;;  %v13950_v52 = vld [vmem:[#allocation43_spill] sm:$0xff] }
 0x1ae   : > { %v2121_v32 = vand.u32 2147483647, %v2120_v29  ;;  %v1929_v44 = vshrl.u32 %v1925_v28, 16  ;;  %v13649_v18 = vand.u32 2147483647, %v13948_v16  ;;  %v1712_v50 = vshll.u32 %v13865_v55, %v13949_v21 }
 0x1af   : > { %vm1936_vm10 = vc.u32 %v1934_v30, %v1930_v41  ;;  %v9086_v39 = vadd.s32 %v1934_v30, %v1930_v41  ;;  %v1713_v27 = vshrl.u32 %v13869_v11, %v13950_v52  ;;  %vm3732_vm1 = vcmp.lt.s32.totalorder %v8542_v33, 4  ;;  %v13951_v41 = vld [vmem:[#allocation45_spill] sm:$0xff]  ;;  %v13953_v30 = vld [vmem:[#allocation50_spill] sm:$0xff] }
 0x1b0   : > { %v2124_v22 = vmul.f32 %v2123_v51, %v2121_v32  ;;  %v1937_v23 = vsel %vm1936_vm10, 1, %v13868_v45  ;;  %v1702_v43 = vand.u32 8388607, %v13649_v18  ;;  %v1715_v28 = vshll.u32 %v13869_v11, %v13949_v21 }
 0x1b1   : > { %v2130_v42 = vsel %vm9070_vm2, 0, %v2128_v20  ;;  %v1931_v14 = vshrl.u32 %v1926_v59, 16  ;;  %v1939_v58 = vadd.s32 %v1937_v23, %v1935_v3  ;;  %v9100_v4 = vor.u32 %v1713_v27, %v1712_v50  ;;  %v13952_v20 = vld [vmem:[#allocation58_spill] sm:$0xff] }
 0x1b2   : > { %v2125_v54 = vxor.u32 2147483648, %v2124_v22  ;;  %v1703_v40 = vor.u32 8388608, %v1702_v43  ;;  %v1716_v9 = vshrl.u32 %v13870_v46, %v13950_v52  ;;  %v1718_v61 = vshll.u32 %v13870_v46, %v13949_v21  ;;  %v13955_v21 = vld [vmem:[#allocation56_spill] sm:$0xff] }
 0x1b3   : > { %v1940_v8 = vadd.s32 %v1939_v58, %v1929_v44  ;;  %v1942_v12 = vmul.u32 %v9020_v24, %v1888_v37  ;;  %v1719_v38 = vshrl.u32 %v13780_v35, %v13950_v52  ;;  %vm1727_vm0 = vcmp.lt.s32.totalorder %v13951_v41, 1 }
 0x1b4   : > { %v2126_v59 = vsel %vm2005_vm13, %v2125_v54, %v2124_v22  ;;  %vm1944_vm8 = vc.u32 %v9083_v56, %v9086_v39  ;;  %v9114_v29 = vor.u32 %v1716_v9, %v1715_v28  ;;  %vm1729_vm11 = vcmp.lt.s32.totalorder %v13951_v41, 3 }
 0x1b5   : > { %v9120_v51 = vsel %vm9070_vm2, %v13917_v26, %v2126_v59  ;;  %v1941_v24 = vadd.s32 %v1940_v8, %v1931_v14  ;;  %v1720_v37 = vor.u32 %v1719_v38, %v1718_v61  ;;  %vm1728_vm14 = vcmp.lt.s32.totalorder %v13951_v41, 2 }
 0x1b6   : > { %v2131_v15 = vmul.f32 %v9120_v51, %v9120_v51  ;;  %v1735_v49 = vsel %vm1727_vm0, %v9100_v4, %v9114_v29  ;;  %v1741_v3 = vsel %vm1729_vm11, %v13953_v30, %v13952_v20  ;;  %v9133_v36 = vshll.u32 %v1703_v40, 8 }
 0x1b7   : > { %v9136_v32 = vsub.s32 32, %v8953_v13  ;;  %v1945_v44 = vadd.s32 1, %v1941_v24  ;;  %v1737_v50 = vsel %vm1729_vm11, %v1720_v37, %v13955_v21  ;;  %v1739_v27 = vsel %vm1727_vm0, %v9114_v29, %v1720_v37 }
 0x1b8   : > { %v9146_v22 = vshll.u32 %v13780_v35, %v8953_v13  ;;  %v2132_v23 = vmul.f32 -0.001358992, %v2131_v15  ;;  %v2139_v43 = vmul.f32 -0.00019511016, %v2131_v15  ;;  %v9148_v28 = vand.u32 3, %v2130_v42 }
 0x1b9   : > { %13954 = vst [vmem:[#allocation7_spill] sm:$0xff] %v9136_v32  ;;  %v1946_v14 = vsel %vm1944_vm8, %v1945_v44, %v1941_v24  ;;  %v1738_v58 = vsel %vm1728_vm14, %v1735_v49, %v1737_v50  ;;  %v1742_v54 = vsel %vm1728_vm14, %v1739_v27, %v1741_v3  ;;  %v1744_v40 = vand.u32 65535, %v9133_v36 }
 0x1ba   : > { %v2133_v9 = vadd.f32 0.041655596, %v2132_v23  ;;  %v2140_v61 = vadd.f32 0.008332121, %v2139_v43  ;;  %v1947_v8 = vadd.s32 %v1946_v14, %v1942_v12  ;;  %v1745_v38 = vshrl.u32 %v9133_v36, 16 }
 0x1bb   : > { %v9162_v42 = vsel %vm3732_vm1, %v8993_v25, 920167782  ;;  %v9166_v59 = vshll.u32 %v13777_v31, %v8953_v13  ;;  %v1746_v24 = vand.u32 65535, %v1742_v54  ;;  %v1747_v49 = vshrl.u32 %v1742_v54, 16 }
 0x1bc   : > { %13956 = vst [vmem:[#allocation17_spill] sm:$0xff] %v9162_v42  ;;  %v13957_v20 = vor.u32 %v8926_v10, %v8856_v6  ;;  %v2134_v12 = vmul.f32 %v2133_v9, %v2131_v15  ;;  %v2141_v3 = vmul.f32 %v2140_v61, %v2131_v15  ;;  %v1948_v44 = vadd.s32 536870912, %v1947_v8 }
 0x1bd   : > { %vm2149_vm12 = vcmp.eq.s32.totalorder %v9148_v28, 0  ;;  %v1748_v21 = vmul.u32 %v1746_v24, %v1744_v40  ;;  %v1749_v50 = vmul.u32 %v1747_v49, %v1744_v40  ;;  %v9176_v27 = vmul.u32 %v1746_v24, %v1745_v38 }
 0x1be   : > { %v9173_v30 = vsel %vm3732_vm1, %v13957_v20, 1326507024  ;;  %v1769_v23 = vshrl.u32 %v1738_v58, 16  ;;  %v2135_v43 = vadd.f32 -0.4999988, %v2134_v12  ;;  %vm2148_vm15 = vcmp.lt.s32.totalorder %v9148_v28, 2 }
 0x1bf   : > { %13958 = vst [vmem:[#allocation21_spill] sm:$0xff] %v9173_v30  ;;  %v2142_v14 = vadd.f32 -0.16666654, %v2141_v3  ;;  %v9179_v54 = vshrl.u32 %v1948_v44, 30  ;;  %v1768_v6 = vand.u32 65535, %v1738_v58  ;;  %vm2152_vm6 = vcmp.eq.s32.totalorder %v9148_v28, 2 }
 0x1c0   : > { %v1711_v10 = vshrl.u32 %v13865_v55, %v13950_v52  ;;  %v1752_v9 = vshll.u32 %v1749_v50, 16  ;;  %v1754_v61 = vshll.u32 %v9176_v27, 16  ;;  %v2136_v20 = vmul.f32 %v2135_v43, %v2131_v15 }
 0x1c1   : > { %v2143_v24 = vmul.f32 %v2142_v14, %v2131_v15  ;;  %v1950_v18 = vshll.u32 %v9179_v54, 30  ;;  %v1732_v12 = vsel %vm1730_vm4, %v1720_v37, 2102212464  ;;  %v1751_v3 = vmul.u32 %v1747_v49, %v1745_v38  ;;  %v7129_v15 = vld [vmem:[%s7354_s11 + $0x40] sm:$0xff] }
 0x1c2   : > { %vm1756_vm7 = vc.u32 %v1748_v21, %v1752_v9  ;;  %v1758_v44 = vadd.s32 %v1752_v9, %v1748_v21  ;;  %v1771_v58 = vmul.u32 %v1769_v23, %v1744_v40  ;;  %v2137_v13 = vadd.f32 1.0, %v2136_v20 }
 0x1c3   : > { %v2144_v25 = vadd.f32 1.0, %v2143_v24  ;;  %v1951_v30 = vsub.s32 %v1947_v8, %v1950_v18  ;;  %v9188_v42 = vmul.u32 %v1768_v6, %v1745_v38  ;;  %v1753_v52 = vshrl.u32 %v1749_v50, 16 }
 0x1c4   : > { %v1757_v33 = vsel %vm1756_vm7, 1, %v13868_v45  ;;  %vm1760_vm5 = vc.u32 %v1758_v44, %v1754_v61  ;;  %v1770_v43 = vmul.u32 %v1768_v6, %v1744_v40  ;;  %vm715_vm2 = vcmp.le.f32.partialorder %v7129_v15, 0.51  ;;  %v13962_v15 = vld [vmem:[#allocation48_spill] sm:$0xff] }
 0x1c5   : > { %v2145_v14 = vmul.f32 %v2144_v25, %v9120_v51  ;;  %v2153_v48 = vxor.u32 2147483648, %v2137_v13  ;;  %vm1952_vm4 = vcmp.lt.s32.totalorder %v1951_v30, 0  ;;  %v1953_v37 = vsub.s32 0, %v1951_v30 }
 0x1c6   : > { %v1759_v49 = vadd.s32 %v1757_v33, %v1751_v3  ;;  %v1761_v21 = vsel %vm1760_vm5, 1, %v13868_v45  ;;  %v1773_v9 = vmul.u32 %v1769_v23, %v1745_v38  ;;  %v1774_v20 = vshll.u32 %v1771_v58, 16 }
 0x1c7   : > { %v2150_v18 = vxor.u32 2147483648, %v2145_v14  ;;  %v2154_v8 = vsel %vm2152_vm6, %v2153_v48, %v2145_v14  ;;  %v1954_v50 = vsel %vm1952_vm4, %v1953_v37, %v1951_v30  ;;  %v1776_v61 = vshll.u32 %v9188_v42, 16 }
 0x1c8   : > { %vm2146_vm13 = vweird.f32 %v13917_v26  ;;  %v1955_v40 = vclz %v1954_v50  ;;  %v1763_v6 = vadd.s32 %v1761_v21, %v1759_v49  ;;  %vm1778_vm9 = vc.u32 %v1770_v43, %v1774_v20 }
 0x1c9   : > { %v2151_v25 = vsel %vm2149_vm12, %v2137_v13, %v2150_v18  ;;  %v1731_v33 = vsel %vm1727_vm0, %v1711_v10, %v9100_v4  ;;  %v1779_v51 = vsel %vm1778_vm9, 1, %v13868_v45  ;;  %v1780_v38 = vadd.s32 %v1774_v20, %v1770_v43  ;;  %v13959_v10 = vld [vmem:[#allocation19_spill] sm:$0xff] }
 0x1ca   : > { %v2155_v48 = vsel %vm2148_vm15, %v2151_v25, %v2154_v8  ;;  %v6879_v23 = vadd.s32 4294967294, %v1955_v40  ;;  %v1733_v26 = vsel %vm1729_vm11, %v9114_v29, %v1732_v12  ;;  %v1755_v24 = vshrl.u32 %v9176_v27, 16 }
 0x1cb   : > { %v2156_v3 = vsel %vm2146_vm13, nan, %v2155_v48  ;;  %v1764_v44 = vadd.s32 %v1763_v6, %v1753_v52  ;;  %v1781_v13 = vadd.s32 %v1779_v51, %v1773_v9  ;;  %vm1782_vm10 = vc.u32 %v1780_v38, %v1776_v61  ;;  %v13961_v51 = vld [vmem:[#allocation44_spill] sm:$0xff] }
 0x1cc   : > { %v5707_v14 = vadd.f32 1.0, %v2156_v3  ;;  %v1943_v4 = vadd.s32 %v9086_v39, %v9083_v56  ;;  %vm6880_vm0 = vcmp.lt.s32.totalorder %v6879_v23, 0  ;;  %v13657_v43 = vand.u32 2147483647, %v13959_v10 }
 0x1cd   : > { %v1958_v28 = vsel %vm6880_vm0, 0, %v6879_v23  ;;  %v1734_v37 = vsel %vm1728_vm14, %v1731_v33, %v1733_v26  ;;  %v1775_v49 = vshrl.u32 %v1771_v58, 16  ;;  %v1783_v29 = vsel %vm1782_vm10, 1, %v13868_v45 }
 0x1ce   : > { %v5739_v12 = vmul.f32 0.5, %v5707_v14  ;;  %v1959_v27 = vsub.s32 32, %v1958_v28  ;;  %v1960_v21 = vshll.u32 %v1951_v30, %v1958_v28  ;;  %v1963_v52 = vsub.s32 4294967266, %v1958_v28 }
 0x1cf   : > { %v9217_v9 = vsub.s32 32, %v8974_v60  ;;  %v9219_v20 = vadd.s32 %v1764_v44, %v1755_v24  ;;  %v1777_v56 = vshrl.u32 %v9188_v42, 16  ;;  %v1785_v39 = vadd.s32 %v1783_v29, %v1781_v13 }
 0x1d0   : > { %v5771_v18 = vsel %vm715_vm2, %v5739_v12, 0.0  ;;  %v1961_v8 = vshrl.u32 %v1943_v4, %v1959_v27  ;;  %v1964_v41 = vadd.s32 127, %v1963_v52  ;;  %v9223_v50 = vadd.s32 %v1780_v38, %v1776_v61  ;;  %v13964_v27 = vld [vmem:[#allocation73_spill] sm:$0xff] }
 0x1d1   : > { %13960 = vst [vmem:[#allocation37_spill] sm:$0xff] %v9217_v9  ;;  %5837 = vperm.xlu1 %7042, %v5771_v18   ;;  %v1973_v58 = vsub.s32 4, %v9179_v54  ;;  %v1786_v40 = vadd.s32 %v1785_v39, %v1775_v49  ;;  %v1788_v30 = vmul.u32 %v9133_v36, %v1734_v37  ;;  %v2472_v6 = vand.u32 8388607, %v13657_v43  ;;  %v13963_v49 = vld [vmem:[#allocation51_spill] sm:$0xff] }
 0x1d2   : > { %v1962_v25 = vor.u32 %v1961_v8, %v1960_v21  ;;  %v1965_v33 = vshll.u32 %v1964_v41, 23  ;;  %v2482_v42 = vshll.u32 %v13865_v55, %v13961_v51  ;;  %v2483_v48 = vshrl.u32 %v13869_v11, %v13962_v15  ;;  %v13965_v21 = vld [vmem:[#allocation60_spill] sm:$0xff] }
 0x1d3   : > { %v1787_v23 = vadd.s32 %v1786_v40, %v1777_v56  ;;  %v2485_v61 = vshll.u32 %v13869_v11, %v13961_v51  ;;  %v2486_v38 = vshrl.u32 %v13870_v46, %v13962_v15  ;;  %v2488_v36 = vshll.u32 %v13870_v46, %v13961_v51  ;;  %v13969_v40 = vld [vmem:[#allocation72_spill] sm:$0xff] }
 0x1d4   : > { %v1966_v26 = vor.u32 4788187, %v1965_v33  ;;  %v1969_v24 = vcvt.s32.f32 %v1962_v25  ;;  %vm1790_vm8 = vc.u32 %v9219_v20, %v9223_v50  ;;  %v2489_v3 = vshrl.u32 %v13780_v35, %v13962_v15 }
 0x1d5   : > { %v1791_v44 = vadd.s32 1, %v1787_v23  ;;  %v2473_v13 = vor.u32 8388608, %v2472_v6  ;;  %v9243_v14 = vor.u32 %v2483_v48, %v2482_v42  ;;  %v9245_v4 = vor.u32 %v2486_v38, %v2485_v61 }
 0x1d6   : > { %v1967_v28 = vand.u32 2147483647, %v1966_v26  ;;  %v9247_v37 = vor.u32 %v2489_v3, %v2488_v36  ;;  %vm2497_vm11 = vcmp.lt.s32.totalorder %v13963_v49, 1  ;;  %vm2499_vm14 = vcmp.lt.s32.totalorder %v13963_v49, 3 }
 0x1d7   : > { %v9253_v29 = vshll.u32 %v13780_v35, %v8974_v60  ;;  %v1792_v12 = vsel %vm1790_vm8, %v1791_v44, %v1787_v23  ;;  %vm2498_vm12 = vcmp.lt.s32.totalorder %v13963_v49, 2  ;;  %v2511_v52 = vsel %vm2499_vm14, %v13965_v21, %v13964_v27 }
 0x1d8   : > { %v13966_v56 = vand.u32 2147483647, %v13931_v5  ;;  %vm1851_vm6 = vcmp.lt.s32.totalorder %v13931_v5, 0  ;;  %v1970_v18 = vmul.f32 %v1969_v24, %v1967_v28  ;;  %v1793_v8 = vadd.s32 %v1792_v12, %v1788_v30 }
 0x1d9   : > { %v2505_v41 = vsel %vm2497_vm11, %v9243_v14, %v9245_v4  ;;  %v2507_v6 = vsel %vm2499_vm14, %v9247_v37, %v13969_v40  ;;  %v2509_v25 = vsel %vm2497_vm11, %v9245_v4, %v9247_v37  ;;  %v9279_v33 = vshll.u32 %v2473_v13, 8 }
 0x1da   : > { %vm9262_vm15 = vcmp.le.f32.partialorder %v13966_v56, 0.7853982  ;;  %v1971_v51 = vxor.u32 2147483648, %v1970_v18  ;;  %v1974_v30 = vsel %vm1851_vm6, %v1973_v58, %v9179_v54  ;;  %v1794_v42 = vadd.s32 536870912, %v1793_v8 }
 0x1db   : > { %v2512_v48 = vsel %vm2498_vm12, %v2509_v25, %v2511_v52  ;;  %v2514_v23 = vand.u32 65535, %v9279_v33  ;;  %v2515_v61 = vshrl.u32 %v9279_v33, 16  ;;  %v9290_v26 = vshrl.u32 %v13777_v31, %v9136_v32 }
 0x1dc   : > { %v2516_v38 = vand.u32 65535, %v2512_v48  ;;  %v2517_v36 = vshrl.u32 %v2512_v48, 16  ;;  %v1972_v24 = vsel %vm1851_vm6, %v1971_v51, %v1970_v18  ;;  %v9294_v3 = vshrl.u32 %v1794_v42, 30 }
 0x1dd   : > { %v2508_v54 = vsel %vm2498_vm12, %v2505_v41, %v2507_v6  ;;  %v9301_v58 = vsel %vm9262_vm15, %v13931_v5, %v1972_v24  ;;  %v9309_v12 = vshrl.u32 %v13778_v53, %v9136_v32  ;;  %v1976_v27 = vsel %vm9262_vm15, 0, %v1974_v30 }
 0x1de   : > { %v2518_v44 = vmul.u32 %v2516_v38, %v2514_v23  ;;  %v9303_v13 = vmul.u32 %v2517_v36, %v2514_v23  ;;  %v9305_v28 = vmul.u32 %v2516_v38, %v2515_v61  ;;  %v1977_v21 = vmul.f32 %v9301_v58, %v9301_v58 }
 0x1df   : > { %v1796_v52 = vshll.u32 %v9294_v3, 30  ;;  %v9318_v56 = vshrl.u32 %v13777_v31, %v9217_v9  ;;  %v9322_v18 = vshll.u32 %v13777_v31, %v8974_v60  ;;  %v2539_v40 = vshrl.u32 %v2508_v54, 16 }
 0x1e0   : > { %v2522_v41 = vshll.u32 %v9303_v13, 16  ;;  %v1978_v6 = vmul.f32 -0.001358992, %v1977_v21  ;;  %v1985_v25 = vmul.f32 -0.00019511016, %v1977_v21  ;;  %v2538_v51 = vand.u32 65535, %v2508_v54 }
 0x1e1   : > { %v1797_v39 = vsub.s32 %v1793_v8, %v1796_v52  ;;  %v9325_v30 = vand.u32 3, %v1976_v27  ;;  %v2521_v42 = vmul.u32 %v2517_v36, %v2515_v61  ;;  %v2524_v48 = vshll.u32 %v9305_v28, 16 }
 0x1e2   : > { %vm2526_vm7 = vc.u32 %v2518_v44, %v2522_v41  ;;  %v1979_v38 = vadd.f32 0.041655596, %v1978_v6  ;;  %v1986_v24 = vadd.f32 0.008332121, %v1985_v25  ;;  %v9330_v60 = vshrl.u32 %v13778_v53, %v9217_v9 }
 0x1e3   : > { %vm1798_vm5 = vcmp.lt.s32.totalorder %v1797_v39, 0  ;;  %v1799_v43 = vsub.s32 0, %v1797_v39  ;;  %v2527_v32 = vsel %vm2526_vm7, 1, %v13868_v45  ;;  %v2528_v2 = vadd.s32 %v2522_v41, %v2518_v44 }
 0x1e4   : > { %v9333_v17 = vmul.u32 %v2539_v40, %v2514_v23  ;;  %v1980_v8 = vmul.f32 %v1979_v38, %v1977_v21  ;;  %v1987_v54 = vmul.f32 %v1986_v24, %v1977_v21  ;;  %v2540_v36 = vmul.u32 %v2538_v51, %v2514_v23 }
 0x1e5   : > { %v1800_v27 = vsel %vm1798_vm5, %v1799_v43, %v1797_v39  ;;  %v2529_v57 = vadd.s32 %v2527_v32, %v2521_v42  ;;  %vm2530_vm2 = vc.u32 %v2528_v2, %v2524_v48  ;;  %v9335_v6 = vmul.u32 %v2538_v51, %v2515_v61 }
 0x1e6   : > { %v1801_v52 = vclz %v1800_v27  ;;  %v1981_v25 = vadd.f32 -0.4999988, %v1980_v8  ;;  %v1988_v19 = vadd.f32 -0.16666654, %v1987_v54  ;;  %vm1994_vm4 = vcmp.lt.s32.totalorder %v9325_v30, 2 }
 0x1e7   : > { %v2531_v9 = vsel %vm2530_vm2, 1, %v13868_v45  ;;  %v2544_v63 = vshll.u32 %v9333_v17, 16  ;;  %vm1992_vm13 = vweird.f32 %v13931_v5  ;;  %vm1995_vm9 = vcmp.eq.s32.totalorder %v9325_v30, 0 }
 0x1e8   : > { %vm1998_vm10 = vcmp.eq.s32.totalorder %v9325_v30, 2  ;;  %v1789_v32 = vadd.s32 %v9223_v50, %v9219_v20  ;;  %v6876_v2 = vadd.s32 4294967294, %v1801_v52  ;;  %v1982_v43 = vmul.f32 %v1981_v25, %v1977_v21 }
 0x1e9   : > { %v1989_v23 = vmul.f32 %v1988_v19, %v1977_v21  ;;  %v2481_v44 = vshrl.u32 %v13865_v55, %v13962_v15  ;;  %vm2548_vm0 = vc.u32 %v2540_v36, %v2544_v63  ;;  %v2523_v41 = vshrl.u32 %v9303_v13, 16 }
 0x1ea   : > { %vm6877_vm8 = vcmp.lt.s32.totalorder %v6876_v2, 0  ;;  %v2533_v51 = vadd.s32 %v2531_v9, %v2529_v57  ;;  %v2543_v42 = vmul.u32 %v2539_v40, %v2515_v61  ;;  %vm4170_vm15 = vcmp.gt.s32.totalorder %v8998_v0, 0 }
 0x1eb   : > { %v1983_v48 = vadd.f32 1.0, %v1982_v43  ;;  %v1990_v38 = vadd.f32 1.0, %v1989_v23  ;;  %v1804_v24 = vsel %vm6877_vm8, 0, %v6876_v2  ;;  %v2546_v8 = vshll.u32 %v9335_v6, 16 }
 0x1ec   : > { %v1805_v20 = vsub.s32 32, %v1804_v24  ;;  %v1806_v50 = vshll.u32 %v1797_v39, %v1804_v24  ;;  %v1809_v54 = vsub.s32 4294967266, %v1804_v24  ;;  %v2549_v19 = vsel %vm2548_vm0, 1, %v13868_v45 }
 0x1ed   : > { %v1991_v15 = vmul.f32 %v1990_v38, %v9301_v58  ;;  %v1999_v21 = vxor.u32 2147483648, %v1983_v48  ;;  %v2501_v57 = vsel %vm2497_vm11, %v2481_v44, %v9243_v14  ;;  %vm13970_vm6 = vcmp.lt.s32.totalorder %v13963_v49, 4 }
 0x1ee   : > { %v2502_v9 = vsel %vm13970_vm6, %v9247_v37, 2102212464  ;;  %v1807_v61 = vshrl.u32 %v1789_v32, %v1805_v20  ;;  %v1810_v13 = vadd.s32 127, %v1809_v54  ;;  %v2525_v40 = vshrl.u32 %v9305_v28, 16  ;;  %v7130_v20 = vld [vmem:[%s7354_s11 + $0x38] sm:$0xff] }
 0x1ef   : > { %v2550_v27 = vadd.s32 %v2544_v63, %v2540_v36  ;;  %v1996_v39 = vxor.u32 2147483648, %v1991_v15  ;;  %v2000_v52 = vsel %vm1998_vm10, %v1999_v21, %v1991_v15  ;;  %v2534_v25 = vadd.s32 %v2533_v51, %v2523_v41 }
 0x1f0   : > { %v2551_v58 = vadd.s32 %v2549_v19, %v2543_v42  ;;  %v1808_v2 = vor.u32 %v1807_v61, %v1806_v50  ;;  %v1811_v43 = vshll.u32 %v1810_v13, 23  ;;  %v2545_v23 = vshrl.u32 %v9333_v17, 16  ;;  %v13977_v13 = vld [vmem:[#allocation55_spill] sm:$0xff] }
 0x1f1   : > { %vm2552_vm11 = vc.u32 %v2550_v27, %v2546_v8  ;;  %vm3578_vm7 = vcmp.lt.s32.totalorder %v8951_v34, 4  ;;  %v1997_v14 = vsel %vm1995_vm9, %v1983_v48, %v1996_v39  ;;  %v2503_v63 = vsel %vm2499_vm14, %v9245_v4, %v2502_v9 }
 0x1f2   : > { %v2547_v37 = vshrl.u32 %v9335_v6, 16  ;;  %v2553_v28 = vsel %vm2552_vm11, 1, %v13868_v45  ;;  %v2001_v36 = vsel %vm1994_vm4, %v1997_v14, %v2000_v52  ;;  %v1812_v32 = vor.u32 4788187, %v1811_v43 }
 0x1f3   : > { %v1815_v17 = vcvt.s32.f32 %v1808_v2  ;;  %v2555_v44 = vadd.s32 %v2553_v28, %v2551_v58  ;;  %v9373_v41 = vadd.s32 1, %v9014_v62  ;;  %v2002_v51 = vsel %vm1992_vm13, nan, %v2001_v36 }
 0x1f4   : > { %v9377_v42 = vadd.s32 %v2534_v25, %v2525_v40  ;;  %v9379_v4 = vadd.s32 %v2550_v27, %v2546_v8  ;;  %v5706_v6 = vadd.f32 1.0, %v2002_v51  ;;  %v1813_v48 = vand.u32 2147483647, %v1812_v32 }
 0x1f5   : > { %v2504_v38 = vsel %vm2498_vm12, %v2501_v57, %v2503_v63  ;;  %v2556_v30 = vadd.s32 %v2555_v44, %v2545_v23  ;;  %v9385_v24 = vor.u32 %v9290_v26, %v9146_v22  ;;  %v3574_v62 = vor.u32 %v9309_v12, %v9166_v59  ;;  %v13975_v57 = vld [vmem:[#allocation22_spill] sm:$0xff] }
 0x1f6   : > { %vm714_vm14 = vcmp.le.f32.partialorder %v7130_v20, 0.51  ;;  %v1819_v5 = vsub.s32 4, %v9294_v3  ;;  %v4171_v8 = vsel %vm4170_vm15, %v8998_v0, 0  ;;  %v5738_v50 = vmul.f32 0.5, %v5706_v6 }
 0x1f7   : > { %13971 = vst [vmem:[#allocation27_spill] sm:$0xff] %v9385_v24  ;;  %v1816_v54 = vmul.f32 %v1815_v17, %v1813_v48  ;;  %v2557_v49 = vadd.s32 %v2556_v30, %v2547_v37  ;;  %v4778_v19 = vand.u32 2139095040, %v8444_v1  ;;  %vm1697_vm12 = vcmp.lt.s32.totalorder %v13948_v16, 0  ;;  %v13981_v30 = vld [vmem:[#allocation57_spill] sm:$0xff] }
 0x1f8   : > { %v2558_v22 = vmul.u32 %v9279_v33, %v2504_v38  ;;  %vm2560_vm5 = vc.u32 %v9377_v42, %v9379_v4  ;;  %vm13707_vm2 = vcmp.lt.s32.totalorder %v8967_v47, 4  ;;  %v5770_v59 = vsel %vm714_vm14, %v5738_v50, 0.0  ;;  %v13976_v33 = vld [vmem:[#allocation49_spill] sm:$0xff] }
 0x1f9   : > { %v13972_v26 = vand.u32 2147483647, %v13948_v16  ;;  %v1817_v0 = vxor.u32 2147483648, %v1816_v54  ;;  %v2561_v15 = vadd.s32 1, %v2557_v49  ;;  %5832 = vperm.xlu0 %7041, %v5770_v59   ;;  %v1820_v21 = vsel %vm1697_vm12, %v1819_v5, %v9294_v3 }
 0x1fa   : > { %v13668_v9 = vand.u32 2147483647, %v13975_v57  ;;  %v2331_v61 = vshll.u32 %v13869_v11, %v13976_v33  ;;  %v2332_v40 = vshrl.u32 %v13870_v46, %v13977_v13  ;;  %v2334_v52 = vshll.u32 %v13870_v46, %v13976_v33 }
 0x1fb   : > { %vm9402_vm4 = vcmp.le.f32.partialorder %v13972_v26, 0.7853982  ;;  %v1818_v27 = vsel %vm1697_vm12, %v1817_v0, %v1816_v54  ;;  %v2562_v39 = vsel %vm2560_vm5, %v2561_v15, %v2557_v49  ;;  %v2335_v25 = vshrl.u32 %v13780_v35, %v13977_v13  ;;  %v13984_v15 = vld [vmem:[#allocation76_spill] sm:$0xff] }
 0x1fc   : > { %v9418_v58 = vor.u32 %v9318_v56, %v9253_v29  ;;  %v9425_v2 = vsel %vm9402_vm4, %v13948_v16, %v1818_v27  ;;  %v2563_v43 = vadd.s32 %v2562_v39, %v2558_v22  ;;  %v9430_v23 = vsel %vm3578_vm7, %v9385_v24, 920167782 }
 0x1fd   : > { %13979 = vst [vmem:[#allocation8_spill] sm:$0xff] %v9430_v23  ;;  %v9432_v14 = vshrl.u32 %v4171_v8, 5  ;;  %v1822_v29 = vsel %vm9402_vm4, 0, %v1820_v21  ;;  %v1823_v56 = vmul.f32 %v9425_v2, %v9425_v2  ;;  %v2318_v37 = vand.u32 8388607, %v13668_v9  ;;  %v13985_v21 = vld [vmem:[#allocation64_spill] sm:$0xff] }
 0x1fe   : > { %13978 = vst [vmem:[#allocation31_spill] sm:$0xff] %v9418_v58  ;;  %v2564_v63 = vadd.s32 536870912, %v2563_v43  ;;  %v2328_v28 = vshll.u32 %v13865_v55, %v13976_v33  ;;  %v2329_v36 = vshrl.u32 %v13869_v11, %v13977_v13  ;;  %v9444_v44 = vor.u32 %v2332_v40, %v2331_v61 }
 0x1ff   : > { %13980 = vst [vmem:[#allocation24_spill] sm:$0xff] %v9432_v14  ;;  %v1824_v32 = vmul.f32 -0.001358992, %v1823_v56  ;;  %v1831_v17 = vmul.f32 -0.00019511016, %v1823_v56  ;;  %v2336_v51 = vor.u32 %v2335_v25, %v2334_v52  ;;  %v9450_v48 = vand.u32 3, %v1822_v29 }
 0x200   : > { %v9448_v6 = vsel %vm3578_vm7, %v3574_v62, 1326507024  ;;  %v9452_v38 = vshrl.u32 %v2564_v63, 30  ;;  %vm2343_vm13 = vcmp.lt.s32.totalorder %v13981_v30, 1  ;;  %v9455_v20 = vand.u32 31, %v4171_v8 }
 0x201   : > { %v1825_v5 = vadd.f32 0.041655596, %v1824_v32  ;;  %v1832_v50 = vadd.f32 0.008332121, %v1831_v17  ;;  %vm2345_vm9 = vcmp.lt.s32.totalorder %v13981_v30, 3  ;;  %v2319_v49 = vor.u32 8388608, %v2318_v37 }
 0x202   : > { %13982 = vst [vmem:[#allocation28_spill] sm:$0xff] %v9455_v20  ;;  %v2566_v54 = vshll.u32 %v9452_v38, 30  ;;  %v2330_v22 = vor.u32 %v2329_v36, %v2328_v28  ;;  %vm2344_vm10 = vcmp.lt.s32.totalorder %v13981_v30, 2  ;;  %v9460_v62 = vshrl.u32 %v4778_v19, 23 }
 0x203   : > { %v1826_v59 = vmul.f32 %v1825_v5, %v1823_v56  ;;  %v1833_v26 = vmul.f32 %v1832_v50, %v1823_v56  ;;  %v2355_v12 = vsel %vm2343_vm13, %v9444_v44, %v2336_v51  ;;  %v9468_v8 = vsel %vm13707_vm2, %v9418_v58, 920167782 }
 0x204   : > { %13983 = vst [vmem:[#allocation29_spill] sm:$0xff] %v9468_v8  ;;  %vm1841_vm0 = vcmp.eq.s32.totalorder %v9450_v48, 0  ;;  %v9471_v0 = vsub.s32 %v2563_v43, %v2566_v54  ;;  %v2357_v19 = vsel %vm2345_vm9, %v13985_v21, %v13984_v15  ;;  %vm1840_vm8 = vcmp.lt.s32.totalorder %v9450_v48, 2 }
 0x205   : > { %v1827_v33 = vadd.f32 -0.4999988, %v1826_v59  ;;  %v1834_v61 = vadd.f32 -0.16666654, %v1833_v26  ;;  %v2327_v40 = vshrl.u32 %v13865_v55, %v13977_v13  ;;  %v2358_v27 = vsel %vm2344_vm10, %v2355_v12, %v2357_v19  ;;  %v13986_v13 = vld [vmem:[#allocation75_spill] sm:$0xff]  ;;  %v7131_v12 = vld [vmem:[%s7354_s11 + $0x30] sm:$0xff] }
 0x206   : > { %vm1838_vm15 = vweird.f32 %v13948_v16  ;;  %vm2568_vm6 = vcmp.lt.s32.totalorder %v9471_v0, 0  ;;  %v2569_v39 = vsub.s32 0, %v9471_v0  ;;  %v2351_v52 = vsel %vm2343_vm13, %v2330_v22, %v9444_v44 }
 0x207   : > { %v9488_v25 = vshll.u32 %v2319_v49, 8  ;;  %v1828_v43 = vmul.f32 %v1827_v33, %v1823_v56  ;;  %v1835_v29 = vmul.f32 %v1834_v61, %v1823_v56  ;;  %vm2467_vm11 = vcmp.lt.s32.totalorder %v13959_v10, 0 }
 0x208   : > { %v2353_v63 = vsel %vm2345_vm9, %v2336_v51, %v13986_v13  ;;  %v2363_v37 = vshrl.u32 %v2358_v27, 16  ;;  %v2570_v28 = vsel %vm2568_vm6, %v2569_v39, %v9471_v0  ;;  %v2362_v17 = vand.u32 65535, %v2358_v27 }
 0x209   : > { %v2360_v36 = vand.u32 65535, %v9488_v25  ;;  %v2361_v32 = vshrl.u32 %v9488_v25, 16  ;;  %v1829_v5 = vadd.f32 1.0, %v1828_v43  ;;  %v1836_v50 = vadd.f32 1.0, %v1835_v29 }
 0x20a   : > { %vm1844_vm14 = vcmp.eq.s32.totalorder %v9450_v48, 2  ;;  %v2571_v56 = vclz %v2570_v28  ;;  %v2559_v54 = vadd.s32 %v9379_v4, %v9377_v42  ;;  %v2347_v49 = vsel %vm2343_vm13, %v2327_v40, %v2330_v22 }
 0x20b   : > { %vm13987_vm12 = vcmp.lt.s32.totalorder %v13981_v30, 4  ;;  %v2365_v26 = vmul.u32 %v2363_v37, %v2360_v36  ;;  %vm713_vm5 = vcmp.le.f32.partialorder %v7131_v12, 0.51  ;;  %v1837_v15 = vmul.f32 %v1836_v50, %v9425_v2 }
 0x20c   : > { %v2348_v59 = vsel %vm13987_vm12, %v2336_v51, 2102212464  ;;  %v1845_v21 = vxor.u32 2147483648, %v1829_v5  ;;  %v6891_v19 = vadd.s32 4294967294, %v2571_v56  ;;  %v2354_v33 = vsel %vm2344_vm10, %v2351_v52, %v2353_v63 }
 0x20d   : > { %v2589_v61 = vsub.s32 4, %v9452_v38  ;;  %v2364_v27 = vmul.u32 %v2362_v17, %v2360_v36  ;;  %v2366_v42 = vmul.u32 %v2362_v17, %v2361_v32  ;;  %v2384_v4 = vand.u32 65535, %v2354_v33 }
 0x20e   : > { %v1842_v39 = vxor.u32 2147483648, %v1837_v15  ;;  %v1846_v22 = vsel %vm1844_vm14, %v1845_v21, %v1837_v15  ;;  %vm6892_vm4 = vcmp.lt.s32.totalorder %v6891_v19, 0  ;;  %v2368_v51 = vshll.u32 %v2365_v26, 16 }
 0x20f   : > { %v2574_v40 = vsel %vm6892_vm4, 0, %v6891_v19  ;;  %v2349_v2 = vsel %vm2345_vm9, %v9444_v44, %v2348_v59  ;;  %v2367_v43 = vmul.u32 %v2363_v37, %v2361_v32  ;;  %v2385_v29 = vshrl.u32 %v2354_v33, 16 }
 0x210   : > { %v1843_v52 = vsel %vm1841_vm0, %v1829_v5, %v1842_v39  ;;  %v13988_v13 = vand.u32 2147483647, %v13959_v10  ;;  %v2575_v28 = vsub.s32 32, %v2574_v40  ;;  %v2576_v17 = vshll.u32 %v9471_v0, %v2574_v40 }
 0x211   : > { %v2579_v50 = vsub.s32 4294967266, %v2574_v40  ;;  %v1847_v56 = vsel %vm1840_vm8, %v1843_v52, %v1846_v22  ;;  %v9528_v44 = vsel %vm2467_vm11, %v2589_v61, %v9452_v38  ;;  %v2370_v37 = vshll.u32 %v2366_v42, 16 }
 0x212   : > { %vm9518_vm13 = vcmp.le.f32.partialorder %v13988_v13, 0.7853982  ;;  %v2386_v5 = vmul.u32 %v2384_v4, %v2360_v36  ;;  %v1848_v59 = vsel %vm1838_vm15, nan, %v1847_v56  ;;  %v2577_v15 = vshrl.u32 %v2559_v54, %v2575_v28 }
 0x213   : > { %v2580_v21 = vadd.s32 127, %v2579_v50  ;;  %vm2372_vm9 = vc.u32 %v2364_v27, %v2368_v51  ;;  %v5705_v19 = vadd.f32 1.0, %v1848_v59  ;;  %v2374_v33 = vadd.s32 %v2368_v51, %v2364_v27 }
 0x214   : > { %v2373_v0 = vsel %vm2372_vm9, 1, %v13868_v45  ;;  %v2387_v39 = vmul.u32 %v2385_v29, %v2360_v36  ;;  %v2578_v48 = vor.u32 %v2577_v15, %v2576_v17  ;;  %v2388_v52 = vmul.u32 %v2384_v4, %v2361_v32  ;;  %v13992_v15 = vld [vmem:[#allocation52_spill] sm:$0xff] }
 0x215   : > { %v2581_v22 = vshll.u32 %v2580_v21, 23  ;;  %v2375_v40 = vadd.s32 %v2373_v0, %v2367_v43  ;;  %v5737_v13 = vmul.f32 0.5, %v5705_v19  ;;  %v2369_v38 = vshrl.u32 %v2365_v26, 16  ;;  %v13993_v0 = vld [vmem:[#allocation61_spill] sm:$0xff] }
 0x216   : > { %vm2376_vm0 = vc.u32 %v2374_v33, %v2370_v37  ;;  %v2390_v61 = vshll.u32 %v2387_v39, 16  ;;  %v2585_v3 = vcvt.s32.f32 %v2578_v48  ;;  %v2389_v54 = vmul.u32 %v2385_v29, %v2361_v32  ;;  %v13991_v32 = vld [vmem:[#allocation25_spill] sm:$0xff] }
 0x217   : > { %v2582_v9 = vor.u32 4788187, %v2581_v22  ;;  %v2377_v16 = vsel %vm2376_vm0, 1, %v13868_v45  ;;  %v5769_v28 = vsel %vm713_vm5, %v5737_v13, 0.0  ;;  %v2371_v50 = vshrl.u32 %v2366_v42, 16 }
 0x218   : > { %v2379_v56 = vadd.s32 %v2377_v16, %v2375_v40  ;;  %v2392_v59 = vshll.u32 %v2388_v52, 16  ;;  %5827 = vperm.xlu2 %7043, %v5769_v28   ;;  %v2350_v27 = vsel %vm2344_vm10, %v2347_v49, %v2349_v2  ;;  %vm2394_vm8 = vc.u32 %v2386_v5, %v2390_v61 }
 0x219   : > { %v2583_v36 = vand.u32 2147483647, %v2582_v9  ;;  %v2396_v4 = vadd.s32 %v2390_v61, %v2386_v5  ;;  %v2592_v26 = vsel %vm9518_vm13, 0, %v9528_v44  ;;  %v2395_v43 = vsel %vm2394_vm8, 1, %v13868_v45 }
 0x21a   : > { %v2380_v51 = vadd.s32 %v2379_v56, %v2369_v38  ;;  %v13670_v12 = vand.u32 2147483647, %v13991_v32  ;;  %v2391_v42 = vshrl.u32 %v2387_v39, 16  ;;  %v2397_v17 = vadd.s32 %v2395_v43, %v2389_v54  ;;  %v13994_v54 = vld [vmem:[#allocation63_spill] sm:$0xff]  ;;  %v13996_v56 = vld [vmem:[#allocation69_spill] sm:$0xff] }
 0x21b   : > { %v2586_v29 = vmul.f32 %v2585_v3, %v2583_v36  ;;  %vm2398_vm15 = vc.u32 %v2396_v4, %v2392_v59  ;;  %v9545_v30 = vadd.s32 %v2396_v4, %v2392_v59  ;;  %v2393_v44 = vshrl.u32 %v2388_v52, 16 }
 0x21c   : > { %v9542_v37 = vadd.s32 %v2380_v51, %v2371_v50  ;;  %v2399_v9 = vsel %vm2398_vm15, 1, %v13868_v45  ;;  %v2164_v49 = vand.u32 8388607, %v13670_v12  ;;  %v2177_v21 = vshll.u32 %v13869_v11, %v13992_v15  ;;  %v13995_v50 = vld [vmem:[#allocation78_spill] sm:$0xff] }
 0x21d   : > { %v2587_v2 = vxor.u32 2147483648, %v2586_v29  ;;  %v2401_v5 = vadd.s32 %v2399_v9, %v2397_v17  ;;  %v2404_v3 = vmul.u32 %v9488_v25, %v2350_v27  ;;  %v2174_v19 = vshll.u32 %v13865_v55, %v13992_v15 }
 0x21e   : > { %v2175_v33 = vshrl.u32 %v13869_v11, %v13993_v0  ;;  %v2178_v39 = vshrl.u32 %v13870_v46, %v13993_v0  ;;  %v2165_v40 = vor.u32 8388608, %v2164_v49  ;;  %v2180_v52 = vshll.u32 %v13870_v46, %v13992_v15  ;;  %v14000_v15 = vld [vmem:[#allocation77_spill] sm:$0xff] }
 0x21f   : > { %v2588_v48 = vsel %vm2467_vm11, %v2587_v2, %v2586_v29  ;;  %v2402_v22 = vadd.s32 %v2401_v5, %v2391_v42  ;;  %vm2406_vm10 = vc.u32 %v9542_v37, %v9545_v30  ;;  %v2181_v38 = vshrl.u32 %v13780_v35, %v13993_v0 }
 0x220   : > { %v9565_v25 = vsel %vm9518_vm13, %v13959_v10, %v2588_v48  ;;  %v9569_v13 = vor.u32 %v2178_v39, %v2177_v21  ;;  %vm2189_vm6 = vcmp.lt.s32.totalorder %v13994_v54, 1  ;;  %vm2191_vm11 = vcmp.lt.s32.totalorder %v13994_v54, 3 }
 0x221   : > { %v2593_v61 = vmul.f32 %v9565_v25, %v9565_v25  ;;  %v2403_v16 = vadd.s32 %v2402_v22, %v2393_v44  ;;  %v9577_v28 = vor.u32 %v2175_v33, %v2174_v19  ;;  %v2182_v63 = vor.u32 %v2181_v38, %v2180_v52 }
 0x222   : > { %vm2190_vm14 = vcmp.lt.s32.totalorder %v13994_v54, 2  ;;  %v2203_v59 = vsel %vm2191_vm11, %v13996_v56, %v13995_v50  ;;  %v9584_v51 = vshll.u32 %v2165_v40, 8  ;;  %v13997_v43 = vor.u32 %v9330_v60, %v9322_v18 }
 0x223   : > { %v2594_v36 = vmul.f32 -0.001358992, %v2593_v61  ;;  %v2601_v27 = vmul.f32 -0.00019511016, %v2593_v61  ;;  %v2407_v4 = vadd.s32 1, %v2403_v16  ;;  %v9594_v42 = vsub.s32 32, %v9455_v20 }
 0x224   : > { %v9591_v29 = vsel %vm13707_vm2, %v13997_v43, 1326507024  ;;  %v9598_v17 = vshll.u32 %v13780_v35, %v9455_v20  ;;  %v2201_v9 = vsel %vm2189_vm6, %v9569_v13, %v2182_v63  ;;  %v9603_v44 = vand.u32 3, %v2592_v26 }
 0x225   : > { %13998 = vst [vmem:[#allocation41_spill] sm:$0xff] %v9591_v29  ;;  %v2595_v49 = vadd.f32 0.041655596, %v2594_v36  ;;  %v2602_v2 = vadd.f32 0.008332121, %v2601_v27  ;;  %v2408_v60 = vsel %vm2406_vm10, %v2407_v4, %v2403_v16  ;;  %v2197_v5 = vsel %vm2189_vm6, %v9577_v28, %v9569_v13 }
 0x226   : > { %13999 = vst [vmem:[#allocation34_spill] sm:$0xff] %v9594_v42  ;;  %v2409_v18 = vadd.s32 %v2408_v60, %v2404_v3  ;;  %v2199_v21 = vsel %vm2191_vm11, %v2182_v63, %v14000_v15  ;;  %v2204_v19 = vsel %vm2190_vm14, %v2201_v9, %v2203_v59  ;;  %v2206_v39 = vand.u32 65535, %v9584_v51 }
 0x227   : > { %v2596_v33 = vmul.f32 %v2595_v49, %v2593_v61  ;;  %v2603_v26 = vmul.f32 %v2602_v2, %v2593_v61  ;;  %v2207_v48 = vshrl.u32 %v9584_v51, 16  ;;  %v9621_v3 = vshll.u32 %v13777_v31, %v9455_v20 }
 0x228   : > { %v2410_v22 = vadd.s32 536870912, %v2409_v18  ;;  %v2208_v40 = vand.u32 65535, %v2204_v19  ;;  %v2209_v52 = vshrl.u32 %v2204_v19, 16  ;;  %vm2610_vm12 = vcmp.lt.s32.totalorder %v9603_v44, 2 }
 0x229   : > { %v2597_v38 = vadd.f32 -0.4999988, %v2596_v33  ;;  %v2604_v16 = vadd.f32 -0.16666654, %v2603_v26  ;;  %vm2611_vm5 = vcmp.eq.s32.totalorder %v9603_v44, 0  ;;  %v2200_v50 = vsel %vm2190_vm14, %v2197_v5, %v2199_v21 }
 0x22a   : > { %v9627_v56 = vshrl.u32 %v2410_v22, 30  ;;  %v2210_v59 = vmul.u32 %v2208_v40, %v2206_v39  ;;  %v2211_v36 = vmul.u32 %v2209_v52, %v2206_v39  ;;  %v9629_v27 = vmul.u32 %v2208_v40, %v2207_v48  ;;  %v7132_v40 = vld [vmem:[%s7354_s11 + $0x58] sm:$0xff] }
 0x22b   : > { %v2598_v4 = vmul.f32 %v2597_v38, %v2593_v61  ;;  %v2605_v43 = vmul.f32 %v2604_v16, %v2593_v61  ;;  %vm2614_vm4 = vcmp.eq.s32.totalorder %v9603_v44, 2  ;;  %v2230_v9 = vand.u32 65535, %v2200_v50 }
 0x22c   : > { %v2412_v49 = vshll.u32 %v9627_v56, 30  ;;  %v2173_v2 = vshrl.u32 %v13865_v55, %v13993_v0  ;;  %v2213_v60 = vmul.u32 %v2209_v52, %v2207_v48  ;;  %v2214_v15 = vshll.u32 %v2211_v36, 16 }
 0x22d   : > { %v2599_v5 = vadd.f32 1.0, %v2598_v4  ;;  %v2606_v21 = vadd.f32 1.0, %v2605_v43  ;;  %v2216_v19 = vshll.u32 %v9629_v27, 16  ;;  %v2231_v33 = vshrl.u32 %v2200_v50, 16 }
 0x22e   : > { %vm4016_vm13 = vcmp.gt.s32.totalorder %v9373_v41, 0  ;;  %v9637_v26 = vsub.s32 %v2409_v18, %v2412_v49  ;;  %vm14001_vm9 = vcmp.lt.s32.totalorder %v13994_v54, 4  ;;  %vm2218_vm0 = vc.u32 %v2210_v59, %v2214_v15 }
 0x22f   : > { %v2194_v61 = vsel %vm14001_vm9, %v2182_v63, 2102212464  ;;  %v2220_v22 = vadd.s32 %v2214_v15, %v2210_v59  ;;  %vm718_vm8 = vcmp.le.f32.partialorder %v7132_v40, 0.51  ;;  %v2607_v0 = vmul.f32 %v2606_v21, %v9565_v25 }
 0x230   : > { %v2615_v52 = vxor.u32 2147483648, %v2599_v5  ;;  %v2219_v38 = vsel %vm2218_vm0, 1, %v13868_v45  ;;  %v2232_v16 = vmul.u32 %v2230_v9, %v2206_v39  ;;  %vm2414_vm15 = vcmp.lt.s32.totalorder %v9637_v26, 0 }
 0x231   : > { %v2415_v50 = vsub.s32 0, %v9637_v26  ;;  %v2221_v4 = vadd.s32 %v2219_v38, %v2213_v60  ;;  %vm2222_vm10 = vc.u32 %v2220_v22, %v2216_v19  ;;  %v2612_v18 = vxor.u32 2147483648, %v2607_v0 }
 0x232   : > { %v2616_v63 = vsel %vm2614_vm4, %v2615_v52, %v2607_v0  ;;  %v2223_v59 = vsel %vm2222_vm10, 1, %v13868_v45  ;;  %v2233_v43 = vmul.u32 %v2231_v33, %v2206_v39  ;;  %vm2608_vm9 = vweird.f32 %v13959_v10 }
 0x233   : > { %v2416_v25 = vsel %vm2414_vm15, %v2415_v50, %v9637_v26  ;;  %v2193_v49 = vsel %vm2189_vm6, %v2173_v2, %v9577_v28  ;;  %v2234_v15 = vmul.u32 %v2230_v9, %v2207_v48  ;;  %v2613_v60 = vsel %vm2611_vm5, %v2599_v5, %v2612_v18  ;;  %v14002_v18 = vld [vmem:[#allocation30_spill] sm:$0xff] }
 0x234   : > { %v2417_v21 = vclz %v2416_v25  ;;  %v2195_v19 = vsel %vm2191_vm11, %v9569_v13, %v2194_v61  ;;  %v2236_v22 = vshll.u32 %v2233_v43, 16  ;;  %v2617_v39 = vsel %vm2610_vm12, %v2613_v60, %v2616_v63 }
 0x235   : > { %v2215_v10 = vshrl.u32 %v2211_v36, 16  ;;  %v2225_v0 = vadd.s32 %v2223_v59, %v2221_v4  ;;  %v2235_v52 = vmul.u32 %v2231_v33, %v2207_v48  ;;  %v2618_v38 = vsel %vm2608_vm9, nan, %v2617_v39 }
 0x236   : > { %v2405_v28 = vadd.s32 %v9545_v30, %v9542_v37  ;;  %v6888_v9 = vadd.s32 4294967294, %v2417_v21  ;;  %vm2240_vm6 = vc.u32 %v2232_v16, %v2236_v22  ;;  %v5710_v2 = vadd.f32 1.0, %v2618_v38  ;;  %v14004_v38 = vld [vmem:[#allocation65_spill] sm:$0xff] }
 0x237   : > { %v2238_v5 = vshll.u32 %v2234_v15, 16  ;;  %v2241_v50 = vsel %vm2240_vm6, 1, %v13868_v45  ;;  %v13669_v25 = vand.u32 2147483647, %v14002_v18  ;;  %v2196_v13 = vsel %vm2190_vm14, %v2193_v49, %v2195_v19 }
 0x238   : > { %vm6889_vm11 = vcmp.lt.s32.totalorder %v6888_v9, 0  ;;  %v2217_v44 = vshrl.u32 %v9629_v27, 16  ;;  %v2242_v36 = vadd.s32 %v2236_v22, %v2232_v16  ;;  %v5742_v48 = vmul.f32 0.5, %v5710_v2 }
 0x239   : > { %v2420_v33 = vsel %vm6889_vm11, 0, %v6888_v9  ;;  %v2226_v61 = vadd.s32 %v2225_v0, %v2215_v10  ;;  %v2243_v4 = vadd.s32 %v2241_v50, %v2235_v52  ;;  %v4017_v37 = vsel %vm4016_vm13, %v9373_v41, 0 }
 0x23a   : > { %v2421_v30 = vsub.s32 32, %v2420_v33  ;;  %v2422_v63 = vshll.u32 %v9637_v26, %v2420_v33  ;;  %v2425_v59 = vsub.s32 4294967266, %v2420_v33  ;;  %v9673_v60 = vadd.s32 4294967169, %v9460_v62 }
 0x23b   : > { %v5774_v54 = vsel %vm718_vm8, %v5742_v48, 0.0  ;;  %v2237_v49 = vshrl.u32 %v2233_v43, 16  ;;  %vm2244_vm14 = vc.u32 %v2242_v36, %v2238_v5  ;;  %v2250_v19 = vmul.u32 %v9584_v51, %v2196_v13  ;;  %v14003_v43 = vld [vmem:[#allocation62_spill] sm:$0xff]  ;;  %v14005_v48 = vld [vmem:[#allocation68_spill] sm:$0xff] }
 0x23c   : > { %5852 = vperm.xlu1 %7042, %v5774_v54   ;;  %v2423_v27 = vshrl.u32 %v2405_v28, %v2421_v30  ;;  %v2426_v16 = vadd.s32 127, %v2425_v59  ;;  %v2245_v21 = vsel %vm2244_vm14, 1, %v13868_v45  ;;  %v9678_v22 = vadd.s32 %v2226_v61, %v2217_v44 }
 0x23d   : > { %v2239_v41 = vshrl.u32 %v2234_v15, 16  ;;  %v2247_v39 = vadd.s32 %v2245_v21, %v2243_v4  ;;  %v2934_v26 = vand.u32 8388607, %v13669_v25  ;;  %v9682_v40 = vadd.s32 %v2242_v36, %v2238_v5 }
 0x23e   : > { %v2424_v62 = vor.u32 %v2423_v27, %v2422_v63  ;;  %v2427_v10 = vshll.u32 %v2426_v16, 23  ;;  %v2944_v0 = vshll.u32 %v13865_v55, %v14003_v43  ;;  %v2945_v28 = vshrl.u32 %v13869_v11, %v14004_v38 }
 0x23f   : > { %v2248_v52 = vadd.s32 %v2247_v39, %v2237_v49  ;;  %v2947_v51 = vshll.u32 %v13869_v11, %v14003_v43  ;;  %v2948_v15 = vshrl.u32 %v13870_v46, %v14004_v38  ;;  %v2950_v50 = vshll.u32 %v13870_v46, %v14003_v43  ;;  %v14009_v39 = vld [vmem:[#allocation88_spill] sm:$0xff] }
 0x240   : > { %v2428_v9 = vor.u32 4788187, %v2427_v10  ;;  %v2431_v2 = vcvt.s32.f32 %v2424_v62  ;;  %v2951_v5 = vshrl.u32 %v13780_v35, %v14004_v38  ;;  %v2435_v13 = vsub.s32 4, %v9627_v56 }
 0x241   : > { %v2249_v44 = vadd.s32 %v2248_v52, %v2239_v41  ;;  %v9697_v36 = vor.u32 %v2948_v15, %v2947_v51  ;;  %vm2959_vm12 = vcmp.lt.s32.totalorder %v14005_v48, 1  ;;  %vm2252_vm5 = vc.u32 %v9678_v22, %v9682_v40 }
 0x242   : > { %v2429_v33 = vand.u32 2147483647, %v2428_v9  ;;  %v9702_v61 = vor.u32 %v2945_v28, %v2944_v0  ;;  %v9704_v4 = vor.u32 %v2951_v5, %v2950_v50  ;;  %v2935_v63 = vor.u32 8388608, %v2934_v26  ;;  %v14010_v26 = vld [vmem:[#allocation80_spill] sm:$0xff]  ;;  %v14011_v28 = vld [vmem:[#allocation85_spill] sm:$0xff] }
 0x243   : > { %v2253_v30 = vadd.s32 1, %v2249_v44  ;;  %vm2960_vm4 = vcmp.lt.s32.totalorder %v14005_v48, 2  ;;  %vm2961_vm13 = vcmp.lt.s32.totalorder %v14005_v48, 3  ;;  %v9710_v59 = vshrl.u32 %v13777_v31, %v9594_v42 }
 0x244   : > { %vm2313_vm0 = vcmp.lt.s32.totalorder %v13975_v57, 0  ;;  %v2432_v54 = vmul.f32 %v2431_v2, %v2429_v33  ;;  %v2971_v49 = vsel %vm2959_vm12, %v9697_v36, %v9704_v4  ;;  %v14006_v27 = vand.u32 2147483647, %v13975_v57 }
 0x245   : > { %v2436_v21 = vsel %vm2313_vm0, %v2435_v13, %v9627_v56  ;;  %v2254_v41 = vsel %vm2252_vm5, %v2253_v30, %v2249_v44  ;;  %v2973_v62 = vsel %vm2961_vm13, %v14010_v26, %v14009_v39  ;;  %v2967_v0 = vsel %vm2959_vm12, %v9702_v61, %v9697_v36 }
 0x246   : > { %vm9719_vm8 = vcmp.le.f32.partialorder %v14006_v27, 0.7853982  ;;  %v2433_v10 = vxor.u32 2147483648, %v2432_v54  ;;  %v2255_v43 = vadd.s32 %v2254_v41, %v2250_v19  ;;  %v2974_v52 = vsel %vm2960_vm4, %v2971_v49, %v2973_v62 }
 0x247   : > { %v2969_v56 = vsel %vm2961_vm13, %v9704_v4, %v14011_v28  ;;  %v9740_v51 = vshll.u32 %v2935_v63, 8  ;;  %v2978_v15 = vand.u32 65535, %v2974_v52  ;;  %v2979_v9 = vshrl.u32 %v2974_v52, 16 }
 0x248   : > { %v9744_v19 = vshrl.u32 %v13778_v53, %v9594_v42  ;;  %v9746_v2 = vshrl.u32 %v4017_v37, 5  ;;  %v2434_v50 = vsel %vm2313_vm0, %v2433_v10, %v2432_v54  ;;  %v2256_v5 = vadd.s32 536870912, %v2255_v43  ;;  %v7133_v54 = vld [vmem:[%s7354_s11 + $0xc8] sm:$0xff] }
 0x249   : > { %v9750_v13 = vand.u32 31, %v4017_v37  ;;  %v9755_v44 = vsel %vm9719_vm8, %v13975_v57, %v2434_v50  ;;  %v2976_v33 = vand.u32 65535, %v9740_v51  ;;  %v2977_v30 = vshrl.u32 %v9740_v51, 16 }
 0x24a   : > { %14012 = vst [vmem:[#allocation40_spill] sm:$0xff] %v9746_v2  ;;  %v2438_v63 = vsel %vm9719_vm8, 0, %v2436_v21  ;;  %v2439_v49 = vmul.f32 %v9755_v44, %v9755_v44  ;;  %v9763_v27 = vshrl.u32 %v2256_v5, 30  ;;  %v2970_v37 = vsel %vm2960_vm4, %v2967_v0, %v2969_v56 }
 0x24b   : > { %14013 = vst [vmem:[#allocation11_spill] sm:$0xff] %v9750_v13  ;;  %v9768_v41 = vmul.f32 6.1599855, %v7133_v54  ;;  %v2980_v39 = vmul.u32 %v2978_v15, %v2976_v33  ;;  %v9770_v26 = vmul.u32 %v2979_v9, %v2976_v33  ;;  %v9772_v62 = vmul.u32 %v2978_v15, %v2977_v30  ;;  %v7134_v15 = vld [vmem:[%s7354_s11 + $0xc0] sm:$0xff] }
 0x24c   : > { %v9775_v16 = vadd.s32 1, %v9673_v60  ;;  %v2440_v21 = vmul.f32 -0.001358992, %v2439_v49  ;;  %v2447_v10 = vmul.f32 -0.00019511016, %v2439_v49  ;;  %v2258_v52 = vshll.u32 %v9763_v27, 30 }
 0x24d   : > { %14014 = vst [vmem:[#allocation32_spill] sm:$0xff] %v9768_v41  ;;  %v9778_v28 = vand.u32 3, %v2438_v63  ;;  %v2984_v0 = vshll.u32 %v9770_v26, 16  ;;  %v3000_v56 = vand.u32 65535, %v2970_v37  ;;  %v3001_v50 = vshrl.u32 %v2970_v37, 16 }
 0x24e   : > { %v2441_v5 = vadd.f32 0.041655596, %v2440_v21  ;;  %v2448_v54 = vadd.f32 0.008332121, %v2447_v10  ;;  %v9781_v25 = vsub.s32 %v2255_v43, %v2258_v52  ;;  %v2983_v12 = vmul.u32 %v2979_v9, %v2977_v30 }
 0x24f   : > { %v9784_v1 = vmul.f32 6.1599855, %v7134_v15  ;;  %v2943_v60 = vshrl.u32 %v13865_v55, %v14004_v38  ;;  %v2986_v42 = vshll.u32 %v9772_v62, 16  ;;  %vm2988_vm15 = vc.u32 %v2980_v39, %v2984_v0 }
 0x250   : > { %v2442_v63 = vmul.f32 %v2441_v5, %v2439_v49  ;;  %v2449_v20 = vmul.f32 %v2448_v54, %v2439_v49  ;;  %vm2260_vm10 = vcmp.lt.s32.totalorder %v9781_v25, 0  ;;  %v2261_v37 = vsub.s32 0, %v9781_v25 }
 0x251   : > { %14015 = vst [vmem:[#allocation39_spill] sm:$0xff] %v9784_v1  ;;  %vm2457_vm9 = vcmp.eq.s32.totalorder %v9778_v28, 0  ;;  %v2989_v43 = vsel %vm2988_vm15, 1, %v13868_v45  ;;  %v2990_v9 = vadd.s32 %v2984_v0, %v2980_v39  ;;  %v3002_v21 = vmul.u32 %v3000_v56, %v2976_v33 }
 0x252   : > { %v9793_v10 = vmul.u32 %v3001_v50, %v2976_v33  ;;  %v2443_v52 = vadd.f32 -0.4999988, %v2442_v63  ;;  %v2450_v15 = vadd.f32 -0.16666654, %v2449_v20  ;;  %vm2456_vm6 = vcmp.lt.s32.totalorder %v9778_v28, 2 }
 0x253   : > { %v2262_v38 = vsel %vm2260_vm10, %v2261_v37, %v9781_v25  ;;  %v2991_v5 = vadd.s32 %v2989_v43, %v2983_v12  ;;  %vm2454_vm11 = vweird.f32 %v13975_v57  ;;  %vm14016_vm14 = vcmp.lt.s32.totalorder %v14005_v48, 4 }
 0x254   : > { %v2263_v54 = vclz %v2262_v38  ;;  %v2964_v8 = vsel %vm14016_vm14, %v9704_v4, 2102212464  ;;  %vm2992_vm5 = vc.u32 %v2990_v9, %v2986_v42  ;;  %v9801_v58 = vmul.u32 %v3000_v56, %v2977_v30 }
 0x255   : > { %v2444_v39 = vmul.f32 %v2443_v52, %v2439_v49  ;;  %v2451_v33 = vmul.f32 %v2450_v15, %v2439_v49  ;;  %v2993_v0 = vsel %vm2992_vm5, 1, %v13868_v45  ;;  %v3006_v20 = vshll.u32 %v9793_v10, 16 }
 0x256   : > { %vm2460_vm0 = vcmp.eq.s32.totalorder %v9778_v28, 2  ;;  %v2251_v12 = vadd.s32 %v9682_v40, %v9678_v22  ;;  %v6885_v63 = vadd.s32 4294967294, %v2263_v54  ;;  %v2985_v37 = vshrl.u32 %v9770_v26, 16 }
 0x257   : > { %v2445_v43 = vadd.f32 1.0, %v2444_v39  ;;  %v2452_v38 = vadd.f32 1.0, %v2451_v33  ;;  %v2995_v4 = vadd.s32 %v2993_v0, %v2991_v5  ;;  %vm3010_vm8 = vc.u32 %v3002_v21, %v3006_v20 }
 0x258   : > { %vm6886_vm15 = vcmp.lt.s32.totalorder %v6885_v63, 0  ;;  %v2963_v42 = vsel %vm2959_vm12, %v2943_v60, %v9702_v61  ;;  %v2965_v49 = vsel %vm2961_vm13, %v9697_v36, %v2964_v8  ;;  %v3005_v56 = vmul.u32 %v3001_v50, %v2977_v30 }
 0x259   : > { %v2453_v9 = vmul.f32 %v2452_v38, %v9755_v44  ;;  %v2461_v22 = vxor.u32 2147483648, %v2445_v43  ;;  %v2266_v40 = vsel %vm6886_vm15, 0, %v6885_v63  ;;  %v3008_v26 = vshll.u32 %v9801_v58, 16 }
 0x25a   : > { %v2267_v52 = vsub.s32 32, %v2266_v40  ;;  %v2268_v15 = vshll.u32 %v9781_v25, %v2266_v40  ;;  %v2271_v5 = vsub.s32 4294967266, %v2266_v40  ;;  %v3011_v54 = vsel %vm3010_vm8, 1, %v13868_v45 }
 0x25b   : > { %v2458_v39 = vxor.u32 2147483648, %v2453_v9  ;;  %v2462_v61 = vsel %vm2460_vm0, %v2461_v22, %v2453_v9  ;;  %v2987_v60 = vshrl.u32 %v9772_v62, 16  ;;  %v2996_v8 = vadd.s32 %v2995_v4, %v2985_v37 }
 0x25c   : > { %v2269_v36 = vshrl.u32 %v2251_v12, %v2267_v52  ;;  %v2272_v30 = vadd.s32 127, %v2271_v5  ;;  %v2966_v44 = vsel %vm2960_vm4, %v2963_v42, %v2965_v49  ;;  %v3012_v50 = vadd.s32 %v3006_v20, %v3002_v21  ;;  %v7135_v49 = vld [vmem:[%s7354_s11 + $0x50] sm:$0xff]  ;;  %v14020_v5 = vld [vmem:[#allocation66_spill] sm:$0xff] }
 0x25d   : > { %v2459_v33 = vsel %vm2457_vm9, %v2445_v43, %v2458_v39  ;;  %v3007_v25 = vshrl.u32 %v9793_v10, 16  ;;  %v3009_v0 = vshrl.u32 %v9801_v58, 16  ;;  %v3013_v63 = vadd.s32 %v3011_v54, %v3005_v56  ;;  %v14021_v39 = vld [vmem:[#allocation74_spill] sm:$0xff] }
 0x25e   : > { %v2463_v38 = vsel %vm2456_vm6, %v2459_v33, %v2462_v61  ;;  %v2270_v62 = vor.u32 %v2269_v36, %v2268_v15  ;;  %v2273_v37 = vshll.u32 %v2272_v30, 23  ;;  %vm3014_vm12 = vc.u32 %v3012_v50, %v3008_v26 }
 0x25f   : > { %vm13683_vm13 = vcmp.lt.s32.totalorder %v9432_v14, 4  ;;  %v2464_v48 = vsel %vm2454_vm11, nan, %v2463_v38  ;;  %v9833_v21 = vadd.s32 %v2996_v8, %v2987_v60  ;;  %v3015_v20 = vsel %vm3014_vm12, 1, %v13868_v45 }
 0x260   : > { %v9836_v10 = vadd.s32 %v3012_v50, %v3008_v26  ;;  %v5709_v58 = vadd.f32 1.0, %v2464_v48  ;;  %v2274_v12 = vor.u32 4788187, %v2273_v37  ;;  %v2277_v43 = vcvt.s32.f32 %v2270_v62  ;;  %v14019_v26 = vld [vmem:[#allocation33_spill] sm:$0xff] }
 0x261   : > { %v3017_v28 = vadd.s32 %v3015_v20, %v3013_v63  ;;  %v9840_v4 = vor.u32 %v9710_v59, %v9598_v17  ;;  %v4190_v42 = vor.u32 %v9744_v19, %v9621_v3  ;;  %v9845_v57 = vsub.s32 32, %v9750_v13 }
 0x262   : > { %vm717_vm4 = vcmp.le.f32.partialorder %v7135_v49, 0.51  ;;  %v9850_v56 = vshll.u32 %v13780_v35, %v9750_v13  ;;  %v5741_v9 = vmul.f32 0.5, %v5709_v58  ;;  %v2275_v22 = vand.u32 2147483647, %v2274_v12  ;;  %v14026_v49 = vld [vmem:[#allocation81_spill] sm:$0xff] }
 0x263   : > { %14017 = vst [vmem:[#allocation42_spill] sm:$0xff] %v9840_v4  ;;  %v3018_v40 = vadd.s32 %v3017_v28, %v3007_v25  ;;  %vm2159_vm10 = vcmp.lt.s32.totalorder %v13991_v32, 0  ;;  %v2281_v17 = vsub.s32 4, %v9763_v27  ;;  %v3020_v59 = vmul.u32 %v9740_v51, %v2966_v44 }
 0x264   : > { %14018 = vst [vmem:[#allocation54_spill] sm:$0xff] %v9845_v57  ;;  %v13678_v3 = vand.u32 2147483647, %v14019_v26  ;;  %v5773_v19 = vsel %vm717_vm4, %v5741_v9, 0.0  ;;  %v2278_v52 = vmul.f32 %v2277_v43, %v2275_v22  ;;  %vm3022_vm9 = vc.u32 %v9833_v21, %v9836_v10 }
 0x265   : > { %v3019_v15 = vadd.s32 %v3018_v40, %v3009_v0  ;;  %5847 = vperm.xlu0 %7041, %v5773_v19   ;;  %v2793_v54 = vshll.u32 %v13869_v11, %v14020_v5  ;;  %v2794_v61 = vshrl.u32 %v13870_v46, %v14021_v39  ;;  %v2796_v60 = vshll.u32 %v13870_v46, %v14020_v5 }
 0x266   : > { %v2797_v51 = vshrl.u32 %v13780_v35, %v14021_v39  ;;  %v9868_v8 = vshll.u32 %v13777_v31, %v9750_v13  ;;  %v14022_v36 = vand.u32 2147483647, %v13991_v32  ;;  %v2279_v44 = vxor.u32 2147483648, %v2278_v52  ;;  %v7136_v13 = vld [vmem:[%s7354_s11 + $0x48] sm:$0xff] }
 0x267   : > { %v3023_v50 = vadd.s32 1, %v3019_v15  ;;  %vm4786_vm11 = vcmp.gt.s32.totalorder %v9775_v16, 0  ;;  %v2282_v33 = vsel %vm2159_vm10, %v2281_v17, %v9763_v27  ;;  %v2790_v25 = vshll.u32 %v13865_v55, %v14020_v5 }
 0x268   : > { %vm9872_vm6 = vcmp.le.f32.partialorder %v14022_v36, 0.7853982  ;;  %v2791_v0 = vshrl.u32 %v13869_v11, %v14021_v39  ;;  %v2280_v38 = vsel %vm2159_vm10, %v2279_v44, %v2278_v52  ;;  %v2780_v37 = vand.u32 8388607, %v13678_v3  ;;  %v14028_v44 = vld [vmem:[#allocation94_spill] sm:$0xff] }
 0x269   : > { %v3024_v62 = vsel %vm3022_vm9, %v3023_v50, %v3019_v15  ;;  %v9895_v27 = vsel %vm9872_vm6, %v13991_v32, %v2280_v38  ;;  %v9897_v20 = vor.u32 %v2794_v61, %v2793_v54  ;;  %v9899_v58 = vor.u32 %v2797_v51, %v2796_v60 }
 0x26a   : > { %v3025_v48 = vadd.s32 %v3024_v62, %v3020_v59  ;;  %v9904_v12 = vsel %vm13683_vm13, %v9840_v4, 920167782  ;;  %v2284_v43 = vsel %vm9872_vm6, 0, %v2282_v33  ;;  %v2285_v28 = vmul.f32 %v9895_v27, %v9895_v27  ;;  %v14029_v33 = vld [vmem:[#allocation95_spill] sm:$0xff] }
 0x26b   : > { %14025 = vst [vmem:[#allocation47_spill] sm:$0xff] %v9904_v12  ;;  %vm2805_vm14 = vcmp.lt.s32.totalorder %v14026_v49, 1  ;;  %v9913_v9 = vsel %vm13683_vm13, %v4190_v42, 1326507024  ;;  %v9917_v22 = vshrl.u32 %v13777_v31, %v9845_v57  ;;  %v2792_v17 = vor.u32 %v2791_v0, %v2790_v25  ;;  %v14030_v25 = vld [vmem:[#allocation86_spill] sm:$0xff] }
 0x26c   : > { %14027 = vst [vmem:[#allocation53_spill] sm:$0xff] %v9913_v9  ;;  %v3026_v40 = vadd.s32 536870912, %v3025_v48  ;;  %v2286_v59 = vmul.f32 -0.001358992, %v2285_v28  ;;  %v2293_v19 = vmul.f32 -0.00019511016, %v2285_v28  ;;  %v2817_v42 = vsel %vm2805_vm14, %v9897_v20, %v9899_v58 }
 0x26d   : > { %v2781_v52 = vor.u32 8388608, %v2780_v37  ;;  %vm2807_vm5 = vcmp.lt.s32.totalorder %v14026_v49, 3  ;;  %v9920_v15 = vand.u32 3, %v2284_v43  ;;  %vm2806_vm0 = vcmp.lt.s32.totalorder %v14026_v49, 2 }
 0x26e   : > { %v9922_v5 = vshrl.u32 %v3026_v40, 30  ;;  %v9931_v54 = vshrl.u32 %v13778_v53, %v9845_v57  ;;  %v9936_v61 = vsel %vm4786_vm11, %v9775_v16, 0  ;;  %v2287_v60 = vadd.f32 0.041655596, %v2286_v59 }
 0x26f   : > { %v2294_v51 = vadd.f32 0.008332121, %v2293_v19  ;;  %v2813_v30 = vsel %vm2805_vm14, %v2792_v17, %v9897_v20  ;;  %v2815_v50 = vsel %vm2807_vm5, %v9899_v58, %v14028_v44  ;;  %v2819_v0 = vsel %vm2807_vm5, %v14030_v25, %v14029_v33 }
 0x270   : > { %v3028_v36 = vshll.u32 %v9922_v5, 30  ;;  %v2288_v16 = vmul.f32 %v2287_v60, %v2285_v28  ;;  %v2820_v62 = vsel %vm2806_vm0, %v2817_v42, %v2819_v0  ;;  %v9952_v37 = vshll.u32 %v2781_v52, 8 }
 0x271   : > { %v2295_v38 = vmul.f32 %v2294_v51, %v2285_v28  ;;  %vm2303_vm8 = vcmp.eq.s32.totalorder %v9920_v15, 0  ;;  %v2824_v40 = vand.u32 65535, %v2820_v62  ;;  %v2825_v59 = vshrl.u32 %v2820_v62, 16 }
 0x272   : > { %v9955_v43 = vsub.s32 %v3025_v48, %v3028_v36  ;;  %v2289_v19 = vadd.f32 -0.4999988, %v2288_v16  ;;  %vm2302_vm15 = vcmp.lt.s32.totalorder %v9920_v15, 2  ;;  %v2816_v33 = vsel %vm2806_vm0, %v2813_v30, %v2815_v50 }
 0x273   : > { %v2296_v44 = vadd.f32 -0.16666654, %v2295_v38  ;;  %v2822_v60 = vand.u32 65535, %v9952_v37  ;;  %vm2300_vm12 = vweird.f32 %v13991_v32  ;;  %vm2306_vm4 = vcmp.eq.s32.totalorder %v9920_v15, 2 }
 0x274   : > { %vm3030_vm10 = vcmp.lt.s32.totalorder %v9955_v43, 0  ;;  %v3031_v48 = vsub.s32 0, %v9955_v43  ;;  %v2823_v52 = vshrl.u32 %v9952_v37, 16  ;;  %v2290_v42 = vmul.f32 %v2289_v19, %v2285_v28 }
 0x275   : > { %v2297_v51 = vmul.f32 %v2296_v44, %v2285_v28  ;;  %v2826_v36 = vmul.u32 %v2824_v40, %v2822_v60  ;;  %v2827_v25 = vmul.u32 %v2825_v59, %v2822_v60  ;;  %v2789_v30 = vshrl.u32 %v13865_v55, %v14021_v39 }
 0x276   : > { %v3032_v0 = vsel %vm3030_vm10, %v3031_v48, %v9955_v43  ;;  %v9969_v50 = vmul.u32 %v2824_v40, %v2823_v52  ;;  %v2847_v16 = vshrl.u32 %v2816_v33, 16  ;;  %v2291_v38 = vadd.f32 1.0, %v2290_v42 }
 0x277   : > { %v2298_v62 = vadd.f32 1.0, %v2297_v51  ;;  %v3033_v3 = vclz %v3032_v0  ;;  %v2830_v63 = vshll.u32 %v2827_v25, 16  ;;  %v3021_v57 = vadd.s32 %v9836_v10, %v9833_v21 }
 0x278   : > { %v2829_v19 = vmul.u32 %v2825_v59, %v2823_v52  ;;  %v2832_v28 = vshll.u32 %v9969_v50, 16  ;;  %v2846_v44 = vand.u32 65535, %v2816_v33  ;;  %vm716_vm9 = vcmp.le.f32.partialorder %v7136_v13, 0.51 }
 0x279   : > { %v2299_v48 = vmul.f32 %v2298_v62, %v9895_v27  ;;  %v2307_v12 = vxor.u32 2147483648, %v2291_v38  ;;  %v6900_v39 = vadd.s32 4294967294, %v3033_v3  ;;  %vm2834_vm6 = vc.u32 %v2826_v36, %v2830_v63 }
 0x27a   : > { %v2809_v40 = vsel %vm2805_vm14, %v2789_v30, %v2792_v17  ;;  %vm14031_vm11 = vcmp.lt.s32.totalorder %v14026_v49, 4  ;;  %v2835_v21 = vsel %vm2834_vm6, 1, %v13868_v45  ;;  %v2836_v10 = vadd.s32 %v2830_v63, %v2826_v36 }
 0x27b   : > { %v2810_v42 = vsel %vm14031_vm11, %v9899_v58, 2102212464  ;;  %v2304_v59 = vxor.u32 2147483648, %v2299_v48  ;;  %v2308_v33 = vsel %vm2306_vm4, %v2307_v12, %v2299_v48  ;;  %vm6901_vm10 = vcmp.lt.s32.totalorder %v6900_v39, 0 }
 0x27c   : > { %v2849_v51 = vmul.u32 %v2847_v16, %v2822_v60  ;;  %v3036_v27 = vsel %vm6901_vm10, 0, %v6900_v39  ;;  %v2837_v0 = vadd.s32 %v2835_v21, %v2829_v19  ;;  %vm2838_vm13 = vc.u32 %v2836_v10, %v2832_v28 }
 0x27d   : > { %v2850_v3 = vmul.u32 %v2846_v44, %v2823_v52  ;;  %v2305_v17 = vsel %vm2303_vm8, %v2291_v38, %v2304_v59  ;;  %v3037_v30 = vsub.s32 32, %v3036_v27  ;;  %v3038_v62 = vshll.u32 %v9955_v43, %v3036_v27 }
 0x27e   : > { %v3041_v58 = vsub.s32 4294967266, %v3036_v27  ;;  %v2309_v63 = vsel %vm2302_vm15, %v2305_v17, %v2308_v33  ;;  %v2811_v12 = vsel %vm2807_vm5, %v9897_v20, %v2810_v42  ;;  %v2831_v36 = vshrl.u32 %v2827_v25, 16 }
 0x27f   : > { %v2848_v48 = vmul.u32 %v2846_v44, %v2822_v60  ;;  %v2310_v19 = vsel %vm2300_vm12, nan, %v2309_v63  ;;  %v3039_v28 = vshrl.u32 %v3021_v57, %v3037_v30  ;;  %v2839_v38 = vsel %vm2838_vm13, 1, %v13868_v45 }
 0x280   : > { %v3042_v39 = vadd.s32 127, %v3041_v58  ;;  %v5708_v21 = vadd.f32 1.0, %v2310_v19  ;;  %v2841_v10 = vadd.s32 %v2839_v38, %v2837_v0  ;;  %v2851_v43 = vmul.u32 %v2847_v16, %v2823_v52 }
 0x281   : > { %v2852_v59 = vshll.u32 %v2849_v51, 16  ;;  %v14032_v15 = vand.u32 2147483647, %v14002_v18  ;;  %v3040_v20 = vor.u32 %v3039_v28, %v3038_v62  ;;  %v3051_v60 = vsub.s32 4, %v9922_v5  ;;  %v14036_v28 = vld [vmem:[#allocation70_spill] sm:$0xff] }
 0x282   : > { %v3043_v25 = vshll.u32 %v3042_v39, 23  ;;  %v2854_v32 = vshll.u32 %v2850_v3, 16  ;;  %v5740_v44 = vmul.f32 0.5, %v5708_v21  ;;  %v2833_v57 = vshrl.u32 %v9969_v50, 16 }
 0x283   : > { %vm9997_vm14 = vcmp.le.f32.partialorder %v14032_v15, 0.7853982  ;;  %v2842_v42 = vadd.s32 %v2841_v10, %v2831_v36  ;;  %vm2856_vm13 = vc.u32 %v2848_v48, %v2852_v59  ;;  %v3047_v0 = vcvt.s32.f32 %v3040_v20 }
 0x284   : > { %v3044_v27 = vor.u32 4788187, %v3043_v25  ;;  %v2857_v52 = vsel %vm2856_vm13, 1, %v13868_v45  ;;  %v2858_v16 = vadd.s32 %v2852_v59, %v2848_v48  ;;  %v5772_v17 = vsel %vm716_vm9, %v5740_v44, 0.0  ;;  %v14035_v48 = vld [vmem:[#allocation36_spill] sm:$0xff] }
 0x285   : > { %vm2929_vm5 = vcmp.lt.s32.totalorder %v14002_v18, 0  ;;  %v2812_v30 = vsel %vm2806_vm0, %v2809_v40, %v2811_v12  ;;  %v2859_v62 = vadd.s32 %v2857_v52, %v2851_v43  ;;  %5842 = vperm.xlu2 %7043, %v5772_v17   ;;  %v2853_v63 = vshrl.u32 %v2849_v51, 16 }
 0x286   : > { %v3045_v58 = vand.u32 2147483647, %v3044_v27  ;;  %v3052_v50 = vsel %vm2929_vm5, %v3051_v60, %v9922_v5  ;;  %vm2860_vm8 = vc.u32 %v2858_v16, %v2854_v32  ;;  %v2855_v36 = vshrl.u32 %v2850_v3, 16  ;;  %v14037_v5 = vld [vmem:[#allocation79_spill] sm:$0xff] }
 0x287   : > { %v2861_v19 = vsel %vm2860_vm8, 1, %v13868_v45  ;;  %v13684_v13 = vand.u32 2147483647, %v14035_v48  ;;  %v2636_v39 = vshll.u32 %v13865_v55, %v14036_v28  ;;  %v10015_v49 = vadd.s32 %v2842_v42, %v2833_v57 }
 0x288   : > { %v3048_v38 = vmul.f32 %v3047_v0, %v3045_v58  ;;  %v10017_v40 = vadd.s32 %v2858_v16, %v2854_v32  ;;  %v2863_v12 = vadd.s32 %v2861_v19, %v2859_v62  ;;  %v2637_v51 = vshrl.u32 %v13869_v11, %v14037_v5  ;;  %v14038_v0 = vld [vmem:[#allocation83_spill] sm:$0xff] }
 0x289   : > { %v2626_v21 = vand.u32 8388607, %v13684_v13  ;;  %v2639_v3 = vshll.u32 %v13869_v11, %v14036_v28  ;;  %v2640_v10 = vshrl.u32 %v13870_v46, %v14037_v5  ;;  %v2642_v15 = vshll.u32 %v13870_v46, %v14036_v28 }
 0x28a   : > { %v3049_v43 = vxor.u32 2147483648, %v3048_v38  ;;  %v2864_v59 = vadd.s32 %v2863_v12, %v2853_v63  ;;  %v2643_v20 = vshrl.u32 %v13780_v35, %v14037_v5  ;;  %v3054_v25 = vsel %vm9997_vm14, 0, %v3052_v50  ;;  %v14040_v63 = vld [vmem:[#allocation97_spill] sm:$0xff] }
 0x28b   : > { %v2866_v60 = vmul.u32 %v9952_v37, %v2812_v30  ;;  %v10034_v32 = vor.u32 %v2637_v51, %v2636_v39  ;;  %v10036_v44 = vor.u32 %v2640_v10, %v2639_v3  ;;  %vm2651_vm0 = vcmp.lt.s32.totalorder %v14038_v0, 1  ;;  %v14042_v51 = vld [vmem:[#allocation96_spill] sm:$0xff] }
 0x28c   : > { %v3050_v57 = vsel %vm2929_vm5, %v3049_v43, %v3048_v38  ;;  %v2865_v42 = vadd.s32 %v2864_v59, %v2855_v36  ;;  %v2644_v27 = vor.u32 %v2643_v20, %v2642_v15  ;;  %vm2868_vm15 = vc.u32 %v10015_v49, %v10017_v40  ;;  %v14041_v36 = vld [vmem:[#allocation90_spill] sm:$0xff] }
 0x28d   : > { %v10044_v52 = vsel %vm9997_vm14, %v14002_v18, %v3050_v57  ;;  %v2627_v37 = vor.u32 8388608, %v2626_v21  ;;  %vm2653_vm12 = vcmp.lt.s32.totalorder %v14038_v0, 3  ;;  %v14039_v16 = vand.u32 2139095040, %v9768_v41  ;;  %v7137_v57 = vld [vmem:[%s7354_s11 + $0xe8] sm:$0xff] }
 0x28e   : > { %v3055_v30 = vmul.f32 %v10044_v52, %v10044_v52  ;;  %v2869_v62 = vadd.s32 1, %v2865_v42  ;;  %vm2652_vm4 = vcmp.lt.s32.totalorder %v14038_v0, 2  ;;  %v10057_v58 = vand.u32 3, %v3054_v25 }
 0x28f   : > { %v10051_v17 = vshrl.u32 %v14039_v16, 23  ;;  %v2663_v50 = vsel %vm2651_vm0, %v10036_v44, %v2644_v27  ;;  %v2665_v19 = vsel %vm2653_vm12, %v14041_v36, %v14040_v63  ;;  %v2659_v12 = vsel %vm2651_vm0, %v10034_v32, %v10036_v44 }
 0x290   : > { %v3056_v28 = vmul.f32 -0.001358992, %v3055_v30  ;;  %v3063_v39 = vmul.f32 -0.00019511016, %v3055_v30  ;;  %v2870_v38 = vsel %vm2868_vm15, %v2869_v62, %v2865_v42  ;;  %v2661_v3 = vsel %vm2653_vm12, %v2644_v27, %v14042_v51 }
 0x291   : > { %v2871_v21 = vadd.s32 %v2870_v38, %v2866_v60  ;;  %v2666_v10 = vsel %vm2652_vm4, %v2663_v50, %v2665_v19  ;;  %v10075_v43 = vshll.u32 %v2627_v37, 8  ;;  %v10078_v42 = vmul.f32 6.1599855, %v7137_v57 }
 0x292   : > { %v3057_v59 = vadd.f32 0.041655596, %v3056_v28  ;;  %v3064_v15 = vadd.f32 0.008332121, %v3063_v39  ;;  %v2670_v20 = vand.u32 65535, %v2666_v10  ;;  %v2671_v25 = vshrl.u32 %v2666_v10, 16 }
 0x293   : > { %14043 = vst [vmem:[#allocation13_spill] sm:$0xff] %v10078_v42  ;;  %v2872_v16 = vadd.s32 536870912, %v2871_v21  ;;  %v2668_v62 = vand.u32 65535, %v10075_v43  ;;  %v2669_v60 = vshrl.u32 %v10075_v43, 16  ;;  %v10084_v63 = vor.u32 %v9917_v22, %v9850_v56 }
 0x294   : > { %v3058_v36 = vmul.f32 %v3057_v59, %v3055_v30  ;;  %v3065_v50 = vmul.f32 %v3064_v15, %v3055_v30  ;;  %v2662_v37 = vsel %vm2652_vm4, %v2659_v12, %v2661_v3  ;;  %vm3073_vm9 = vcmp.eq.s32.totalorder %v10057_v58, 0 }
 0x295   : > { %14044 = vst [vmem:[#allocation35_spill] sm:$0xff] %v10084_v63  ;;  %v10089_v19 = vshrl.u32 %v2872_v16, 30  ;;  %v2672_v28 = vmul.u32 %v2670_v20, %v2668_v62  ;;  %v2673_v39 = vmul.u32 %v2671_v25, %v2668_v62  ;;  %v10091_v38 = vmul.u32 %v2670_v20, %v2669_v60 }
 0x296   : > { %v3059_v51 = vadd.f32 -0.4999988, %v3058_v36  ;;  %v3066_v10 = vadd.f32 -0.16666654, %v3065_v50  ;;  %vm3072_vm6 = vcmp.lt.s32.totalorder %v10057_v58, 2  ;;  %vm3076_vm11 = vcmp.eq.s32.totalorder %v10057_v58, 2 }
 0x297   : > { %v2692_v56 = vand.u32 65535, %v2662_v37  ;;  %v2874_v22 = vshll.u32 %v10089_v19, 30  ;;  %v2635_v12 = vshrl.u32 %v13865_v55, %v14037_v5  ;;  %v2675_v3 = vmul.u32 %v2671_v25, %v2669_v60 }
 0x298   : > { %v2676_v59 = vshll.u32 %v2673_v39, 16  ;;  %v3060_v15 = vmul.f32 %v3059_v51, %v3055_v30  ;;  %v3067_v57 = vmul.f32 %v3066_v10, %v3055_v30  ;;  %v2678_v20 = vshll.u32 %v10091_v38, 16  ;;  %v7138_v51 = vld [vmem:[%s7354_s11 + $0x70] sm:$0xff] }
 0x299   : > { %v2693_v16 = vshrl.u32 %v2662_v37, 16  ;;  %v10099_v36 = vsub.s32 %v2871_v21, %v2874_v22  ;;  %vm14045_vm10 = vcmp.lt.s32.totalorder %v14038_v0, 4  ;;  %v2694_v5 = vmul.u32 %v2692_v56, %v2668_v62 }
 0x29a   : > { %v2656_v50 = vsel %vm14045_vm10, %v2644_v27, 2102212464  ;;  %vm2680_vm14 = vc.u32 %v2672_v28, %v2676_v59  ;;  %v2682_v13 = vadd.s32 %v2676_v59, %v2672_v28  ;;  %v3061_v33 = vadd.f32 1.0, %v3060_v15 }
 0x29b   : > { %v3068_v41 = vadd.f32 1.0, %v3067_v57  ;;  %v2681_v4 = vsel %vm2680_vm14, 1, %v13868_v45  ;;  %vm2876_vm13 = vcmp.lt.s32.totalorder %v10099_v36, 0  ;;  %v2877_v25 = vsub.s32 0, %v10099_v36 }
 0x29c   : > { %v2683_v30 = vadd.s32 %v2681_v4, %v2675_v3  ;;  %vm2684_vm5 = vc.u32 %v2682_v13, %v2678_v20  ;;  %vm721_vm8 = vcmp.le.f32.partialorder %v7138_v51, 0.51  ;;  %v3077_v37 = vxor.u32 2147483648, %v3061_v33 }
 0x29d   : > { %v3069_v21 = vmul.f32 %v3068_v41, %v10044_v52  ;;  %v2685_v27 = vsel %vm2684_vm5, 1, %v13868_v45  ;;  %v2695_v10 = vmul.u32 %v2693_v16, %v2668_v62  ;;  %v2878_v28 = vsel %vm2876_vm13, %v2877_v25, %v10099_v36 }
 0x29e   : > { %v2655_v22 = vsel %vm2651_vm0, %v2635_v12, %v10034_v32  ;;  %v2657_v59 = vsel %vm2653_vm12, %v10036_v44, %v2656_v50  ;;  %v2696_v4 = vmul.u32 %v2692_v56, %v2669_v60  ;;  %v2879_v41 = vclz %v2878_v28 }
 0x29f   : > { %v3074_v13 = vxor.u32 2147483648, %v3069_v21  ;;  %v3078_v3 = vsel %vm3076_vm11, %v3077_v37, %v3069_v21  ;;  %v2698_v52 = vshll.u32 %v2695_v10, 16  ;;  %vm3070_vm15 = vweird.f32 %v14002_v18  ;;  %v14046_v18 = vld [vmem:[#allocation38_spill] sm:$0xff] }
 0x2a0   : > { %v2867_v62 = vadd.s32 %v10017_v40, %v10015_v49  ;;  %v2677_v15 = vshrl.u32 %v2673_v39, 16  ;;  %v2687_v57 = vadd.s32 %v2685_v27, %v2683_v30  ;;  %v6897_v12 = vadd.s32 4294967294, %v2879_v41 }
 0x2a1   : > { %v3075_v32 = vsel %vm3073_vm9, %v3061_v33, %v3074_v13  ;;  %v10125_v44 = vsel %vm2652_vm4, %v2655_v22, %v2657_v59  ;;  %vm2702_vm0 = vc.u32 %v2694_v5, %v2698_v52  ;;  %v2697_v20 = vmul.u32 %v2693_v16, %v2669_v60 }
 0x2a2   : > { %v3079_v56 = vsel %vm3072_vm6, %v3075_v32, %v3078_v3  ;;  %v2700_v50 = vshll.u32 %v2696_v4, 16  ;;  %v13688_v25 = vand.u32 2147483647, %v14046_v18  ;;  %vm6898_vm12 = vcmp.lt.s32.totalorder %v6897_v12, 0 }
 0x2a3   : > { %v3080_v21 = vsel %vm3070_vm15, nan, %v3079_v56  ;;  %v2703_v49 = vsel %vm2702_vm0, 1, %v13868_v45  ;;  %v2704_v40 = vadd.s32 %v2698_v52, %v2694_v5  ;;  %vm2775_vm9 = vcmp.lt.s32.totalorder %v14019_v26, 0  ;;  %v14048_v56 = vld [vmem:[#allocation82_spill] sm:$0xff] }
 0x2a4   : > { %v5713_v39 = vadd.f32 1.0, %v3080_v21  ;;  %v2882_v33 = vsel %vm6898_vm12, 0, %v6897_v12  ;;  %v2679_v0 = vshrl.u32 %v10091_v38, 16  ;;  %v2688_v30 = vadd.s32 %v2687_v57, %v2677_v15 }
 0x2a5   : > { %v2883_v37 = vsub.s32 32, %v2882_v33  ;;  %v2884_v58 = vshll.u32 %v10099_v36, %v2882_v33  ;;  %v2887_v27 = vsub.s32 4294967266, %v2882_v33  ;;  %v2712_v60 = vmul.u32 %v10075_v43, %v10125_v44  ;;  %v14047_v44 = vld [vmem:[#allocation71_spill] sm:$0xff] }
 0x2a6   : > { %v5745_v16 = vmul.f32 0.5, %v5713_v39  ;;  %v2897_v28 = vsub.s32 4, %v10089_v19  ;;  %v2705_v22 = vadd.s32 %v2703_v49, %v2697_v20  ;;  %v3396_v5 = vand.u32 8388607, %v13688_v25  ;;  %v14049_v33 = vld [vmem:[#allocation87_spill] sm:$0xff] }
 0x2a7   : > { %v2885_v59 = vshrl.u32 %v2867_v62, %v2883_v37  ;;  %v2888_v13 = vadd.s32 127, %v2887_v27  ;;  %v2699_v3 = vshrl.u32 %v2695_v10, 16  ;;  %vm2706_vm4 = vc.u32 %v2704_v40, %v2700_v50 }
 0x2a8   : > { %v5777_v38 = vsel %vm721_vm8, %v5745_v16, 0.0  ;;  %v10140_v41 = vadd.s32 %v2688_v30, %v2679_v0  ;;  %v2701_v36 = vshrl.u32 %v2696_v4, 16  ;;  %v2707_v52 = vsel %vm2706_vm4, 1, %v13868_v45 }
 0x2a9   : > { %5867 = vperm.xlu1 %7042, %v5777_v38   ;;  %v2886_v43 = vor.u32 %v2885_v59, %v2884_v58  ;;  %v2889_v15 = vshll.u32 %v2888_v13, 23  ;;  %v10143_v57 = vadd.s32 %v2704_v40, %v2700_v50  ;;  %v2709_v32 = vadd.s32 %v2707_v52, %v2705_v22  ;;  %v14055_v38 = vld [vmem:[#allocation98_spill] sm:$0xff] }
 0x2aa   : > { %v3397_v12 = vor.u32 8388608, %v3396_v5  ;;  %v3406_v62 = vshll.u32 %v13865_v55, %v14047_v44  ;;  %v3407_v10 = vshrl.u32 %v13869_v11, %v14048_v56  ;;  %v3409_v51 = vshll.u32 %v13869_v11, %v14047_v44 }
 0x2ab   : > { %v2890_v20 = vor.u32 4788187, %v2889_v15  ;;  %v2893_v4 = vcvt.s32.f32 %v2886_v43  ;;  %v2710_v21 = vadd.s32 %v2709_v32, %v2699_v3  ;;  %v3410_v49 = vshrl.u32 %v13870_v46, %v14048_v56 }
 0x2ac   : > { %v10153_v39 = vor.u32 %v3407_v10, %v3406_v62  ;;  %v3412_v50 = vshll.u32 %v13870_v46, %v14047_v44  ;;  %v3413_v40 = vshrl.u32 %v13780_v35, %v14048_v56  ;;  %vm3421_vm6 = vcmp.lt.s32.totalorder %v14049_v33, 1 }
 0x2ad   : > { %v2891_v0 = vand.u32 2147483647, %v2890_v20  ;;  %v2898_v30 = vsel %vm2775_vm9, %v2897_v28, %v10089_v19  ;;  %v2711_v37 = vadd.s32 %v2710_v21, %v2701_v36  ;;  %v10163_v58 = vor.u32 %v3410_v49, %v3409_v51  ;;  %v14050_v19 = vld [vmem:[#allocation99_spill] sm:$0xff]  ;;  %v14051_v28 = vld [vmem:[#allocation92_spill] sm:$0xff] }
 0x2ae   : > { %vm2714_vm11 = vc.u32 %v10140_v41, %v10143_v57  ;;  %v10167_v27 = vor.u32 %v3413_v40, %v3412_v50  ;;  %vm3422_vm10 = vcmp.lt.s32.totalorder %v14049_v33, 2  ;;  %vm3423_vm14 = vcmp.lt.s32.totalorder %v14049_v33, 3 }
 0x2af   : > { %v2894_v16 = vmul.f32 %v2893_v4, %v2891_v0  ;;  %v2715_v22 = vadd.s32 1, %v2711_v37  ;;  %v3429_v5 = vsel %vm3421_vm6, %v10153_v39, %v10163_v58  ;;  %v3435_v59 = vsel %vm3423_vm14, %v14051_v28, %v14050_v19 }
 0x2b0   : > { %v14052_v13 = vand.u32 2147483647, %v14019_v26  ;;  %v3431_v36 = vsel %vm3423_vm14, %v10167_v27, %v14055_v38  ;;  %v3433_v52 = vsel %vm3421_vm6, %v10163_v58, %v10167_v27  ;;  %v10193_v43 = vshll.u32 %v3397_v12, 8 }
 0x2b1   : > { %v2895_v32 = vxor.u32 2147483648, %v2894_v16  ;;  %v2716_v62 = vsel %vm2714_vm11, %v2715_v22, %v2711_v37  ;;  %v3432_v51 = vsel %vm3422_vm10, %v3429_v5, %v3431_v36  ;;  %v3436_v20 = vsel %vm3422_vm10, %v3433_v52, %v3435_v59 }
 0x2b2   : > { %vm10181_vm13 = vcmp.le.f32.partialorder %v14052_v13, 0.7853982  ;;  %v2717_v10 = vadd.s32 %v2716_v62, %v2712_v60  ;;  %v3438_v4 = vand.u32 65535, %v10193_v43  ;;  %v3439_v21 = vshrl.u32 %v10193_v43, 16 }
 0x2b3   : > { %v2900_v44 = vsel %vm10181_vm13, 0, %v2898_v30  ;;  %v2896_v12 = vsel %vm2775_vm9, %v2895_v32, %v2894_v16  ;;  %v3440_v49 = vand.u32 65535, %v3436_v20  ;;  %v3441_v50 = vshrl.u32 %v3436_v20, 16 }
 0x2b4   : > { %v10208_v40 = vshrl.u32 %v9936_v61, 5  ;;  %v10211_v60 = vand.u32 31, %v9936_v61  ;;  %v2899_v0 = vsel %vm10181_vm13, %v14019_v26, %v2896_v12  ;;  %v2718_v30 = vadd.s32 536870912, %v2717_v10 }
 0x2b5   : > { %v2901_v37 = vmul.f32 %v2899_v0, %v2899_v0  ;;  %v3442_v22 = vmul.u32 %v3440_v49, %v3438_v4  ;;  %v10216_v5 = vmul.u32 %v3441_v50, %v3438_v4  ;;  %v10218_v16 = vmul.u32 %v3440_v49, %v3439_v21 }
 0x2b6   : > { %14056 = vst [vmem:[#allocation43_spill] sm:$0xff] %v10211_v60  ;;  %v10221_v19 = vadd.s32 4294967169, %v10051_v17  ;;  %v10223_v28 = vand.u32 3, %v2900_v44  ;;  %v10225_v59 = vshrl.u32 %v2718_v30, 30  ;;  %v3463_v61 = vshrl.u32 %v3432_v51, 16 }
 0x2b7   : > { %v2902_v13 = vmul.f32 -0.001358992, %v2901_v37  ;;  %v2909_v38 = vmul.f32 -0.00019511016, %v2901_v37  ;;  %v3446_v3 = vshll.u32 %v10216_v5, 16  ;;  %v3462_v36 = vand.u32 65535, %v3432_v51 }
 0x2b8   : > { %v14057_v52 = vand.u32 2139095040, %v9784_v1  ;;  %v2720_v62 = vshll.u32 %v10225_v59, 30  ;;  %v3445_v20 = vmul.u32 %v3441_v50, %v3439_v21  ;;  %v3448_v17 = vshll.u32 %v10218_v16, 16 }
 0x2b9   : > { %v2903_v12 = vadd.f32 0.041655596, %v2902_v13  ;;  %v2910_v44 = vadd.f32 0.008332121, %v2909_v38  ;;  %vm3450_vm5 = vc.u32 %v3442_v22, %v3446_v3  ;;  %v3452_v49 = vadd.s32 %v3446_v3, %v3442_v22 }
 0x2ba   : > { %v10230_v32 = vshrl.u32 %v14057_v52, 23  ;;  %vm2922_vm8 = vcmp.eq.s32.totalorder %v10223_v28, 2  ;;  %v10235_v30 = vsub.s32 %v2717_v10, %v2720_v62  ;;  %v3451_v25 = vsel %vm3450_vm5, 1, %v13868_v45 }
 0x2bb   : > { %v10238_v51 = vmul.u32 %v3463_v61, %v3438_v4  ;;  %v2904_v15 = vmul.f32 %v2903_v12, %v2901_v37  ;;  %v2911_v52 = vmul.f32 %v2910_v44, %v2901_v37  ;;  %v3405_v1 = vshrl.u32 %v13865_v55, %v14048_v56 }
 0x2bc   : > { %v3464_v50 = vmul.u32 %v3462_v36, %v3438_v4  ;;  %vm2919_vm15 = vcmp.eq.s32.totalorder %v10223_v28, 0  ;;  %vm2722_vm0 = vcmp.lt.s32.totalorder %v10235_v30, 0  ;;  %v2723_v22 = vsub.s32 0, %v10235_v30 }
 0x2bd   : > { %v3453_v13 = vadd.s32 %v3451_v25, %v3445_v20  ;;  %v10245_v38 = vmul.u32 %v3462_v36, %v3439_v21  ;;  %v2905_v10 = vadd.f32 -0.4999988, %v2904_v15  ;;  %v2912_v3 = vadd.f32 -0.16666654, %v2911_v52 }
 0x2be   : > { %vm2918_vm12 = vcmp.lt.s32.totalorder %v10223_v28, 2  ;;  %vm14058_vm9 = vcmp.lt.s32.totalorder %v14049_v33, 4  ;;  %vm3454_vm4 = vc.u32 %v3452_v49, %v3448_v17  ;;  %v2724_v56 = vsel %vm2722_vm0, %v2723_v22, %v10235_v30 }
 0x2bf   : > { %v3426_v62 = vsel %vm14058_vm9, %v10167_v27, 2102212464  ;;  %v3447_v4 = vshrl.u32 %v10216_v5, 16  ;;  %v3455_v12 = vsel %vm3454_vm4, 1, %v13868_v45  ;;  %v3468_v44 = vshll.u32 %v10238_v51, 16 }
 0x2c0   : > { %vm13706_vm11 = vcmp.lt.s32.totalorder %v9746_v2, 4  ;;  %v2906_v25 = vmul.f32 %v2905_v10, %v2901_v37  ;;  %v2913_v15 = vmul.f32 %v2912_v3, %v2901_v37  ;;  %v2725_v36 = vclz %v2724_v56 }
 0x2c1   : > { %v3467_v20 = vmul.u32 %v3463_v61, %v3439_v21  ;;  %v3457_v52 = vadd.s32 %v3455_v12, %v3453_v13  ;;  %v3470_v9 = vshll.u32 %v10245_v38, 16  ;;  %vm3472_vm13 = vc.u32 %v3464_v50, %v3468_v44 }
 0x2c2   : > { %v3474_v27 = vadd.s32 %v3468_v44, %v3464_v50  ;;  %v2907_v17 = vadd.f32 1.0, %v2906_v25  ;;  %v2914_v49 = vadd.f32 1.0, %v2913_v15  ;;  %v2713_v5 = vadd.s32 %v10143_v57, %v10140_v41 }
 0x2c3   : > { %v6894_v22 = vadd.s32 4294967294, %v2725_v36  ;;  %v3425_v14 = vsel %vm3421_vm6, %v3405_v1, %v10153_v39  ;;  %v3427_v37 = vsel %vm3423_vm14, %v10163_v58, %v3426_v62  ;;  %v3449_v21 = vshrl.u32 %v10218_v16, 16 }
 0x2c4   : > { %v3473_v61 = vsel %vm3472_vm13, 1, %v13868_v45  ;;  %v2915_v13 = vmul.f32 %v2914_v49, %v2899_v0  ;;  %v2923_v50 = vxor.u32 2147483648, %v2907_v17  ;;  %vm3476_vm0 = vc.u32 %v3474_v27, %v3470_v9 }
 0x2c5   : > { %vm6895_vm5 = vcmp.lt.s32.totalorder %v6894_v22, 0  ;;  %v3458_v3 = vadd.s32 %v3457_v52, %v3447_v4  ;;  %v3469_v41 = vshrl.u32 %v10238_v51, 16  ;;  %v3475_v57 = vadd.s32 %v3473_v61, %v3467_v20 }
 0x2c6   : > { %v2728_v10 = vsel %vm6895_vm5, 0, %v6894_v22  ;;  %v2920_v56 = vxor.u32 2147483648, %v2915_v13  ;;  %v2924_v1 = vsel %vm2922_vm8, %v2923_v50, %v2915_v13  ;;  %vm2916_vm6 = vweird.f32 %v14019_v26 }
 0x2c7   : > { %v2729_v39 = vsub.s32 32, %v2728_v10  ;;  %v2730_v58 = vshll.u32 %v10235_v30, %v2728_v10  ;;  %v2733_v16 = vsub.s32 4294967266, %v2728_v10  ;;  %v3428_v0 = vsel %vm3422_vm10, %v3425_v14, %v3427_v37  ;;  %v14064_v10 = vld [vmem:[#allocation46_spill] sm:$0xff] }
 0x2c8   : > { %v3477_v62 = vsel %vm3476_vm0, 1, %v13868_v45  ;;  %v2921_v51 = vsel %vm2919_vm15, %v2907_v17, %v2920_v56  ;;  %v3471_v12 = vshrl.u32 %v10245_v38, 16  ;;  %v10280_v26 = vadd.s32 %v3458_v3, %v3449_v21  ;;  %v7139_v38 = vld [vmem:[%s7354_s11 + $0xe0] sm:$0xff]  ;;  %v14065_v56 = vld [vmem:[#allocation84_spill] sm:$0xff] }
 0x2c9   : > { %v2731_v4 = vshrl.u32 %v2713_v5, %v2729_v39  ;;  %v3479_v44 = vadd.s32 %v3477_v62, %v3475_v57  ;;  %v2925_v30 = vsel %vm2918_vm12, %v2921_v51, %v2924_v1  ;;  %v2734_v25 = vadd.s32 127, %v2733_v16 }
 0x2ca   : > { %v10282_v15 = vadd.s32 %v3474_v27, %v3470_v9  ;;  %v5240_v14 = vand.u32 2139095040, %v10078_v42  ;;  %v2926_v33 = vsel %vm2916_vm6, nan, %v2925_v30  ;;  %v10288_v52 = vsel %vm13706_vm11, %v10084_v63, 920167782  ;;  %v7140_v27 = vld [vmem:[%s7354_s11 + $0x68] sm:$0xff] }
 0x2cb   : > { %v2732_v36 = vor.u32 %v2731_v4, %v2730_v58  ;;  %v3480_v20 = vadd.s32 %v3479_v44, %v3469_v41  ;;  %14059 = vst [vmem:[#allocation45_spill] sm:$0xff] %v10288_v52  ;;  %v10291_v17 = vmul.f32 6.1599855, %v7139_v38  ;;  %v5712_v28 = vadd.f32 1.0, %v2926_v33  ;;  %v14066_v58 = vld [vmem:[#allocation89_spill] sm:$0xff] }
 0x2cc   : > { %v2735_v49 = vshll.u32 %v2734_v25, 23  ;;  %v14061_v5 = vor.u32 %v9931_v54, %v9868_v8  ;;  %vm720_vm10 = vcmp.le.f32.partialorder %v7140_v27, 0.51  ;;  %v3482_v37 = vmul.u32 %v10193_v43, %v3428_v0 }
 0x2cd   : > { %14060 = vst [vmem:[#allocation58_spill] sm:$0xff] %v10291_v17  ;;  %v3481_v22 = vadd.s32 %v3480_v20, %v3471_v12  ;;  %v5744_v21 = vmul.f32 0.5, %v5712_v28  ;;  %v2739_v13 = vcvt.s32.f32 %v2732_v36  ;;  %vm3484_vm14 = vc.u32 %v10280_v26, %v10282_v15  ;;  %v7141_v20 = vld [vmem:[%s7354_s11 + $0xd8] sm:$0xff] }
 0x2ce   : > { %v10298_v9 = vsel %vm13706_vm11, %v14061_v5, 1326507024  ;;  %v2736_v61 = vor.u32 4788187, %v2735_v49  ;;  %v10305_v50 = vsub.s32 32, %v10211_v60  ;;  %v10309_v8 = vshll.u32 %v13780_v35, %v10211_v60 }
 0x2cf   : > { %14062 = vst [vmem:[#allocation50_spill] sm:$0xff] %v10298_v9  ;;  %v3485_v54 = vadd.s32 1, %v3481_v22  ;;  %v13693_v3 = vand.u32 2147483647, %v14064_v10  ;;  %v5776_v41 = vsel %vm720_vm10, %v5744_v21, 0.0  ;;  %v2743_v43 = vsub.s32 4, %v10225_v59 }
 0x2d0   : > { %14063 = vst [vmem:[#allocation56_spill] sm:$0xff] %v10305_v50  ;;  %v2737_v57 = vand.u32 2147483647, %v2736_v61  ;;  %v3255_v1 = vshll.u32 %v13869_v11, %v14065_v56  ;;  %5862 = vperm.xlu0 %7041, %v5776_v41   ;;  %v3256_v16 = vshrl.u32 %v13870_v46, %v14066_v58  ;;  %v3258_v0 = vshll.u32 %v13870_v46, %v14065_v56  ;;  %v14070_v21 = vld [vmem:[#allocation93_spill] sm:$0xff] }
 0x2d1   : > { %v3486_v39 = vsel %vm3484_vm14, %v3485_v54, %v3481_v22  ;;  %v3259_v62 = vshrl.u32 %v13780_v35, %v14066_v58  ;;  %v10323_v51 = vshll.u32 %v13777_v31, %v10211_v60  ;;  %v10326_v4 = vadd.s32 1, %v10221_v19 }
 0x2d2   : > { %v2740_v12 = vmul.f32 %v2739_v13, %v2737_v57  ;;  %v3487_v44 = vadd.s32 %v3486_v39, %v3482_v37  ;;  %v10330_v30 = vshrl.u32 %v13777_v31, %v10305_v50  ;;  %v6929_v25 = vadd.s32 4294967169, %v10230_v32  ;;  %v14071_v39 = vld [vmem:[#allocation106_spill] sm:$0xff] }
 0x2d3   : > { %vm2621_vm8 = vcmp.lt.s32.totalorder %v14035_v48, 0  ;;  %v3242_v33 = vand.u32 8388607, %v13693_v3  ;;  %v14067_v36 = vand.u32 2147483647, %v14035_v48  ;;  %v3252_v49 = vshll.u32 %v13865_v55, %v14065_v56 }
 0x2d4   : > { %v2741_v19 = vxor.u32 2147483648, %v2740_v12  ;;  %v2744_v38 = vsel %vm2621_vm8, %v2743_v43, %v10225_v59  ;;  %v3488_v28 = vadd.s32 536870912, %v3487_v44  ;;  %v3253_v32 = vshrl.u32 %v13869_v11, %v14066_v58 }
 0x2d5   : > { %vm10338_vm15 = vcmp.le.f32.partialorder %v14067_v36, 0.7853982  ;;  %v10347_v5 = vor.u32 %v3256_v16, %v3255_v1  ;;  %v3260_v27 = vor.u32 %v3259_v62, %v3258_v0  ;;  %vm3267_vm12 = vcmp.lt.s32.totalorder %v14070_v21, 1  ;;  %v14072_v16 = vld [vmem:[#allocation102_spill] sm:$0xff] }
 0x2d6   : > { %v2742_v22 = vsel %vm2621_vm8, %v2741_v19, %v2740_v12  ;;  %v10349_v37 = vshrl.u32 %v3488_v28, 30  ;;  %vm3269_vm9 = vcmp.lt.s32.totalorder %v14070_v21, 3  ;;  %v10355_v59 = vshrl.u32 %v13778_v53, %v10305_v50 }
 0x2d7   : > { %v10357_v61 = vshrl.u32 %v5240_v14, 23  ;;  %v10362_v13 = vsel %vm10338_vm15, %v14035_v48, %v2742_v22  ;;  %v3243_v54 = vor.u32 8388608, %v3242_v33  ;;  %v2746_v57 = vsel %vm10338_vm15, 0, %v2744_v38 }
 0x2d8   : > { %v2747_v43 = vmul.f32 %v10362_v13, %v10362_v13  ;;  %v3490_v56 = vshll.u32 %v10349_v37, 30  ;;  %v3254_v1 = vor.u32 %v3253_v32, %v3252_v49  ;;  %vm3268_vm4 = vcmp.lt.s32.totalorder %v14070_v21, 2 }
 0x2d9   : > { %v3279_v14 = vsel %vm3267_vm12, %v10347_v5, %v3260_v27  ;;  %v3281_v0 = vsel %vm3269_vm9, %v14072_v16, %v14071_v39  ;;  %v10378_v62 = vadd.s32 1, %v6929_v25  ;;  %v10383_v19 = vmul.f32 6.1599855, %v7141_v20 }
 0x2da   : > { %v2748_v12 = vmul.f32 -0.001358992, %v2747_v43  ;;  %v2755_v33 = vmul.f32 -0.00019511016, %v2747_v43  ;;  %v10380_v36 = vsub.s32 %v3487_v44, %v3490_v56  ;;  %v10385_v38 = vand.u32 3, %v2746_v57  ;;  %v14074_v57 = vld [vmem:[#allocation105_spill] sm:$0xff] }
 0x2db   : > { %14073 = vst [vmem:[#allocation19_spill] sm:$0xff] %v10383_v19  ;;  %v3251_v28 = vshrl.u32 %v13865_v55, %v14066_v58  ;;  %v10389_v49 = vshll.u32 %v3243_v54, 8  ;;  %v3282_v25 = vsel %vm3268_vm4, %v3279_v14, %v3281_v0  ;;  %v3275_v56 = vsel %vm3267_vm12, %v3254_v1, %v10347_v5 }
 0x2dc   : > { %v2749_v32 = vadd.f32 0.041655596, %v2748_v12  ;;  %v2756_v22 = vadd.f32 0.008332121, %v2755_v33  ;;  %vm3492_vm13 = vcmp.lt.s32.totalorder %v10380_v36, 0  ;;  %v3493_v44 = vsub.s32 0, %v10380_v36 }
 0x2dd   : > { %v3277_v39 = vsel %vm3269_vm9, %v3260_v27, %v14074_v57  ;;  %v3284_v58 = vand.u32 65535, %v10389_v49  ;;  %vm3391_vm5 = vcmp.lt.s32.totalorder %v14046_v18, 0  ;;  %v3286_v12 = vand.u32 65535, %v3282_v25 }
 0x2de   : > { %v2750_v54 = vmul.f32 %v2749_v32, %v2747_v43  ;;  %v2757_v16 = vmul.f32 %v2756_v22, %v2747_v43  ;;  %vm2765_vm0 = vcmp.eq.s32.totalorder %v10385_v38, 0  ;;  %vm2768_vm6 = vcmp.eq.s32.totalorder %v10385_v38, 2 }
 0x2df   : > { %v3494_v14 = vsel %vm3492_vm13, %v3493_v44, %v10380_v36  ;;  %v3285_v0 = vshrl.u32 %v10389_v49, 16  ;;  %v3287_v33 = vshrl.u32 %v3282_v25, 16  ;;  %vm2764_vm10 = vcmp.lt.s32.totalorder %v10385_v38, 2 }
 0x2e0   : > { %v2751_v20 = vadd.f32 -0.4999988, %v2750_v54  ;;  %v2758_v41 = vadd.f32 -0.16666654, %v2757_v16  ;;  %v3495_v57 = vclz %v3494_v14  ;;  %v3278_v32 = vsel %vm3268_vm4, %v3275_v56, %v3277_v39 }
 0x2e1   : > { %vm2762_vm14 = vweird.f32 %v14035_v48  ;;  %v3483_v22 = vadd.s32 %v10282_v15, %v10280_v26  ;;  %v3271_v3 = vsel %vm3267_vm12, %v3251_v28, %v3254_v1  ;;  %v3288_v44 = vmul.u32 %v3286_v12, %v3284_v58 }
 0x2e2   : > { %v3289_v42 = vmul.u32 %v3287_v33, %v3284_v58  ;;  %v2752_v50 = vmul.f32 %v2751_v20, %v2747_v43  ;;  %v2759_v25 = vmul.f32 %v2758_v41, %v2747_v43  ;;  %v6909_v54 = vadd.s32 4294967294, %v3495_v57 }
 0x2e3   : > { %vm14075_vm8 = vcmp.lt.s32.totalorder %v14070_v21, 4  ;;  %v3513_v14 = vsub.s32 4, %v10349_v37  ;;  %v10418_v56 = vmul.u32 %v3286_v12, %v3285_v0  ;;  %v3309_v60 = vshrl.u32 %v3278_v32, 16 }
 0x2e4   : > { %v3272_v16 = vsel %vm14075_vm8, %v3260_v27, 2102212464  ;;  %v3292_v39 = vshll.u32 %v3289_v42, 16  ;;  %v2753_v52 = vadd.f32 1.0, %v2752_v50  ;;  %v2760_v26 = vadd.f32 1.0, %v2759_v25  ;;  %v7142_v50 = vld [vmem:[%s7354_s11 + $0x60] sm:$0xff] }
 0x2e5   : > { %vm6910_vm15 = vcmp.lt.s32.totalorder %v6909_v54, 0  ;;  %v3308_v15 = vand.u32 65535, %v3278_v32  ;;  %v14076_v1 = vand.u32 2147483647, %v14046_v18  ;;  %v3273_v27 = vsel %vm3269_vm9, %v10347_v5, %v3272_v16 }
 0x2e6   : > { %v3498_v41 = vsel %vm6910_vm15, 0, %v6909_v54  ;;  %v3291_v43 = vmul.u32 %v3287_v33, %v3285_v0  ;;  %vm10429_vm13 = vc.u32 %v3288_v44, %v3292_v39  ;;  %vm719_vm8 = vcmp.le.f32.partialorder %v7142_v50, 0.51 }
 0x2e7   : > { %vm10422_vm12 = vcmp.le.f32.partialorder %v14076_v1, 0.7853982  ;;  %v2761_v20 = vmul.f32 %v2760_v26, %v10362_v13  ;;  %v2769_v57 = vxor.u32 2147483648, %v2753_v52  ;;  %v3499_v32 = vsub.s32 32, %v3498_v41 }
 0x2e8   : > { %v3500_v25 = vshll.u32 %v10380_v36, %v3498_v41  ;;  %v3503_v1 = vsub.s32 4294967266, %v3498_v41  ;;  %v10439_v54 = vsel %vm3391_vm5, %v3513_v14, %v10349_v37  ;;  %v3294_v5 = vshll.u32 %v10418_v56, 16 }
 0x2e9   : > { %v3311_v33 = vmul.u32 %v3309_v60, %v3284_v58  ;;  %v2766_v16 = vxor.u32 2147483648, %v2761_v20  ;;  %v2770_v63 = vsel %vm2768_vm6, %v2769_v57, %v2761_v20  ;;  %v3501_v9 = vshrl.u32 %v3483_v22, %v3499_v32 }
 0x2ea   : > { %v3310_v2 = vmul.u32 %v3308_v15, %v3284_v58  ;;  %v3504_v13 = vadd.s32 127, %v3503_v1  ;;  %v3297_v36 = vsel %vm10429_vm13, 1, %v13868_v45  ;;  %v3298_v26 = vadd.s32 %v3292_v39, %v3288_v44 }
 0x2eb   : > { %v3312_v41 = vmul.u32 %v3308_v15, %v3285_v0  ;;  %v2767_v37 = vsel %vm2765_vm0, %v2753_v52, %v2766_v16  ;;  %v3502_v14 = vor.u32 %v3501_v9, %v3500_v25  ;;  %v3293_v29 = vshrl.u32 %v3289_v42, 16 }
 0x2ec   : > { %v3299_v47 = vadd.s32 %v3297_v36, %v3291_v43  ;;  %v2771_v23 = vsel %vm2764_vm10, %v2767_v37, %v2770_v63  ;;  %v3505_v24 = vshll.u32 %v3504_v13, 23  ;;  %vm3300_vm9 = vc.u32 %v3298_v26, %v3294_v5  ;;  %v14083_v13 = vld [vmem:[#allocation104_spill] sm:$0xff] }
 0x2ed   : > { %v3314_v22 = vshll.u32 %v3311_v33, 16  ;;  %v2772_v58 = vsel %vm2762_vm14, nan, %v2771_v23  ;;  %v3509_v20 = vcvt.s32.f32 %v3502_v14  ;;  %v3301_v12 = vsel %vm3300_vm9, 1, %v13868_v45 }
 0x2ee   : > { %v3313_v44 = vmul.u32 %v3309_v60, %v3285_v0  ;;  %v5711_v39 = vadd.f32 1.0, %v2772_v58  ;;  %v3506_v15 = vor.u32 4788187, %v3505_v24  ;;  %v3303_v57 = vadd.s32 %v3301_v12, %v3299_v47  ;;  %v14081_v47 = vld [vmem:[#allocation59_spill] sm:$0xff] }
 0x2ef   : > { %v3316_v52 = vshll.u32 %v3312_v41, 16  ;;  %v3516_v42 = vsel %vm10422_vm12, 0, %v10439_v54  ;;  %v3274_v63 = vsel %vm3268_vm4, %v3271_v3, %v3273_v27  ;;  %vm3318_vm0 = vc.u32 %v3310_v2, %v3314_v22 }
 0x2f0   : > { %v3320_v9 = vadd.s32 %v3314_v22, %v3310_v2  ;;  %v5743_v38 = vmul.f32 0.5, %v5711_v39  ;;  %v3507_v48 = vand.u32 2147483647, %v3506_v15  ;;  %v3295_v23 = vshrl.u32 %v10418_v56, 16 }
 0x2f1   : > { %v3304_v43 = vadd.s32 %v3303_v57, %v3293_v29  ;;  %v3315_v32 = vshrl.u32 %v3311_v33, 16  ;;  %v3319_v60 = vsel %vm3318_vm0, 1, %v13868_v45  ;;  %v13709_v24 = vand.u32 2147483647, %v14081_v47  ;;  %v14082_v29 = vld [vmem:[#allocation100_spill] sm:$0xff] }
 0x2f2   : > { %vm3322_vm6 = vc.u32 %v3320_v9, %v3316_v52  ;;  %v5775_v0 = vsel %vm719_vm8, %v5743_v38, 0.0  ;;  %v3510_v25 = vmul.f32 %v3509_v20, %v3507_v48  ;;  %v3317_v1 = vshrl.u32 %v3312_v41, 16  ;;  %v14084_v38 = vld [vmem:[#allocation112_spill] sm:$0xff] }
 0x2f3   : > { %v3321_v54 = vadd.s32 %v3319_v60, %v3313_v44  ;;  %5857 = vperm.xlu2 %7043, %v5775_v0   ;;  %v3323_v3 = vsel %vm3322_vm6, 1, %v13868_v45  ;;  %v3328_v2 = vmul.u32 %v10389_v49, %v3274_v63  ;;  %v3088_v21 = vand.u32 8388607, %v13709_v24  ;;  %v14086_v0 = vld [vmem:[#allocation113_spill] sm:$0xff] }
 0x2f4   : > { %v3098_v56 = vshll.u32 %v13865_v55, %v14082_v29  ;;  %v3511_v27 = vxor.u32 2147483648, %v3510_v25  ;;  %v10469_v5 = vadd.s32 %v3304_v43, %v3295_v23  ;;  %v10471_v33 = vadd.s32 %v3320_v9, %v3316_v52  ;;  %v7143_v23 = vld [vmem:[%s7354_s11 + $0xf8] sm:$0xff] }
 0x2f5   : > { %v3325_v50 = vadd.s32 %v3323_v3, %v3321_v54  ;;  %v3089_v16 = vor.u32 8388608, %v3088_v21  ;;  %v3099_v36 = vshrl.u32 %v13869_v11, %v14083_v13  ;;  %v3101_v26 = vshll.u32 %v13869_v11, %v14082_v29 }
 0x2f6   : > { %v3102_v49 = vshrl.u32 %v13870_v46, %v14083_v13  ;;  %v3512_v41 = vsel %vm3391_vm5, %v3511_v27, %v3510_v25  ;;  %v3104_v14 = vshll.u32 %v13870_v46, %v14082_v29  ;;  %v3105_v22 = vshrl.u32 %v13780_v35, %v14083_v13  ;;  %v14087_v25 = vld [vmem:[#allocation109_spill] sm:$0xff] }
 0x2f7   : > { %v3326_v37 = vadd.s32 %v3325_v50, %v3315_v32  ;;  %v10488_v58 = vsel %vm10422_vm12, %v14046_v18, %v3512_v41  ;;  %v10490_v20 = vor.u32 %v3099_v36, %v3098_v56  ;;  %vm3113_vm4 = vcmp.lt.s32.totalorder %v7959_v7, 1 }
 0x2f8   : > { %v10492_v12 = vor.u32 %v3102_v49, %v3101_v26  ;;  %v3517_v44 = vmul.f32 %v10488_v58, %v10488_v58  ;;  %vm3330_vm5 = vc.u32 %v10469_v5, %v10471_v33  ;;  %v10499_v15 = vor.u32 %v3105_v22, %v3104_v14 }
 0x2f9   : > { %v3327_v39 = vadd.s32 %v3326_v37, %v3317_v1  ;;  %vm3114_vm10 = vcmp.lt.s32.totalorder %v7959_v7, 2  ;;  %vm3115_vm14 = vcmp.lt.s32.totalorder %v7959_v7, 3  ;;  %v10507_v57 = vshll.u32 %v3089_v16, 8 }
 0x2fa   : > { %v3121_v28 = vsel %vm3113_vm4, %v10490_v20, %v10492_v12  ;;  %v3518_v52 = vmul.f32 -0.001358992, %v3517_v44  ;;  %v3525_v63 = vmul.f32 -0.00019511016, %v3517_v44  ;;  %v3123_v48 = vsel %vm3115_vm14, %v10499_v15, %v14084_v38 }
 0x2fb   : > { %v3331_v9 = vadd.s32 1, %v3327_v39  ;;  %v10514_v43 = vmul.f32 6.1599855, %v7143_v23  ;;  %v10516_v32 = vand.u32 3, %v3516_v42  ;;  %v3125_v60 = vsel %vm3113_vm4, %v10492_v12, %v10499_v15 }
 0x2fc   : > { %v3127_v1 = vsel %vm3115_vm14, %v14087_v25, %v14086_v0  ;;  %v10528_v54 = vor.u32 %v10330_v30, %v10309_v8  ;;  %v3519_v3 = vadd.f32 0.041655596, %v3518_v52  ;;  %v3526_v21 = vadd.f32 0.008332121, %v3525_v63 }
 0x2fd   : > { %14085 = vst [vmem:[#allocation44_spill] sm:$0xff] %v10514_v43  ;;  %v3332_v42 = vsel %vm3330_vm5, %v3331_v9, %v3327_v39  ;;  %v3124_v56 = vsel %vm3114_vm10, %v3121_v28, %v3123_v48  ;;  %v3128_v27 = vsel %vm3114_vm10, %v3125_v60, %v3127_v1  ;;  %v3130_v50 = vand.u32 65535, %v10507_v57 }
 0x2fe   : > { %14088 = vst [vmem:[#allocation48_spill] sm:$0xff] %v10528_v54  ;;  %v3333_v29 = vadd.s32 %v3332_v42, %v3328_v2  ;;  %v3520_v16 = vmul.f32 %v3519_v3, %v3517_v44  ;;  %v3527_v36 = vmul.f32 %v3526_v21, %v3517_v44  ;;  %v3131_v8 = vshrl.u32 %v10507_v57, 16 }
 0x2ff   : > { %v3132_v30 = vand.u32 65535, %v3128_v27  ;;  %v4806_v26 = vor.u32 %v10355_v59, %v10323_v51  ;;  %vm3535_vm15 = vcmp.eq.s32.totalorder %v10516_v32, 0  ;;  %v3133_v2 = vshrl.u32 %v3128_v27, 16 }
 0x300   : > { %v3334_v49 = vadd.s32 536870912, %v3333_v29  ;;  %v3521_v41 = vadd.f32 -0.4999988, %v3520_v16  ;;  %v3528_v37 = vadd.f32 -0.16666654, %v3527_v36  ;;  %vm3534_vm12 = vcmp.lt.s32.totalorder %v10516_v32, 2 }
 0x301   : > { %v3136_v14 = vmul.u32 %v3132_v30, %v3131_v8  ;;  %v3154_v22 = vand.u32 65535, %v3124_v56  ;;  %vm3532_vm13 = vweird.f32 %v14046_v18  ;;  %v3134_v28 = vmul.u32 %v3132_v30, %v3130_v50  ;;  %v7144_v16 = vld [vmem:[%s7354_s11 + $0x88] sm:$0xff] }
 0x302   : > { %v10544_v39 = vshrl.u32 %v3334_v49, 30  ;;  %v3135_v52 = vmul.u32 %v3133_v2, %v3130_v50  ;;  %v3155_v63 = vshrl.u32 %v3124_v56, 16  ;;  %v3522_v9 = vmul.f32 %v3521_v41, %v3517_v44 }
 0x303   : > { %v3529_v38 = vmul.f32 %v3528_v37, %v3517_v44  ;;  %vm3538_vm8 = vcmp.eq.s32.totalorder %v10516_v32, 2  ;;  %v3097_v48 = vshrl.u32 %v13865_v55, %v14083_v13  ;;  %v3137_v60 = vmul.u32 %v3133_v2, %v3131_v8 }
 0x304   : > { %v3336_v23 = vshll.u32 %v10544_v39, 30  ;;  %v3138_v0 = vshll.u32 %v3135_v52, 16  ;;  %v3140_v25 = vshll.u32 %v3136_v14, 16  ;;  %v3523_v1 = vadd.f32 1.0, %v3522_v9 }
 0x305   : > { %v3530_v3 = vadd.f32 1.0, %v3529_v38  ;;  %v3139_v21 = vshrl.u32 %v3135_v52, 16  ;;  %v3156_v42 = vmul.u32 %v3154_v22, %v3130_v50  ;;  %v3157_v44 = vmul.u32 %v3155_v63, %v3130_v50 }
 0x306   : > { %v10550_v27 = vsub.s32 %v3333_v29, %v3336_v23  ;;  %vm3142_vm9 = vc.u32 %v3134_v28, %v3138_v0  ;;  %v3144_v56 = vadd.s32 %v3138_v0, %v3134_v28  ;;  %vm4632_vm0 = vcmp.gt.s32.totalorder %v10326_v4, 0 }
 0x307   : > { %vm724_vm6 = vcmp.le.f32.partialorder %v7144_v16, 0.51  ;;  %v3531_v13 = vmul.f32 %v3530_v3, %v10488_v58  ;;  %v3539_v36 = vxor.u32 2147483648, %v3523_v1  ;;  %v3143_v30 = vsel %vm3142_vm9, 1, %v13868_v45 }
 0x308   : > { %v3158_v49 = vmul.u32 %v3154_v22, %v3131_v8  ;;  %vm3338_vm5 = vcmp.lt.s32.totalorder %v10550_v27, 0  ;;  %v3339_v2 = vsub.s32 0, %v10550_v27  ;;  %v3145_v41 = vadd.s32 %v3143_v30, %v3137_v60 }
 0x309   : > { %vm3146_vm11 = vc.u32 %v3144_v56, %v3140_v25  ;;  %v3536_v29 = vxor.u32 2147483648, %v3531_v13  ;;  %v3540_v50 = vsel %vm3538_vm8, %v3539_v36, %v3531_v13  ;;  %vm14089_vm2 = vcmp.lt.s32.totalorder %v7959_v7, 4 }
 0x30a   : > { %v3118_v37 = vsel %vm14089_vm2, %v10499_v15, 2102212464  ;;  %v3147_v58 = vsel %vm3146_vm11, 1, %v13868_v45  ;;  %v3340_v28 = vsel %vm3338_vm5, %v3339_v2, %v10550_v27  ;;  %v3159_v22 = vmul.u32 %v3155_v63, %v3131_v8 }
 0x30b   : > { %v3149_v52 = vadd.s32 %v3147_v58, %v3145_v41  ;;  %v3160_v9 = vshll.u32 %v3157_v44, 16  ;;  %v3537_v38 = vsel %vm3535_vm15, %v3523_v1, %v3536_v29  ;;  %v3341_v23 = vclz %v3340_v28 }
 0x30c   : > { %v3141_v60 = vshrl.u32 %v3136_v14, 16  ;;  %v3162_v0 = vshll.u32 %v3158_v49, 16  ;;  %v3541_v25 = vsel %vm3534_vm12, %v3537_v38, %v3540_v50  ;;  %v3329_v13 = vadd.s32 %v10471_v33, %v10469_v5 }
 0x30d   : > { %v3150_v3 = vadd.s32 %v3149_v52, %v3139_v21  ;;  %vm3164_vm8 = vc.u32 %v3156_v42, %v3160_v9  ;;  %v3166_v56 = vadd.s32 %v3160_v9, %v3156_v42  ;;  %v3542_v15 = vsel %vm3532_vm13, nan, %v3541_v25  ;;  %v14091_v9 = vld [vmem:[#allocation108_spill] sm:$0xff] }
 0x30e   : > { %v6906_v8 = vadd.s32 4294967294, %v3341_v23  ;;  %v3165_v63 = vsel %vm3164_vm8, 1, %v13868_v45  ;;  %v5716_v36 = vadd.f32 1.0, %v3542_v15  ;;  %v3117_v14 = vsel %vm3113_vm4, %v3097_v48, %v10490_v20 }
 0x30f   : > { %v3119_v32 = vsel %vm3115_vm14, %v10492_v12, %v3118_v37  ;;  %v3167_v1 = vadd.s32 %v3165_v63, %v3159_v22  ;;  %v10580_v21 = vadd.s32 %v3150_v3, %v3141_v60  ;;  %v3161_v18 = vshrl.u32 %v3157_v44, 16  ;;  %v14090_v22 = vld [vmem:[#allocation67_spill] sm:$0xff] }
 0x310   : > { %vm6907_vm2 = vcmp.lt.s32.totalorder %v6906_v8, 0  ;;  %vm3168_vm11 = vc.u32 %v3166_v56, %v3162_v0  ;;  %v5748_v42 = vmul.f32 0.5, %v5716_v36  ;;  %v10583_v30 = vadd.s32 %v3166_v56, %v3162_v0 }
 0x311   : > { %v3344_v5 = vsel %vm6907_vm2, 0, %v6906_v8  ;;  %v3169_v33 = vsel %vm3168_vm11, 1, %v13868_v45  ;;  %v3120_v48 = vsel %vm3114_vm10, %v3117_v14, %v3119_v32  ;;  %v4633_v12 = vsel %vm4632_vm0, %v10326_v4, 0 }
 0x312   : > { %v3345_v2 = vsub.s32 32, %v3344_v5  ;;  %v3346_v41 = vshll.u32 %v10550_v27, %v3344_v5  ;;  %v3349_v20 = vsub.s32 4294967266, %v3344_v5  ;;  %v5780_v44 = vsel %vm724_vm6, %v5748_v42, 0.0  ;;  %v14094_v42 = vld [vmem:[#allocation107_spill] sm:$0xff] }
 0x313   : > { %v3163_v29 = vshrl.u32 %v3158_v49, 16  ;;  %v3171_v50 = vadd.s32 %v3169_v33, %v3167_v1  ;;  %v10592_v37 = vshrl.u32 %v4633_v12, 5  ;;  %v10595_v58 = vadd.s32 4294967169, %v10357_v61  ;;  %5882 = vperm.xlu1 %7042, %v5780_v44   ;;  %v14092_v61 = vld [vmem:[#allocation111_spill] sm:$0xff] }
 0x314   : > { %v3347_v28 = vshrl.u32 %v3329_v13, %v3345_v2  ;;  %v3350_v27 = vadd.s32 127, %v3349_v20  ;;  %v3174_v7 = vmul.u32 %v10507_v57, %v3120_v48  ;;  %vm3176_vm4 = vc.u32 %v10580_v21, %v10583_v30  ;;  %v14095_v48 = vld [vmem:[#allocation9_spill] sm:$0xff] }
 0x315   : > { %v3172_v52 = vadd.s32 %v3171_v50, %v3161_v18  ;;  %v13708_v4 = vand.u32 2147483647, %v14090_v22  ;;  %vm4810_vm10 = vcmp.lt.s32.totalorder %v10208_v40, 4  ;;  %v3868_v38 = vshll.u32 %v13865_v55, %v14091_v9 }
 0x316   : > { %v3348_v16 = vor.u32 %v3347_v28, %v3346_v41  ;;  %v3351_v49 = vshll.u32 %v3350_v27, 23  ;;  %v3869_v23 = vshrl.u32 %v13869_v11, %v14092_v61  ;;  %v3871_v57 = vshll.u32 %v13869_v11, %v14091_v9 }
 0x317   : > { %v3173_v60 = vadd.s32 %v3172_v52, %v3163_v29  ;;  %v3858_v0 = vand.u32 8388607, %v13708_v4  ;;  %v3872_v25 = vshrl.u32 %v13870_v46, %v14092_v61  ;;  %v3874_v13 = vshll.u32 %v13870_v46, %v14091_v9  ;;  %v14097_v29 = vld [vmem:[#allocation5_spill] sm:$0xff] }
 0x318   : > { %v3352_v3 = vor.u32 4788187, %v3351_v49  ;;  %v3355_v56 = vcvt.s32.f32 %v3348_v16  ;;  %v10612_v15 = vor.u32 %v3869_v23, %v3868_v38  ;;  %v3875_v14 = vshrl.u32 %v13780_v35, %v14092_v61 }
 0x319   : > { %v3177_v8 = vadd.s32 1, %v3173_v60  ;;  %v3859_v63 = vor.u32 8388608, %v3858_v0  ;;  %v10616_v36 = vor.u32 %v3872_v25, %v3871_v57  ;;  %v10620_v32 = vand.u32 31, %v4633_v12  ;;  %v14096_v12 = vld [vmem:[#allocation16_spill] sm:$0xff] }
 0x31a   : > { %v3353_v1 = vand.u32 2147483647, %v3352_v3  ;;  %v3359_v18 = vsub.s32 4, %v10544_v39  ;;  %vm3883_vm14 = vcmp.lt.s32.totalorder %v14094_v42, 1  ;;  %v10627_v33 = vor.u32 %v3875_v14, %v3874_v13 }
 0x31b   : > { %14093 = vst [vmem:[#allocation51_spill] sm:$0xff] %v10620_v32  ;;  %v3178_v5 = vsel %vm3176_vm4, %v3177_v8, %v3173_v60  ;;  %vm3884_vm15 = vcmp.lt.s32.totalorder %v14094_v42, 2  ;;  %vm3885_vm12 = vcmp.lt.s32.totalorder %v14094_v42, 3  ;;  %v3891_v20 = vsel %vm3883_vm14, %v10612_v15, %v10616_v36 }
 0x31c   : > { %v3356_v2 = vmul.f32 %v3355_v56, %v3353_v1  ;;  %v3179_v41 = vadd.s32 %v3178_v5, %v3174_v7  ;;  %v3897_v44 = vsel %vm3885_vm12, %v14096_v12, %v14095_v48  ;;  %vm3237_vm13 = vcmp.lt.s32.totalorder %v14064_v10, 0 }
 0x31d   : > { %v3893_v50 = vsel %vm3885_vm12, %v10627_v33, %v14097_v29  ;;  %v3895_v28 = vsel %vm3883_vm14, %v10616_v36, %v10627_v33  ;;  %v10648_v27 = vshll.u32 %v3859_v63, 8  ;;  %v14098_v52 = vand.u32 2147483647, %v14064_v10 }
 0x31e   : > { %v3357_v16 = vxor.u32 2147483648, %v3356_v2  ;;  %v3360_v49 = vsel %vm3237_vm13, %v3359_v18, %v10544_v39  ;;  %v3180_v9 = vadd.s32 536870912, %v3179_v41  ;;  %v10659_v38 = vsel %vm3884_vm15, %v3891_v20, %v3893_v50 }
 0x31f   : > { %vm10652_vm9 = vcmp.le.f32.partialorder %v14098_v52, 0.7853982  ;;  %v3898_v23 = vsel %vm3884_vm15, %v3895_v28, %v3897_v44  ;;  %v3900_v60 = vand.u32 65535, %v10648_v27  ;;  %v3901_v0 = vshrl.u32 %v10648_v27, 16 }
 0x320   : > { %v3358_v57 = vsel %vm3237_vm13, %v3357_v16, %v3356_v2  ;;  %v10665_v25 = vshrl.u32 %v3180_v9, 30  ;;  %v3902_v3 = vand.u32 65535, %v3898_v23  ;;  %v3903_v56 = vshrl.u32 %v3898_v23, 16 }
 0x321   : > { %v10670_v39 = vsel %vm4810_vm10, %v10528_v54, 920167782  ;;  %vm4478_vm0 = vcmp.gt.s32.totalorder %v10378_v62, 0  ;;  %v14102_v13 = vand.u32 2139095040, %v10291_v17  ;;  %v3361_v63 = vsel %vm10652_vm9, %v14064_v10, %v3358_v57 }
 0x322   : > { %14101 = vst [vmem:[#allocation73_spill] sm:$0xff] %v10670_v39  ;;  %v10685_v14 = vsel %vm4810_vm10, %v4806_v26, 1326507024  ;;  %v3362_v1 = vsel %vm10652_vm9, 0, %v3360_v49  ;;  %v3363_v18 = vmul.f32 %v3361_v63, %v3361_v63  ;;  %v3182_v5 = vshll.u32 %v10665_v25, 30 }
 0x323   : > { %v10675_v8 = vshrl.u32 %v14102_v13, 23  ;;  %14103 = vst [vmem:[#allocation60_spill] sm:$0xff] %v10685_v14  ;;  %v3904_v2 = vmul.u32 %v3902_v3, %v3900_v60  ;;  %v10690_v20 = vmul.u32 %v3903_v56, %v3900_v60  ;;  %v10692_v48 = vmul.u32 %v3902_v3, %v3901_v0 }
 0x324   : > { %v3925_v12 = vshrl.u32 %v10659_v38, 16  ;;  %v10696_v44 = vsel %vm4478_vm0, %v10378_v62, 0  ;;  %v3364_v51 = vmul.f32 -0.001358992, %v3363_v18  ;;  %v3371_v59 = vmul.f32 -0.00019511016, %v3363_v18 }
 0x325   : > { %v3183_v26 = vsub.s32 %v3179_v41, %v3182_v5  ;;  %v10699_v29 = vadd.s32 1, %v10595_v58  ;;  %v10701_v50 = vand.u32 3, %v3362_v1  ;;  %v3908_v28 = vshll.u32 %v10690_v20, 16 }
 0x326   : > { %v3910_v52 = vshll.u32 %v10692_v48, 16  ;;  %v3365_v7 = vadd.f32 0.041655596, %v3364_v51  ;;  %v3372_v16 = vadd.f32 0.008332121, %v3371_v59  ;;  %v3924_v62 = vand.u32 65535, %v10659_v38 }
 0x327   : > { %vm3184_vm6 = vcmp.lt.s32.totalorder %v3183_v26, 0  ;;  %v3185_v49 = vsub.s32 0, %v3183_v26  ;;  %vm3912_vm5 = vc.u32 %v3904_v2, %v3908_v28  ;;  %v3914_v9 = vadd.s32 %v3908_v28, %v3904_v2 }
 0x328   : > { %v10706_v23 = vmul.u32 %v3925_v12, %v3900_v60  ;;  %v3366_v41 = vmul.f32 %v3365_v7, %v3363_v18  ;;  %v3373_v57 = vmul.f32 %v3372_v16, %v3363_v18  ;;  %v3907_v3 = vmul.u32 %v3903_v56, %v3901_v0 }
 0x329   : > { %v3186_v58 = vsel %vm3184_vm6, %v3185_v49, %v3183_v26  ;;  %v10709_v13 = vsub.s32 32, %v10620_v32  ;;  %vm3381_vm8 = vcmp.eq.s32.totalorder %v10701_v50, 0  ;;  %v3913_v5 = vsel %vm3912_vm5, 1, %v13868_v45 }
 0x32a   : > { %v3187_v1 = vclz %v3186_v58  ;;  %v3367_v51 = vadd.f32 -0.4999988, %v3366_v41  ;;  %v3374_v59 = vadd.f32 -0.16666654, %v3373_v57  ;;  %vm3380_vm2 = vcmp.lt.s32.totalorder %v10701_v50, 2 }
 0x32b   : > { %14104 = vst [vmem:[#allocation72_spill] sm:$0xff] %v10709_v13  ;;  %vm3384_vm11 = vcmp.eq.s32.totalorder %v10701_v50, 2  ;;  %vm3916_vm4 = vc.u32 %v3914_v9, %v3910_v52  ;;  %vm3378_vm13 = vweird.f32 %v14064_v10  ;;  %v3175_v38 = vadd.s32 %v10583_v30, %v10580_v21 }
 0x32c   : > { %v6903_v56 = vadd.s32 4294967294, %v3187_v1  ;;  %v3926_v2 = vmul.u32 %v3924_v62, %v3900_v60  ;;  %v3930_v28 = vshll.u32 %v10706_v23, 16  ;;  %v3368_v7 = vmul.f32 %v3367_v51, %v3363_v18 }
 0x32d   : > { %v3375_v16 = vmul.f32 %v3374_v59, %v3363_v18  ;;  %v3867_v49 = vshrl.u32 %v13865_v55, %v14092_v61  ;;  %v3915_v41 = vadd.s32 %v3913_v5, %v3907_v3  ;;  %v3888_v52 = vsel %vm3886_vm3, %v10627_v33, 2102212464 }
 0x32e   : > { %vm6904_vm9 = vcmp.lt.s32.totalorder %v6903_v56, 0  ;;  %v3917_v9 = vsel %vm3916_vm4, 1, %v13868_v45  ;;  %v3928_v57 = vmul.u32 %v3924_v62, %v3901_v0  ;;  %v3369_v58 = vadd.f32 1.0, %v3368_v7 }
 0x32f   : > { %v3376_v21 = vadd.f32 1.0, %v3375_v16  ;;  %v3190_v30 = vsel %vm6904_vm9, 0, %v6903_v56  ;;  %v3929_v60 = vmul.u32 %v3925_v12, %v3901_v0  ;;  %vm3934_vm0 = vc.u32 %v3926_v2, %v3930_v28 }
 0x330   : > { %v3191_v1 = vsub.s32 32, %v3190_v30  ;;  %v3192_v4 = vshll.u32 %v3183_v26, %v3190_v30  ;;  %v3195_v51 = vsub.s32 4294967266, %v3190_v30  ;;  %v3385_v59 = vxor.u32 2147483648, %v3369_v58 }
 0x331   : > { %v3377_v18 = vmul.f32 %v3376_v21, %v3361_v63  ;;  %v3909_v61 = vshrl.u32 %v10690_v20, 16  ;;  %v3919_v3 = vadd.s32 %v3917_v9, %v3915_v41  ;;  %v3887_v33 = vsel %vm3883_vm14, %v3867_v49, %v10612_v15 }
 0x332   : > { %v3193_v5 = vshrl.u32 %v3175_v38, %v3191_v1  ;;  %v3196_v24 = vadd.s32 127, %v3195_v51  ;;  %v3932_v62 = vshll.u32 %v3928_v57, 16  ;;  %v3889_v12 = vsel %vm3885_vm12, %v10616_v36, %v3888_v52 }
 0x333   : > { %v3382_v7 = vxor.u32 2147483648, %v3377_v18  ;;  %v3386_v0 = vsel %vm3384_vm11, %v3385_v59, %v3377_v18  ;;  %v3935_v63 = vsel %vm3934_vm0, 1, %v13868_v45  ;;  %v3936_v56 = vadd.s32 %v3930_v28, %v3926_v2 }
 0x334   : > { %v3194_v26 = vor.u32 %v3193_v5, %v3192_v4  ;;  %v3197_v20 = vshll.u32 %v3196_v24, 23  ;;  %v3937_v38 = vadd.s32 %v3935_v63, %v3929_v60  ;;  %v3911_v15 = vshrl.u32 %v10692_v48, 16  ;;  %v14109_v63 = vld [vmem:[#allocation26_spill] sm:$0xff] }
 0x335   : > { %v3383_v16 = vsel %vm3381_vm8, %v3369_v58, %v3382_v7  ;;  %v3920_v49 = vadd.s32 %v3919_v3, %v3909_v61  ;;  %v3931_v41 = vshrl.u32 %v10706_v23, 16  ;;  %vm3938_vm3 = vc.u32 %v3936_v56, %v3932_v62  ;;  %v7145_v58 = vld [vmem:[%s7354_s11 + $0x80] sm:$0xff] }
 0x336   : > { %v3387_v9 = vsel %vm3380_vm2, %v3383_v16, %v3386_v0  ;;  %v3198_v21 = vor.u32 4788187, %v3197_v20  ;;  %v3201_v36 = vcvt.s32.f32 %v3194_v26  ;;  %v10743_v24 = vshll.u32 %v13780_v35, %v10620_v32  ;;  %v14108_v7 = vld [vmem:[#allocation91_spill] sm:$0xff]  ;;  %v14110_v20 = vld [vmem:[#allocation10_spill] sm:$0xff] }
 0x337   : > { %v3388_v4 = vsel %vm3378_vm13, nan, %v3387_v9  ;;  %v3890_v2 = vsel %vm3884_vm15, %v3887_v33, %v3889_v12  ;;  %v3939_v48 = vsel %vm3938_vm3, 1, %v13868_v45  ;;  %v3933_v52 = vshrl.u32 %v3928_v57, 16 }
 0x338   : > { %v5715_v28 = vadd.f32 1.0, %v3388_v4  ;;  %v3199_v23 = vand.u32 2147483647, %v3198_v21  ;;  %v3941_v50 = vadd.s32 %v3939_v48, %v3937_v38  ;;  %vm723_vm14 = vcmp.le.f32.partialorder %v7145_v58, 0.51 }
 0x339   : > { %v3205_v30 = vsub.s32 4, %v10665_v25  ;;  %v10752_v60 = vadd.s32 %v3920_v49, %v3911_v15  ;;  %v10754_v1 = vadd.s32 %v3936_v56, %v3932_v62  ;;  %v10758_v10 = vshll.u32 %v13777_v31, %v10620_v32 }
 0x33a   : > { %v5747_v42 = vmul.f32 0.5, %v5715_v28  ;;  %v3202_v51 = vmul.f32 %v3201_v36, %v3199_v23  ;;  %v3942_v18 = vadd.s32 %v3941_v50, %v3931_v41  ;;  %v10761_v59 = vshrl.u32 %v10696_v44, 5 }
 0x33b   : > { %v14105_v57 = vand.u32 2147483647, %v14081_v47  ;;  %vm3083_vm12 = vcmp.lt.s32.totalorder %v14081_v47, 0  ;;  %v3944_v3 = vmul.u32 %v10648_v27, %v3890_v2  ;;  %v13710_v0 = vand.u32 2147483647, %v14108_v7 }
 0x33c   : > { %v5779_v5 = vsel %vm723_vm14, %v5747_v42, 0.0  ;;  %v3203_v33 = vxor.u32 2147483648, %v3202_v51  ;;  %v3943_v62 = vadd.s32 %v3942_v18, %v3933_v52  ;;  %v3206_v12 = vsel %vm3083_vm12, %v3205_v30, %v10665_v25  ;;  %v14112_v18 = vld [vmem:[#allocation23_spill] sm:$0xff] }
 0x33d   : > { %vm10765_vm15 = vcmp.le.f32.partialorder %v14105_v57, 0.7853982  ;;  %5877 = vperm.xlu0 %7041, %v5779_v5   ;;  %vm3946_vm6 = vc.u32 %v10752_v60, %v10754_v1  ;;  %v3717_v26 = vshll.u32 %v13869_v11, %v14109_v63  ;;  %v3718_v56 = vshrl.u32 %v13870_v46, %v14110_v20 }
 0x33e   : > { %v3204_v38 = vsel %vm3083_vm12, %v3203_v33, %v3202_v51  ;;  %v3947_v16 = vadd.s32 1, %v3943_v62  ;;  %v3720_v27 = vshll.u32 %v13870_v46, %v14109_v63  ;;  %v3721_v15 = vshrl.u32 %v13780_v35, %v14110_v20 }
 0x33f   : > { %v10784_v49 = vand.u32 31, %v10696_v44  ;;  %v3207_v25 = vsel %vm10765_vm15, %v14081_v47, %v3204_v38  ;;  %v3714_v41 = vshll.u32 %v13865_v55, %v14109_v63  ;;  %v3715_v9 = vshrl.u32 %v13869_v11, %v14110_v20 }
 0x340   : > { %vm5248_vm5 = vcmp.gt.s32.totalorder %v10699_v29, 0  ;;  %v3209_v21 = vmul.f32 %v3207_v25, %v3207_v25  ;;  %v3948_v36 = vsel %vm3946_vm6, %v3947_v16, %v3943_v62  ;;  %v3704_v4 = vand.u32 8388607, %v13710_v0  ;;  %v14113_v16 = vld [vmem:[#allocation17_spill] sm:$0xff] }
 0x341   : > { %14111 = vst [vmem:[#allocation22_spill] sm:$0xff] %v10784_v49  ;;  %v10798_v44 = vshrl.u32 %v13777_v31, %v10709_v13  ;;  %v10801_v2 = vadd.s32 4294967169, %v10675_v8  ;;  %v3208_v48 = vsel %vm10765_vm15, 0, %v3206_v12  ;;  %v3949_v28 = vadd.s32 %v3948_v36, %v3944_v3 }
 0x342   : > { %v3210_v23 = vmul.f32 -0.001358992, %v3209_v21  ;;  %v3217_v52 = vmul.f32 -0.00019511016, %v3209_v21  ;;  %v3719_v50 = vor.u32 %v3718_v56, %v3717_v26  ;;  %v3722_v58 = vor.u32 %v3721_v15, %v3720_v27  ;;  %v14114_v27 = vld [vmem:[#allocation21_spill] sm:$0xff]  ;;  %v14115_v15 = vld [vmem:[#allocation15_spill] sm:$0xff] }
 0x343   : > { %v10807_v30 = vshrl.u32 %v13778_v53, %v10709_v13  ;;  %v3950_v42 = vadd.s32 536870912, %v3949_v28  ;;  %v3716_v51 = vor.u32 %v3715_v9, %v3714_v41  ;;  %vm3729_vm8 = vcmp.lt.s32.totalorder %v14112_v18, 1 }
 0x344   : > { %v3211_v57 = vadd.f32 0.041655596, %v3210_v23  ;;  %v3218_v5 = vadd.f32 0.008332121, %v3217_v52  ;;  %v3705_v8 = vor.u32 8388608, %v3704_v4  ;;  %vm3731_vm2 = vcmp.lt.s32.totalorder %v14112_v18, 3 }
 0x345   : > { %v10814_v61 = vsel %vm5248_vm5, %v10699_v29, 0  ;;  %v3225_v3 = vand.u32 3, %v3208_v48  ;;  %v10816_v33 = vshrl.u32 %v3950_v42, 30  ;;  %vm3730_vm11 = vcmp.lt.s32.totalorder %v14112_v18, 2  ;;  %v14120_v18 = vld [vmem:[#allocation12_spill] sm:$0xff] }
 0x346   : > { %v3212_v12 = vmul.f32 %v3211_v57, %v3209_v21  ;;  %v3219_v63 = vmul.f32 %v3218_v5, %v3209_v21  ;;  %v3741_v26 = vsel %vm3729_vm8, %v3719_v50, %v3722_v58  ;;  %v3737_v38 = vsel %vm3729_vm8, %v3716_v51, %v3719_v50 }
 0x347   : > { %v3952_v56 = vshll.u32 %v10816_v33, 30  ;;  %v3739_v29 = vsel %vm3731_vm2, %v3722_v58, %v14113_v16  ;;  %v3743_v41 = vsel %vm3731_vm2, %v14115_v15, %v14114_v27  ;;  %v10834_v48 = vshll.u32 %v3705_v8, 8 }
 0x348   : > { %v3213_v9 = vadd.f32 -0.4999988, %v3212_v12  ;;  %v3220_v36 = vadd.f32 -0.16666654, %v3219_v63  ;;  %v3744_v4 = vsel %vm3730_vm11, %v3741_v26, %v3743_v41  ;;  %vm3224_vm4 = vweird.f32 %v14081_v47 }
 0x349   : > { %vm3230_vm13 = vcmp.eq.s32.totalorder %v3225_v3, 2  ;;  %v10837_v23 = vsub.s32 %v3949_v28, %v3952_v56  ;;  %v3748_v52 = vand.u32 65535, %v3744_v4  ;;  %v3749_v42 = vshrl.u32 %v3744_v4, 16 }
 0x34a   : > { %v3214_v57 = vmul.f32 %v3213_v9, %v3209_v21  ;;  %v3221_v5 = vmul.f32 %v3220_v36, %v3209_v21  ;;  %v3740_v16 = vsel %vm3730_vm11, %v3737_v38, %v3739_v29  ;;  %v3746_v12 = vand.u32 65535, %v10834_v48  ;;  %v7146_v9 = vld [vmem:[%s7354_s11 + $0x78] sm:$0xff] }
 0x34b   : > { %vm3954_vm9 = vcmp.lt.s32.totalorder %v10837_v23, 0  ;;  %v3955_v8 = vsub.s32 0, %v10837_v23  ;;  %v3713_v63 = vshrl.u32 %v13865_v55, %v14110_v20  ;;  %v3747_v28 = vshrl.u32 %v10834_v48, 16 }
 0x34c   : > { %v3215_v26 = vadd.f32 1.0, %v3214_v57  ;;  %v3222_v56 = vadd.f32 1.0, %v3221_v5  ;;  %v3734_v27 = vsel %vm3732_vm1, %v3722_v58, 2102212464  ;;  %v3751_v21 = vmul.u32 %v3749_v42, %v3746_v12 }
 0x34d   : > { %v3956_v15 = vsel %vm3954_vm9, %v3955_v8, %v10837_v23  ;;  %v3750_v38 = vmul.u32 %v3748_v52, %v3746_v12  ;;  %v10850_v29 = vmul.u32 %v3748_v52, %v3747_v28  ;;  %v3771_v41 = vshrl.u32 %v3740_v16, 16 }
 0x34e   : > { %vm722_vm0 = vcmp.le.f32.partialorder %v7146_v9, 0.51  ;;  %v3223_v36 = vmul.f32 %v3222_v56, %v3207_v25  ;;  %v3231_v4 = vxor.u32 2147483648, %v3215_v26  ;;  %v3957_v62 = vclz %v3956_v15 }
 0x34f   : > { %v3754_v20 = vshll.u32 %v3751_v21, 16  ;;  %vm3226_vm3 = vcmp.lt.s32.totalorder %v3225_v3, 2  ;;  %vm3227_vm14 = vcmp.eq.s32.totalorder %v3225_v3, 0  ;;  %v3945_v57 = vadd.s32 %v10754_v1, %v10752_v60 }
 0x350   : > { %v3756_v58 = vshll.u32 %v10850_v29, 16  ;;  %v3228_v5 = vxor.u32 2147483648, %v3223_v36  ;;  %v3232_v8 = vsel %vm3230_vm13, %v3231_v4, %v3223_v36  ;;  %v6918_v0 = vadd.s32 4294967294, %v3957_v62 }
 0x351   : > { %v3733_v52 = vsel %vm3729_vm8, %v3713_v63, %v3716_v51  ;;  %v3735_v25 = vsel %vm3731_vm2, %v3719_v50, %v3734_v27  ;;  %vm3758_vm1 = vc.u32 %v3750_v38, %v3754_v20  ;;  %v3760_v56 = vadd.s32 %v3754_v20, %v3750_v38 }
 0x352   : > { %v3770_v15 = vand.u32 65535, %v3740_v16  ;;  %v3229_v17 = vsel %vm3227_vm14, %v3215_v26, %v3228_v5  ;;  %vm6919_vm15 = vcmp.lt.s32.totalorder %v6918_v0, 0  ;;  %v3753_v13 = vmul.u32 %v3749_v42, %v3747_v28 }
 0x353   : > { %v3773_v32 = vmul.u32 %v3771_v41, %v3746_v12  ;;  %v3233_v60 = vsel %vm3226_vm3, %v3229_v17, %v3232_v8  ;;  %v3960_v1 = vsel %vm6919_vm15, 0, %v6918_v0  ;;  %v3759_v39 = vsel %vm3758_vm1, 1, %v13868_v45 }
 0x354   : > { %vm3762_vm12 = vc.u32 %v3760_v56, %v3756_v58  ;;  %v3234_v62 = vsel %vm3224_vm4, nan, %v3233_v60  ;;  %v3961_v51 = vsub.s32 32, %v3960_v1  ;;  %v3962_v63 = vshll.u32 %v10837_v23, %v3960_v1 }
 0x355   : > { %v3965_v50 = vsub.s32 4294967266, %v3960_v1  ;;  %v5714_v27 = vadd.f32 1.0, %v3234_v62  ;;  %v3975_v16 = vsub.s32 4, %v10816_v33  ;;  %v3755_v26 = vshrl.u32 %v3751_v21, 16  ;;  %v14119_v62 = vld [vmem:[#allocation101_spill] sm:$0xff] }
 0x356   : > { %v3772_v38 = vmul.u32 %v3770_v15, %v3746_v12  ;;  %v14116_v42 = vand.u32 2147483647, %v14090_v22  ;;  %v3963_v0 = vshrl.u32 %v3945_v57, %v3961_v51  ;;  %v3761_v36 = vadd.s32 %v3759_v39, %v3753_v13 }
 0x357   : > { %v3966_v3 = vadd.s32 127, %v3965_v50  ;;  %v3763_v47 = vsel %vm3762_vm12, 1, %v13868_v45  ;;  %v5746_v4 = vmul.f32 0.5, %v5714_v27  ;;  %v3774_v20 = vmul.u32 %v3770_v15, %v3747_v28 }
 0x358   : > { %vm10869_vm6 = vcmp.le.f32.partialorder %v14116_v42, 0.7853982  ;;  %v3775_v23 = vmul.u32 %v3771_v41, %v3747_v28  ;;  %v3776_v58 = vshll.u32 %v3773_v32, 16  ;;  %v3964_v5 = vor.u32 %v3963_v0, %v3962_v63  ;;  %v14121_v42 = vld [vmem:[#allocation7_spill] sm:$0xff] }
 0x359   : > { %v3967_v8 = vshll.u32 %v3966_v3, 23  ;;  %v3757_v21 = vshrl.u32 %v10850_v29, 16  ;;  %v3765_v12 = vadd.s32 %v3763_v47, %v3761_v36  ;;  %v5778_v56 = vsel %vm722_vm0, %v5746_v4, 0.0 }
 0x35a   : > { %vm3853_vm5 = vcmp.lt.s32.totalorder %v14090_v22, 0  ;;  %v3778_v60 = vshll.u32 %v3774_v20, 16  ;;  %vm3780_vm8 = vc.u32 %v3772_v38, %v3776_v58  ;;  %5872 = vperm.xlu2 %7043, %v5778_v56   ;;  %v3971_v39 = vcvt.s32.f32 %v3964_v5 }
 0x35b   : > { %v3968_v57 = vor.u32 4788187, %v3967_v8  ;;  %v3766_v13 = vadd.s32 %v3765_v12, %v3755_v26  ;;  %v3781_v1 = vsel %vm3780_vm8, 1, %v13868_v45  ;;  %v3736_v28 = vsel %vm3730_vm11, %v3733_v52, %v3735_v25 }
 0x35c   : > { %v3782_v41 = vadd.s32 %v3776_v58, %v3772_v38  ;;  %v3783_v15 = vadd.s32 %v3781_v1, %v3775_v23  ;;  %v13717_v29 = vand.u32 2147483647, %v14119_v62  ;;  %v3976_v9 = vsel %vm3853_vm5, %v3975_v16, %v10816_v33 }
 0x35d   : > { %v3969_v51 = vand.u32 2147483647, %v3968_v57  ;;  %v10884_v63 = vadd.s32 %v3766_v13, %v3757_v21  ;;  %v3777_v50 = vshrl.u32 %v3773_v32, 16  ;;  %v3560_v52 = vshll.u32 %v13865_v55, %v14120_v18  ;;  %v14122_v13 = vld [vmem:[#allocation27_spill] sm:$0xff] }
 0x35e   : > { %vm3784_vm2 = vc.u32 %v3782_v41, %v3778_v60  ;;  %v10886_v27 = vadd.s32 %v3782_v41, %v3778_v60  ;;  %v3550_v26 = vand.u32 8388607, %v13717_v29  ;;  %v3561_v0 = vshrl.u32 %v13869_v11, %v14121_v42 }
 0x35f   : > { %v3972_v25 = vmul.f32 %v3971_v39, %v3969_v51  ;;  %v3785_v38 = vsel %vm3784_vm2, 1, %v13868_v45  ;;  %v3563_v33 = vshll.u32 %v13869_v11, %v14120_v18  ;;  %v3978_v32 = vsel %vm10869_vm6, 0, %v3976_v9 }
 0x360   : > { %v3779_v16 = vshrl.u32 %v3774_v20, 16  ;;  %v3787_v3 = vadd.s32 %v3785_v38, %v3783_v15  ;;  %v3551_v36 = vor.u32 8388608, %v3550_v26  ;;  %v10899_v4 = vor.u32 %v3561_v0, %v3560_v52  ;;  %v14124_v15 = vld [vmem:[#allocation8_spill] sm:$0xff] }
 0x361   : > { %v3973_v47 = vxor.u32 2147483648, %v3972_v25  ;;  %v3564_v23 = vshrl.u32 %v13870_v46, %v14121_v42  ;;  %v3566_v58 = vshll.u32 %v13870_v46, %v14120_v18  ;;  %v3790_v8 = vmul.u32 %v10834_v48, %v3736_v28 }
 0x362   : > { %v3788_v5 = vadd.s32 %v3787_v3, %v3777_v50  ;;  %v3567_v21 = vshrl.u32 %v13780_v35, %v14121_v42  ;;  %vm3575_vm11 = vcmp.lt.s32.totalorder %v8951_v34, 1  ;;  %vm3792_vm4 = vc.u32 %v10884_v63, %v10886_v27 }
 0x363   : > { %v3974_v20 = vsel %vm3853_vm5, %v3973_v47, %v3972_v25  ;;  %v10913_v12 = vor.u32 %v3564_v23, %v3563_v33  ;;  %vm3577_vm13 = vcmp.lt.s32.totalorder %v8951_v34, 3  ;;  %vm3576_vm9 = vcmp.lt.s32.totalorder %v8951_v34, 2 }
 0x364   : > { %v10919_v56 = vsel %vm10869_vm6, %v14090_v22, %v3974_v20  ;;  %v3789_v48 = vadd.s32 %v3788_v5, %v3779_v16  ;;  %v3568_v60 = vor.u32 %v3567_v21, %v3566_v58  ;;  %v3589_v1 = vsel %vm3577_vm13, %v14122_v13, %v9448_v6 }
 0x365   : > { %v3979_v57 = vmul.f32 %v10919_v56, %v10919_v56  ;;  %v3583_v39 = vsel %vm3575_vm11, %v10899_v4, %v10913_v12  ;;  %v10932_v17 = vshll.u32 %v3551_v36, 8  ;;  %v10935_v28 = vsub.s32 32, %v10784_v49 }
 0x366   : > { %v3793_v41 = vadd.s32 1, %v3789_v48  ;;  %v3585_v51 = vsel %vm3577_vm13, %v3568_v60, %v14124_v15  ;;  %v3587_v9 = vsel %vm3575_vm11, %v10913_v12, %v3568_v60  ;;  %v10945_v50 = vshll.u32 %v13780_v35, %v10784_v49 }
 0x367   : > { %14123 = vst [vmem:[#allocation49_spill] sm:$0xff] %v10935_v28  ;;  %v3980_v26 = vmul.f32 -0.001358992, %v3979_v57  ;;  %v3987_v6 = vmul.f32 -0.00019511016, %v3979_v57  ;;  %v10947_v18 = vand.u32 3, %v3978_v32  ;;  %v3586_v25 = vsel %vm3576_vm9, %v3583_v39, %v3585_v51 }
 0x368   : > { %v3794_v52 = vsel %vm3792_vm4, %v3793_v41, %v3789_v48  ;;  %v3590_v38 = vsel %vm3576_vm9, %v3587_v9, %v3589_v1  ;;  %v3592_v0 = vand.u32 65535, %v10932_v17  ;;  %v3593_v36 = vshrl.u32 %v10932_v17, 16 }
 0x369   : > { %v3981_v33 = vadd.f32 0.041655596, %v3980_v26  ;;  %v3988_v16 = vadd.f32 0.008332121, %v3987_v6  ;;  %v3795_v3 = vadd.s32 %v3794_v52, %v3790_v8  ;;  %v10960_v32 = vor.u32 %v10798_v44, %v10743_v24 }
 0x36a   : > { %v10964_v47 = vshll.u32 %v13777_v31, %v10784_v49  ;;  %v3594_v23 = vand.u32 65535, %v3590_v38  ;;  %v3595_v58 = vshrl.u32 %v3590_v38, 16  ;;  %v3617_v1 = vshrl.u32 %v3586_v25, 16 }
 0x36b   : > { %14125 = vst [vmem:[#allocation55_spill] sm:$0xff] %v10960_v32  ;;  %v3982_v21 = vmul.f32 %v3981_v33, %v3979_v57  ;;  %v3989_v20 = vmul.f32 %v3988_v16, %v3979_v57  ;;  %v3796_v48 = vadd.s32 536870912, %v3795_v3  ;;  %vm3996_vm0 = vcmp.lt.s32.totalorder %v10947_v18, 2 }
 0x36c   : > { %v3596_v39 = vmul.u32 %v3594_v23, %v3592_v0  ;;  %v10968_v8 = vmul.u32 %v3595_v58, %v3592_v0  ;;  %v10970_v13 = vmul.u32 %v3594_v23, %v3593_v36  ;;  %v3616_v15 = vand.u32 65535, %v3586_v25 }
 0x36d   : > { %v3983_v24 = vadd.f32 -0.4999988, %v3982_v21  ;;  %v3990_v44 = vadd.f32 -0.16666654, %v3989_v20  ;;  %v10973_v41 = vshrl.u32 %v3796_v48, 30  ;;  %vm3994_vm3 = vweird.f32 %v14090_v22 }
 0x36e   : > { %vm3997_vm14 = vcmp.eq.s32.totalorder %v10947_v18, 0  ;;  %vm4000_vm1 = vcmp.eq.s32.totalorder %v10947_v18, 2  ;;  %v3600_v51 = vshll.u32 %v10968_v8, 16  ;;  %v3602_v9 = vshll.u32 %v10970_v13, 16 }
 0x36f   : > { %v3984_v26 = vmul.f32 %v3983_v24, %v3979_v57  ;;  %v3991_v6 = vmul.f32 %v3990_v44, %v3979_v57  ;;  %v3798_v52 = vshll.u32 %v10973_v41, 30  ;;  %v3559_v38 = vshrl.u32 %v13865_v55, %v14121_v42  ;;  %v7147_v44 = vld [vmem:[%s7354_s11 + $0xa0] sm:$0xff] }
 0x370   : > { %v3599_v33 = vmul.u32 %v3595_v58, %v3593_v36  ;;  %vm3604_vm15 = vc.u32 %v3596_v39, %v3600_v51  ;;  %v3606_v25 = vadd.s32 %v3600_v51, %v3596_v39  ;;  %v3619_v16 = vmul.u32 %v3617_v1, %v3592_v0 }
 0x371   : > { %v3985_v23 = vadd.f32 1.0, %v3984_v26  ;;  %v3992_v21 = vadd.f32 1.0, %v3991_v6  ;;  %v3799_v20 = vsub.s32 %v3795_v3, %v3798_v52  ;;  %v10983_v48 = vmul.u32 %v3616_v15, %v3593_v36 }
 0x372   : > { %v3580_v29 = vsel %vm3578_vm7, %v3568_v60, 2102212464  ;;  %v3605_v24 = vsel %vm3604_vm15, 1, %v13868_v45  ;;  %vm3608_vm12 = vc.u32 %v3606_v25, %v3602_v9  ;;  %v3618_v57 = vmul.u32 %v3616_v15, %v3592_v0 }
 0x373   : > { %vm727_vm6 = vcmp.le.f32.partialorder %v7147_v44, 0.51  ;;  %v3993_v42 = vmul.f32 %v3992_v21, %v10919_v56  ;;  %v4001_v58 = vxor.u32 2147483648, %v3985_v23  ;;  %vm3800_vm5 = vcmp.lt.s32.totalorder %v3799_v20, 0  ;;  %v14128_v44 = vld [vmem:[#allocation37_spill] sm:$0xff] }
 0x374   : > { %v3801_v39 = vsub.s32 0, %v3799_v20  ;;  %v3607_v51 = vadd.s32 %v3605_v24, %v3599_v33  ;;  %v3609_v26 = vsel %vm3608_vm12, 1, %v13868_v45  ;;  %v3621_v3 = vmul.u32 %v3617_v1, %v3593_v36 }
 0x375   : > { %v3622_v6 = vshll.u32 %v3619_v16, 16  ;;  %v3998_v52 = vxor.u32 2147483648, %v3993_v42  ;;  %v4002_v60 = vsel %vm4000_vm1, %v4001_v58, %v3993_v42  ;;  %v3624_v9 = vshll.u32 %v10983_v48, 16 }
 0x376   : > { %v3802_v5 = vsel %vm3800_vm5, %v3801_v39, %v3799_v20  ;;  %v3601_v15 = vshrl.u32 %v10968_v8, 16  ;;  %v3611_v25 = vadd.s32 %v3609_v26, %v3607_v51  ;;  %v3791_v33 = vadd.s32 %v10886_v27, %v10884_v63  ;;  %v14126_v63 = vld [vmem:[#allocation103_spill] sm:$0xff] }
 0x377   : > { %v3803_v0 = vclz %v3802_v5  ;;  %vm3626_vm7 = vc.u32 %v3618_v57, %v3622_v6  ;;  %v3999_v56 = vsel %vm3997_vm14, %v3985_v23, %v3998_v52  ;;  %v3628_v1 = vadd.s32 %v3622_v6, %v3618_v57 }
 0x378   : > { %v3627_v36 = vsel %vm3626_vm7, 1, %v13868_v45  ;;  %v4003_v21 = vsel %vm3996_vm0, %v3999_v56, %v4002_v60  ;;  %v3579_v5 = vsel %vm3575_vm11, %v3559_v38, %v10899_v4  ;;  %v3581_v8 = vsel %vm3577_vm13, %v10913_v12, %v3580_v29 }
 0x379   : > { %v6915_v24 = vadd.s32 4294967294, %v3803_v0  ;;  %v4004_v23 = vsel %vm3994_vm3, nan, %v4003_v21  ;;  %v3629_v42 = vadd.s32 %v3627_v36, %v3621_v3  ;;  %vm3630_vm8 = vc.u32 %v3628_v1, %v3624_v9 }
 0x37a   : > { %v13718_v27 = vand.u32 2147483647, %v14126_v63  ;;  %v5719_v57 = vadd.f32 1.0, %v4004_v23  ;;  %v3603_v18 = vshrl.u32 %v10970_v13, 16  ;;  %v3612_v58 = vadd.s32 %v3611_v25, %v3601_v15 }
 0x37b   : > { %vm6916_vm2 = vcmp.lt.s32.totalorder %v6915_v24, 0  ;;  %v3582_v4 = vsel %vm3576_vm9, %v3579_v5, %v3581_v8  ;;  %v3623_v38 = vshrl.u32 %v3619_v16, 16  ;;  %v3631_v51 = vsel %vm3630_vm8, 1, %v13868_v45 }
 0x37c   : > { %v3806_v39 = vsel %vm6916_vm2, 0, %v6915_v24  ;;  %v5751_v29 = vmul.f32 0.5, %v5719_v57  ;;  %v11016_v3 = vshrl.u32 %v10814_v61, 5  ;;  %v3625_v6 = vshrl.u32 %v10983_v48, 16 }
 0x37d   : > { %v3807_v12 = vsub.s32 32, %v3806_v39  ;;  %v3808_v22 = vshll.u32 %v3799_v20, %v3806_v39  ;;  %v3811_v26 = vsub.s32 4294967266, %v3806_v39  ;;  %v11019_v52 = vadd.s32 %v3628_v1, %v3624_v9  ;;  %v14127_v9 = vld [vmem:[#allocation20_spill] sm:$0xff] }
 0x37e   : > { %v3633_v13 = vadd.s32 %v3631_v51, %v3629_v42  ;;  %v5783_v60 = vsel %vm727_vm6, %v5751_v29, 0.0  ;;  %v11022_v15 = vadd.s32 %v3612_v58, %v3603_v18  ;;  %v3821_v16 = vsub.s32 4, %v10973_v41  ;;  %v14129_v51 = vld [vmem:[#allocation18_spill] sm:$0xff] }
 0x37f   : > { %v3809_v0 = vshrl.u32 %v3791_v33, %v3807_v12  ;;  %v3812_v34 = vadd.s32 127, %v3811_v26  ;;  %5897 = vperm.xlu1 %7042, %v5783_v60   ;;  %v3636_v20 = vmul.u32 %v10932_v17, %v3582_v4  ;;  %v4320_v56 = vand.u32 8388607, %v13718_v27  ;;  %v14132_v26 = vld [vmem:[#allocation31_spill] sm:$0xff] }
 0x380   : > { %v3634_v25 = vadd.s32 %v3633_v13, %v3623_v38  ;;  %v4330_v1 = vshll.u32 %v13865_v55, %v14127_v9  ;;  %v4331_v33 = vshrl.u32 %v13869_v11, %v14128_v44  ;;  %v4333_v24 = vshll.u32 %v13869_v11, %v14127_v9 }
 0x381   : > { %v3810_v36 = vor.u32 %v3809_v0, %v3808_v22  ;;  %v3813_v48 = vshll.u32 %v3812_v34, 23  ;;  %v4334_v5 = vshrl.u32 %v13870_v46, %v14128_v44  ;;  %v4336_v17 = vshll.u32 %v13870_v46, %v14127_v9  ;;  %v14131_v22 = vld [vmem:[#allocation41_spill] sm:$0xff] }
 0x382   : > { %v3635_v21 = vadd.s32 %v3634_v25, %v3625_v6  ;;  %vm3638_vm11 = vc.u32 %v11022_v15, %v11019_v52  ;;  %v4337_v42 = vshrl.u32 %v13780_v35, %v14128_v44  ;;  %v4321_v18 = vor.u32 8388608, %v4320_v56  ;;  %v14136_v25 = vld [vmem:[#allocation29_spill] sm:$0xff] }
 0x383   : > { %v3814_v8 = vor.u32 4788187, %v3813_v48  ;;  %v3817_v23 = vcvt.s32.f32 %v3810_v36  ;;  %v11042_v58 = vor.u32 %v4331_v33, %v4330_v1  ;;  %v11044_v39 = vor.u32 %v4334_v5, %v4333_v24 }
 0x384   : > { %v3639_v57 = vadd.s32 1, %v3635_v21  ;;  %v11046_v38 = vor.u32 %v4337_v42, %v4336_v17  ;;  %vm4345_vm4 = vcmp.lt.s32.totalorder %v14129_v51, 1  ;;  %vm4347_vm13 = vcmp.lt.s32.totalorder %v14129_v51, 3 }
 0x385   : > { %v3815_v4 = vand.u32 2147483647, %v3814_v8  ;;  %v11051_v29 = vand.u32 31, %v10814_v61  ;;  %vm4346_vm9 = vcmp.lt.s32.totalorder %v14129_v51, 2  ;;  %v4359_v6 = vsel %vm4347_vm13, %v14132_v26, %v14131_v22 }
 0x386   : > { %v3640_v12 = vsel %vm3638_vm11, %v3639_v57, %v3635_v21  ;;  %vm4656_vm0 = vcmp.lt.s32.totalorder %v10592_v37, 4  ;;  %v14133_v13 = vand.u32 2147483647, %v14108_v7  ;;  %vm3699_vm14 = vcmp.lt.s32.totalorder %v14108_v7, 0 }
 0x387   : > { %14130 = vst [vmem:[#allocation57_spill] sm:$0xff] %v11051_v29  ;;  %v3818_v61 = vmul.f32 %v3817_v23, %v3815_v4  ;;  %v3641_v0 = vadd.s32 %v3640_v12, %v3636_v20  ;;  %v4353_v34 = vsel %vm4345_vm4, %v11042_v58, %v11044_v39  ;;  %v4355_v56 = vsel %vm4347_vm13, %v11046_v38, %v14136_v25 }
 0x388   : > { %vm11061_vm3 = vcmp.le.f32.partialorder %v14133_v13, 0.7853982  ;;  %v4357_v36 = vsel %vm4345_vm4, %v11044_v39, %v11046_v38  ;;  %v11078_v48 = vshll.u32 %v4321_v18, 8  ;;  %v3822_v20 = vsel %vm3699_vm14, %v3821_v16, %v10973_v41 }
 0x389   : > { %v3819_v9 = vxor.u32 2147483648, %v3818_v61  ;;  %v3642_v1 = vadd.s32 536870912, %v3641_v0  ;;  %v4360_v33 = vsel %vm4346_vm9, %v4357_v36, %v4359_v6  ;;  %v11089_v8 = vshrl.u32 %v13777_v31, %v10935_v28 }
 0x38a   : > { %v4362_v21 = vand.u32 65535, %v11078_v48  ;;  %v4363_v24 = vshrl.u32 %v11078_v48, 16  ;;  %v4364_v5 = vand.u32 65535, %v4360_v33  ;;  %v4365_v17 = vshrl.u32 %v4360_v33, 16 }
 0x38b   : > { %v3820_v23 = vsel %vm3699_vm14, %v3819_v9, %v3818_v61  ;;  %v11093_v42 = vshrl.u32 %v3642_v1, 30  ;;  %v4356_v41 = vsel %vm4346_vm9, %v4353_v34, %v4355_v56  ;;  %v11106_v12 = vshrl.u32 %v13778_v53, %v10935_v28 }
 0x38c   : > { %v3823_v16 = vsel %vm11061_vm3, %v14108_v7, %v3820_v23  ;;  %v4366_v57 = vmul.u32 %v4364_v5, %v4362_v21  ;;  %v11100_v18 = vmul.u32 %v4365_v17, %v4362_v21  ;;  %v11102_v4 = vmul.u32 %v4364_v5, %v4363_v24 }
 0x38d   : > { %v3824_v22 = vsel %vm11061_vm3, 0, %v3822_v20  ;;  %v3825_v26 = vmul.f32 %v3823_v16, %v3823_v16  ;;  %v3644_v6 = vshll.u32 %v11093_v42, 30  ;;  %v11112_v13 = vadd.s32 1, %v10801_v2 }
 0x38e   : > { %v14137_v61 = vand.u32 2139095040, %v10383_v19  ;;  %v4370_v25 = vshll.u32 %v11100_v18, 16  ;;  %v4387_v56 = vshrl.u32 %v4356_v41, 16  ;;  %v4386_v33 = vand.u32 65535, %v4356_v41 }
 0x38f   : > { %v3826_v36 = vmul.f32 -0.001358992, %v3825_v26  ;;  %v3833_v9 = vmul.f32 -0.00019511016, %v3825_v26  ;;  %v3645_v1 = vsub.s32 %v3641_v0, %v3644_v6  ;;  %v11119_v5 = vand.u32 3, %v3824_v22 }
 0x390   : > { %v11116_v34 = vshrl.u32 %v14137_v61, 23  ;;  %v4369_v60 = vmul.u32 %v4365_v17, %v4363_v24  ;;  %v4372_v20 = vshll.u32 %v11102_v4, 16  ;;  %vm4374_vm1 = vc.u32 %v4366_v57, %v4370_v25 }
 0x391   : > { %v3827_v23 = vadd.f32 0.041655596, %v3826_v36  ;;  %v3834_v2 = vadd.f32 0.008332121, %v3833_v9  ;;  %vm3646_vm15 = vcmp.lt.s32.totalorder %v3645_v1, 0  ;;  %v3647_v27 = vsub.s32 0, %v3645_v1 }
 0x392   : > { %v11125_v61 = vsel %vm4656_vm0, %v10960_v32, 920167782  ;;  %v4375_v19 = vsel %vm4374_vm1, 1, %v13868_v45  ;;  %v4376_v28 = vadd.s32 %v4370_v25, %v4366_v57  ;;  %v11128_v0 = vmul.u32 %v4387_v56, %v4362_v21 }
 0x393   : > { %14138 = vst [vmem:[#allocation76_spill] sm:$0xff] %v11125_v61  ;;  %v3828_v41 = vmul.f32 %v3827_v23, %v3825_v26  ;;  %v3835_v22 = vmul.f32 %v3834_v2, %v3825_v26  ;;  %v3648_v17 = vsel %vm3646_vm15, %v3647_v27, %v3645_v1  ;;  %v4388_v6 = vmul.u32 %v4386_v33, %v4362_v21 }
 0x394   : > { %v3649_v49 = vclz %v3648_v17  ;;  %v4377_v54 = vadd.s32 %v4375_v19, %v4369_v60  ;;  %vm4378_vm12 = vc.u32 %v4376_v28, %v4372_v20  ;;  %v11130_v36 = vmul.u32 %v4386_v33, %v4363_v24 }
 0x395   : > { %v3829_v9 = vadd.f32 -0.4999988, %v3828_v41  ;;  %v3836_v14 = vadd.f32 -0.16666654, %v3835_v22  ;;  %vm3842_vm6 = vcmp.lt.s32.totalorder %v11119_v5, 2  ;;  %v4379_v32 = vsel %vm4378_vm12, 1, %v13868_v45 }
 0x396   : > { %v4392_v61 = vshll.u32 %v11128_v0, 16  ;;  %vm3840_vm5 = vweird.f32 %v14108_v7  ;;  %vm3843_vm7 = vcmp.eq.s32.totalorder %v11119_v5, 0  ;;  %vm3846_vm8 = vcmp.eq.s32.totalorder %v11119_v5, 2  ;;  %v7148_v7 = vld [vmem:[%s7354_s11 + $0x98] sm:$0xff] }
 0x397   : > { %v3637_v19 = vadd.s32 %v11019_v52, %v11022_v15  ;;  %v6912_v28 = vadd.s32 4294967294, %v3649_v49  ;;  %v3830_v27 = vmul.f32 %v3829_v9, %v3825_v26  ;;  %v3837_v21 = vmul.f32 %v3836_v14, %v3825_v26 }
 0x398   : > { %v4329_v57 = vshrl.u32 %v13865_v55, %v14128_v44  ;;  %vm4396_vm2 = vc.u32 %v4388_v6, %v4392_v61  ;;  %v4371_v25 = vshrl.u32 %v11100_v18, 16  ;;  %v4381_v33 = vadd.s32 %v4379_v32, %v4377_v54 }
 0x399   : > { %vm6913_vm11 = vcmp.lt.s32.totalorder %v6912_v28, 0  ;;  %v4391_v60 = vmul.u32 %v4387_v56, %v4363_v24  ;;  %v3831_v20 = vadd.f32 1.0, %v3830_v27  ;;  %v3838_v23 = vadd.f32 1.0, %v3837_v21 }
 0x39a   : > { %v3652_v2 = vsel %vm6913_vm11, 0, %v6912_v28  ;;  %v4394_v41 = vshll.u32 %v11130_v36, 16  ;;  %v4397_v49 = vsel %vm4396_vm2, 1, %v13868_v45  ;;  %v4349_v44 = vsel %vm4345_vm4, %v4329_v57, %v11042_v58 }
 0x39b   : > { %v3653_v22 = vsub.s32 32, %v3652_v2  ;;  %v3654_v17 = vshll.u32 %v3645_v1, %v3652_v2  ;;  %v3657_v52 = vsub.s32 4294967266, %v3652_v2  ;;  %v3839_v14 = vmul.f32 %v3838_v23, %v3823_v16 }
 0x39c   : > { %v3847_v15 = vxor.u32 2147483648, %v3831_v20  ;;  %vm14139_vm3 = vcmp.lt.s32.totalorder %v14129_v51, 4  ;;  %v4373_v18 = vshrl.u32 %v11102_v4, 16  ;;  %v4398_v26 = vadd.s32 %v4392_v61, %v4388_v6 }
 0x39d   : > { %v4350_v54 = vsel %vm14139_vm3, %v11046_v38, 2102212464  ;;  %v3655_v32 = vshrl.u32 %v3637_v19, %v3653_v22  ;;  %v3658_v24 = vadd.s32 127, %v3657_v52  ;;  %v3844_v56 = vxor.u32 2147483648, %v3839_v14 }
 0x39e   : > { %v3848_v1 = vsel %vm3846_vm8, %v3847_v15, %v3839_v14  ;;  %v4382_v9 = vadd.s32 %v4381_v33, %v4371_v25  ;;  %v4399_v16 = vadd.s32 %v4397_v49, %v4391_v60  ;;  %v4393_v21 = vshrl.u32 %v11128_v0, 16 }
 0x39f   : > { %v3656_v28 = vor.u32 %v3655_v32, %v3654_v17  ;;  %v3659_v27 = vshll.u32 %v3658_v24, 23  ;;  %vm4400_vm4 = vc.u32 %v4398_v26, %v4394_v41  ;;  %v3845_v58 = vsel %vm3843_vm7, %v3831_v20, %v3844_v56  ;;  %v14146_v24 = vld [vmem:[#allocation28_spill] sm:$0xff] }
 0x3a0   : > { %v4351_v38 = vsel %vm4347_vm13, %v11044_v39, %v4350_v54  ;;  %v4395_v4 = vshrl.u32 %v11130_v36, 16  ;;  %v4401_v61 = vsel %vm4400_vm4, 1, %v13868_v45  ;;  %v3849_v6 = vsel %vm3842_vm6, %v3845_v58, %v3848_v1 }
 0x3a1   : > { %v3660_v19 = vor.u32 4788187, %v3659_v27  ;;  %v3663_v57 = vcvt.s32.f32 %v3656_v28  ;;  %v4403_v25 = vadd.s32 %v4401_v61, %v4399_v16  ;;  %v14140_v0 = vor.u32 %v10807_v30, %v10758_v10 }
 0x3a2   : > { %v3850_v39 = vsel %vm3840_vm5, nan, %v3849_v6  ;;  %v11173_v36 = vadd.s32 %v4382_v9, %v4373_v18  ;;  %v11175_v60 = vadd.s32 %v4398_v26, %v4394_v41  ;;  %vm4502_vm13 = vcmp.lt.s32.totalorder %v10761_v59, 4  ;;  %v14147_v18 = vld [vmem:[#allocation34_spill] sm:$0xff] }
 0x3a3   : > { %v11169_v33 = vsel %vm4656_vm0, %v14140_v0, 1326507024  ;;  %v5718_v5 = vadd.f32 1.0, %v3850_v39  ;;  %v3661_v20 = vand.u32 2147483647, %v3660_v19  ;;  %v4352_v23 = vsel %vm4346_vm9, %v4349_v44, %v4351_v38 }
 0x3a4   : > { %v4404_v2 = vadd.s32 %v4403_v25, %v4393_v21  ;;  %v11181_v10 = vsub.s32 32, %v11051_v29  ;;  %v11185_v30 = vshll.u32 %v13780_v35, %v11051_v29  ;;  %vm726_vm14 = vcmp.le.f32.partialorder %v7148_v7, 0.51  ;;  %v14148_v7 = vld [vmem:[#allocation24_spill] sm:$0xff] }
 0x3a5   : > { %v3667_v41 = vsub.s32 4, %v11093_v42  ;;  %v11191_v22 = vor.u32 %v11089_v8, %v10945_v50  ;;  %v5750_v17 = vmul.f32 0.5, %v5718_v5  ;;  %v3664_v52 = vmul.f32 %v3663_v57, %v3661_v20 }
 0x3a6   : > { %14141 = vst [vmem:[#allocation64_spill] sm:$0xff] %v11181_v10  ;;  %v4405_v51 = vadd.s32 %v4404_v2, %v4395_v4  ;;  %v4498_v49 = vor.u32 %v11106_v12, %v10964_v47  ;;  %vm3545_vm9 = vcmp.lt.s32.totalorder %v14119_v62, 0  ;;  %v4406_v14 = vmul.u32 %v11078_v48, %v4352_v23  ;;  %v14145_v47 = vld [vmem:[#allocation110_spill] sm:$0xff] }
 0x3a7   : > { %vm4408_vm1 = vc.u32 %v11173_v36, %v11175_v60  ;;  %v5782_v15 = vsel %vm726_vm14, %v5750_v17, 0.0  ;;  %v14142_v44 = vand.u32 2147483647, %v14119_v62  ;;  %v3665_v50 = vxor.u32 2147483648, %v3664_v52 }
 0x3a8   : > { %v4409_v8 = vadd.s32 1, %v4405_v51  ;;  %5892 = vperm.xlu0 %7041, %v5782_v15   ;;  %v3668_v32 = vsel %vm3545_vm9, %v3667_v41, %v11093_v42  ;;  %v13727_v12 = vand.u32 2147483647, %v14145_v47  ;;  %v4179_v48 = vshll.u32 %v13869_v11, %v14146_v24 }
 0x3a9   : > { %vm11201_vm15 = vcmp.le.f32.partialorder %v14142_v44, 0.7853982  ;;  %v4180_v26 = vshrl.u32 %v13870_v46, %v14147_v18  ;;  %v3666_v56 = vsel %vm3545_vm9, %v3665_v50, %v3664_v52  ;;  %v4182_v9 = vshll.u32 %v13870_v46, %v14146_v24 }
 0x3aa   : > { %v4410_v1 = vsel %vm4408_vm1, %v4409_v8, %v4405_v51  ;;  %v4183_v16 = vshrl.u32 %v13780_v35, %v14147_v18  ;;  %v11217_v28 = vshrl.u32 %v13777_v31, %v11181_v10  ;;  %v11221_v42 = vshll.u32 %v13777_v31, %v11051_v29 }
 0x3ab   : > { %v11226_v27 = vsel %vm11201_vm15, %v14119_v62, %v3666_v56  ;;  %v4411_v21 = vadd.s32 %v4410_v1, %v4406_v14  ;;  %v11230_v58 = vshrl.u32 %v13778_v53, %v11181_v10  ;;  %vm5094_vm12 = vcmp.gt.s32.totalorder %v11112_v13, 0 }
 0x3ac   : > { %v3670_v38 = vsel %vm11201_vm15, 0, %v3668_v32  ;;  %v3671_v4 = vmul.f32 %v11226_v27, %v11226_v27  ;;  %v4166_v6 = vand.u32 8388607, %v13727_v12  ;;  %v4176_v19 = vshll.u32 %v13865_v55, %v14146_v24  ;;  %v14149_v24 = vld [vmem:[#allocation53_spill] sm:$0xff] }
 0x3ad   : > { %v4412_v61 = vadd.s32 536870912, %v4411_v21  ;;  %v4177_v57 = vshrl.u32 %v13869_v11, %v14147_v18  ;;  %v11243_v39 = vor.u32 %v4180_v26, %v4179_v48  ;;  %v4184_v5 = vor.u32 %v4183_v16, %v4182_v9  ;;  %v14150_v48 = vld [vmem:[#allocation42_spill] sm:$0xff] }
 0x3ae   : > { %v3672_v25 = vmul.f32 -0.001358992, %v3671_v4  ;;  %v3679_v0 = vmul.f32 -0.00019511016, %v3671_v4  ;;  %v11248_v20 = vsel %vm4502_vm13, %v11191_v22, 920167782  ;;  %v4175_v1 = vshrl.u32 %v13865_v55, %v14147_v18 }
 0x3af   : > { %v11250_v23 = vand.u32 3, %v3670_v38  ;;  %v11252_v2 = vshrl.u32 %v4412_v61, 30  ;;  %vm4191_vm6 = vcmp.lt.s32.totalorder %v14148_v7, 1  ;;  %v11256_v41 = vadd.s32 4294967169, %v11116_v34  ;;  %v14151_v18 = vld [vmem:[#allocation47_spill] sm:$0xff] }
 0x3b0   : > { %v3673_v17 = vadd.f32 0.041655596, %v3672_v25  ;;  %v3680_v52 = vadd.f32 0.008332121, %v3679_v0  ;;  %vm4193_vm5 = vcmp.lt.s32.totalorder %v14148_v7, 3  ;;  %v4167_v14 = vor.u32 8388608, %v4166_v6 }
 0x3b1   : > { %v4414_v51 = vshll.u32 %v11252_v2, 30  ;;  %v4178_v15 = vor.u32 %v4177_v57, %v4176_v19  ;;  %vm4192_vm7 = vcmp.lt.s32.totalorder %v14148_v7, 2  ;;  %v11263_v44 = vsel %vm4502_vm13, %v4498_v49, 1326507024 }
 0x3b2   : > { %v3674_v54 = vmul.f32 %v3673_v17, %v3671_v4  ;;  %v3681_v50 = vmul.f32 %v3680_v52, %v3671_v4  ;;  %v4203_v34 = vsel %vm4191_vm6, %v11243_v39, %v4184_v5  ;;  %v11271_v8 = vsel %vm5094_vm12, %v11112_v13, 0 }
 0x3b3   : > { %vm3689_vm8 = vcmp.eq.s32.totalorder %v11250_v23, 0  ;;  %v11274_v32 = vsub.s32 %v4411_v21, %v4414_v51  ;;  %v4205_v49 = vsel %vm4193_vm5, %v14150_v48, %v14149_v24  ;;  %vm3688_vm2 = vcmp.lt.s32.totalorder %v11250_v23, 2  ;;  %v7149_v24 = vld [vmem:[%s7354_s11 + $0x90] sm:$0xff] }
 0x3b4   : > { %v3675_v26 = vadd.f32 -0.4999988, %v3674_v54  ;;  %v3682_v56 = vadd.f32 -0.16666654, %v3681_v50  ;;  %v4206_v13 = vsel %vm4192_vm7, %v4203_v34, %v4205_v49  ;;  %vm3686_vm11 = vweird.f32 %v14119_v62 }
 0x3b5   : > { %vm4416_vm3 = vcmp.lt.s32.totalorder %v11274_v32, 0  ;;  %v4417_v9 = vsub.s32 0, %v11274_v32  ;;  %v4199_v16 = vsel %vm4191_vm6, %v4178_v15, %v11243_v39  ;;  %v11291_v21 = vshll.u32 %v4167_v14, 8 }
 0x3b6   : > { %v3676_v38 = vmul.f32 %v3675_v26, %v3671_v4  ;;  %v3683_v61 = vmul.f32 %v3682_v56, %v3671_v4  ;;  %vm4315_vm4 = vcmp.lt.s32.totalorder %v14126_v63, 0  ;;  %v4201_v6 = vsel %vm4193_vm5, %v4184_v5, %v14151_v18 }
 0x3b7   : > { %v4211_v19 = vshrl.u32 %v4206_v13, 16  ;;  %v4418_v57 = vsel %vm4416_vm3, %v4417_v9, %v11274_v32  ;;  %v4208_v25 = vand.u32 65535, %v11291_v21  ;;  %v4209_v0 = vshrl.u32 %v11291_v21, 16 }
 0x3b8   : > { %v4210_v17 = vand.u32 65535, %v4206_v13  ;;  %v3677_v52 = vadd.f32 1.0, %v3676_v38  ;;  %v3684_v51 = vadd.f32 1.0, %v3683_v61  ;;  %vm3692_vm14 = vcmp.eq.s32.totalorder %v11250_v23, 2 }
 0x3b9   : > { %v4419_v4 = vclz %v4418_v57  ;;  %v4407_v14 = vadd.s32 %v11175_v60, %v11173_v36  ;;  %v4195_v54 = vsel %vm4191_vm6, %v4175_v1, %v4178_v15  ;;  %vm14152_vm9 = vcmp.lt.s32.totalorder %v14148_v7, 4 }
 0x3ba   : > { %v4196_v50 = vsel %vm14152_vm9, %v4184_v5, 2102212464  ;;  %v4213_v34 = vmul.u32 %v4211_v19, %v4208_v25  ;;  %vm725_vm1 = vcmp.le.f32.partialorder %v7149_v24, 0.51  ;;  %v3685_v48 = vmul.f32 %v3684_v51, %v11226_v27 }
 0x3bb   : > { %v3693_v49 = vxor.u32 2147483648, %v3677_v52  ;;  %v6927_v26 = vadd.s32 4294967294, %v4419_v4  ;;  %v4202_v56 = vsel %vm4192_vm7, %v4199_v16, %v4201_v6  ;;  %v4437_v13 = vsub.s32 4, %v11252_v2 }
 0x3bc   : > { %v4212_v9 = vmul.u32 %v4210_v17, %v4208_v25  ;;  %v4214_v36 = vmul.u32 %v4210_v17, %v4209_v0  ;;  %v4232_v60 = vand.u32 65535, %v4202_v56  ;;  %v3690_v38 = vxor.u32 2147483648, %v3685_v48 }
 0x3bd   : > { %v3694_v15 = vsel %vm3692_vm14, %v3693_v49, %v3685_v48  ;;  %vm6928_vm15 = vcmp.lt.s32.totalorder %v6927_v26, 0  ;;  %v4216_v5 = vshll.u32 %v4213_v34, 16  ;;  %v4197_v27 = vsel %vm4193_vm5, %v11243_v39, %v4196_v50 }
 0x3be   : > { %v4422_v1 = vsel %vm6928_vm15, 0, %v6927_v26  ;;  %v4215_v61 = vmul.u32 %v4211_v19, %v4209_v0  ;;  %v4233_v18 = vshrl.u32 %v4202_v56, 16  ;;  %v3691_v16 = vsel %vm3689_vm8, %v3677_v52, %v3690_v38 }
 0x3bf   : > { %v14153_v6 = vand.u32 2147483647, %v14126_v63  ;;  %v4423_v17 = vsub.s32 32, %v4422_v1  ;;  %v4424_v51 = vshll.u32 %v11274_v32, %v4422_v1  ;;  %v4427_v4 = vsub.s32 4294967266, %v4422_v1 }
 0x3c0   : > { %v3695_v48 = vsel %vm3688_vm2, %v3691_v16, %v3694_v15  ;;  %v11331_v39 = vsel %vm4315_vm4, %v4437_v13, %v11252_v2  ;;  %v4218_v19 = vshll.u32 %v4214_v36, 16  ;;  %v4234_v52 = vmul.u32 %v4232_v60, %v4208_v25 }
 0x3c1   : > { %vm11321_vm12 = vcmp.le.f32.partialorder %v14153_v6, 0.7853982  ;;  %v3696_v50 = vsel %vm3686_vm11, nan, %v3695_v48  ;;  %v4425_v49 = vshrl.u32 %v4407_v14, %v4423_v17  ;;  %v4428_v26 = vadd.s32 127, %v4427_v4 }
 0x3c2   : > { %vm4220_vm6 = vc.u32 %v4212_v9, %v4216_v5  ;;  %v5717_v56 = vadd.f32 1.0, %v3696_v50  ;;  %v4222_v38 = vadd.s32 %v4216_v5, %v4212_v9  ;;  %v4235_v1 = vmul.u32 %v4233_v18, %v4208_v25 }
 0x3c3   : > { %v4221_v32 = vsel %vm4220_vm6, 1, %v13868_v45  ;;  %v4426_v23 = vor.u32 %v4425_v49, %v4424_v51  ;;  %v4429_v15 = vshll.u32 %v4428_v26, 23  ;;  %v4236_v6 = vmul.u32 %v4232_v60, %v4209_v0 }
 0x3c4   : > { %v4223_v16 = vadd.s32 %v4221_v32, %v4215_v61  ;;  %v5749_v12 = vmul.f32 0.5, %v5717_v56  ;;  %v4217_v2 = vshrl.u32 %v4213_v34, 16  ;;  %vm4224_vm5 = vc.u32 %v4222_v38, %v4218_v19  ;;  %v14158_v56 = vld [vmem:[#allocation54_spill] sm:$0xff] }
 0x3c5   : > { %v4238_v13 = vshll.u32 %v4235_v1, 16  ;;  %v4430_v10 = vor.u32 4788187, %v4429_v15  ;;  %v4433_v29 = vcvt.s32.f32 %v4426_v23  ;;  %v4225_v62 = vsel %vm4224_vm5, 1, %v13868_v45 }
 0x3c6   : > { %v4237_v14 = vmul.u32 %v4233_v18, %v4209_v0  ;;  %v5781_v17 = vsel %vm725_vm1, %v5749_v12, 0.0  ;;  %v4219_v4 = vshrl.u32 %v4214_v36, 16  ;;  %v4227_v48 = vadd.s32 %v4225_v62, %v4223_v16  ;;  %v14156_v0 = vld [vmem:[#allocation6_spill] sm:$0xff] }
 0x3c7   : > { %v4240_v50 = vshll.u32 %v4236_v6, 16  ;;  %5887 = vperm.xlu2 %7043, %v5781_v17   ;;  %v4431_v25 = vand.u32 2147483647, %v4430_v10  ;;  %v4198_v9 = vsel %vm4192_vm7, %v4195_v54, %v4197_v27  ;;  %vm4242_vm8 = vc.u32 %v4234_v52, %v4238_v13 }
 0x3c8   : > { %v4244_v60 = vadd.s32 %v4238_v13, %v4234_v52  ;;  %v4440_v34 = vsel %vm11321_vm12, 0, %v11331_v39  ;;  %v4228_v5 = vadd.s32 %v4227_v48, %v4217_v2  ;;  %v4243_v61 = vsel %vm4242_vm8, 1, %v13868_v45  ;;  %v14157_v52 = vld [vmem:[#allocation11_spill] sm:$0xff] }
 0x3c9   : > { %v13733_v24 = vand.u32 2147483647, %v14156_v0  ;;  %v4434_v12 = vmul.f32 %v4433_v29, %v4431_v25  ;;  %v4239_v36 = vshrl.u32 %v4235_v1, 16  ;;  %v4245_v18 = vadd.s32 %v4243_v61, %v4237_v14  ;;  %v14159_v14 = vld [vmem:[#allocation40_spill] sm:$0xff]  ;;  %v14161_v48 = vld [vmem:[#allocation35_spill] sm:$0xff] }
 0x3ca   : > { %vm4246_vm2 = vc.u32 %v4244_v60, %v4240_v50  ;;  %v11345_v51 = vadd.s32 %v4228_v5, %v4219_v4  ;;  %v11348_v7 = vadd.s32 %v4244_v60, %v4240_v50  ;;  %v4241_v39 = vshrl.u32 %v4236_v6, 16  ;;  %v14160_v4 = vld [vmem:[#allocation50_spill] sm:$0xff] }
 0x3cb   : > { %v4247_v10 = vsel %vm4246_vm2, 1, %v13868_v45  ;;  %v4012_v54 = vand.u32 8388607, %v13733_v24  ;;  %v4435_v27 = vxor.u32 2147483648, %v4434_v12  ;;  %v4025_v49 = vshll.u32 %v13869_v11, %v14157_v52 }
 0x3cc   : > { %v4249_v19 = vadd.s32 %v4247_v10, %v4245_v18  ;;  %v4252_v29 = vmul.u32 %v11291_v21, %v4198_v9  ;;  %v4022_v26 = vshll.u32 %v13865_v55, %v14157_v52  ;;  %v4023_v32 = vshrl.u32 %v13869_v11, %v14158_v56 }
 0x3cd   : > { %v4026_v38 = vshrl.u32 %v13870_v46, %v14158_v56  ;;  %v4436_v1 = vsel %vm4315_vm4, %v4435_v27, %v4434_v12  ;;  %v4013_v15 = vor.u32 8388608, %v4012_v54  ;;  %v4028_v16 = vshll.u32 %v13870_v46, %v14157_v52 }
 0x3ce   : > { %v4250_v23 = vadd.s32 %v4249_v19, %v4239_v36  ;;  %v11368_v21 = vsel %vm11321_vm12, %v14126_v63, %v4436_v1  ;;  %vm4254_vm7 = vc.u32 %v11345_v51, %v11348_v7  ;;  %v4029_v2 = vshrl.u32 %v13780_v35, %v14158_v56 }
 0x3cf   : > { %v11372_v6 = vor.u32 %v4026_v38, %v4025_v49  ;;  %v4441_v13 = vmul.f32 %v11368_v21, %v11368_v21  ;;  %vm4037_vm11 = vcmp.lt.s32.totalorder %v14159_v14, 1  ;;  %vm4039_vm3 = vcmp.lt.s32.totalorder %v14159_v14, 3 }
 0x3d0   : > { %v4251_v62 = vadd.s32 %v4250_v23, %v4241_v39  ;;  %v11380_v17 = vor.u32 %v4023_v32, %v4022_v26  ;;  %v4030_v57 = vor.u32 %v4029_v2, %v4028_v16  ;;  %vm4038_vm4 = vcmp.lt.s32.totalorder %v14159_v14, 2 }
 0x3d1   : > { %v4051_v50 = vsel %vm4039_vm3, %v14161_v48, %v14160_v4  ;;  %v4442_v25 = vmul.f32 -0.001358992, %v4441_v13  ;;  %v4449_v9 = vmul.f32 -0.00019511016, %v4441_v13  ;;  %v11387_v5 = vshll.u32 %v4013_v15, 8 }
 0x3d2   : > { %v4255_v60 = vadd.s32 1, %v4251_v62  ;;  %v11391_v61 = vor.u32 %v11217_v28, %v11185_v30  ;;  %v5268_v12 = vor.u32 %v11230_v58, %v11221_v42  ;;  %v5548_v36 = vand.u32 2139095040, %v10514_v43  ;;  %v14162_v28 = vld [vmem:[#allocation45_spill] sm:$0xff] }
 0x3d3   : > { %v4049_v18 = vsel %vm4037_vm11, %v11372_v6, %v4030_v57  ;;  %v4443_v10 = vadd.f32 0.041655596, %v4442_v25  ;;  %v4450_v54 = vadd.f32 0.008332121, %v4449_v9  ;;  %v11399_v27 = vand.u32 3, %v4440_v34 }
 0x3d4   : > { %v4256_v39 = vsel %vm4254_vm7, %v4255_v60, %v4251_v62  ;;  %v4045_v30 = vsel %vm4037_vm11, %v11380_v17, %v11372_v6  ;;  %v4047_v52 = vsel %vm4039_vm3, %v4030_v57, %v14162_v28  ;;  %v4052_v49 = vsel %vm4038_vm4, %v4049_v18, %v4051_v50 }
 0x3d5   : > { %v4257_v19 = vadd.s32 %v4256_v39, %v4252_v29  ;;  %v4444_v26 = vmul.f32 %v4443_v10, %v4441_v13  ;;  %v4451_v34 = vmul.f32 %v4450_v54, %v4441_v13  ;;  %v4054_v32 = vand.u32 65535, %v11387_v5 }
 0x3d6   : > { %v4055_v38 = vshrl.u32 %v11387_v5, 16  ;;  %v11416_v29 = vshrl.u32 %v11271_v8, 5  ;;  %v4056_v23 = vand.u32 65535, %v4052_v49  ;;  %v4057_v15 = vshrl.u32 %v4052_v49, 16 }
 0x3d7   : > { %v4258_v1 = vadd.s32 536870912, %v4257_v19  ;;  %v4445_v16 = vadd.f32 -0.4999988, %v4444_v26  ;;  %v4452_v2 = vadd.f32 -0.16666654, %v4451_v34  ;;  %vm4458_vm14 = vcmp.lt.s32.totalorder %v11399_v27, 2 }
 0x3d8   : > { %vm4459_vm9 = vcmp.eq.s32.totalorder %v11399_v27, 0  ;;  %v4048_v62 = vsel %vm4038_vm4, %v4045_v30, %v4047_v52  ;;  %v4058_v48 = vmul.u32 %v4056_v23, %v4054_v32  ;;  %v4059_v50 = vmul.u32 %v4057_v15, %v4054_v32 }
 0x3d9   : > { %v11422_v4 = vshrl.u32 %v4258_v1, 30  ;;  %v11424_v25 = vmul.u32 %v4056_v23, %v4055_v38  ;;  %v4446_v9 = vmul.f32 %v4445_v16, %v4441_v13  ;;  %v4453_v60 = vmul.f32 %v4452_v2, %v4441_v13  ;;  %v7150_v23 = vld [vmem:[%s7354_s11 + $0xb8] sm:$0xff] }
 0x3da   : > { %vm4462_vm1 = vcmp.eq.s32.totalorder %v11399_v27, 2  ;;  %v4078_v18 = vand.u32 65535, %v4048_v62  ;;  %v4021_v54 = vshrl.u32 %v13865_v55, %v14158_v56  ;;  %v4061_v39 = vmul.u32 %v4057_v15, %v4055_v38 }
 0x3db   : > { %v4260_v10 = vshll.u32 %v11422_v4, 30  ;;  %v4062_v28 = vshll.u32 %v4059_v50, 16  ;;  %v4447_v30 = vadd.f32 1.0, %v4446_v9  ;;  %v4454_v52 = vadd.f32 1.0, %v4453_v60 }
 0x3dc   : > { %v4064_v49 = vshll.u32 %v11424_v25, 16  ;;  %v4079_v26 = vshrl.u32 %v4048_v62, 16  ;;  %vm14163_vm15 = vcmp.lt.s32.totalorder %v14159_v14, 4  ;;  %vm730_vm6 = vcmp.le.f32.partialorder %v7150_v23, 0.51 }
 0x3dd   : > { %v11431_v34 = vsub.s32 %v4257_v19, %v4260_v10  ;;  %v4042_v13 = vsel %vm14163_vm15, %v4030_v57, 2102212464  ;;  %vm4066_vm12 = vc.u32 %v4058_v48, %v4062_v28  ;;  %v4068_v1 = vadd.s32 %v4062_v28, %v4058_v48 }
 0x3de   : > { %v4455_v16 = vmul.f32 %v4454_v52, %v11368_v21  ;;  %v4463_v2 = vxor.u32 2147483648, %v4447_v30  ;;  %v4067_v56 = vsel %vm4066_vm12, 1, %v13868_v45  ;;  %v4080_v15 = vmul.u32 %v4078_v18, %v4054_v32 }
 0x3df   : > { %vm4262_vm5 = vcmp.lt.s32.totalorder %v11431_v34, 0  ;;  %v4263_v9 = vsub.s32 0, %v11431_v34  ;;  %v4069_v62 = vadd.s32 %v4067_v56, %v4061_v39  ;;  %vm4070_vm8 = vc.u32 %v4068_v1, %v4064_v49 }
 0x3e0   : > { %v4460_v19 = vxor.u32 2147483648, %v4455_v16  ;;  %v4464_v57 = vsel %vm4462_vm1, %v4463_v2, %v4455_v16  ;;  %v4071_v48 = vsel %vm4070_vm8, 1, %v13868_v45  ;;  %v4081_v60 = vmul.u32 %v4079_v26, %v4054_v32 }
 0x3e1   : > { %vm4456_vm2 = vweird.f32 %v14126_v63  ;;  %v4264_v21 = vsel %vm4262_vm5, %v4263_v9, %v11431_v34  ;;  %v4041_v10 = vsel %vm4037_vm11, %v4021_v54, %v11380_v17  ;;  %v4082_v28 = vmul.u32 %v4078_v18, %v4055_v38 }
 0x3e2   : > { %v4461_v39 = vsel %vm4459_vm9, %v4447_v30, %v4460_v19  ;;  %v4265_v52 = vclz %v4264_v21  ;;  %v4043_v49 = vsel %vm4039_vm3, %v11372_v6, %v4042_v13  ;;  %v4084_v1 = vshll.u32 %v4081_v60, 16  ;;  %v14164_v19 = vld [vmem:[#allocation14_spill] sm:$0xff] }
 0x3e3   : > { %v4465_v32 = vsel %vm4458_vm14, %v4461_v39, %v4464_v57  ;;  %v4063_v63 = vshrl.u32 %v4059_v50, 16  ;;  %v4073_v16 = vadd.s32 %v4071_v48, %v4069_v62  ;;  %v4083_v2 = vmul.u32 %v4079_v26, %v4055_v38 }
 0x3e4   : > { %v4466_v56 = vsel %vm4456_vm2, nan, %v4465_v32  ;;  %v4253_v17 = vadd.s32 %v11348_v7, %v11345_v51  ;;  %v6924_v18 = vadd.s32 4294967294, %v4265_v52  ;;  %vm4088_vm7 = vc.u32 %v4080_v15, %v4084_v1 }
 0x3e5   : > { %v5722_v54 = vadd.f32 1.0, %v4466_v56  ;;  %v4086_v30 = vshll.u32 %v4082_v28, 16  ;;  %v4089_v9 = vsel %vm4088_vm7, 1, %v13868_v45  ;;  %v13732_v21 = vand.u32 2147483647, %v14164_v19  ;;  %v14167_v56 = vld [vmem:[#allocation56_spill] sm:$0xff] }
 0x3e6   : > { %vm6925_vm11 = vcmp.lt.s32.totalorder %v6924_v18, 0  ;;  %v4044_v6 = vsel %vm4038_vm4, %v4041_v10, %v4043_v49  ;;  %v4065_v27 = vshrl.u32 %v11424_v25, 16  ;;  %v4090_v50 = vadd.s32 %v4084_v1, %v4080_v15 }
 0x3e7   : > { %v5754_v38 = vmul.f32 0.5, %v5722_v54  ;;  %v4268_v26 = vsel %vm6925_vm11, 0, %v6924_v18  ;;  %v4074_v13 = vadd.s32 %v4073_v16, %v4063_v63  ;;  %v4091_v62 = vadd.s32 %v4089_v9, %v4083_v2  ;;  %v14166_v63 = vld [vmem:[#allocation43_spill] sm:$0xff] }
 0x3e8   : > { %v11463_v51 = vand.u32 31, %v11271_v8  ;;  %v4269_v7 = vsub.s32 32, %v4268_v26  ;;  %v4270_v57 = vshll.u32 %v11431_v34, %v4268_v26  ;;  %v4273_v48 = vsub.s32 4294967266, %v4268_v26 }
 0x3e9   : > { %v11467_v39 = vadd.s32 1, %v11256_v41  ;;  %v5786_v14 = vsel %vm730_vm6, %v5754_v38, 0.0  ;;  %v4085_v10 = vshrl.u32 %v4081_v60, 16  ;;  %vm4092_vm3 = vc.u32 %v4090_v50, %v4086_v30 }
 0x3ea   : > { %14165 = vst [vmem:[#allocation75_spill] sm:$0xff] %v11463_v51  ;;  %5912 = vperm.xlu1 %7042, %v5786_v14   ;;  %v4271_v25 = vshrl.u32 %v4253_v17, %v4269_v7  ;;  %v4274_v15 = vadd.s32 127, %v4273_v48  ;;  %v4093_v52 = vsel %vm4092_vm3, 1, %v13868_v45  ;;  %v4098_v49 = vmul.u32 %v11387_v5, %v4044_v6 }
 0x3eb   : > { %vm5272_vm4 = vcmp.lt.s32.totalorder %v11016_v3, 4  ;;  %v11473_v8 = vadd.s32 %v4074_v13, %v4065_v27  ;;  %v4087_v34 = vshrl.u32 %v4082_v28, 16  ;;  %v4095_v1 = vadd.s32 %v4093_v52, %v4091_v62  ;;  %v14171_v52 = vld [vmem:[#allocation60_spill] sm:$0xff] }
 0x3ec   : > { %v4782_v41 = vand.u32 8388607, %v13732_v21  ;;  %v4272_v23 = vor.u32 %v4271_v25, %v4270_v57  ;;  %v4275_v32 = vshll.u32 %v4274_v15, 23  ;;  %v11477_v60 = vadd.s32 %v4090_v50, %v4086_v30 }
 0x3ed   : > { %v4792_v16 = vshll.u32 %v13865_v55, %v14166_v63  ;;  %v4096_v2 = vadd.s32 %v4095_v1, %v4085_v10  ;;  %v4793_v5 = vshrl.u32 %v13869_v11, %v14167_v56  ;;  %v4795_v17 = vshll.u32 %v13869_v11, %v14166_v63 }
 0x3ee   : > { %v4796_v28 = vshrl.u32 %v13870_v46, %v14167_v56  ;;  %v4276_v18 = vor.u32 4788187, %v4275_v32  ;;  %v4279_v54 = vcvt.s32.f32 %v4272_v23  ;;  %v4798_v9 = vshll.u32 %v13870_v46, %v14166_v63 }
 0x3ef   : > { %v4799_v30 = vshrl.u32 %v13780_v35, %v14167_v56  ;;  %v4283_v6 = vsub.s32 4, %v11422_v4  ;;  %v4097_v27 = vadd.s32 %v4096_v2, %v4087_v34  ;;  %vm4807_vm14 = vcmp.lt.s32.totalorder %v10208_v40, 1  ;;  %v14172_v34 = vld [vmem:[#allocation48_spill] sm:$0xff] }
 0x3f0   : > { %v11492_v50 = vor.u32 %v4796_v28, %v4795_v17  ;;  %v4277_v38 = vand.u32 2147483647, %v4276_v18  ;;  %vm4100_vm9 = vc.u32 %v11473_v8, %v11477_v60  ;;  %v11497_v26 = vor.u32 %v4793_v5, %v4792_v16  ;;  %v14173_v16 = vld [vmem:[#allocation73_spill] sm:$0xff] }
 0x3f1   : > { %v11499_v13 = vor.u32 %v4799_v30, %v4798_v9  ;;  %v4101_v62 = vadd.s32 1, %v4097_v27  ;;  %v4783_v7 = vor.u32 8388608, %v4782_v41  ;;  %vm4808_vm1 = vcmp.lt.s32.totalorder %v10208_v40, 2  ;;  %v7151_v28 = vld [vmem:[%s7354_s11 + $0xf0] sm:$0xff] }
 0x3f2   : > { %vm4809_vm15 = vcmp.lt.s32.totalorder %v10208_v40, 3  ;;  %v11505_v57 = vshrl.u32 %v5548_v36, 23  ;;  %vm4161_vm12 = vcmp.lt.s32.totalorder %v14145_v47, 0  ;;  %v4280_v48 = vmul.f32 %v4279_v54, %v4277_v38 }
 0x3f3   : > { %v4819_v14 = vsel %vm4807_vm14, %v11492_v50, %v11499_v13  ;;  %v14168_v10 = vand.u32 2147483647, %v14145_v47  ;;  %v4284_v36 = vsel %vm4161_vm12, %v4283_v6, %v11422_v4  ;;  %v4102_v15 = vsel %vm4100_vm9, %v4101_v62, %v4097_v27 }
 0x3f4   : > { %v4821_v1 = vsel %vm4809_vm15, %v14172_v34, %v14171_v52  ;;  %v4281_v41 = vxor.u32 2147483648, %v4280_v48  ;;  %v4103_v23 = vadd.s32 %v4102_v15, %v4098_v49  ;;  %v4815_v32 = vsel %vm4807_vm14, %v11497_v26, %v11492_v50 }
 0x3f5   : > { %vm11514_vm6 = vcmp.le.f32.partialorder %v14168_v10, 0.7853982  ;;  %v4822_v63 = vsel %vm4808_vm1, %v4819_v14, %v4821_v1  ;;  %v4817_v4 = vsel %vm4809_vm15, %v11499_v13, %v14173_v16  ;;  %v11535_v2 = vshll.u32 %v4783_v7, 8 }
 0x3f6   : > { %v4826_v5 = vand.u32 65535, %v4822_v63  ;;  %v4827_v17 = vshrl.u32 %v4822_v63, 16  ;;  %v11540_v49 = vsel %vm5272_vm4, %v11391_v61, 920167782  ;;  %v11543_v18 = vmul.f32 6.1599855, %v7151_v28 }
 0x3f7   : > { %v4282_v54 = vsel %vm4161_vm12, %v4281_v41, %v4280_v48  ;;  %v4104_v9 = vadd.s32 536870912, %v4103_v23  ;;  %v11552_v30 = vsel %vm5272_vm4, %v5268_v12, 1326507024  ;;  %v4824_v27 = vand.u32 65535, %v11535_v2 }
 0x3f8   : > { %14174 = vst [vmem:[#allocation25_spill] sm:$0xff] %v11543_v18  ;;  %v11557_v6 = vsel %vm11514_vm6, %v14145_v47, %v4282_v54  ;;  %v4825_v38 = vshrl.u32 %v11535_v2, 16  ;;  %v4286_v62 = vsel %vm11514_vm6, 0, %v4284_v36  ;;  %v4818_v58 = vsel %vm4808_vm1, %v4815_v32, %v4817_v4 }
 0x3f9   : > { %v4287_v7 = vmul.f32 %v11557_v6, %v11557_v6  ;;  %v11565_v42 = vshrl.u32 %v4104_v9, 30  ;;  %v11570_v12 = vsub.s32 32, %v11463_v51  ;;  %v4828_v48 = vmul.u32 %v4826_v5, %v4824_v27 }
 0x3fa   : > { %v11572_v14 = vmul.u32 %v4827_v17, %v4824_v27  ;;  %v11574_v10 = vmul.u32 %v4826_v5, %v4825_v38  ;;  %v11578_v25 = vshll.u32 %v13780_v35, %v11463_v51  ;;  %v11581_v34 = vand.u32 3, %v4286_v62 }
 0x3fb   : > { %v4288_v36 = vmul.f32 -0.001358992, %v4287_v7  ;;  %v4295_v15 = vmul.f32 -0.00019511016, %v4287_v7  ;;  %v4106_v52 = vshll.u32 %v11565_v42, 30  ;;  %v4848_v41 = vand.u32 65535, %v4818_v58 }
 0x3fc   : > { %v4832_v1 = vshll.u32 %v11572_v14, 16  ;;  %v4849_v32 = vshrl.u32 %v4818_v58, 16  ;;  %v4831_v5 = vmul.u32 %v4827_v17, %v4825_v38  ;;  %v11588_v28 = vshll.u32 %v13777_v31, %v11463_v51 }
 0x3fd   : > { %v4289_v63 = vadd.f32 0.041655596, %v4288_v36  ;;  %v4296_v16 = vadd.f32 0.008332121, %v4295_v15  ;;  %v11584_v4 = vsub.s32 %v4103_v23, %v4106_v52  ;;  %v4791_v54 = vshrl.u32 %v13865_v55, %v14167_v56 }
 0x3fe   : > { %v4834_v9 = vshll.u32 %v11574_v10, 16  ;;  %vm4836_vm5 = vc.u32 %v4828_v48, %v4832_v1  ;;  %vm4305_vm2 = vcmp.eq.s32.totalorder %v11581_v34, 0  ;;  %v4838_v17 = vadd.s32 %v4832_v1, %v4828_v48 }
 0x3ff   : > { %v4290_v62 = vmul.f32 %v4289_v63, %v4287_v7  ;;  %v4297_v21 = vmul.f32 %v4296_v16, %v4287_v7  ;;  %vm4108_vm8 = vcmp.lt.s32.totalorder %v11584_v4, 0  ;;  %v4109_v58 = vsub.s32 0, %v11584_v4 }
 0x400   : > { %v4837_v23 = vsel %vm4836_vm5, 1, %v13868_v45  ;;  %v4850_v36 = vmul.u32 %v4848_v41, %v4824_v27  ;;  %v11597_v15 = vmul.u32 %v4849_v32, %v4824_v27  ;;  %vm4304_vm7 = vcmp.lt.s32.totalorder %v11581_v34, 2 }
 0x401   : > { %v4291_v52 = vadd.f32 -0.4999988, %v4290_v62  ;;  %v4298_v24 = vadd.f32 -0.16666654, %v4297_v21  ;;  %v4110_v56 = vsel %vm4108_vm8, %v4109_v58, %v11584_v4  ;;  %v4839_v63 = vadd.s32 %v4837_v23, %v4831_v5 }
 0x402   : > { %vm4302_vm11 = vweird.f32 %v14145_v47  ;;  %v4111_v16 = vclz %v4110_v56  ;;  %v4812_v43 = vsel %vm4810_vm10, %v11499_v13, 2102212464  ;;  %vm4840_vm3 = vc.u32 %v4838_v17, %v4834_v9 }
 0x403   : > { %v11605_v51 = vmul.u32 %v4848_v41, %v4825_v38  ;;  %v4292_v48 = vmul.f32 %v4291_v52, %v4287_v7  ;;  %v4299_v27 = vmul.f32 %v4298_v24, %v4287_v7  ;;  %v4841_v1 = vsel %vm4840_vm3, 1, %v13868_v45 }
 0x404   : > { %v4854_v21 = vshll.u32 %v11597_v15, 16  ;;  %vm4308_vm9 = vcmp.eq.s32.totalorder %v11581_v34, 2  ;;  %v4099_v5 = vadd.s32 %v11477_v60, %v11473_v8  ;;  %v6921_v62 = vadd.s32 4294967294, %v4111_v16 }
 0x405   : > { %v4833_v58 = vshrl.u32 %v11572_v14, 16  ;;  %vm4940_vm12 = vcmp.gt.s32.totalorder %v11467_v39, 0  ;;  %v4293_v13 = vadd.f32 1.0, %v4292_v48  ;;  %v4300_v9 = vadd.f32 1.0, %v4299_v27 }
 0x406   : > { %v4843_v41 = vadd.s32 %v4841_v1, %v4839_v63  ;;  %vm4858_vm10 = vc.u32 %v4850_v36, %v4854_v21  ;;  %vm6922_vm6 = vcmp.lt.s32.totalorder %v6921_v62, 0  ;;  %v4811_v24 = vsel %vm4807_vm14, %v4791_v54, %v11497_v26 }
 0x407   : > { %v4813_v7 = vsel %vm4809_vm15, %v11492_v50, %v4812_v43  ;;  %v4853_v23 = vmul.u32 %v4849_v32, %v4825_v38  ;;  %v4301_v8 = vmul.f32 %v4300_v9, %v11557_v6  ;;  %v4309_v60 = vxor.u32 2147483648, %v4293_v13 }
 0x408   : > { %v4114_v14 = vsel %vm6922_vm6, 0, %v6921_v62  ;;  %v4856_v17 = vshll.u32 %v11605_v51, 16  ;;  %v4859_v16 = vsel %vm4858_vm10, 1, %v13868_v45  ;;  %v4835_v54 = vshrl.u32 %v11574_v10, 16 }
 0x409   : > { %v4115_v52 = vsub.s32 32, %v4114_v14  ;;  %v4116_v56 = vshll.u32 %v11584_v4, %v4114_v14  ;;  %v4119_v63 = vsub.s32 4294967266, %v4114_v14  ;;  %v4306_v48 = vxor.u32 2147483648, %v4301_v8 }
 0x40a   : > { %v4310_v26 = vsel %vm4308_vm9, %v4309_v60, %v4301_v8  ;;  %v4844_v43 = vadd.s32 %v4843_v41, %v4833_v58  ;;  %v4814_v6 = vsel %vm4808_vm1, %v4811_v24, %v4813_v7  ;;  %v4860_v32 = vadd.s32 %v4854_v21, %v4850_v36  ;;  %v7152_v7 = vld [vmem:[%s7354_s11 + $0xb0] sm:$0xff] }
 0x40b   : > { %v4117_v50 = vshrl.u32 %v4099_v5, %v4115_v52  ;;  %v4120_v38 = vadd.s32 127, %v4119_v63  ;;  %v4307_v27 = vsel %vm4305_vm2, %v4293_v13, %v4306_v48  ;;  %v4855_v4 = vshrl.u32 %v11597_v15, 16 }
 0x40c   : > { %v4857_v1 = vshrl.u32 %v11605_v51, 16  ;;  %v4861_v62 = vadd.s32 %v4859_v16, %v4853_v23  ;;  %v4311_v9 = vsel %vm4304_vm7, %v4307_v27, %v4310_v26  ;;  %vm4862_vm14 = vc.u32 %v4860_v32, %v4856_v17  ;;  %v14176_v26 = vld [vmem:[#allocation51_spill] sm:$0xff] }
 0x40d   : > { %v4118_v10 = vor.u32 %v4117_v50, %v4116_v56  ;;  %v4121_v58 = vshll.u32 %v4120_v38, 23  ;;  %v4312_v40 = vsel %vm4302_vm11, nan, %v4311_v9  ;;  %v11637_v5 = vadd.s32 %v4844_v43, %v4835_v54  ;;  %v14175_v56 = vld [vmem:[#allocation32_spill] sm:$0xff] }
 0x40e   : > { %v4863_v36 = vsel %vm4862_vm14, 1, %v13868_v45  ;;  %v11640_v21 = vadd.s32 %v4860_v32, %v4856_v17  ;;  %v5721_v15 = vadd.f32 1.0, %v4312_v40  ;;  %v5110_v34 = vshrl.u32 %v13777_v31, %v11570_v12  ;;  %v14177_v54 = vld [vmem:[#allocation72_spill] sm:$0xff] }
 0x40f   : > { %v4122_v13 = vor.u32 4788187, %v4121_v58  ;;  %v4125_v51 = vcvt.s32.f32 %v4118_v10  ;;  %v4865_v41 = vadd.s32 %v4863_v36, %v4861_v62  ;;  %v11646_v24 = vshrl.u32 %v13778_v53, %v11570_v12  ;;  %v14182_v32 = vld [vmem:[#allocation76_spill] sm:$0xff] }
 0x410   : > { %v6950_v47 = vadd.s32 4294967169, %v11505_v57  ;;  %vm729_vm1 = vcmp.le.f32.partialorder %v7152_v7, 0.51  ;;  %v4941_v23 = vsel %vm4940_vm12, %v11467_v39, 0  ;;  %v5753_v8 = vmul.f32 0.5, %v5721_v15 }
 0x411   : > { %v4123_v60 = vand.u32 2147483647, %v4122_v13  ;;  %v4866_v14 = vadd.s32 %v4865_v41, %v4855_v4  ;;  %vm4007_vm15 = vcmp.lt.s32.totalorder %v14156_v0, 0  ;;  %v4129_v17 = vsub.s32 4, %v11565_v42 }
 0x412   : > { %v4868_v52 = vmul.u32 %v11535_v2, %v4814_v6  ;;  %v13738_v63 = vand.u32 2147483647, %v14175_v56  ;;  %v5785_v16 = vsel %vm729_vm1, %v5753_v8, 0.0  ;;  %vm4870_vm5 = vc.u32 %v11637_v5, %v11640_v21 }
 0x413   : > { %v4126_v48 = vmul.f32 %v4125_v51, %v4123_v60  ;;  %v4867_v57 = vadd.s32 %v4866_v14, %v4857_v1  ;;  %5907 = vperm.xlu0 %7041, %v5785_v16   ;;  %v4641_v39 = vshll.u32 %v13869_v11, %v14176_v26  ;;  %v4642_v43 = vshrl.u32 %v13870_v46, %v14177_v54  ;;  %v7153_v14 = vld [vmem:[%s7354_s11 + $0xa8] sm:$0xff] }
 0x414   : > { %v4644_v50 = vshll.u32 %v13870_v46, %v14176_v26  ;;  %v4645_v2 = vshrl.u32 %v13780_v35, %v14177_v54  ;;  %v5394_v38 = vand.u32 2139095040, %v11543_v18  ;;  %v14178_v6 = vand.u32 2147483647, %v14156_v0 }
 0x415   : > { %v4127_v27 = vxor.u32 2147483648, %v4126_v48  ;;  %v4871_v4 = vadd.s32 1, %v4867_v57  ;;  %v11674_v1 = vshrl.u32 %v4941_v23, 5  ;;  %v4130_v62 = vsel %vm4007_vm15, %v4129_v17, %v11565_v42 }
 0x416   : > { %vm11670_vm8 = vcmp.le.f32.partialorder %v14178_v6, 0.7853982  ;;  %v4638_v9 = vshll.u32 %v13865_v55, %v14176_v26  ;;  %v4639_v10 = vshrl.u32 %v13869_v11, %v14177_v54  ;;  %v11683_v58 = vand.u32 31, %v4941_v23 }
 0x417   : > { %v4128_v40 = vsel %vm4007_vm15, %v4127_v27, %v4126_v48  ;;  %v4872_v36 = vsel %vm4870_vm5, %v4871_v4, %v4867_v57  ;;  %v4628_v15 = vand.u32 8388607, %v13738_v63  ;;  %v11697_v51 = vor.u32 %v4642_v43, %v4641_v39  ;;  %v14183_v4 = vld [vmem:[#allocation55_spill] sm:$0xff] }
 0x418   : > { %v11695_v42 = vsel %vm11670_vm8, %v14156_v0, %v4128_v40  ;;  %v4873_v13 = vadd.s32 %v4872_v36, %v4868_v52  ;;  %v11699_v41 = vor.u32 %v4645_v2, %v4644_v50  ;;  %v11701_v7 = vadd.s32 1, %v6950_v47 }
 0x419   : > { %v4132_v23 = vsel %vm11670_vm8, 0, %v4130_v62  ;;  %v4133_v8 = vmul.f32 %v11695_v42, %v11695_v42  ;;  %vm4653_vm2 = vcmp.lt.s32.totalorder %v10592_v37, 1  ;;  %v11709_v60 = vor.u32 %v5110_v34, %v11578_v25 }
 0x41a   : > { %v4874_v17 = vadd.s32 536870912, %v4873_v13  ;;  %v4640_v52 = vor.u32 %v4639_v10, %v4638_v9  ;;  %v4629_v47 = vor.u32 8388608, %v4628_v15  ;;  %vm4655_vm7 = vcmp.lt.s32.totalorder %v10592_v37, 3 }
 0x41b   : > { %v4134_v16 = vmul.f32 -0.001358992, %v4133_v8  ;;  %v4141_v48 = vmul.f32 -0.00019511016, %v4133_v8  ;;  %v11714_v57 = vand.u32 3, %v4132_v23  ;;  %vm4654_vm11 = vcmp.lt.s32.totalorder %v10592_v37, 2 }
 0x41c   : > { %v11716_v26 = vshrl.u32 %v4874_v17, 30  ;;  %v4665_v25 = vsel %vm4653_vm2, %v11697_v51, %v11699_v41  ;;  %v11724_v34 = vsub.s32 32, %v11683_v58  ;;  %v11726_v39 = vshrl.u32 %v5394_v38, 23 }
 0x41d   : > { %v4135_v43 = vadd.f32 0.041655596, %v4134_v16  ;;  %v4142_v50 = vadd.f32 0.008332121, %v4141_v48  ;;  %v4661_v6 = vsel %vm4653_vm2, %v4640_v52, %v11697_v51  ;;  %v4663_v27 = vsel %vm4655_vm7, %v11699_v41, %v14182_v32 }
 0x41e   : > { %14181 = vst [vmem:[#allocation52_spill] sm:$0xff] %v11724_v34  ;;  %v4876_v2 = vshll.u32 %v11716_v26, 30  ;;  %v4667_v62 = vsel %vm4655_vm7, %v14183_v4, %v11169_v33  ;;  %v11742_v40 = vshll.u32 %v4629_v47, 8  ;;  %vm4151_vm3 = vcmp.eq.s32.totalorder %v11714_v57, 0 }
 0x41f   : > { %v4136_v38 = vmul.f32 %v4135_v43, %v4133_v8  ;;  %v4143_v9 = vmul.f32 %v4142_v50, %v4133_v8  ;;  %v4668_v10 = vsel %vm4654_vm11, %v4665_v25, %v4667_v62  ;;  %vm4150_vm9 = vcmp.lt.s32.totalorder %v11714_v57, 2 }
 0x420   : > { %v11745_v36 = vsub.s32 %v4873_v13, %v4876_v2  ;;  %v4672_v15 = vand.u32 65535, %v4668_v10  ;;  %v4673_v23 = vshrl.u32 %v4668_v10, 16  ;;  %v4664_v33 = vsel %vm4654_vm11, %v4661_v6, %v4663_v27 }
 0x421   : > { %v4137_v17 = vadd.f32 -0.4999988, %v4136_v38  ;;  %v4144_v16 = vadd.f32 -0.16666654, %v4143_v9  ;;  %v4670_v48 = vand.u32 65535, %v11742_v40  ;;  %vm4148_vm12 = vweird.f32 %v14156_v0 }
 0x422   : > { %vm4154_vm10 = vcmp.eq.s32.totalorder %v11714_v57, 2  ;;  %vm4878_vm6 = vcmp.lt.s32.totalorder %v11745_v36, 0  ;;  %v4879_v13 = vsub.s32 0, %v11745_v36  ;;  %v4671_v47 = vshrl.u32 %v11742_v40, 16 }
 0x423   : > { %v4138_v25 = vmul.f32 %v4137_v17, %v4133_v8  ;;  %v4145_v43 = vmul.f32 %v4144_v16, %v4133_v8  ;;  %v4674_v50 = vmul.u32 %v4672_v15, %v4670_v48  ;;  %v4675_v2 = vmul.u32 %v4673_v23, %v4670_v48 }
 0x424   : > { %v4880_v32 = vsel %vm4878_vm6, %v4879_v13, %v11745_v36  ;;  %v4637_v6 = vshrl.u32 %v13865_v55, %v14177_v54  ;;  %v11759_v27 = vmul.u32 %v4672_v15, %v4671_v47  ;;  %v4695_v4 = vshrl.u32 %v4664_v33, 16 }
 0x425   : > { %v4139_v62 = vadd.f32 1.0, %v4138_v25  ;;  %v4146_v38 = vadd.f32 1.0, %v4145_v43  ;;  %v4881_v9 = vclz %v4880_v32  ;;  %v4678_v10 = vshll.u32 %v4675_v2, 16 }
 0x426   : > { %v4869_v63 = vadd.s32 %v11640_v21, %v11637_v5  ;;  %v4677_v17 = vmul.u32 %v4673_v23, %v4671_v47  ;;  %v4680_v8 = vshll.u32 %v11759_v27, 16  ;;  %v4694_v16 = vand.u32 65535, %v4664_v33 }
 0x427   : > { %vm728_vm14 = vcmp.le.f32.partialorder %v7153_v14, 0.51  ;;  %v4147_v13 = vmul.f32 %v4146_v38, %v11695_v42  ;;  %v4155_v18 = vxor.u32 2147483648, %v4139_v62  ;;  %v6936_v54 = vadd.s32 4294967294, %v4881_v9 }
 0x428   : > { %vm4682_vm1 = vc.u32 %v4674_v50, %v4678_v10  ;;  %v4657_v15 = vsel %vm4653_vm2, %v4637_v6, %v4640_v52  ;;  %v4658_v25 = vsel %vm4656_vm0, %v11699_v41, 2102212464  ;;  %v4684_v21 = vadd.s32 %v4678_v10, %v4674_v50 }
 0x429   : > { %v4683_v5 = vsel %vm4682_vm1, 1, %v13868_v45  ;;  %v4152_v23 = vxor.u32 2147483648, %v4147_v13  ;;  %v4156_v33 = vsel %vm4154_vm10, %v4155_v18, %v4147_v13  ;;  %vm6937_vm15 = vcmp.lt.s32.totalorder %v6936_v54, 0 }
 0x42a   : > { %v4697_v43 = vmul.u32 %v4695_v4, %v4670_v48  ;;  %v4884_v42 = vsel %vm6937_vm15, 0, %v6936_v54  ;;  %v4685_v32 = vadd.s32 %v4683_v5, %v4677_v17  ;;  %vm4686_vm5 = vc.u32 %v4684_v21, %v4680_v8 }
 0x42b   : > { %v4698_v38 = vmul.u32 %v4694_v16, %v4671_v47  ;;  %v4153_v52 = vsel %vm4151_vm3, %v4139_v62, %v4152_v23  ;;  %v4885_v6 = vsub.s32 32, %v4884_v42  ;;  %v4886_v9 = vshll.u32 %v11745_v36, %v4884_v42 }
 0x42c   : > { %v4889_v41 = vsub.s32 4294967266, %v4884_v42  ;;  %v4157_v50 = vsel %vm4150_vm9, %v4153_v52, %v4156_v33  ;;  %v4659_v18 = vsel %vm4655_vm7, %v11697_v51, %v4658_v25  ;;  %v4679_v10 = vshrl.u32 %v4675_v2, 16 }
 0x42d   : > { %v4696_v13 = vmul.u32 %v4694_v16, %v4670_v48  ;;  %v4158_v17 = vsel %vm4148_vm12, nan, %v4157_v50  ;;  %v4887_v8 = vshrl.u32 %v4869_v63, %v4885_v6  ;;  %v4687_v62 = vsel %vm4686_vm5, 1, %v13868_v45 }
 0x42e   : > { %v4890_v54 = vadd.s32 127, %v4889_v41  ;;  %v5720_v5 = vadd.f32 1.0, %v4158_v17  ;;  %v4689_v21 = vadd.s32 %v4687_v62, %v4685_v32  ;;  %v4699_v36 = vmul.u32 %v4695_v4, %v4671_v47 }
 0x42f   : > { %v4700_v23 = vshll.u32 %v4697_v43, 16  ;;  %v14184_v57 = vand.u32 2147483647, %v14164_v19  ;;  %v4888_v51 = vor.u32 %v4887_v8, %v4886_v9  ;;  %v4899_v48 = vsub.s32 4, %v11716_v26  ;;  %v14188_v8 = vld [vmem:[#allocation22_spill] sm:$0xff] }
 0x430   : > { %v4891_v2 = vshll.u32 %v4890_v54, 23  ;;  %v4702_v0 = vshll.u32 %v4698_v38, 16  ;;  %v5752_v16 = vmul.f32 0.5, %v5720_v5  ;;  %v4681_v63 = vshrl.u32 %v11759_v27, 16 }
 0x431   : > { %vm11787_vm0 = vcmp.le.f32.partialorder %v14184_v57, 0.7853982  ;;  %v4690_v25 = vadd.s32 %v4689_v21, %v4679_v10  ;;  %vm4704_vm8 = vc.u32 %v4696_v13, %v4700_v23  ;;  %v4895_v32 = vcvt.s32.f32 %v4888_v51 }
 0x432   : > { %v4892_v42 = vor.u32 4788187, %v4891_v2  ;;  %v4705_v47 = vsel %vm4704_vm8, 1, %v13868_v45  ;;  %v4706_v4 = vadd.s32 %v4700_v23, %v4696_v13  ;;  %v5784_v52 = vsel %vm728_vm14, %v5752_v16, 0.0  ;;  %v14187_v13 = vld [vmem:[#allocation39_spill] sm:$0xff] }
 0x433   : > { %vm4777_vm2 = vcmp.lt.s32.totalorder %v14164_v19, 0  ;;  %v4660_v6 = vsel %vm4654_vm11, %v4657_v15, %v4659_v18  ;;  %v4707_v9 = vadd.s32 %v4705_v47, %v4699_v36  ;;  %5902 = vperm.xlu2 %7043, %v5784_v52   ;;  %v4701_v50 = vshrl.u32 %v4697_v43, 16  ;;  %v14189_v43 = vld [vmem:[#allocation49_spill] sm:$0xff] }
 0x434   : > { %v4893_v41 = vand.u32 2147483647, %v4892_v42  ;;  %v4900_v27 = vsel %vm4777_vm2, %v4899_v48, %v11716_v26  ;;  %vm4708_vm7 = vc.u32 %v4706_v4, %v4702_v0  ;;  %v4703_v10 = vshrl.u32 %v4698_v38, 16 }
 0x435   : > { %v4709_v17 = vsel %vm4708_vm7, 1, %v13868_v45  ;;  %v13742_v14 = vand.u32 2147483647, %v14187_v13  ;;  %v4484_v54 = vshll.u32 %v13865_v55, %v14188_v8  ;;  %vm5118_vm3 = vcmp.lt.s32.totalorder %v11416_v29, 4 }
 0x436   : > { %v4896_v37 = vmul.f32 %v4895_v32, %v4893_v41  ;;  %v11806_v15 = vadd.s32 %v4690_v25, %v4681_v63  ;;  %v11808_v18 = vadd.s32 %v4706_v4, %v4702_v0  ;;  %v4711_v62 = vadd.s32 %v4709_v17, %v4707_v9 }
 0x437   : > { %v4474_v26 = vand.u32 8388607, %v13742_v14  ;;  %v4485_v38 = vshrl.u32 %v13869_v11, %v14189_v43  ;;  %v4487_v5 = vshll.u32 %v13869_v11, %v14188_v8  ;;  %v4488_v21 = vshrl.u32 %v13870_v46, %v14189_v43 }
 0x438   : > { %v4897_v36 = vxor.u32 2147483648, %v4896_v37  ;;  %v4712_v23 = vadd.s32 %v4711_v62, %v4701_v50  ;;  %v4490_v57 = vshll.u32 %v13870_v46, %v14188_v8  ;;  %v4491_v51 = vshrl.u32 %v13780_v35, %v14189_v43 }
 0x439   : > { %v4902_v2 = vsel %vm11787_vm0, 0, %v4900_v27  ;;  %v4714_v48 = vmul.u32 %v11742_v40, %v4660_v6  ;;  %v11825_v0 = vor.u32 %v4485_v38, %v4484_v54  ;;  %v11827_v16 = vor.u32 %v4488_v21, %v4487_v5 }
 0x43a   : > { %v4898_v63 = vsel %vm4777_vm2, %v4897_v36, %v4896_v37  ;;  %v4713_v25 = vadd.s32 %v4712_v23, %v4703_v10  ;;  %v4492_v42 = vor.u32 %v4491_v51, %v4490_v57  ;;  %vm4499_vm11 = vcmp.lt.s32.totalorder %v10761_v59, 1 }
 0x43b   : > { %v11835_v32 = vsel %vm11787_vm0, %v14164_v19, %v4898_v63  ;;  %vm4716_vm9 = vc.u32 %v11806_v15, %v11808_v18  ;;  %v4475_v40 = vor.u32 8388608, %v4474_v26  ;;  %vm4501_vm12 = vcmp.lt.s32.totalorder %v10761_v59, 3 }
 0x43c   : > { %v11842_v47 = vshll.u32 %v13780_v35, %v11683_v58  ;;  %v4903_v4 = vmul.f32 %v11835_v32, %v11835_v32  ;;  %v4717_v52 = vadd.s32 1, %v4713_v25  ;;  %vm4500_vm10 = vcmp.lt.s32.totalorder %v10761_v59, 2 }
 0x43d   : > { %v11849_v33 = vshll.u32 %v13777_v31, %v11683_v58  ;;  %v11851_v6 = vand.u32 3, %v4902_v2  ;;  %v4511_v9 = vsel %vm4499_vm11, %v11827_v16, %v4492_v42  ;;  %v4513_v41 = vsel %vm4501_vm12, %v11191_v22, %v11263_v44 }
 0x43e   : > { %v4904_v27 = vmul.f32 -0.001358992, %v4903_v4  ;;  %v4911_v50 = vmul.f32 -0.00019511016, %v4903_v4  ;;  %v4718_v10 = vsel %vm4716_vm9, %v4717_v52, %v4713_v25  ;;  %v4507_v17 = vsel %vm4499_vm11, %v11825_v0, %v11827_v16 }
 0x43f   : > { %v4719_v8 = vadd.s32 %v4718_v10, %v4714_v48  ;;  %v4509_v54 = vsel %vm4501_vm12, %v4492_v42, %v11248_v20  ;;  %v4514_v37 = vsel %vm4500_vm10, %v4511_v9, %v4513_v41  ;;  %v11869_v62 = vshll.u32 %v4475_v40, 8 }
 0x440   : > { %v4905_v26 = vadd.f32 0.041655596, %v4904_v27  ;;  %v4912_v22 = vadd.f32 0.008332121, %v4911_v50  ;;  %v4518_v44 = vand.u32 65535, %v4514_v37  ;;  %v4519_v38 = vshrl.u32 %v4514_v37, 16 }
 0x441   : > { %v11874_v5 = vsel %vm5118_vm3, %v11709_v60, 920167782  ;;  %v4720_v21 = vadd.s32 536870912, %v4719_v8  ;;  %v4516_v36 = vand.u32 65535, %v11869_v62  ;;  %v4517_v23 = vshrl.u32 %v11869_v62, 16 }
 0x442   : > { %v14190_v20 = vor.u32 %v11646_v24, %v11588_v28  ;;  %v4906_v51 = vmul.f32 %v4905_v26, %v4903_v4  ;;  %v4913_v2 = vmul.f32 %v4912_v22, %v4903_v4  ;;  %v4510_v48 = vsel %vm4500_vm10, %v4507_v17, %v4509_v54 }
 0x443   : > { %vm4921_vm6 = vcmp.eq.s32.totalorder %v11851_v6, 0  ;;  %v11888_v63 = vshrl.u32 %v4720_v21, 30  ;;  %v4520_v25 = vmul.u32 %v4518_v44, %v4516_v36  ;;  %v4521_v40 = vmul.u32 %v4519_v38, %v4516_v36 }
 0x444   : > { %v11883_v57 = vsel %vm5118_vm3, %v14190_v20, 1326507024  ;;  %v11890_v52 = vmul.u32 %v4518_v44, %v4517_v23  ;;  %v4907_v9 = vadd.f32 -0.4999988, %v4906_v51  ;;  %v4914_v41 = vadd.f32 -0.16666654, %v4913_v2 }
 0x445   : > { %vm4920_vm14 = vcmp.lt.s32.totalorder %v11851_v6, 2  ;;  %vm4924_vm1 = vcmp.eq.s32.totalorder %v11851_v6, 2  ;;  %v4540_v28 = vand.u32 65535, %v4510_v48  ;;  %v4722_v24 = vshll.u32 %v11888_v63, 30 }
 0x446   : > { %v4483_v27 = vshrl.u32 %v13865_v55, %v14189_v43  ;;  %v4523_v50 = vmul.u32 %v4519_v38, %v4517_v23  ;;  %v4524_v10 = vshll.u32 %v4521_v40, 16  ;;  %v4908_v17 = vmul.f32 %v4907_v9, %v4903_v4  ;;  %v7154_v9 = vld [vmem:[%s7354_s11 + $0xd0] sm:$0xff] }
 0x447   : > { %v4915_v54 = vmul.f32 %v4914_v41, %v4903_v4  ;;  %v4526_v37 = vshll.u32 %v11890_v52, 16  ;;  %v4541_v26 = vshrl.u32 %v4510_v48, 16  ;;  %v11898_v22 = vsub.s32 %v4719_v8, %v4722_v24 }
 0x448   : > { %v4504_v44 = vsel %vm4502_vm13, %v4492_v42, 2102212464  ;;  %vm4528_vm15 = vc.u32 %v4520_v25, %v4524_v10  ;;  %v4530_v21 = vadd.s32 %v4524_v10, %v4520_v25  ;;  %v4909_v20 = vadd.f32 1.0, %v4908_v17 }
 0x449   : > { %v4916_v51 = vadd.f32 1.0, %v4915_v54  ;;  %v4529_v2 = vsel %vm4528_vm15, 1, %v13868_v45  ;;  %v4542_v43 = vmul.u32 %v4540_v28, %v4516_v36  ;;  %vm4724_vm5 = vcmp.lt.s32.totalorder %v11898_v22, 0 }
 0x44a   : > { %v4725_v38 = vsub.s32 0, %v11898_v22  ;;  %v4531_v4 = vadd.s32 %v4529_v2, %v4523_v50  ;;  %vm4532_vm0 = vc.u32 %v4530_v21, %v4526_v37  ;;  %vm733_vm8 = vcmp.le.f32.partialorder %v7154_v9, 0.51  ;;  %v14191_v2 = vld [vmem:[#allocation13_spill] sm:$0xff] }
 0x44b   : > { %v4917_v8 = vmul.f32 %v4916_v51, %v11835_v32  ;;  %v4925_v48 = vxor.u32 2147483648, %v4909_v20  ;;  %v4533_v42 = vsel %vm4532_vm0, 1, %v13868_v45  ;;  %v4543_v41 = vmul.u32 %v4541_v26, %v4516_v36 }
 0x44c   : > { %v4726_v25 = vsel %vm4724_vm5, %v4725_v38, %v11898_v22  ;;  %v4503_v24 = vsel %vm4499_vm11, %v4483_v27, %v11825_v0  ;;  %v4505_v10 = vsel %vm4501_vm12, %v11827_v16, %v4504_v44  ;;  %v11915_v50 = vmul.u32 %v4540_v28, %v4517_v23 }
 0x44d   : > { %v4922_v17 = vxor.u32 2147483648, %v4917_v8  ;;  %v4926_v32 = vsel %vm4924_vm1, %v4925_v48, %v4917_v8  ;;  %v4727_v54 = vclz %v4726_v25  ;;  %v4546_v37 = vshll.u32 %v4543_v41, 16 }
 0x44e   : > { %vm4918_vm13 = vweird.f32 %v14164_v19  ;;  %v4715_v36 = vadd.s32 %v11808_v18, %v11806_v15  ;;  %v4525_v21 = vshrl.u32 %v4521_v40, 16  ;;  %v4535_v51 = vadd.s32 %v4533_v42, %v4531_v4 }
 0x44f   : > { %v4923_v0 = vsel %vm4921_vm6, %v4909_v20, %v4922_v17  ;;  %v6933_v27 = vadd.s32 4294967294, %v4727_v54  ;;  %v11926_v16 = vsel %vm4500_vm10, %v4503_v24, %v4505_v10  ;;  %vm4550_vm2 = vc.u32 %v4542_v43, %v4546_v37 }
 0x450   : > { %v4927_v28 = vsel %vm4920_vm14, %v4923_v0, %v4926_v32  ;;  %v4545_v44 = vmul.u32 %v4541_v26, %v4517_v23  ;;  %v4548_v19 = vshll.u32 %v11915_v50, 16  ;;  %v13741_v38 = vand.u32 2147483647, %v14191_v2 }
 0x451   : > { %v4928_v15 = vsel %vm4918_vm13, nan, %v4927_v28  ;;  %vm6934_vm7 = vcmp.lt.s32.totalorder %v6933_v27, 0  ;;  %v4551_v18 = vsel %vm4550_vm2, 1, %v13868_v45  ;;  %v4552_v40 = vadd.s32 %v4546_v37, %v4542_v43 }
 0x452   : > { %v5725_v20 = vadd.f32 1.0, %v4928_v15  ;;  %vm4623_vm11 = vcmp.lt.s32.totalorder %v14175_v56, 0  ;;  %v4730_v59 = vsel %vm6934_vm7, 0, %v6933_v27  ;;  %v4527_v4 = vshrl.u32 %v11890_v52, 16 }
 0x453   : > { %v4536_v8 = vadd.s32 %v4535_v51, %v4525_v21  ;;  %v4731_v48 = vsub.s32 32, %v4730_v59  ;;  %v4732_v6 = vshll.u32 %v11898_v22, %v4730_v59  ;;  %v4735_v23 = vsub.s32 4294967266, %v4730_v59 }
 0x454   : > { %v4560_v26 = vmul.u32 %v11869_v62, %v11926_v16  ;;  %v5757_v42 = vmul.f32 0.5, %v5725_v20  ;;  %v4745_v25 = vsub.s32 4, %v11888_v63  ;;  %v4553_v24 = vadd.s32 %v4551_v18, %v4545_v44  ;;  %v14192_v16 = vld [vmem:[#allocation57_spill] sm:$0xff] }
 0x455   : > { %v5244_v43 = vand.u32 8388607, %v13741_v38  ;;  %v4733_v10 = vshrl.u32 %v4715_v36, %v4731_v48  ;;  %v4736_v17 = vadd.s32 127, %v4735_v23  ;;  %v4547_v32 = vshrl.u32 %v4543_v41, 16  ;;  %v14193_v41 = vld [vmem:[#allocation64_spill] sm:$0xff] }
 0x456   : > { %vm4554_vm9 = vc.u32 %v4552_v40, %v4548_v19  ;;  %v5789_v52 = vsel %vm733_vm8, %v5757_v42, 0.0  ;;  %v11942_v54 = vadd.s32 %v4536_v8, %v4527_v4  ;;  %v4549_v22 = vshrl.u32 %v11915_v50, 16 }
 0x457   : > { %v4555_v37 = vsel %vm4554_vm9, 1, %v13868_v45  ;;  %5927 = vperm.xlu1 %7042, %v5789_v52   ;;  %v4734_v62 = vor.u32 %v4733_v10, %v4732_v6  ;;  %v4737_v21 = vshll.u32 %v4736_v17, 23  ;;  %v11946_v51 = vadd.s32 %v4552_v40, %v4548_v19 }
 0x458   : > { %v4557_v0 = vadd.s32 %v4555_v37, %v4553_v24  ;;  %v5245_v27 = vor.u32 8388608, %v5244_v43  ;;  %v5254_v36 = vshll.u32 %v13865_v55, %v14192_v16  ;;  %v5255_v9 = vshrl.u32 %v13869_v11, %v14193_v41 }
 0x459   : > { %v5257_v28 = vshll.u32 %v13869_v11, %v14192_v16  ;;  %vm5556_vm12 = vcmp.gt.s32.totalorder %v11701_v7, 0  ;;  %v4738_v50 = vor.u32 4788187, %v4737_v21  ;;  %v4741_v44 = vcvt.s32.f32 %v4734_v62 }
 0x45a   : > { %v4558_v15 = vadd.s32 %v4557_v0, %v4547_v32  ;;  %v5258_v19 = vshrl.u32 %v13870_v46, %v14193_v41  ;;  %v11957_v18 = vor.u32 %v5255_v9, %v5254_v36  ;;  %v5260_v40 = vshll.u32 %v13870_v46, %v14192_v16 }
 0x45b   : > { %v5261_v20 = vshrl.u32 %v13780_v35, %v14193_v41  ;;  %vm5269_vm10 = vcmp.lt.s32.totalorder %v11016_v3, 1  ;;  %v4739_v59 = vand.u32 2147483647, %v4738_v50  ;;  %v4746_v4 = vsel %vm4623_vm11, %v4745_v25, %v11888_v63 }
 0x45c   : > { %v4559_v8 = vadd.s32 %v4558_v15, %v4549_v22  ;;  %v11967_v48 = vor.u32 %v5258_v19, %v5257_v28  ;;  %vm4562_vm6 = vc.u32 %v11942_v54, %v11946_v51  ;;  %vm5270_vm14 = vcmp.lt.s32.totalorder %v11016_v3, 2 }
 0x45d   : > { %v11971_v6 = vor.u32 %v5261_v20, %v5260_v40  ;;  %vm5271_vm1 = vcmp.lt.s32.totalorder %v11016_v3, 3  ;;  %v4742_v23 = vmul.f32 %v4741_v44, %v4739_v59  ;;  %v14194_v25 = vand.u32 2147483647, %v14175_v56 }
 0x45e   : > { %v4563_v42 = vadd.s32 1, %v4559_v8  ;;  %v5277_v24 = vsel %vm5269_vm10, %v11957_v18, %v11967_v48  ;;  %v5283_v63 = vsel %vm5271_vm1, %v11391_v61, %v11552_v30  ;;  %v11997_v32 = vshll.u32 %v5245_v27, 8 }
 0x45f   : > { %vm11985_vm15 = vcmp.le.f32.partialorder %v14194_v25, 0.7853982  ;;  %v5279_v10 = vsel %vm5271_vm1, %v11971_v6, %v11540_v49  ;;  %v5281_v17 = vsel %vm5269_vm10, %v11967_v48, %v11971_v6  ;;  %v12000_v61 = vadd.s32 4294967169, %v11726_v39 }
 0x460   : > { %v4743_v30 = vxor.u32 2147483648, %v4742_v23  ;;  %v4748_v52 = vsel %vm11985_vm15, 0, %v4746_v4  ;;  %v4564_v22 = vsel %vm4562_vm6, %v4563_v42, %v4559_v8  ;;  %v5280_v62 = vsel %vm5270_vm14, %v5277_v24, %v5279_v10 }
 0x461   : > { %v4565_v37 = vadd.s32 %v4564_v22, %v4560_v26  ;;  %v5284_v49 = vsel %vm5270_vm14, %v5281_v17, %v5283_v63  ;;  %v5286_v21 = vand.u32 65535, %v11997_v32  ;;  %v5287_v39 = vshrl.u32 %v11997_v32, 16 }
 0x462   : > { %v4744_v0 = vsel %vm4623_vm11, %v4743_v30, %v4742_v23  ;;  %v5288_v27 = vand.u32 65535, %v5284_v49  ;;  %v5289_v16 = vshrl.u32 %v5284_v49, 16  ;;  %v12014_v36 = vshrl.u32 %v13777_v31, %v11724_v34 }
 0x463   : > { %v12018_v26 = vshrl.u32 %v13778_v53, %v11724_v34  ;;  %v4747_v9 = vsel %vm11985_vm15, %v14175_v56, %v4744_v0  ;;  %v4566_v28 = vadd.s32 536870912, %v4565_v37  ;;  %v12028_v40 = vsel %vm5556_vm12, %v11701_v7, 0 }
 0x464   : > { %v4749_v50 = vmul.f32 %v4747_v9, %v4747_v9  ;;  %v5290_v44 = vmul.u32 %v5288_v27, %v5286_v21  ;;  %v5291_v15 = vmul.u32 %v5289_v16, %v5286_v21  ;;  %v12023_v19 = vmul.u32 %v5288_v27, %v5287_v39 }
 0x465   : > { %v12030_v20 = vand.u32 3, %v4748_v52  ;;  %v12032_v59 = vshrl.u32 %v4566_v28, 30  ;;  %v5311_v4 = vshrl.u32 %v5280_v62, 16  ;;  %v5310_v24 = vand.u32 65535, %v5280_v62 }
 0x466   : > { %v4750_v8 = vmul.f32 -0.001358992, %v4749_v50  ;;  %v4757_v23 = vmul.f32 -0.00019511016, %v4749_v50  ;;  %v5294_v42 = vshll.u32 %v5291_v15, 16  ;;  %v12035_v63 = vshrl.u32 %v12028_v40, 5 }
 0x467   : > { %v4568_v25 = vshll.u32 %v12032_v59, 30  ;;  %v5293_v43 = vmul.u32 %v5289_v16, %v5287_v39  ;;  %v5296_v10 = vshll.u32 %v12023_v19, 16  ;;  %vm4770_vm0 = vcmp.eq.s32.totalorder %v12030_v20, 2 }
 0x468   : > { %v4751_v17 = vadd.f32 0.041655596, %v4750_v8  ;;  %v4758_v7 = vadd.f32 0.008332121, %v4757_v23  ;;  %vm5298_vm5 = vc.u32 %v5290_v44, %v5294_v42  ;;  %v5300_v30 = vadd.s32 %v5294_v42, %v5290_v44 }
 0x469   : > { %v12040_v52 = vsub.s32 %v4565_v37, %v4568_v25  ;;  %v5299_v22 = vsel %vm5298_vm5, 1, %v13868_v45  ;;  %v12043_v49 = vmul.u32 %v5311_v4, %v5286_v21  ;;  %v5253_v27 = vshrl.u32 %v13865_v55, %v14193_v41 }
 0x46a   : > { %v4752_v62 = vmul.f32 %v4751_v17, %v4749_v50  ;;  %v4759_v0 = vmul.f32 %v4758_v7, %v4749_v50  ;;  %v5312_v16 = vmul.u32 %v5310_v24, %v5286_v21  ;;  %vm4767_vm8 = vcmp.eq.s32.totalorder %v12030_v20, 0 }
 0x46b   : > { %vm4570_vm13 = vcmp.lt.s32.totalorder %v12040_v52, 0  ;;  %v4571_v28 = vsub.s32 0, %v12040_v52  ;;  %v5301_v44 = vadd.s32 %v5299_v22, %v5293_v43  ;;  %v5314_v8 = vmul.u32 %v5310_v24, %v5287_v39 }
 0x46c   : > { %v4753_v37 = vadd.f32 -0.4999988, %v4752_v62  ;;  %v4760_v23 = vadd.f32 -0.16666654, %v4759_v0  ;;  %vm4766_vm2 = vcmp.lt.s32.totalorder %v12030_v20, 2  ;;  %vm5302_vm7 = vc.u32 %v5300_v30, %v5296_v10 }
 0x46d   : > { %v5274_v42 = vsel %vm5272_vm4, %v11971_v6, 2102212464  ;;  %v4572_v41 = vsel %vm4570_vm13, %v4571_v28, %v12040_v52  ;;  %v5295_v21 = vshrl.u32 %v5291_v15, 16  ;;  %v5303_v25 = vsel %vm5302_vm7, 1, %v13868_v45 }
 0x46e   : > { %v5316_v17 = vshll.u32 %v12043_v49, 16  ;;  %v4754_v7 = vmul.f32 %v4753_v37, %v4749_v50  ;;  %v4761_v38 = vmul.f32 %v4760_v23, %v4749_v50  ;;  %v4573_v43 = vclz %v4572_v41 }
 0x46f   : > { %v5315_v24 = vmul.u32 %v5311_v4, %v5287_v39  ;;  %v5305_v22 = vadd.s32 %v5303_v25, %v5301_v44  ;;  %v5318_v62 = vshll.u32 %v5314_v8, 16  ;;  %v4561_v6 = vadd.s32 %v11946_v51, %v11942_v54 }
 0x470   : > { %vm5320_vm11 = vc.u32 %v5312_v16, %v5316_v17  ;;  %v5322_v0 = vadd.s32 %v5316_v17, %v5312_v16  ;;  %v4755_v14 = vadd.f32 1.0, %v4754_v7  ;;  %v4762_v34 = vadd.f32 1.0, %v4761_v38 }
 0x471   : > { %v6930_v10 = vadd.s32 4294967294, %v4573_v43  ;;  %v5273_v15 = vsel %vm5269_vm10, %v5253_v27, %v11957_v18  ;;  %v5275_v50 = vsel %vm5271_vm1, %v11967_v48, %v5274_v42  ;;  %v5297_v39 = vshrl.u32 %v12023_v19, 16 }
 0x472   : > { %v5321_v4 = vsel %vm5320_vm11, 1, %v13868_v45  ;;  %v4763_v30 = vmul.f32 %v4762_v34, %v4747_v9  ;;  %v4771_v16 = vxor.u32 2147483648, %v4755_v14  ;;  %vm5324_vm9 = vc.u32 %v5322_v0, %v5318_v62 }
 0x473   : > { %vm6931_vm4 = vcmp.lt.s32.totalorder %v6930_v10, 0  ;;  %v5306_v28 = vadd.s32 %v5305_v22, %v5295_v21  ;;  %v5317_v54 = vshrl.u32 %v12043_v49, 16  ;;  %v5323_v51 = vadd.s32 %v5321_v4, %v5315_v24 }
 0x474   : > { %v4576_v38 = vsel %vm6931_vm4, 0, %v6930_v10  ;;  %v4768_v44 = vxor.u32 2147483648, %v4763_v30  ;;  %v4772_v18 = vsel %vm4770_vm0, %v4771_v16, %v4763_v30  ;;  %vm4764_vm12 = vweird.f32 %v14175_v56 }
 0x475   : > { %v4577_v27 = vsub.s32 32, %v4576_v38  ;;  %v4578_v48 = vshll.u32 %v12040_v52, %v4576_v38  ;;  %v4581_v19 = vsub.s32 4294967266, %v4576_v38  ;;  %v5276_v34 = vsel %vm5270_vm14, %v5273_v15, %v5275_v50  ;;  %v14198_v50 = vld [vmem:[#allocation75_spill] sm:$0xff] }
 0x476   : > { %v5325_v9 = vsel %vm5324_vm9, 1, %v13868_v45  ;;  %v4769_v49 = vsel %vm4767_vm8, %v4755_v14, %v4768_v44  ;;  %v5319_v23 = vshrl.u32 %v5314_v8, 16  ;;  %v12079_v52 = vadd.s32 %v5306_v28, %v5297_v39  ;;  %v7155_v14 = vld [vmem:[%s7354_s11 + $0xc8] sm:$0xff] }
 0x477   : > { %v4579_v37 = vshrl.u32 %v4561_v6, %v4577_v27  ;;  %v5327_v42 = vadd.s32 %v5325_v9, %v5323_v51  ;;  %v4773_v41 = vsel %vm4766_vm2, %v4769_v49, %v4772_v18  ;;  %v4582_v21 = vadd.s32 127, %v4581_v19 }
 0x478   : > { %v12081_v56 = vadd.s32 %v5322_v0, %v5318_v62  ;;  %v12084_v3 = vand.u32 31, %v12028_v40  ;;  %v4774_v25 = vsel %vm4764_vm12, nan, %v4773_v41  ;;  %v12087_v43 = vadd.s32 1, %v12000_v61  ;;  %v14197_v0 = vld [vmem:[#allocation58_spill] sm:$0xff] }
 0x479   : > { %v4580_v17 = vor.u32 %v4579_v37, %v4578_v48  ;;  %v5328_v7 = vadd.s32 %v5327_v42, %v5317_v54  ;;  %vm732_vm10 = vcmp.le.f32.partialorder %v7155_v14, 0.51  ;;  %v5724_v8 = vadd.f32 1.0, %v4774_v25 }
 0x47a   : > { %v4583_v24 = vshll.u32 %v4582_v21, 23  ;;  %vm4964_vm6 = vcmp.lt.s32.totalorder %v11674_v1, 4  ;;  %v4591_v20 = vsub.s32 4, %v12032_v59  ;;  %v5330_v62 = vmul.u32 %v11997_v32, %v5276_v34 }
 0x47b   : > { %v5329_v22 = vadd.s32 %v5328_v7, %v5319_v23  ;;  %v5083_v40 = vand.u32 2147483647, %v14197_v0  ;;  %v5756_v6 = vmul.f32 0.5, %v5724_v8  ;;  %v4587_v15 = vcvt.s32.f32 %v4580_v17 }
 0x47c   : > { %v4584_v10 = vor.u32 4788187, %v4583_v24  ;;  %vm5332_vm14 = vc.u32 %v12079_v52, %v12081_v56  ;;  %v5103_v39 = vshll.u32 %v13869_v11, %v14198_v50  ;;  %v5104_v4 = vshrl.u32 %v13870_v46, %v11570_v12 }
 0x47d   : > { %v5333_v61 = vadd.s32 1, %v5329_v22  ;;  %v5106_v30 = vshll.u32 %v13870_v46, %v14198_v50  ;;  %v12104_v32 = vor.u32 %v12014_v36, %v11842_v47  ;;  %v5788_v16 = vsel %vm732_vm10, %v5756_v6, 0.0 }
 0x47e   : > { %v4585_v38 = vand.u32 2147483647, %v4584_v10  ;;  %v5107_v28 = vshrl.u32 %v13780_v35, %v11570_v12  ;;  %5922 = vperm.xlu0 %7041, %v5788_v16   ;;  %v5090_v51 = vand.u32 8388607, %v5083_v40  ;;  %v5100_v44 = vshll.u32 %v13865_v55, %v14198_v50 }
 0x47f   : > { %v5334_v54 = vsel %vm5332_vm14, %v5333_v61, %v5329_v22  ;;  %v5101_v18 = vshrl.u32 %v13869_v11, %v11570_v12  ;;  %v4960_v47 = vor.u32 %v12018_v26, %v11849_v33  ;;  %vm4469_vm1 = vcmp.lt.s32.totalorder %v14187_v13, 0 }
 0x480   : > { %v4588_v36 = vmul.f32 %v4587_v15, %v4585_v38  ;;  %v5335_v27 = vadd.s32 %v5334_v54, %v5330_v62  ;;  %v14199_v48 = vand.u32 2147483647, %v14187_v13  ;;  %v4592_v34 = vsel %vm4469_vm1, %v4591_v20, %v12032_v59 }
 0x481   : > { %v12127_v9 = vor.u32 %v5104_v4, %v5103_v39  ;;  %v5108_v49 = vor.u32 %v5107_v28, %v5106_v30  ;;  %vm5115_vm5 = vcmp.lt.s32.totalorder %v11416_v29, 1  ;;  %vm5117_vm0 = vcmp.lt.s32.totalorder %v11416_v29, 3 }
 0x482   : > { %vm12120_vm15 = vcmp.le.f32.partialorder %v14199_v48, 0.7853982  ;;  %v4589_v37 = vxor.u32 2147483648, %v4588_v36  ;;  %v5336_v23 = vadd.s32 536870912, %v5335_v27  ;;  %v12132_v33 = vsub.s32 32, %v12084_v3 }
 0x483   : > { %v12136_v26 = vshll.u32 %v13780_v35, %v12084_v3  ;;  %v5091_v42 = vor.u32 8388608, %v5090_v51  ;;  %v5102_v41 = vor.u32 %v5101_v18, %v5100_v44  ;;  %v12140_v59 = vshll.u32 %v13777_v31, %v12084_v3 }
 0x484   : > { %v4590_v21 = vsel %vm4469_vm1, %v4589_v37, %v4588_v36  ;;  %v4594_v25 = vsel %vm12120_vm15, 0, %v4592_v34  ;;  %v12146_v17 = vshrl.u32 %v5336_v23, 30  ;;  %vm5116_vm8 = vcmp.lt.s32.totalorder %v11416_v29, 2 }
 0x485   : > { %v12151_v7 = vsel %vm12120_vm15, %v14187_v13, %v4590_v21  ;;  %v5127_v14 = vsel %vm5115_vm5, %v12127_v9, %v5108_v49  ;;  %v5129_v8 = vsel %vm5117_vm0, %v11709_v60, %v11883_v57  ;;  %v12164_v24 = vsel %vm4964_vm6, %v12104_v32, 920167782 }
 0x486   : > { %v12168_v20 = vsel %vm4964_vm6, %v4960_v47, 1326507024  ;;  %v4595_v22 = vmul.f32 %v12151_v7, %v12151_v7  ;;  %v5338_v62 = vshll.u32 %v12146_v17, 30  ;;  %v12173_v6 = vand.u32 3, %v4594_v25 }
 0x487   : > { %v5123_v60 = vsel %vm5115_vm5, %v5102_v41, %v12127_v9  ;;  %v5125_v57 = vsel %vm5117_vm0, %v5108_v49, %v11874_v5  ;;  %v12181_v10 = vshll.u32 %v5091_v42, 8  ;;  %v5130_v39 = vsel %vm5116_vm8, %v5127_v14, %v5129_v8 }
 0x488   : > { %v4596_v15 = vmul.f32 -0.001358992, %v4595_v22  ;;  %v4603_v61 = vmul.f32 -0.00019511016, %v4595_v22  ;;  %v12183_v50 = vsub.s32 %v5335_v27, %v5338_v62  ;;  %v12189_v4 = vshrl.u32 %v13777_v31, %v12132_v33 }
 0x489   : > { %v12193_v30 = vshrl.u32 %v13778_v53, %v12132_v33  ;;  %v5132_v16 = vand.u32 65535, %v12181_v10  ;;  %v5134_v5 = vand.u32 65535, %v5130_v39  ;;  %v5126_v54 = vsel %vm5116_vm8, %v5123_v60, %v5125_v57 }
 0x48a   : > { %v4597_v38 = vadd.f32 0.041655596, %v4596_v15  ;;  %v4604_v28 = vadd.f32 0.008332121, %v4603_v61  ;;  %vm5340_vm13 = vcmp.lt.s32.totalorder %v12183_v50, 0  ;;  %v5341_v51 = vsub.s32 0, %v12183_v50 }
 0x48b   : > { %v5099_v44 = vshrl.u32 %v13865_v55, %v11570_v12  ;;  %v5133_v18 = vshrl.u32 %v12181_v10, 16  ;;  %v5135_v47 = vshrl.u32 %v5130_v39, 16  ;;  %vm4616_vm2 = vcmp.eq.s32.totalorder %v12173_v6, 2 }
 0x48c   : > { %v4598_v36 = vmul.f32 %v4597_v38, %v4595_v22  ;;  %v4605_v27 = vmul.f32 %v4604_v28, %v4595_v22  ;;  %vm5239_vm7 = vcmp.lt.s32.totalorder %v14191_v2, 0  ;;  %v5120_v48 = vsel %vm5118_vm3, %v5108_v49, 2102212464 }
 0x48d   : > { %vm4613_vm11 = vcmp.eq.s32.totalorder %v12173_v6, 0  ;;  %v5342_v19 = vsel %vm5340_vm13, %v5341_v51, %v12183_v50  ;;  %v5136_v34 = vmul.u32 %v5134_v5, %v5132_v16  ;;  %v5137_v37 = vmul.u32 %v5135_v47, %v5132_v16 }
 0x48e   : > { %v5157_v23 = vshrl.u32 %v5126_v54, 16  ;;  %v4599_v12 = vadd.f32 -0.4999988, %v4598_v36  ;;  %v4606_v42 = vadd.f32 -0.16666654, %v4605_v27  ;;  %vm4612_vm4 = vcmp.lt.s32.totalorder %v12173_v6, 2 }
 0x48f   : > { %v5331_v21 = vadd.s32 %v12081_v56, %v12079_v52  ;;  %v5343_v25 = vclz %v5342_v19  ;;  %vm4610_vm9 = vweird.f32 %v14187_v13  ;;  %v5119_v49 = vsel %vm5115_vm5, %v5099_v44, %v5102_v41  ;;  %v7156_v44 = vld [vmem:[%s7354_s11 + $0xc0] sm:$0xff] }
 0x490   : > { %v12215_v14 = vmul.u32 %v5134_v5, %v5133_v18  ;;  %v5140_v8 = vshll.u32 %v5137_v37, 16  ;;  %v5156_v62 = vand.u32 65535, %v5126_v54  ;;  %v4600_v60 = vmul.f32 %v4599_v12, %v4595_v22 }
 0x491   : > { %v4607_v57 = vmul.f32 %v4606_v42, %v4595_v22  ;;  %v6945_v15 = vadd.s32 4294967294, %v5343_v25  ;;  %v5121_v61 = vsel %vm5117_vm0, %v12127_v9, %v5120_v48  ;;  %v5361_v52 = vsub.s32 4, %v12146_v17 }
 0x492   : > { %v5139_v56 = vmul.u32 %v5135_v47, %v5133_v18  ;;  %vm5144_vm3 = vc.u32 %v5136_v34, %v5140_v8  ;;  %v12221_v39 = vmul.u32 %v5157_v23, %v5132_v16  ;;  %v4601_v38 = vadd.f32 1.0, %v4600_v60 }
 0x493   : > { %v4608_v41 = vadd.f32 1.0, %v4607_v57  ;;  %vm6946_vm12 = vcmp.lt.s32.totalorder %v6945_v15, 0  ;;  %v5145_v5 = vsel %vm5144_vm3, 1, %v13868_v45  ;;  %v5142_v54 = vshll.u32 %v12215_v14, 16 }
 0x494   : > { %v5346_v28 = vsel %vm6946_vm12, 0, %v6945_v15  ;;  %v5146_v22 = vadd.s32 %v5140_v8, %v5136_v34  ;;  %v12225_v51 = vmul.u32 %v5156_v62, %v5133_v18  ;;  %vm731_vm10 = vcmp.le.f32.partialorder %v7156_v44, 0.51 }
 0x495   : > { %v4609_v9 = vmul.f32 %v4608_v41, %v12151_v7  ;;  %v4617_v36 = vxor.u32 2147483648, %v4601_v38  ;;  %v5347_v47 = vsub.s32 32, %v5346_v28  ;;  %v5348_v27 = vshll.u32 %v12183_v50, %v5346_v28 }
 0x496   : > { %v5351_v48 = vsub.s32 4294967266, %v5346_v28  ;;  %v12233_v19 = vsel %vm5239_vm7, %v5361_v52, %v12146_v17  ;;  %v5147_v12 = vadd.s32 %v5145_v5, %v5139_v56  ;;  %v5158_v42 = vmul.u32 %v5156_v62, %v5132_v16 }
 0x497   : > { %v4614_v25 = vxor.u32 2147483648, %v4609_v9  ;;  %v4618_v34 = vsel %vm4616_vm2, %v4617_v36, %v4609_v9  ;;  %v5349_v8 = vshrl.u32 %v5331_v21, %v5347_v47  ;;  %v5162_v60 = vshll.u32 %v12221_v39, 16 }
 0x498   : > { %v5352_v7 = vadd.s32 127, %v5351_v48  ;;  %v5141_v57 = vshrl.u32 %v5137_v37, 16  ;;  %vm5148_vm14 = vc.u32 %v5146_v22, %v5142_v54  ;;  %v5161_v15 = vmul.u32 %v5157_v23, %v5133_v18 }
 0x499   : > { %v4615_v50 = vsel %vm4613_vm11, %v4601_v38, %v4614_v25  ;;  %v5350_v41 = vor.u32 %v5349_v8, %v5348_v27  ;;  %v5149_v17 = vsel %vm5148_vm14, 1, %v13868_v45  ;;  %v5164_v52 = vshll.u32 %v12225_v51, 16  ;;  %v14205_v25 = vld [vmem:[#allocation19_spill] sm:$0xff] }
 0x49a   : > { %v4619_v16 = vsel %vm4612_vm4, %v4615_v50, %v4618_v34  ;;  %v5353_v62 = vshll.u32 %v5352_v7, 23  ;;  %v5143_v21 = vshrl.u32 %v12215_v14, 16  ;;  %v5151_v56 = vadd.s32 %v5149_v17, %v5147_v12 }
 0x49b   : > { %v4620_v37 = vsel %vm4610_vm9, nan, %v4619_v16  ;;  %v5357_v5 = vcvt.s32.f32 %v5350_v41  ;;  %vm5166_vm1 = vc.u32 %v5158_v42, %v5162_v60  ;;  %v5168_v18 = vadd.s32 %v5162_v60, %v5158_v42  ;;  %v14206_v60 = vld [vmem:[#allocation52_spill] sm:$0xff] }
 0x49c   : > { %vm5402_vm15 = vcmp.gt.s32.totalorder %v12087_v43, 0  ;;  %v5723_v23 = vadd.f32 1.0, %v4620_v37  ;;  %v5354_v38 = vor.u32 4788187, %v5353_v62  ;;  %v5152_v28 = vadd.s32 %v5151_v56, %v5141_v57 }
 0x49d   : > { %v5167_v54 = vsel %vm5166_vm1, 1, %v13868_v45  ;;  %v14202_v6 = vand.u32 2147483647, %v14191_v2  ;;  %v5122_v13 = vsel %vm5116_vm8, %v5119_v49, %v5121_v61  ;;  %vm5170_vm0 = vc.u32 %v5168_v18, %v5164_v52 }
 0x49e   : > { %v5169_v14 = vadd.s32 %v5167_v54, %v5161_v15  ;;  %v5755_v9 = vmul.f32 0.5, %v5723_v23  ;;  %v5355_v36 = vand.u32 2147483647, %v5354_v38  ;;  %v5163_v27 = vshrl.u32 %v12221_v39, 16 }
 0x49f   : > { %vm12251_vm5 = vcmp.le.f32.partialorder %v14202_v6, 0.7853982  ;;  %v12261_v48 = vadd.s32 %v5152_v28, %v5143_v21  ;;  %v5171_v12 = vsel %vm5170_vm0, 1, %v13868_v45  ;;  %v12264_v42 = vadd.s32 %v5168_v18, %v5164_v52 }
 0x4a0   : > { %v5364_v47 = vsel %vm12251_vm5, 0, %v12233_v19  ;;  %v4929_v34 = vand.u32 2147483647, %v14205_v25  ;;  %v5787_v29 = vsel %vm731_vm10, %v5755_v9, 0.0  ;;  %v5358_v49 = vmul.f32 %v5357_v5, %v5355_v36 }
 0x4a1   : > { %v5165_v61 = vshrl.u32 %v12225_v51, 16  ;;  %v5173_v8 = vadd.s32 %v5171_v12, %v5169_v14  ;;  %vm5580_vm8 = vcmp.lt.s32.totalorder %v12035_v63, 4  ;;  %5917 = vperm.xlu2 %7043, %v5787_v29   ;;  %v4946_v19 = vshll.u32 %v13865_v55, %v11683_v58 }
 0x4a2   : > { %v4936_v39 = vand.u32 8388607, %v4929_v34  ;;  %v4947_v7 = vshrl.u32 %v13869_v11, %v14206_v60  ;;  %v4949_v44 = vshll.u32 %v13869_v11, %v11683_v58  ;;  %v5359_v57 = vxor.u32 2147483648, %v5358_v49 }
 0x4a3   : > { %v5174_v15 = vadd.s32 %v5173_v8, %v5163_v27  ;;  %v4950_v51 = vshrl.u32 %v13870_v46, %v14206_v60  ;;  %v4952_v50 = vshll.u32 %v13870_v46, %v11683_v58  ;;  %v5176_v41 = vmul.u32 %v12181_v10, %v5122_v13 }
 0x4a4   : > { %vm5178_vm13 = vc.u32 %v12261_v48, %v12264_v42  ;;  %v4937_v17 = vor.u32 8388608, %v4936_v39  ;;  %v4953_v52 = vshrl.u32 %v13780_v35, %v14206_v60  ;;  %v5360_v16 = vsel %vm5239_vm7, %v5359_v57, %v5358_v49 }
 0x4a5   : > { %v5175_v62 = vadd.s32 %v5174_v15, %v5165_v61  ;;  %v12289_v21 = vor.u32 %v4950_v51, %v4949_v44  ;;  %vm4961_vm2 = vcmp.lt.s32.totalorder %v11674_v1, 1  ;;  %v5363_v58 = vsel %vm12251_vm5, %v14191_v2, %v5360_v16 }
 0x4a6   : > { %v12295_v10 = vor.u32 %v4947_v7, %v4946_v19  ;;  %v4954_v56 = vor.u32 %v4953_v52, %v4952_v50  ;;  %vm4963_vm11 = vcmp.lt.s32.totalorder %v11674_v1, 3  ;;  %v5365_v37 = vmul.f32 %v5363_v58, %v5363_v58 }
 0x4a7   : > { %v5179_v5 = vadd.s32 1, %v5175_v62  ;;  %vm4962_vm4 = vcmp.lt.s32.totalorder %v11674_v1, 2  ;;  %v4975_v18 = vsel %vm4963_vm11, %v12104_v32, %v12168_v20  ;;  %v5576_v23 = vor.u32 %v12193_v30, %v12140_v59  ;;  %v14207_v1 = vld [vmem:[#allocation44_spill] sm:$0xff] }
 0x4a8   : > { %v12308_v38 = vsel %vm5402_vm15, %v12087_v43, 0  ;;  %v4973_v28 = vsel %vm4961_vm2, %v12289_v21, %v4954_v56  ;;  %v12313_v54 = vshll.u32 %v4937_v17, 8  ;;  %v5366_v6 = vmul.f32 -0.001358992, %v5365_v37 }
 0x4a9   : > { %v5373_v22 = vmul.f32 -0.00019511016, %v5365_v37  ;;  %v12315_v13 = vand.u32 3, %v5364_v47  ;;  %v5180_v32 = vsel %vm5178_vm13, %v5179_v5, %v5175_v62  ;;  %v4969_v43 = vsel %vm4961_vm2, %v12295_v10, %v12289_v21 }
 0x4aa   : > { %v5181_v59 = vadd.s32 %v5180_v32, %v5176_v41  ;;  %v4971_v20 = vsel %vm4963_vm11, %v4954_v56, %v12164_v24  ;;  %v4976_v30 = vsel %vm4962_vm4, %v4973_v28, %v4975_v18  ;;  %v5367_v14 = vadd.f32 0.041655596, %v5366_v6 }
 0x4ab   : > { %v5374_v9 = vadd.f32 0.008332121, %v5373_v22  ;;  %v4978_v36 = vand.u32 65535, %v12313_v54  ;;  %v12331_v47 = vshrl.u32 %v12313_v54, 16  ;;  %v12335_v27 = vor.u32 %v12189_v4, %v12136_v26 }
 0x4ac   : > { %v5182_v12 = vadd.s32 536870912, %v5181_v59  ;;  %v4980_v29 = vand.u32 65535, %v4976_v30  ;;  %v4981_v49 = vshrl.u32 %v4976_v30, 16  ;;  %v12339_v24 = vsel %vm5580_vm8, %v5576_v23, 1326507024 }
 0x4ad   : > { %v5368_v61 = vmul.f32 %v5367_v14, %v5365_v37  ;;  %v5375_v8 = vmul.f32 %v5374_v9, %v5365_v37  ;;  %v4972_v39 = vsel %vm4962_vm4, %v4969_v43, %v4971_v20  ;;  %vm5383_vm7 = vcmp.eq.s32.totalorder %v12315_v13, 0 }
 0x4ae   : > { %v12344_v19 = vshrl.u32 %v5182_v12, 30  ;;  %v4982_v7 = vmul.u32 %v4980_v29, %v4978_v36  ;;  %v4983_v44 = vmul.u32 %v4981_v49, %v4978_v36  ;;  %v12347_v26 = vmul.u32 %v4980_v29, %v12331_v47 }
 0x4af   : > { %v5369_v4 = vadd.f32 -0.4999988, %v5368_v61  ;;  %v5376_v57 = vadd.f32 -0.16666654, %v5375_v8  ;;  %vm5382_vm9 = vcmp.lt.s32.totalorder %v12315_v13, 2  ;;  %vm5386_vm3 = vcmp.eq.s32.totalorder %v12315_v13, 2 }
 0x4b0   : > { %v5002_v15 = vand.u32 65535, %v4972_v39  ;;  %v5184_v51 = vshll.u32 %v12344_v19, 30  ;;  %v4945_v50 = vshrl.u32 %v13865_v55, %v14206_v60  ;;  %v4985_v41 = vmul.u32 %v4981_v49, %v12331_v47 }
 0x4b1   : > { %v4986_v17 = vshll.u32 %v4983_v44, 16  ;;  %v5370_v52 = vmul.f32 %v5369_v4, %v5365_v37  ;;  %v5377_v16 = vmul.f32 %v5376_v57, %v5365_v37  ;;  %v4988_v62 = vshll.u32 %v12347_v26, 16 }
 0x4b2   : > { %v5003_v5 = vshrl.u32 %v4972_v39, 16  ;;  %v12356_v18 = vsub.s32 %v5181_v59, %v5184_v51  ;;  %v4966_v23 = vsel %vm4964_vm6, %v4954_v56, 2102212464  ;;  %v5004_v60 = vmul.u32 %v5002_v15, %v4978_v36  ;;  %v7157_v39 = vld [vmem:[%s7354_s11 + $0xe8] sm:$0xff] }
 0x4b3   : > { %vm4990_vm12 = vc.u32 %v4982_v7, %v4986_v17  ;;  %v4992_v28 = vadd.s32 %v4986_v17, %v4982_v7  ;;  %v5371_v6 = vadd.f32 1.0, %v5370_v52  ;;  %v5378_v22 = vadd.f32 1.0, %v5377_v16 }
 0x4b4   : > { %v4991_v32 = vsel %vm4990_vm12, 1, %v13868_v45  ;;  %vm5186_vm10 = vcmp.lt.s32.totalorder %v12356_v18, 0  ;;  %v5187_v37 = vsub.s32 0, %v12356_v18  ;;  %v5005_v14 = vmul.u32 %v5003_v5, %v4978_v36 }
 0x4b5   : > { %v4993_v43 = vadd.s32 %v4991_v32, %v4985_v41  ;;  %vm4994_vm14 = vc.u32 %v4992_v28, %v4988_v62  ;;  %v5379_v20 = vmul.f32 %v5378_v22, %v5363_v58  ;;  %v5387_v59 = vxor.u32 2147483648, %v5371_v6 }
 0x4b6   : > { %v4995_v30 = vsel %vm4994_vm14, 1, %v13868_v45  ;;  %v5188_v56 = vsel %vm5186_vm10, %v5187_v37, %v12356_v18  ;;  %v4965_v9 = vsel %vm4961_vm2, %v4945_v50, %v12295_v10  ;;  %v4967_v12 = vsel %vm4963_vm11, %v12289_v21, %v4966_v23 }
 0x4b7   : > { %v5006_v29 = vmul.u32 %v5002_v15, %v12331_v47  ;;  %v5384_v49 = vxor.u32 2147483648, %v5379_v20  ;;  %v5388_v58 = vsel %vm5386_vm3, %v5387_v59, %v5379_v20  ;;  %v5189_v61 = vclz %v5188_v56 }
 0x4b8   : > { %v5008_v8 = vshll.u32 %v5005_v14, 16  ;;  %vm736_vm6 = vcmp.le.f32.partialorder %v7157_v39, 0.51  ;;  %vm5380_vm1 = vweird.f32 %v14191_v2  ;;  %v4987_v36 = vshrl.u32 %v4983_v44, 16 }
 0x4b9   : > { %v4997_v7 = vadd.s32 %v4995_v30, %v4993_v43  ;;  %v5385_v10 = vsel %vm5383_vm7, %v5371_v6, %v5384_v49  ;;  %vm5085_vm15 = vcmp.lt.s32.totalorder %v14197_v0, 0  ;;  %v5177_v21 = vadd.s32 %v12264_v42, %v12261_v48 }
 0x4ba   : > { %v6942_v4 = vadd.s32 4294967294, %v5189_v61  ;;  %vm5012_vm5 = vc.u32 %v5004_v60, %v5008_v8  ;;  %v5389_v57 = vsel %vm5382_vm9, %v5385_v10, %v5388_v58  ;;  %v12385_v15 = vsel %vm4962_vm4, %v4965_v9, %v4967_v12 }
 0x4bb   : > { %v5007_v2 = vmul.u32 %v5003_v5, %v12331_v47  ;;  %v5010_v44 = vshll.u32 %v5006_v29, 16  ;;  %v5390_v51 = vsel %vm5380_vm1, nan, %v5389_v57  ;;  %v5013_v50 = vsel %vm5012_vm5, 1, %v13868_v45 }
 0x4bc   : > { %vm6943_vm0 = vcmp.lt.s32.totalorder %v6942_v4, 0  ;;  %v5014_v41 = vadd.s32 %v5008_v8, %v5004_v60  ;;  %v5728_v17 = vadd.f32 1.0, %v5390_v51  ;;  %v4989_v48 = vshrl.u32 %v12347_v26, 16 }
 0x4bd   : > { %v5192_v52 = vsel %vm6943_vm0, 0, %v6942_v4  ;;  %v4998_v42 = vadd.s32 %v4997_v7, %v4987_v36  ;;  %v5545_v23 = vand.u32 2147483647, %v14207_v1  ;;  %v5207_v47 = vsub.s32 4, %v12344_v19 }
 0x4be   : > { %v5193_v16 = vsub.s32 32, %v5192_v52  ;;  %v5194_v13 = vshll.u32 %v12356_v18, %v5192_v52  ;;  %v5197_v62 = vsub.s32 4294967266, %v5192_v52  ;;  %v5760_v28 = vmul.f32 0.5, %v5728_v17 }
 0x4bf   : > { %v5009_v5 = vshrl.u32 %v5005_v14, 16  ;;  %v5015_v6 = vadd.s32 %v5013_v50, %v5007_v2  ;;  %v5011_v37 = vshrl.u32 %v5006_v29, 16  ;;  %vm5016_vm13 = vc.u32 %v5014_v41, %v5010_v44 }
 0x4c0   : > { %v5195_v22 = vshrl.u32 %v5177_v21, %v5193_v16  ;;  %v5198_v32 = vadd.s32 127, %v5197_v62  ;;  %v5792_v60 = vsel %vm736_vm6, %v5760_v28, 0.0  ;;  %v12394_v43 = vadd.s32 %v4998_v42, %v4989_v48 }
 0x4c1   : > { %v5017_v26 = vsel %vm5016_vm13, 1, %v13868_v45  ;;  %v5018_v20 = vadd.s32 %v5014_v41, %v5010_v44  ;;  %5942 = vperm.xlu1 %7042, %v5792_v60   ;;  %v5552_v56 = vand.u32 8388607, %v5545_v23  ;;  %v5208_v14 = vsel %vm5085_vm15, %v5207_v47, %v12344_v19 }
 0x4c2   : > { %v5196_v18 = vor.u32 %v5195_v22, %v5194_v13  ;;  %v5199_v59 = vshll.u32 %v5198_v32, 23  ;;  %v5019_v30 = vadd.s32 %v5017_v26, %v5015_v6  ;;  %v5022_v9 = vmul.u32 %v12313_v54, %v12385_v15 }
 0x4c3   : > { %v5562_v12 = vshll.u32 %v13865_v55, %v12084_v3  ;;  %v5563_v29 = vshrl.u32 %v13869_v11, %v12132_v33  ;;  %v5565_v8 = vshll.u32 %v13869_v11, %v12084_v3  ;;  %vm5024_vm2 = vc.u32 %v12394_v43, %v5018_v20 }
 0x4c4   : > { %v5200_v49 = vor.u32 4788187, %v5199_v59  ;;  %v5203_v58 = vcvt.s32.f32 %v5196_v18  ;;  %v5020_v61 = vadd.s32 %v5019_v30, %v5009_v5  ;;  %v5566_v19 = vshrl.u32 %v13870_v46, %v12132_v33 }
 0x4c5   : > { %v5568_v54 = vshll.u32 %v13870_v46, %v12084_v3  ;;  %v5569_v39 = vshrl.u32 %v13780_v35, %v12132_v33  ;;  %v5553_v10 = vor.u32 8388608, %v5552_v56  ;;  %vm5577_vm11 = vcmp.lt.s32.totalorder %v12035_v63, 1 }
 0x4c6   : > { %v5201_v36 = vand.u32 2147483647, %v5200_v49  ;;  %v5021_v7 = vadd.s32 %v5020_v61, %v5011_v37  ;;  %v12418_v21 = vor.u32 %v5563_v29, %v5562_v12  ;;  %v12420_v4 = vor.u32 %v5566_v19, %v5565_v8 }
 0x4c7   : > { %v5570_v57 = vor.u32 %v5569_v39, %v5568_v54  ;;  %vm5579_vm4 = vcmp.lt.s32.totalorder %v12035_v63, 3  ;;  %vm5578_vm7 = vcmp.lt.s32.totalorder %v12035_v63, 2  ;;  %v5586_v44 = vsel %vm5580_vm8, %v12335_v27, 920167782 }
 0x4c8   : > { %v5204_v15 = vmul.f32 %v5203_v58, %v5201_v36  ;;  %v5025_v2 = vadd.s32 1, %v5021_v7  ;;  %v5591_v3 = vsel %vm5579_vm4, %v12335_v27, %v12339_v24  ;;  %vm12433_vm9 = vcmp.le.f32.partialorder %v5083_v40, 0.7853982 }
 0x4c9   : > { %v5589_v50 = vsel %vm5577_vm11, %v12420_v4, %v5570_v57  ;;  %v12441_v41 = vand.u32 31, %v12308_v38  ;;  %v5210_v24 = vsel %vm12433_vm9, 0, %v5208_v14  ;;  %v5585_v40 = vsel %vm5577_vm11, %v12418_v21, %v12420_v4 }
 0x4ca   : > { %v5205_v17 = vxor.u32 2147483648, %v5204_v15  ;;  %v5026_v27 = vsel %vm5024_vm2, %v5025_v2, %v5021_v7  ;;  %v5592_v48 = vsel %vm5578_vm7, %v5589_v50, %v5591_v3  ;;  %v12453_v42 = vshll.u32 %v5553_v10, 8  ;;  %v12495_v2 = vpop.permute.xlu2 %374 }
 0x4cb   : > { %v5027_v52 = vadd.s32 %v5026_v27, %v5022_v9  ;;  %v5587_v13 = vsel %vm5579_vm4, %v5570_v57, %v5586_v44  ;;  %v5596_v62 = vand.u32 65535, %v5592_v48  ;;  %v5597_v28 = vshrl.u32 %v5592_v48, 16 }
 0x4cc   : > { %v5206_v16 = vsel %vm5085_vm15, %v5205_v17, %v5204_v15  ;;  %v5594_v6 = vand.u32 65535, %v12453_v42  ;;  %v5595_v22 = vshrl.u32 %v12453_v42, 16  ;;  %v12467_v32 = vshrl.u32 %v12308_v38, 5 }
 0x4cd   : > { %v12462_v47 = vsel %vm12433_vm9, %v14197_v0, %v5206_v16  ;;  %v5028_v5 = vadd.s32 536870912, %v5027_v52  ;;  %v12470_v37 = vsub.s32 32, %v12441_v41  ;;  %v12474_v26 = vand.u32 3, %v5210_v24 }
 0x4ce   : > { %v5211_v60 = vmul.f32 %v12462_v47, %v12462_v47  ;;  %v5598_v59 = vmul.u32 %v5596_v62, %v5594_v6  ;;  %v5599_v30 = vmul.u32 %v5597_v28, %v5594_v6  ;;  %v12478_v56 = vmul.u32 %v5596_v62, %v5595_v22 }
 0x4cf   : > { %v12476_v18 = vshrl.u32 %v5028_v5, 30  ;;  %v5561_v38 = vshrl.u32 %v13865_v55, %v12132_v33  ;;  %v5588_v12 = vsel %vm5578_vm7, %v5585_v40, %v5587_v13  ;;  %v12485_v29 = vadd.s32 %v5018_v20, %v12394_v43 }
 0x4d0   : > { %v5212_v14 = vmul.f32 -0.001358992, %v5211_v60  ;;  %v5219_v9 = vmul.f32 -0.00019511016, %v5211_v60  ;;  %v5601_v58 = vmul.u32 %v5597_v28, %v5595_v22  ;;  %v5602_v61 = vshll.u32 %v5599_v30, 16 }
 0x4d1   : > { %v5030_v49 = vshll.u32 %v12476_v18, 30  ;;  %v5604_v54 = vshll.u32 %v12478_v56, 16  ;;  %v5618_v39 = vand.u32 65535, %v5588_v12  ;;  %vm5232_vm3 = vcmp.eq.s32.totalorder %v12474_v26, 2 }
 0x4d2   : > { %v5213_v8 = vadd.f32 0.041655596, %v5212_v14  ;;  %v5220_v19 = vadd.f32 0.008332121, %v5219_v9  ;;  %vm5606_vm12 = vc.u32 %v5598_v59, %v5602_v61  ;;  %v5608_v33 = vadd.s32 %v5602_v61, %v5598_v59 }
 0x4d3   : > { %v12490_v36 = vsub.s32 %v5027_v52, %v5030_v49  ;;  %v5619_v7 = vshrl.u32 %v5588_v12, 16  ;;  %v5582_v43 = vsel %vm5580_vm8, %v5570_v57, 2102212464  ;;  %v5607_v20 = vsel %vm5606_vm12, 1, %v13868_v45 }
 0x4d4   : > { %v5214_v10 = vmul.f32 %v5213_v8, %v5211_v60  ;;  %v5221_v15 = vmul.f32 %v5220_v19, %v5211_v60  ;;  %v5609_v44 = vadd.s32 %v5607_v20, %v5601_v58  ;;  %vm5610_vm14 = vc.u32 %v5608_v33, %v5604_v54  ;;  %v12518_v33 = vpop.permute.xlu2 %379 }
 0x4d5   : > { %vm5032_vm10 = vcmp.lt.s32.totalorder %v12490_v36, 0  ;;  %v5033_v3 = vsub.s32 0, %v12490_v36  ;;  %vm5228_vm6 = vcmp.lt.s32.totalorder %v12474_v26, 2  ;;  %v5611_v17 = vsel %vm5610_vm14, 1, %v13868_v45 }
 0x4d6   : > { %v5215_v51 = vadd.f32 -0.4999988, %v5214_v10  ;;  %v5222_v50 = vadd.f32 -0.16666654, %v5221_v15  ;;  %v5620_v24 = vmul.u32 %v5618_v39, %v5594_v6  ;;  %vm5226_vm1 = vweird.f32 %v14197_v0 }
 0x4d7   : > { %v5034_v57 = vsel %vm5032_vm10, %v5033_v3, %v12490_v36  ;;  %v5603_v27 = vshrl.u32 %v5599_v30, 16  ;;  %v5613_v52 = vadd.s32 %v5611_v17, %v5609_v44  ;;  %v5621_v40 = vmul.u32 %v5619_v7, %v5594_v6 }
 0x4d8   : > { %v5216_v48 = vmul.f32 %v5215_v51, %v5211_v60  ;;  %v5223_v16 = vmul.f32 %v5222_v50, %v5211_v60  ;;  %v5035_v13 = vclz %v5034_v57  ;;  %v5622_v62 = vmul.u32 %v5618_v39, %v5595_v22 }
 0x4d9   : > { %v5581_v28 = vsel %vm5577_vm11, %v5561_v38, %v12418_v21  ;;  %v5583_v5 = vsel %vm5579_vm4, %v12420_v4, %v5582_v43  ;;  %v5623_v59 = vmul.u32 %v5619_v7, %v5595_v22  ;;  %v5624_v14 = vshll.u32 %v5621_v40, 16 }
 0x4da   : > { %v5217_v9 = vadd.f32 1.0, %v5216_v48  ;;  %v5224_v12 = vadd.f32 1.0, %v5223_v16  ;;  %v6939_v49 = vadd.s32 4294967294, %v5035_v13  ;;  %v5605_v30 = vshrl.u32 %v12478_v56, 16  ;;  %v7158_v16 = vld [vmem:[%s7354_s11 + $0xe0] sm:$0xff] }
 0x4db   : > { %v5614_v6 = vadd.s32 %v5613_v52, %v5603_v27  ;;  %v5626_v58 = vshll.u32 %v5622_v62, 16  ;;  %vm5628_vm8 = vc.u32 %v5620_v24, %v5624_v14  ;;  %v5630_v60 = vadd.s32 %v5624_v14, %v5620_v24  ;;  %v12532_v24 = vpop.permute.xlu1 %364  ;;  %v12538_v27 = vpop.permute.xlu0 %354 }
 0x4dc   : > { %v5225_v61 = vmul.f32 %v5224_v12, %v12462_v47  ;;  %v5233_v8 = vxor.u32 2147483648, %v5217_v9  ;;  %vm6940_vm15 = vcmp.lt.s32.totalorder %v6939_v49, 0  ;;  %v5629_v21 = vsel %vm5628_vm8, 1, %v13868_v45 }
 0x4dd   : > { %vm5229_vm5 = vcmp.eq.s32.totalorder %v12474_v26, 0  ;;  %v5038_v4 = vsel %vm6940_vm15, 0, %v6939_v49  ;;  %v5584_v22 = vsel %vm5578_vm7, %v5581_v28, %v5583_v5  ;;  %v5631_v38 = vadd.s32 %v5629_v21, %v5623_v59  ;;  %v14210_v28 = vld [vmem:[#allocation25_spill] sm:$0xff]  ;;  %v12566_v21 = vpop.permute.xlu2 %394 }
 0x4de   : > { %v5230_v19 = vxor.u32 2147483648, %v5225_v61  ;;  %v5234_v56 = vsel %vm5232_vm3, %v5233_v8, %v5225_v61  ;;  %v5039_v54 = vsub.s32 32, %v5038_v4  ;;  %v5040_v39 = vshll.u32 %v12490_v36, %v5038_v4 }
 0x4df   : > { %v5043_v47 = vsub.s32 4294967266, %v5038_v4  ;;  %v12520_v7 = vadd.s32 %v5614_v6, %v5605_v30  ;;  %v5625_v10 = vshrl.u32 %v5621_v40, 16  ;;  %vm5632_vm0 = vc.u32 %v5630_v60, %v5626_v58  ;;  %v5987_v4 = vld [vmem:[%s12550_s14] sm:$0xff] }
 0x4e0   : > { %v5231_v15 = vsel %vm5229_vm5, %v5217_v9, %v5230_v19  ;;  %v5041_v43 = vshrl.u32 %v12485_v29, %v5039_v54  ;;  %v5627_v63 = vshrl.u32 %v5622_v62, 16  ;;  %v5633_v20 = vsel %vm5632_vm0, 1, %v13868_v45  ;;  %6022 = vperm.xlu1 %7042, %v5987_v4  }
 0x4e1   : > { %v5235_v3 = vsel %vm5228_vm6, %v5231_v15, %v5234_v56  ;;  %v5044_v44 = vadd.s32 127, %v5043_v47  ;;  %v12526_v51 = vadd.s32 %v5630_v60, %v5626_v58  ;;  %v5635_v36 = vadd.s32 %v5633_v20, %v5631_v38 }
 0x4e2   : > { %v5417_v50 = vshll.u32 %v13780_v35, %v12441_v41  ;;  %v5420_v17 = vshll.u32 %v13777_v31, %v12441_v41  ;;  %v5236_v29 = vsel %vm5226_vm1, nan, %v5235_v3  ;;  %v5042_v57 = vor.u32 %v5041_v43, %v5040_v39 }
 0x4e3   : > { %v5421_v26 = vshrl.u32 %v13778_v53, %v12470_v37  ;;  %v5727_v52 = vadd.f32 1.0, %v5236_v29  ;;  %v5045_v40 = vshll.u32 %v5044_v44, 23  ;;  %v5636_v48 = vadd.s32 %v5635_v36, %v5625_v10  ;;  %v12593_v15 = vpop.permute.xlu0 %359 }
 0x4e4   : > { %vm735_vm13 = vcmp.le.f32.partialorder %v7158_v16, 0.51  ;;  %v5049_v13 = vcvt.s32.f32 %v5042_v57  ;;  %v5638_v62 = vmul.u32 %v12453_v42, %v5584_v22  ;;  %v5391_v5 = vand.u32 2147483647, %v14210_v28 }
 0x4e5   : > { %v5759_v59 = vmul.f32 0.5, %v5727_v52  ;;  %v5046_v0 = vor.u32 4788187, %v5045_v40  ;;  %v5637_v14 = vadd.s32 %v5636_v48, %v5627_v63  ;;  %vm5640_vm2 = vc.u32 %v12520_v7, %v12526_v51 }
 0x4e6   : > { %v5411_v53 = vshll.u32 %v13869_v11, %v12441_v41  ;;  %v5412_v42 = vshrl.u32 %v13870_v46, %v12470_v37  ;;  %v5414_v9 = vshll.u32 %v13870_v46, %v12441_v41  ;;  %v5415_v12 = vshrl.u32 %v13780_v35, %v12470_v37 }
 0x4e7   : > { %v5418_v49 = vshrl.u32 %v13777_v31, %v12470_v37  ;;  %v5791_v30 = vsel %vm735_vm13, %v5759_v59, 0.0  ;;  %v5047_v6 = vand.u32 2147483647, %v5046_v0  ;;  %v5641_v58 = vadd.s32 1, %v5637_v14  ;;  %v12628_v0 = vpop.permute.xlu2 %409 }
 0x4e8   : > { %v5422_v60 = vor.u32 %v5421_v26, %v5420_v17  ;;  %vm5426_vm11 = vcmp.lt.s32.totalorder %v12467_v32, 4  ;;  %5937 = vperm.xlu0 %7041, %v5791_v30   ;;  %v5053_v61 = vsub.s32 4, %v12476_v18  ;;  %v5398_v8 = vand.u32 8388607, %v5391_v5 }
 0x4e9   : > { %v5050_v46 = vmul.f32 %v5049_v13, %v5047_v6  ;;  %v5642_v31 = vsel %vm5640_vm2, %v5641_v58, %v5637_v14  ;;  %v5408_v35 = vshll.u32 %v13865_v55, %v12441_v41  ;;  %v5409_v22 = vshrl.u32 %v13869_v11, %v12470_v37  ;;  %v12590_v41 = vpop.permute.xlu1 %369 }
 0x4ea   : > { %vm4931_vm4 = vcmp.lt.s32.totalorder %v14205_v25, 0  ;;  %v5643_v38 = vadd.s32 %v5642_v31, %v5638_v62  ;;  %v12577_v19 = vor.u32 %v5412_v42, %v5411_v53  ;;  %v12579_v56 = vor.u32 %v5415_v12, %v5414_v9 }
 0x4eb   : > { %v5419_v54 = vor.u32 %v5418_v49, %v5417_v50  ;;  %vm12583_vm7 = vcmp.le.f32.partialorder %v4929_v34, 0.7853982  ;;  %v5051_v47 = vxor.u32 2147483648, %v5050_v46  ;;  %vm5423_vm9 = vcmp.lt.s32.totalorder %v12467_v32, 1  ;;  %v12639_v4 = vpop.permute.xlu0 %384 }
 0x4ec   : > { %v5436_v11 = vsel %vm5426_vm11, %v5422_v60, 1326507024  ;;  %v5644_v10 = vadd.s32 536870912, %v5643_v38  ;;  %vm5425_vm3 = vcmp.lt.s32.totalorder %v12467_v32, 3  ;;  %v5054_v63 = vsel %vm4931_vm4, %v5053_v61, %v12476_v18 }
 0x4ed   : > { %v5052_v43 = vsel %vm4931_vm4, %v5051_v47, %v5050_v46  ;;  %v5399_v34 = vor.u32 8388608, %v5398_v8  ;;  %v12596_v20 = vor.u32 %v5409_v22, %v5408_v35  ;;  %vm5424_vm12 = vcmp.lt.s32.totalorder %v12467_v32, 2 }
 0x4ee   : > { %v5055_v3 = vsel %vm12583_vm7, %v14205_v25, %v5052_v43  ;;  %v12601_v44 = vshrl.u32 %v5644_v10, 30  ;;  %v5435_v36 = vsel %vm5423_vm9, %v12577_v19, %v12579_v56  ;;  %v5432_v50 = vsel %vm5426_vm11, %v5419_v54, 920167782 }
 0x4ef   : > { %v5057_v18 = vmul.f32 %v5055_v3, %v5055_v3  ;;  %v5437_v17 = vsel %vm5425_vm3, %v5419_v54, %v5436_v11  ;;  %v5056_v29 = vsel %vm12583_vm7, 0, %v5054_v63  ;;  %v12617_v48 = vshll.u32 %v5399_v34, 8 }
 0x4f0   : > { %v5646_v57 = vshll.u32 %v12601_v44, 30  ;;  %v5438_v40 = vsel %vm5424_vm12, %v5435_v36, %v5437_v17  ;;  %v5431_v13 = vsel %vm5423_vm9, %v12596_v20, %v12577_v19  ;;  %v5433_v62 = vsel %vm5425_vm3, %v12579_v56, %v5432_v50 }
 0x4f1   : > { %v5058_v26 = vmul.f32 -0.001358992, %v5057_v18  ;;  %v5065_v52 = vmul.f32 -0.00019511016, %v5057_v18  ;;  %v5442_v59 = vand.u32 65535, %v5438_v40  ;;  %v5073_v42 = vand.u32 3, %v5056_v29  ;;  %v12636_v61 = vpop.permute.xlu1 %389 }
 0x4f2   : > { %v12619_v16 = vsub.s32 %v5643_v38, %v5646_v57  ;;  %v5440_v12 = vand.u32 65535, %v12617_v48  ;;  %v5441_v49 = vshrl.u32 %v12617_v48, 16  ;;  %v5434_v58 = vsel %vm5424_vm12, %v5431_v13, %v5433_v62 }
 0x4f3   : > { %v5059_v14 = vadd.f32 0.041655596, %v5058_v26  ;;  %v5066_v53 = vadd.f32 0.008332121, %v5065_v52  ;;  %v5443_v60 = vshrl.u32 %v5438_v40, 16  ;;  %vm5072_vm14 = vweird.f32 %v14205_v25 }
 0x4f4   : > { %vm5648_vm10 = vcmp.lt.s32.totalorder %v12619_v16, 0  ;;  %v5649_v9 = vsub.s32 0, %v12619_v16  ;;  %v5444_v46 = vmul.u32 %v5442_v59, %v5440_v12  ;;  %vm5074_vm6 = vcmp.lt.s32.totalorder %v5073_v42, 2 }
 0x4f5   : > { %v5060_v30 = vmul.f32 %v5059_v14, %v5057_v18  ;;  %v5067_v6 = vmul.f32 %v5066_v53, %v5057_v18  ;;  %v12641_v38 = vmul.u32 %v5443_v60, %v5440_v12  ;;  %v12644_v54 = vmul.u32 %v5442_v59, %v5441_v49 }
 0x4f6   : > { %v5650_v8 = vsel %vm5648_vm10, %v5649_v9, %v12619_v16  ;;  %v5465_v39 = vshrl.u32 %v5434_v58, 16  ;;  %vm5078_vm1 = vcmp.eq.s32.totalorder %v5073_v42, 2  ;;  %v5639_v63 = vadd.s32 %v12526_v51, %v12520_v7 }
 0x4f7   : > { %v5061_v31 = vadd.f32 -0.4999988, %v5060_v30  ;;  %v5068_v35 = vadd.f32 -0.16666654, %v5067_v6  ;;  %v5651_v22 = vclz %v5650_v8  ;;  %v5448_v43 = vshll.u32 %v12641_v38, 16 }
 0x4f8   : > { %v5447_v34 = vmul.u32 %v5443_v60, %v5441_v49  ;;  %v5464_v36 = vand.u32 65535, %v5434_v58  ;;  %v5450_v57 = vshll.u32 %v12644_v54, 16  ;;  %v12651_v52 = vmul.u32 %v5465_v39, %v5440_v12 }
 0x4f9   : > { %v5062_v47 = vmul.f32 %v5061_v31, %v5057_v18  ;;  %v5069_v11 = vmul.f32 %v5068_v35, %v5057_v18  ;;  %v6951_v10 = vadd.s32 4294967294, %v5651_v22  ;;  %vm5452_vm15 = vc.u32 %v5444_v46, %v5448_v43  ;;  %v12653_v18 = vpop.permute.xlu2 %424  ;;  %v12657_v58 = vpop.permute.xlu1 %404 }
 0x4fa   : > { %v5453_v26 = vsel %vm5452_vm15, 1, %v13868_v45  ;;  %vm5075_vm5 = vcmp.eq.s32.totalorder %v5073_v42, 0  ;;  %v5454_v59 = vadd.s32 %v5448_v43, %v5444_v46  ;;  %v5466_v14 = vmul.u32 %v5464_v36, %v5440_v12  ;;  %v12660_v31 = vpop.permute.xlu0 %399 }
 0x4fb   : > { %v5063_v50 = vadd.f32 1.0, %v5062_v47  ;;  %v5070_v17 = vadd.f32 1.0, %v5069_v11  ;;  %vm6952_vm8 = vcmp.lt.s32.totalorder %v6951_v10, 0  ;;  %v5468_v6 = vmul.u32 %v5464_v36, %v5441_v49 }
 0x4fc   : > { %v5654_v29 = vsel %vm6952_vm8, 0, %v6951_v10  ;;  %v5455_v8 = vadd.s32 %v5453_v26, %v5447_v34  ;;  %vm5456_vm0 = vc.u32 %v5454_v59, %v5450_v57  ;;  %v5469_v12 = vmul.u32 %v5465_v39, %v5441_v49  ;;  %v7159_v49 = vld [vmem:[%s7354_s11 + $0xd8] sm:$0xff] }
 0x4fd   : > { %v5071_v40 = vmul.f32 %v5070_v17, %v5055_v3  ;;  %v5079_v13 = vxor.u32 2147483648, %v5063_v50  ;;  %v5655_v62 = vsub.s32 32, %v5654_v29  ;;  %v5656_v7 = vshll.u32 %v12619_v16, %v5654_v29 }
 0x4fe   : > { %v5659_v51 = vsub.s32 4294967266, %v5654_v29  ;;  %v5470_v3 = vshll.u32 %v12651_v52, 16  ;;  %v5457_v46 = vsel %vm5456_vm0, 1, %v13868_v45  ;;  %v5449_v11 = vshrl.u32 %v12641_v38, 16 }
 0x4ff   : > { %v5076_v53 = vxor.u32 2147483648, %v5071_v40  ;;  %v5080_v9 = vsel %vm5078_vm1, %v5079_v13, %v5071_v40  ;;  %v5657_v30 = vshrl.u32 %v5639_v63, %v5655_v62  ;;  %v5459_v10 = vadd.s32 %v5457_v46, %v5455_v8 }
 0x500   : > { %v5660_v60 = vadd.s32 127, %v5659_v51  ;;  %v5407_v63 = vshrl.u32 %v13865_v55, %v12470_v37  ;;  %v5472_v34 = vshll.u32 %v5468_v6, 16  ;;  %vm5474_vm13 = vc.u32 %v5466_v14, %v5470_v3 }
 0x501   : > { %v5077_v35 = vsel %vm5075_vm5, %v5063_v50, %v5076_v53  ;;  %v5658_v16 = vor.u32 %v5657_v30, %v5656_v7  ;;  %v5475_v29 = vsel %vm5474_vm13, 1, %v13868_v45  ;;  %vm734_vm2 = vcmp.le.f32.partialorder %v7159_v49, 0.51  ;;  %v12675_v37 = vpop.permute.xlu2 %439 }
 0x502   : > { %v5081_v22 = vsel %vm5074_vm6, %v5077_v35, %v5080_v9  ;;  %v5661_v47 = vshll.u32 %v5660_v60, 23  ;;  %v5428_v42 = vsel %vm5426_vm11, %v12579_v56, 2102212464  ;;  %v5476_v38 = vadd.s32 %v5470_v3, %v5466_v14  ;;  %v12686_v14 = vpop.permute.xlu1 %419  ;;  %v12694_v30 = vpop.permute.xlu0 %414 }
 0x503   : > { %v5082_v43 = vsel %vm5072_vm14, nan, %v5081_v22  ;;  %v5665_v17 = vcvt.s32.f32 %v5658_v16  ;;  %v5477_v39 = vadd.s32 %v5475_v29, %v5469_v12  ;;  %v5451_v26 = vshrl.u32 %v12644_v54, 16 }
 0x504   : > { %v5726_v36 = vadd.f32 1.0, %v5082_v43  ;;  %v5662_v50 = vor.u32 4788187, %v5661_v47  ;;  %v5460_v55 = vadd.s32 %v5459_v10, %v5449_v11  ;;  %v5427_v40 = vsel %vm5423_vm9, %v5407_v63, %v12596_v20 }
 0x505   : > { %v5471_v13 = vshrl.u32 %v12651_v52, 16  ;;  %vm5478_vm4 = vc.u32 %v5476_v38, %v5472_v34  ;;  %v5429_v56 = vsel %vm5425_vm3, %v12577_v19, %v5428_v42  ;;  %vm5547_vm11 = vcmp.lt.s32.totalorder %v14207_v1, 0 }
 0x506   : > { %v5758_v25 = vmul.f32 0.5, %v5726_v36  ;;  %v5663_v57 = vand.u32 2147483647, %v5662_v50  ;;  %v5479_v51 = vsel %vm5478_vm4, 1, %v13868_v45  ;;  %v5473_v54 = vshrl.u32 %v5468_v6, 16 }
 0x507   : > { %v5481_v59 = vadd.s32 %v5479_v51, %v5477_v39  ;;  %vm12690_vm7 = vcmp.le.f32.partialorder %v5545_v23, 0.7853982  ;;  %v5461_v53 = vadd.s32 %v5460_v55, %v5451_v26  ;;  %v5480_v9 = vadd.s32 %v5476_v38, %v5472_v34 }
 0x508   : > { %v5790_v62 = vsel %vm734_vm2, %v5758_v25, 0.0  ;;  %v5666_v7 = vmul.f32 %v5665_v17, %v5663_v57  ;;  %v5430_v19 = vsel %vm5424_vm12, %v5427_v40, %v5429_v56  ;;  %v5669_v8 = vsub.s32 4, %v12601_v44 }
 0x509   : > { %5932 = vperm.xlu2 %7043, %v5790_v62   ;;  %v5482_v60 = vadd.s32 %v5481_v59, %v5471_v13  ;;  %v5484_v16 = vmul.u32 %v12617_v48, %v5430_v19  ;;  %vm5486_vm9 = vc.u32 %v5461_v53, %v5480_v9  ;;  %v12705_v32 = vpop.permute.xlu2 %454  ;;  %vm5688_vm6 = vweird.f32 %v14207_v1 }
 0x50a   : > { %v5667_v52 = vxor.u32 2147483648, %v5666_v7  ;;  %v5670_v47 = vsel %vm5547_vm11, %v5669_v8, %v12601_v44  ;;  %v12710_v34 = vpop.permute.xlu1 %434  ;;  %v12714_v29 = vpop.permute.xlu0 %429  ;;  %vm5393_vm15 = vcmp.lt.s32.totalorder %v14210_v28, 0  ;;  %vm12746_vm5 = vcmp.le.f32.partialorder %v5391_v5, 0.7853982 }
 0x50b   : > { %v5483_v3 = vadd.s32 %v5482_v60, %v5473_v54  ;;  %v5672_v36 = vsel %vm12690_vm7, 0, %v5670_v47  ;;  %vm5534_vm4 = vweird.f32 %v14210_v28 }
 0x50c   : > { %v5668_v6 = vsel %vm5547_vm11, %v5667_v52, %v5666_v7  ;;  %v5689_v39 = vand.u32 3, %v5672_v36 }
 0x50d   : > { %v5671_v23 = vsel %vm12690_vm7, %v14207_v1, %v5668_v6  ;;  %v5487_v46 = vadd.s32 1, %v5483_v3 }
 0x50e   : > { %v5673_v35 = vmul.f32 %v5671_v23, %v5671_v23  ;;  %vm5694_vm3 = vcmp.eq.s32.totalorder %v5689_v39, 2  ;;  %vm5691_vm10 = vcmp.eq.s32.totalorder %v5689_v39, 0  ;;  %vm5690_vm14 = vcmp.lt.s32.totalorder %v5689_v39, 2 }
 0x50f   : > { %v5488_v11 = vsel %vm5486_vm9, %v5487_v46, %v5483_v3 }
 0x510   : > { %v5674_v12 = vmul.f32 -0.001358992, %v5673_v35  ;;  %v5681_v22 = vmul.f32 -0.00019511016, %v5673_v35  ;;  %v5489_v63 = vadd.s32 %v5488_v11, %v5484_v16  ;;  %v7160_v16 = vld [vmem:[%s7354_s11 + $0xf8] sm:$0xff] }
 0x511   : > { %v12719_v13 = vpop.permute.xlu2 %469  ;;  %vm738_vm8 = vcmp.le.f32.partialorder %v7160_v16, 0.51 }
 0x512   : > { %v5675_v10 = vadd.f32 0.041655596, %v5674_v12  ;;  %v5682_v43 = vadd.f32 0.008332121, %v5681_v22  ;;  %v5490_v17 = vadd.s32 536870912, %v5489_v63  ;;  %v12721_v51 = vpop.permute.xlu1 %449  ;;  %v12723_v52 = vpop.permute.xlu0 %444 }
 0x514   : > { %v5676_v48 = vmul.f32 %v5675_v10, %v5673_v35  ;;  %v5683_v50 = vmul.f32 %v5682_v43, %v5673_v35  ;;  %v12716_v38 = vshrl.u32 %v5490_v17, 30 }
 0x516   : > { %v5677_v49 = vadd.f32 -0.4999988, %v5676_v48  ;;  %v5684_v42 = vadd.f32 -0.16666654, %v5683_v50  ;;  %v5492_v57 = vshll.u32 %v12716_v38, 30 }
 0x518   : > { %v5678_v44 = vmul.f32 %v5677_v49, %v5673_v35  ;;  %v5685_v25 = vmul.f32 %v5684_v42, %v5673_v35  ;;  %v5493_v40 = vsub.s32 %v5489_v63, %v5492_v57  ;;  %v5485_v35 = vadd.s32 %v5480_v9, %v5461_v53 }
 0x519   : > { %v12727_v12 = vpop.permute.xlu2 %484 }
 0x51a   : > { %v5679_v26 = vadd.f32 1.0, %v5678_v44  ;;  %v5686_v55 = vadd.f32 1.0, %v5685_v25  ;;  %vm5494_vm12 = vcmp.lt.s32.totalorder %v5493_v40, 0  ;;  %v5495_v56 = vsub.s32 0, %v5493_v40  ;;  %14215 = vst [vmem:[#allocation61_spill] sm:$0xff] %v12727_v12  ;;  %v12729_v36 = vpop.permute.xlu1 %464  ;;  %v12731_v48 = vpop.permute.xlu0 %459  ;;  %v12736_v44 = vld [vmem:[%s12550_s14 + $0x18] sm:$0xff] }
 0x51b   : > { %14217 = vst [vmem:[#allocation78_spill] sm:$0xff] %v12736_v44  ;;  %v12739_v25 = vld [vmem:[%s12550_s14 + $0x10] sm:$0xff]  ;;  %6031 = vperm.xlu1 %7042, %v12736_v44   ;;  %v12867_v12 = vld [vmem:[%s12550_s14 + $0xb8] sm:$0xff]  ;;  %v13752_v44 = vmov 1  }
 0x51c   : > { %v5687_v62 = vmul.f32 %v5686_v55, %v5671_v23  ;;  %v5695_v7 = vxor.u32 2147483648, %v5679_v26  ;;  %v5496_v20 = vsel %vm5494_vm12, %v5495_v56, %v5493_v40 }
 0x51d   : > { %v5497_v19 = vclz %v5496_v20 }
 0x51e   : > { %v5692_v54 = vxor.u32 2147483648, %v5687_v62  ;;  %v5696_v59 = vsel %vm5694_vm3, %v5695_v7, %v5687_v62  ;;  %v5515_v7 = vsub.s32 4, %v12716_v38 }
 0x51f   : > { %v6948_v8 = vadd.s32 4294967294, %v5497_v19  ;;  %v12763_v19 = vld [vmem:[%s12550_s14 + $0x30] sm:$0xff] }
 0x520   : > { %v5693_v60 = vsel %vm5691_vm10, %v5679_v26, %v5692_v54 }
 0x521   : > { %v5697_v6 = vsel %vm5690_vm14, %v5693_v60, %v5696_v59  ;;  %vm6949_vm1 = vcmp.lt.s32.totalorder %v6948_v8, 0  ;;  %v12733_v42 = vpop.permute.xlu2 %499  ;;  %v12766_v60 = vld [vmem:[%s12550_s14 + $0x28] sm:$0xff] }
 0x522   : > { %v5698_v23 = vsel %vm5688_vm6, nan, %v5697_v6  ;;  %v5500_v46 = vsel %vm6949_vm1, 0, %v6948_v8  ;;  %14216 = vst [vmem:[#allocation63_spill] sm:$0xff] %v12733_v42  ;;  %v12750_v55 = vpop.permute.xlu1 %479  ;;  %v5516_v6 = vsel %vm5393_vm15, %v5515_v7, %v12716_v38 }
 0x523   : > { %v5730_v3 = vadd.f32 1.0, %v5698_v23  ;;  %v5501_v47 = vsub.s32 32, %v5500_v46  ;;  %v5502_v11 = vshll.u32 %v5493_v40, %v5500_v46  ;;  %v5505_v10 = vsub.s32 4294967266, %v5500_v46  ;;  %v12752_v40 = vpop.permute.xlu0 %474  ;;  %6040 = vperm.xlu1 %7042, %v12763_v19  }
 0x525   : > { %v5762_v22 = vmul.f32 0.5, %v5730_v3  ;;  %v5503_v43 = vshrl.u32 %v5485_v35, %v5501_v47  ;;  %v5506_v63 = vadd.s32 127, %v5505_v10  ;;  %v12776_v3 = vld [vmem:[%s13471_s3] ss:$0 sm:$0xff]  ;;  %v5518_v35 = vsel %vm12746_vm5, 0, %v5516_v6 }
 0x526   : > { %v519_v38 = vsub.f32 %v12495_v2, %v12776_v3 }
 0x527   : > { %v5794_v1 = vsel %vm738_vm8, %v5762_v22, 0.0  ;;  %v5504_v53 = vor.u32 %v5503_v43, %v5502_v11  ;;  %v5507_v9 = vshll.u32 %v5506_v63, 23 }
 0x528   : > { %5952 = vperm.xlu0 %7041, %v5794_v1   ;;  %v5535_v1 = vand.u32 3, %v5518_v35 }
 0x529   : > { %v5508_v50 = vor.u32 4788187, %v5507_v9  ;;  %v5511_v17 = vcvt.s32.f32 %v5504_v53  ;;  %v12760_v20 = vpop.permute.xlu2 %5797  ;;  %v12789_v9 = vld [vmem:[%s12550_s14 + $0x48] sm:$0xff] }
 0x52a   : > { %v12780_v22 = vpop.permute.xlu1 %494  ;;  %vm5540_vm0 = vcmp.eq.s32.totalorder %v5535_v1, 2  ;;  %vm5537_vm13 = vcmp.eq.s32.totalorder %v5535_v1, 0  ;;  %vm5536_vm2 = vcmp.lt.s32.totalorder %v5535_v1, 2 }
 0x52b   : > { %v5509_v49 = vand.u32 2147483647, %v5508_v50  ;;  %v12784_v10 = vpop.permute.xlu0 %489  ;;  %v12792_v50 = vld [vmem:[%s12550_s14 + $0x40] sm:$0xff]  ;;  %6049 = vperm.xlu1 %7042, %v12789_v9  }
 0x52d   : > { %v5512_v39 = vmul.f32 %v5511_v17, %v5509_v49  ;;  %v551_v17 = vmul.f32 -1970.0, %v519_v38 }
 0x52f   : > { %v5513_v26 = vxor.u32 2147483648, %v5512_v39 }
 0x530   : > { %6028 = vperm.xlu0 %7041, %v12739_v25  }
 0x531   : > { %v5514_v62 = vsel %vm5393_vm15, %v5513_v26, %v5512_v39  ;;  %v12786_v53 = vpop.permute.xlu2 %5812  ;;  %v583_v26 = vmul.f32 %v551_v17, %v519_v38 }
 0x532   : > { %v5517_v56 = vsel %vm12746_vm5, %v14210_v28, %v5514_v62 }
 0x533   : > { %v5519_v54 = vmul.f32 %v5517_v56, %v5517_v56  ;;  %v619_v35 = vmul.f32 1.442695, %v583_v26 }
 0x535   : > { %v5520_v59 = vmul.f32 -0.001358992, %v5519_v54  ;;  %v5527_v5 = vmul.f32 -0.00019511016, %v5519_v54  ;;  %7057 = vpow2.f32 %v619_v35  ;;  %v12836_v35 = vld [vmem:[%s12550_s14 + $0x20] sm:$0xff] }
 0x536   : > { %14225 = vst [vmem:[#allocation68_spill] sm:$0xff] %v12836_v35 }
 0x537   : > { %v5521_v8 = vadd.f32 0.041655596, %v5520_v59  ;;  %v5528_v23 = vadd.f32 0.008332121, %v5527_v5  ;;  %v12799_v5 = vpop.permute.xlu0 %504 }
 0x538   : > { %6037 = vperm.xlu0 %7041, %v12766_v60  }
 0x539   : > { %v5522_v16 = vmul.f32 %v5521_v8, %v5519_v54  ;;  %v5529_v46 = vmul.f32 %v5528_v23, %v5519_v54  ;;  %v12801_v6 = vpop.permute.xlu2 %5827  ;;  %v12804_v8 = vld [vmem:[%s12550_s14 + $0x60] sm:$0xff] }
 0x53a   : > { %6058 = vperm.xlu1 %7042, %v12804_v8  }
 0x53b   : > { %v5523_v47 = vadd.f32 -0.4999988, %v5522_v16  ;;  %v5530_v11 = vadd.f32 -0.16666654, %v5529_v46  ;;  %v7161_v46 = vld [vmem:[%s7354_s11 + $0xf0] sm:$0xff]  ;;  %s284_s11 = sand.u32 1, %s7228_s19  }
 0x53c   : > { %vm737_vm11 = vcmp.le.f32.partialorder %v7161_v46, 0.51  ;;  %v12844_v46 = vld [vmem:[%s12550_s14 + $0xa8] sm:$0xff]  ;;  %s6972_s12 = smul.u32 24, %s284_s11  ;;  %s6729_s27 = scalar_lea.sflag [#allocation3], %s284_s11 }
 0x53d   : > { %v5524_v43 = vmul.f32 %v5523_v47, %v5519_v54  ;;  %v5531_v63 = vmul.f32 %v5530_v11, %v5519_v54  ;;  %v12797_v54 = vpop.permute.xlu1 %509  ;;  %14228 = vst [vmem:[#allocation85_spill] sm:$0xff] %v12844_v46 }
 0x53e   : > { %s286_s13 = scalar_lea.vmem [#allocation2], %s6972_s12 }
 0x53f   : > { %v5525_v2 = vadd.f32 1.0, %v5524_v43  ;;  %v5532_v49 = vadd.f32 1.0, %v5531_v63  ;;  %v12814_v1 = vpop.permute.xlu0 %5802  ;;  %v6002_v43 = vld [vmem:[%s12550_s14 + $0x78] sm:$0xff]  ;;  %v12818_v63 = vld [vmem:[%s12550_s14 + $0x70] sm:$0xff]  ;;  %s6743_s24 = sshll.u32 %s286_s13, 4  ;;  %s6744_s24 = int_to_ptr.vmem [resolvable:$true] %s6743_s24 }
 0x540   : > { %6046 = vperm.xlu0 %7041, %v12792_v50   ;;  %14220 = vst [vmem:[#allocation69_spill] sm:$0xff] %v12814_v1 }
 0x541   : > { %v5533_v39 = vmul.f32 %v5532_v49, %v5517_v56  ;;  %v5541_v57 = vxor.u32 2147483648, %v5525_v2  ;;  %v12807_v56 = vld [vmem:[%s12550_s14 + $0x58] sm:$0xff]  ;;  %v12820_v17 = vpop.permute.xlu2 %5842  ;;  %v5988_v49 = vld [vmem:[%s12550_s14 + $0x8] sm:$0xff] }
 0x542   : > { %14221 = vst [vmem:[#allocation77_spill] sm:$0xff] %v12820_v17  ;;  %6067 = vperm.xlu1 %7042, %v6002_v43   ;;  %v522_v17 = vsub.f32 %v12636_v61, %v12776_v3  ;;  %v525_v61 = vsub.f32 %v12657_v58, %v12776_v3 }
 0x543   : > { %v5538_v62 = vxor.u32 2147483648, %v5533_v39  ;;  %v5542_v7 = vsel %vm5540_vm0, %v5541_v57, %v5533_v39 }
 0x545   : > { %v5539_v59 = vsel %vm5537_vm13, %v5525_v2, %v5538_v62  ;;  %v12812_v11 = vpop.permute.xlu1 %5807  ;;  %v7058_v2 = vpop.eup %7057  ;;  %v6005_v62 = vld [vmem:[%s12550_s14 + $0x90] sm:$0xff] }
 0x546   : > { %v5543_v23 = vsel %vm5536_vm2, %v5539_v59, %v5542_v7  ;;  %v679_v39 = vmul.f32 0.25, %v7058_v2  ;;  %v12828_v7 = vld [vmem:[%s12550_s14 + $0x88] sm:$0xff]  ;;  %v12854_v2 = vld [vmem:[%s12550_s14 + $0x38] sm:$0xff] }
 0x547   : > { %v5544_v28 = vsel %vm5534_vm4, nan, %v5543_v23  ;;  %v5818_v26 = vpop.permute.xlu0 %5817  ;;  %14223 = vst [vmem:[#allocation62_spill] sm:$0xff] %v12828_v7 }
 0x548   : > { %6055 = vperm.xlu0 %7041, %v12807_v56   ;;  %v5729_v16 = vadd.f32 1.0, %v5544_v28  ;;  %v12830_v59 = vmul.f32 %v5818_v26, %v679_v39  ;;  %14230 = vst [vmem:[#allocation66_spill] sm:$0xff] %v12854_v2 }
 0x549   : > { %v12832_v23 = vpop.permute.xlu2 %5857 }
 0x54a   : > { %v5761_v38 = vmul.f32 0.5, %v5729_v16  ;;  %14224 = vst [vmem:[#allocation65_spill] sm:$0xff] %v12830_v59  ;;  %6076 = vperm.xlu1 %7042, %v6005_v62   ;;  %v12864_v62 = vld [vmem:[%s12550_s14 + $0xc0] sm:$0xff] }
 0x54b   : > { %14233 = vst [vmem:[#allocation94_spill] sm:$0xff] %v12864_v62 }
 0x54c   : > { %v5793_v47 = vsel %vm737_vm11, %v5761_v38, 0.0  ;;  %v12847_v38 = vld [vmem:[%s12550_s14 + $0xa0] sm:$0xff] }
 0x54d   : > { %5947 = vperm.xlu2 %7043, %v5793_v47   ;;  %v12824_v57 = vpop.permute.xlu1 %5822  ;;  %14229 = vst [vmem:[#allocation33_spill] sm:$0xff] %v12847_v38 }
 0x54e   : > { %14222 = vst [vmem:[#allocation30_spill] sm:$0xff] %v12824_v57  ;;  %v6017_v57 = vld [vmem:[%s12550_s14 + $0xf0] sm:$0xff] }
 0x54f   : > { %v12841_v16 = vpop.permute.xlu0 %5832 }
 0x550   : > { %6064 = vperm.xlu0 %7041, %v12818_v63   ;;  %14227 = vst [vmem:[#allocation80_spill] sm:$0xff] %v12841_v16  ;;  %v12912_v16 = vld [vmem:[%s12550_s14 + $0x98] sm:$0xff] }
 0x551   : > { %v12849_v47 = vpop.permute.xlu2 %5872 }
 0x552   : > { %6085 = vperm.xlu1 %7042, %v12844_v46  }
 0x555   : > { %6025 = vperm.xlu2 %7043, %v5988_v49   ;;  %v12839_v28 = vpop.permute.xlu1 %5837  ;;  %v542_v49 = vsub.f32 %v12784_v10, %v12776_v3 }
 0x556   : > { %14226 = vst [vmem:[#allocation88_spill] sm:$0xff] %v12839_v28 }
 0x557   : > { %v12861_v26 = vpop.permute.xlu0 %5847  ;;  %v574_v46 = vmul.f32 -1970.0, %v542_v49 }
 0x558   : > { %6073 = vperm.xlu0 %7041, %v12828_v7   ;;  %14232 = vst [vmem:[#allocation81_spill] sm:$0xff] %v12861_v26 }
 0x559   : > { %v12869_v42 = vpop.permute.xlu2 %5887  ;;  %v606_v10 = vmul.f32 %v574_v46, %v542_v49 }
 0x55a   : > { %14234 = vst [vmem:[#allocation95_spill] sm:$0xff] %v12869_v42  ;;  %6094 = vperm.xlu1 %7042, %v12864_v62   ;;  %v12886_v42 = vld [vmem:[%s12550_s14 + $0x68] sm:$0xff] }
 0x55b   : > { %v665_v62 = vmul.f32 1.442695, %v606_v10 }
 0x55d   : > { %6034 = vperm.xlu2 %7043, %v12836_v35   ;;  %v12859_v39 = vpop.permute.xlu1 %5852  ;;  %v12874_v35 = vld [vmem:[%s12550_s14 + $0x50] sm:$0xff]  ;;  %7059 = vpow2.f32 %v665_v62 }
 0x55e   : > { %14231 = vst [vmem:[#allocation74_spill] sm:$0xff] %v12859_v39 }
 0x55f   : > { %v12879_v7 = vpop.permute.xlu0 %5862 }
 0x560   : > { %6082 = vperm.xlu0 %7041, %v12847_v38   ;;  %14235 = vst [vmem:[#allocation86_spill] sm:$0xff] %v12879_v7  ;;  %v6015_v7 = vld [vmem:[%s12550_s14 + $0xe0] sm:$0xff]  ;;  %v518_v38 = vsub.f32 %v12590_v41, %v12776_v3 }
 0x561   : > { %v12882_v59 = vpop.permute.xlu2 %5902 }
 0x562   : > { %14236 = vst [vmem:[#allocation36_spill] sm:$0xff] %v12882_v59  ;;  %7044 = vset.pattern.permute.xlu1 %v13752_v44  ;;  %v12897_v59 = vld [vmem:[%s12550_s14 + $0x80] sm:$0xff] }
 0x563   : > { %6259 = vperm.xlu1 %7044, %v6002_v43   ;;  %v7060_v44 = vpop.eup %7059  ;;  %v543_v43 = vsub.f32 %v12780_v22, %v12776_v3 }
 0x565   : > { %6043 = vperm.xlu2 %7043, %v12854_v2   ;;  %v12877_v1 = vpop.permute.xlu1 %5867  ;;  %v6018_v2 = vld [vmem:[%s12550_s14 + $0xf8] sm:$0xff] }
 0x567   : > { %v12891_v49 = vpop.permute.xlu0 %5877 }
 0x568   : > { %6091 = vperm.xlu0 %7041, %v12867_v12   ;;  %14238 = vst [vmem:[#allocation79_spill] sm:$0xff] %v12891_v49  ;;  %v14242_v49 = vmov 1  }
 0x569   : > { %v12894_v26 = vpop.permute.xlu2 %5917 }
 0x56a   : > { %14239 = vst [vmem:[#allocation83_spill] sm:$0xff] %v12894_v26 }
 0x56b   : > { %6307 = vperm.xlu1 %7044, %v6018_v2  }
 0x56d   : > { %6052 = vperm.xlu2 %7043, %v12874_v35   ;;  %v12889_v46 = vpop.permute.xlu1 %5882 }
 0x56e   : > { %14237 = vst [vmem:[#allocation70_spill] sm:$0xff] %v12889_v46  ;;  %v702_v46 = vmul.f32 0.25, %v7060_v44 }
 0x56f   : > { %v12904_v10 = vpop.permute.xlu0 %5892 }
 0x570   : > { %6115 = vperm.xlu0 %7041, %v6018_v2   ;;  %14241 = vst [vmem:[#allocation90_spill] sm:$0xff] %v12904_v10  ;;  %v575_v2 = vmul.f32 -1970.0, %v543_v43 }
 0x571   : > { %v5933_v26 = vpop.permute.xlu2 %5932 }
 0x572   : > { %v12909_v39 = vmul.f32 %v5933_v26, %v702_v46  ;;  %v607_v22 = vmul.f32 %v575_v2, %v543_v43  ;;  %v6009_v26 = vld [vmem:[%s12550_s14 + $0xb0] sm:$0xff]  ;;  %v545_v43 = vsub.f32 %v12799_v5, %v12776_v3  ;;  %v12937_v5 = vld [vmem:[%s12550_s14 + $0xe8] sm:$0xff] }
 0x573   : > { %6250 = vperm.xlu1 %7044, %v12804_v8  }
 0x574   : > { %14243 = vst [vmem:[#allocation96_spill] sm:$0xff] %v12909_v39  ;;  %v667_v8 = vmul.f32 1.442695, %v607_v22  ;;  %v6012_v39 = vld [vmem:[%s12550_s14 + $0xc8] sm:$0xff] }
 0x575   : > { %6061 = vperm.xlu2 %7043, %v12886_v42   ;;  %v12902_v62 = vpop.permute.xlu1 %5897 }
 0x576   : > { %14240 = vst [vmem:[#allocation97_spill] sm:$0xff] %v12902_v62  ;;  %v546_v62 = vsub.f32 %v12797_v54, %v12776_v3  ;;  %7061 = vpow2.f32 %v667_v8  ;;  %v520_v8 = vsub.f32 %v12518_v33, %v12776_v3  ;;  %v517_v33 = vsub.f32 %v12532_v24, %v12776_v3 }
 0x577   : > { %v12919_v10 = vpop.permute.xlu0 %5907 }
 0x578   : > { %6106 = vperm.xlu0 %7041, %v6015_v7   ;;  %14245 = vst [vmem:[#allocation71_spill] sm:$0xff] %v12919_v10  ;;  %v552_v10 = vmul.f32 -1970.0, %v520_v8 }
 0x57a   : > { %v584_v28 = vmul.f32 %v552_v10, %v520_v8 }
 0x57b   : > { %6298 = vperm.xlu1 %7044, %v6015_v7  }
 0x57c   : > { %v7062_v22 = vpop.eup %7061  ;;  %v621_v41 = vmul.f32 1.442695, %v584_v28  ;;  %v521_v28 = vsub.f32 %v12639_v4, %v12776_v3  ;;  %v524_v4 = vsub.f32 %v12660_v31, %v12776_v3  ;;  %v528_v31 = vsub.f32 %v12686_v14, %v12776_v3 }
 0x57d   : > { %6070 = vperm.xlu2 %7043, %v12897_v59   ;;  %v12917_v44 = vpop.permute.xlu1 %5912  ;;  %v531_v14 = vsub.f32 %v12710_v34, %v12776_v3  ;;  %v533_v34 = vsub.f32 %v12723_v52, %v12776_v3 }
 0x57e   : > { %14244 = vst [vmem:[#allocation38_spill] sm:$0xff] %v12917_v44 }
 0x57f   : > { %v12927_v2 = vpop.permute.xlu0 %5922 }
 0x580   : > { %7048 = vset.pattern.permute.xlu0 %v14242_v49  ;;  %14247 = vst [vmem:[#allocation87_spill] sm:$0xff] %v12927_v2 }
 0x581   : > { %6256 = vperm.xlu0 %7048, %v12818_v63   ;;  %v578_v63 = vmul.f32 -1970.0, %v546_v62 }
 0x583   : > { %v610_v46 = vmul.f32 %v578_v63, %v546_v62  ;;  %7049 = vset.pattern.permute.xlu1 %v13868_v45  ;;  %v523_v62 = vsub.f32 %v12566_v21, %v12776_v3  ;;  %v526_v63 = vsub.f32 %v12628_v0, %v12776_v3  ;;  %v515_v0 = vsub.f32 %v12538_v27, %v12776_v3 }
 0x584   : > { %6109 = vperm.xlu1 %7049, %v12937_v5  }
 0x585   : > { %6079 = vperm.xlu2 %7043, %v12912_v16   ;;  %v12925_v54 = vpop.permute.xlu1 %5927  ;;  %v673_v7 = vmul.f32 1.442695, %v610_v46  ;;  %v558_v44 = vmul.f32 -1970.0, %v526_v63 }
 0x586   : > { %14246 = vst [vmem:[#allocation82_spill] sm:$0xff] %v12925_v54 }
 0x587   : > { %7063 = vpow2.f32 %v673_v7  ;;  %v5938_v2 = vpop.permute.xlu0 %5937  ;;  %v555_v7 = vmul.f32 -1970.0, %v523_v62 }
 0x589   : > { %6247 = vperm.xlu0 %7048, %v12807_v56   ;;  %v577_v56 = vmul.f32 -1970.0, %v545_v43  ;;  %v587_v24 = vmul.f32 %v555_v7, %v523_v62  ;;  %v550_v62 = vmul.f32 -1970.0, %v518_v38 }
 0x58b   : > { %v609_v54 = vmul.f32 %v577_v56, %v545_v43 }
 0x58c   : > { %7050 = vset.pattern.permute.xlu1 %v14242_v49 }
 0x58d   : > { %6088 = vperm.xlu2 %7043, %v6009_v26   ;;  %v12942_v46 = vpop.permute.xlu1 %5942  ;;  %v671_v43 = vmul.f32 1.442695, %v609_v54  ;;  %v7064_v56 = vpop.eup %7063 }
 0x58e   : > { %14248 = vst [vmem:[#allocation99_spill] sm:$0xff] %v12942_v46  ;;  %v549_v46 = vmul.f32 -1970.0, %v517_v33  ;;  %v706_v27 = vmul.f32 0.25, %v7064_v56 }
 0x58f   : > { %7065 = vpow2.f32 %v671_v43 }
 0x590   : > { %v581_v8 = vmul.f32 %v549_v46, %v517_v33  ;;  %7067 = vpow2.f32 %v621_v41  ;;  %v538_v41 = vsub.f32 %v12719_v13, %v12776_v3  ;;  %v527_v13 = vsub.f32 %v12694_v30, %v12776_v3 }
 0x591   : > { %6238 = vperm.xlu0 %7048, %v12792_v50   ;;  %v703_v50 = vmul.f32 0.25, %v7062_v22  ;;  %v529_v22 = vsub.f32 %v12653_v18, %v12776_v3  ;;  %v560_v30 = vmul.f32 -1970.0, %v528_v31 }
 0x592   : > { %v615_v33 = vmul.f32 1.442695, %v581_v8 }
 0x593   : > { %v12946_v21 = vmul.f32 %v5938_v2, %v703_v50  ;;  %v590_v2 = vmul.f32 %v558_v44, %v526_v63  ;;  %v547_v50 = vmul.f32 -1970.0, %v515_v0  ;;  %v561_v18 = vmul.f32 -1970.0, %v529_v22 }
 0x594   : > { %v532_v63 = vsub.f32 %v12675_v37, %v12776_v3 }
 0x595   : > { %6097 = vperm.xlu2 %7043, %v6012_v39   ;;  %14249 = vst [vmem:[#allocation92_spill] sm:$0xff] %v12946_v21  ;;  %v12959_v10 = vpop.permute.xlu1 %6022  ;;  %v6013_v21 = vld [vmem:[%s12550_s14 + $0xd0] sm:$0xff]  ;;  %v633_v43 = vmul.f32 1.442695, %v590_v2  ;;  %v579_v56 = vmul.f32 %v547_v50, %v515_v0  ;;  %v7066_v46 = vpop.eup %7065  ;;  %v554_v0 = vmul.f32 -1970.0, %v522_v17  ;;  %v553_v50 = vmul.f32 -1970.0, %v521_v28 }
 0x596   : > { %14250 = vst [vmem:[#allocation98_spill] sm:$0xff] %v12959_v10  ;;  %6292 = vperm.xlu1 %7050, %v6013_v21   ;;  %v593_v10 = vmul.f32 %v561_v18, %v529_v22  ;;  %v564_v37 = vmul.f32 -1970.0, %v532_v63 }
 0x597   : > { %v611_v2 = vmul.f32 1.442695, %v579_v56 }
 0x598   : > { %v639_v22 = vmul.f32 1.442695, %v593_v10  ;;  %v596_v8 = vmul.f32 %v564_v37, %v532_v63  ;;  %v556_v63 = vmul.f32 -1970.0, %v524_v4 }
 0x599   : > { %6289 = vperm.xlu0 %7048, %v6012_v39   ;;  %v516_v39 = vsub.f32 %v12593_v15, %v12776_v3  ;;  %v627_v15 = vmul.f32 1.442695, %v587_v24 }
 0x59a   : > { %v5953_v54 = vpop.permute.xlu0 %5952 }
 0x59b   : > { %v12961_v7 = vmul.f32 %v5953_v54, %v706_v27  ;;  %v548_v44 = vmul.f32 -1970.0, %v516_v39  ;;  %v582_v27 = vmul.f32 %v550_v62, %v518_v38  ;;  %7069 = vpow2.f32 %v627_v15  ;;  %v12989_v15 = vpop.eup %7067 }
 0x59c   : > { %7071 = vpow2.f32 %v633_v43  ;;  %v705_v38 = vmul.f32 0.25, %v7066_v46  ;;  %v557_v43 = vmul.f32 -1970.0, %v525_v61 }
 0x59d   : > { %7045 = vset.pattern.permute.xlu2 %v14242_v49  ;;  %v580_v24 = vmul.f32 %v548_v44, %v516_v39  ;;  %v12977_v18 = vpop.permute.xlu1 %6031  ;;  %7073 = vpow2.f32 %v615_v33  ;;  %v617_v39 = vmul.f32 1.442695, %v582_v27  ;;  %v586_v44 = vmul.f32 %v554_v0, %v522_v17 }
 0x59e   : > { %6304 = vperm.xlu2 %7045, %v6017_v57   ;;  %7051 = vset.pattern.permute.xlu1 %v13868_v45  ;;  %7075 = vpow2.f32 %v611_v2  ;;  %v570_v33 = vmul.f32 -1970.0, %v538_v41  ;;  %v530_v17 = vsub.f32 %v12714_v29, %v12776_v3  ;;  %v645_v27 = vmul.f32 1.442695, %v596_v8 }
 0x59f   : > { %v613_v10 = vmul.f32 1.442695, %v580_v24  ;;  %6100 = vperm.xlu1 %7051, %v6013_v21   ;;  %7077 = vpow2.f32 %v639_v22  ;;  %v534_v21 = vsub.f32 %v12721_v51, %v12776_v3  ;;  %v589_v37 = vmul.f32 %v557_v43, %v525_v61 }
 0x5a0   : > { %7079 = vpow2.f32 %v617_v39  ;;  %v559_v2 = vmul.f32 -1970.0, %v527_v13  ;;  %v563_v22 = vmul.f32 -1970.0, %v531_v14  ;;  %v536_v29 = vsub.f32 %v12731_v48, %v12776_v3 }
 0x5a1   : > { %6280 = vperm.xlu0 %7048, %v6009_v26   ;;  %v535_v26 = vsub.f32 %v12705_v32, %v12776_v3  ;;  %7081 = vpow2.f32 %v613_v10  ;;  %v539_v61 = vsub.f32 %v12752_v40, %v12776_v3  ;;  %v592_v48 = vmul.f32 %v560_v30, %v528_v31 }
 0x5a2   : > { %v12979_v32 = vpop.permute.xlu0 %6028  ;;  %7083 = vpow2.f32 %v645_v27  ;;  %v566_v10 = vmul.f32 -1970.0, %v534_v21  ;;  %v565_v43 = vmul.f32 -1970.0, %v533_v34  ;;  %v540_v30 = vsub.f32 %v12750_v55, %v12776_v3 }
 0x5a3   : > { %v567_v54 = vmul.f32 -1970.0, %v535_v26 }
 0x5a4   : > { %v598_v27 = vmul.f32 %v566_v10, %v534_v21 }
 0x5a5   : > { %v599_v46 = vmul.f32 %v567_v54, %v535_v26  ;;  %v588_v26 = vmul.f32 %v556_v63, %v524_v4  ;;  %v602_v54 = vmul.f32 %v570_v33, %v538_v41  ;;  %v631_v41 = vmul.f32 1.442695, %v589_v37 }
 0x5a6   : > { %7046 = vset.pattern.permute.xlu2 %v13868_v45  ;;  %v568_v63 = vmul.f32 -1970.0, %v536_v29  ;;  %v637_v33 = vmul.f32 1.442695, %v592_v48  ;;  %v597_v37 = vmul.f32 %v565_v43, %v533_v34  ;;  %v649_v55 = vmul.f32 1.442695, %v598_v27 }
 0x5a7   : > { %6112 = vperm.xlu2 %7046, %v6017_v57   ;;  %v5948_v58 = vpop.permute.xlu2 %5947  ;;  %v12993_v57 = vpop.eup %7069  ;;  %v651_v51 = vmul.f32 1.442695, %v599_v46  ;;  %7053 = vset.pattern.permute.xlu1 %v14242_v49  ;;  %v657_v31 = vmul.f32 1.442695, %v602_v54  ;;  %v572_v34 = vmul.f32 -1970.0, %v540_v30 }
 0x5a8   : > { %v12986_v62 = vmul.f32 %v5948_v58, %v705_v38  ;;  %v12997_v56 = vpop.eup %7071  ;;  %v562_v58 = vmul.f32 -1970.0, %v530_v17  ;;  %6241 = vperm.xlu1 %7053, %v12789_v9   ;;  %v647_v54 = vmul.f32 1.442695, %v597_v37  ;;  %v683_v37 = vmul.f32 0.25, %v12993_v57 }
 0x5a9   : > { %6229 = vperm.xlu0 %7048, %v12766_v60   ;;  %v585_v60 = vmul.f32 %v553_v50, %v521_v28  ;;  %v13003_v24 = vpop.eup %7073  ;;  %v625_v28 = vmul.f32 1.442695, %v586_v44  ;;  %v13009_v50 = vpop.permute.xlu1 %6040  ;;  %v591_v44 = vmul.f32 %v559_v2, %v527_v13  ;;  %v537_v13 = vsub.f32 %v12729_v36, %v12776_v3 }
 0x5aa   : > { %v13011_v38 = vpop.permute.xlu0 %6037  ;;  %v13013_v39 = vpop.eup %7075  ;;  %v594_v46 = vmul.f32 %v562_v58, %v530_v17  ;;  %v677_v27 = vmul.f32 0.25, %v13003_v24 }
 0x5ab   : > { %v623_v0 = vmul.f32 1.442695, %v585_v60  ;;  %v13021_v4 = vpop.eup %7077  ;;  %7085 = vpow2.f32 %v625_v28  ;;  %v629_v60 = vmul.f32 1.442695, %v588_v26  ;;  %v635_v28 = vmul.f32 1.442695, %v591_v44 }
 0x5ac   : > { %v13024_v8 = vpop.eup %7079  ;;  %v641_v21 = vmul.f32 1.442695, %v594_v46  ;;  %v569_v3 = vmul.f32 -1970.0, %v537_v13 }
 0x5ad   : > { %v13027_v40 = vpop.eup %7081  ;;  %7087 = vpow2.f32 %v623_v0  ;;  %v600_v0 = vmul.f32 %v568_v63, %v536_v29 }
 0x5ae   : > { %7089 = vpow2.f32 %v651_v51  ;;  %v7084_v2 = vpop.eup %7083 }
 0x5af   : > { %7047 = vset.pattern.permute.xlu2 %v14242_v49  ;;  %v13018_v52 = vpop.permute.xlu2 %6025  ;;  %7091 = vpow2.f32 %v631_v41  ;;  %v653_v58 = vmul.f32 1.442695, %v600_v0  ;;  %v604_v41 = vmul.f32 %v572_v34, %v540_v30  ;;  %v692_v0 = vmul.f32 0.25, %v7084_v2  ;;  %v13073_v34 = vld [vmem:[%s13472_s4] ss:$0 sm:$0xff] }
 0x5b0   : > { %6253 = vperm.xlu2 %7047, %v12886_v42   ;;  %v571_v42 = vmul.f32 -1970.0, %v539_v61  ;;  %7093 = vpow2.f32 %v629_v60  ;;  %6232 = vperm.xlu1 %7053, %v12763_v19   ;;  %vm6123_vm6 = vcmp.eq.s32.totalorder %v13073_v34, %v13009_v50  ;;  %vm6122_vm0 = vcmp.eq.s32.totalorder %v13073_v34, %v13011_v38  ;;  %v14263_v50 = vld [vmem:[#allocation79_spill] sm:$0xff] }
 0x5b1   : > { %6220 = vperm.xlu0 %7048, %v12739_v25   ;;  %v595_v25 = vmul.f32 %v563_v22, %v531_v14  ;;  %v13034_v9 = vpop.permute.xlu1 %6049  ;;  %v7086_v17 = vpop.eup %7085  ;;  %7095 = vpow2.f32 %v657_v31  ;;  %v13050_v46 = vmul.f32 1.442695, %v604_v41  ;;  %vm6120_vm13 = vcmp.eq.s32.totalorder %v13073_v34, %v12977_v18 }
 0x5b2   : > { %v13036_v26 = vpop.permute.xlu0 %6046  ;;  %v603_v22 = vmul.f32 %v571_v42, %v539_v61  ;;  %7097 = vpow2.f32 %v637_v33  ;;  %v678_v33 = vmul.f32 0.25, %v13024_v8  ;;  %v682_v30 = vmul.f32 0.25, %v7086_v17 }
 0x5b3   : > { %v643_v14 = vmul.f32 1.442695, %v595_v25  ;;  %v7088_v36 = vpop.eup %7087  ;;  %7099 = vpow2.f32 %v635_v28  ;;  %v675_v17 = vmul.f32 0.25, %v13013_v39  ;;  %vm6126_vm10 = vcmp.eq.s32.totalorder %v13073_v34, %v13034_v9 }
 0x5b4   : > { %v7090_v29 = vpop.eup %7089  ;;  %v659_v61 = vmul.f32 1.442695, %v603_v22  ;;  %vm6125_vm1 = vcmp.eq.s32.totalorder %v13073_v34, %v13036_v26  ;;  %vm6119_vm2 = vcmp.eq.s32.totalorder %v13073_v34, %v12979_v32 }
 0x5b5   : > { %7101 = vpow2.f32 %v643_v14  ;;  %v7092_v48 = vpop.eup %7091  ;;  %v686_v14 = vmul.f32 0.25, %v12997_v56  ;;  %v13060_v8 = vmul.f32 0.25, %v7090_v29  ;;  %v6014_v29 = vld [vmem:[%s12550_s14 + $0xd8] sm:$0xff] }
 0x5b6   : > { %7103 = vpow2.f32 %v641_v21  ;;  %v7094_v10 = vpop.eup %7093 }
 0x5b7   : > { %v13038_v51 = vpop.permute.xlu2 %6034  ;;  %7105 = vpow2.f32 %v649_v55  ;;  %v7096_v44 = vpop.eup %7095  ;;  %v681_v55 = vmul.f32 0.25, %v7088_v36 }
 0x5b8   : > { %6301 = vperm.xlu2 %7047, %v12937_v5   ;;  %7107 = vpow2.f32 %v647_v54  ;;  %v7098_v43 = vpop.eup %7097  ;;  %6283 = vperm.xlu1 %7053, %v12867_v12   ;;  %v13062_v24 = vmul.f32 0.25, %v7096_v44  ;;  %v684_v12 = vmul.f32 0.25, %v7094_v10  ;;  %v13094_v44 = vmul.f32 %v12786_v53, %v678_v33 }
 0x5b9   : > { %6271 = vperm.xlu0 %7048, %v12912_v16   ;;  %v601_v16 = vmul.f32 %v569_v3, %v537_v13  ;;  %7109 = vpow2.f32 %v653_v58  ;;  %v13043_v60 = vpop.permute.xlu1 %6058  ;;  %v7100_v25 = vpop.eup %7099  ;;  %v680_v13 = vmul.f32 0.25, %v12989_v15  ;;  %v688_v22 = vmul.f32 0.25, %v7098_v43 }
 0x5ba   : > { %v13045_v5 = vpop.permute.xlu0 %6055  ;;  %7111 = vpow2.f32 %v659_v61  ;;  %v687_v2 = vmul.f32 0.25, %v7100_v25  ;;  %v13085_v61 = vmul.f32 %v12760_v20, %v675_v17  ;;  %vm6129_vm3 = vcmp.eq.s32.totalorder %v13073_v34, %v13043_v60  ;;  %v14255_v17 = vld [vmem:[#allocation80_spill] sm:$0xff] }
 0x5bb   : > { %v7102_v19 = vpop.eup %7101  ;;  %v655_v31 = vmul.f32 1.442695, %v601_v16  ;;  %vm6128_vm12 = vcmp.eq.s32.totalorder %v13073_v34, %v13045_v5  ;;  %vm6121_vm11 = vcmp.eq.s32.totalorder %v13073_v34, %v13038_v51 }
 0x5bc   : > { %v7104_v42 = vpop.eup %7103  ;;  %v13065_v3 = vmul.f32 0.25, %v7102_v19  ;;  %v13097_v20 = vmul.f32 %v12832_v23, %v687_v2  ;;  %v13100_v19 = vmul.f32 %v12801_v6, %v681_v55  ;;  %v14254_v23 = vld [vmem:[#allocation88_spill] sm:$0xff]  ;;  %v14256_v6 = vld [vmem:[#allocation74_spill] sm:$0xff] }
 0x5bd   : > { %v7106_v28 = vpop.eup %7105  ;;  %v690_v57 = vmul.f32 0.25, %v7104_v42  ;;  %7113 = vpow2.f32 %v655_v31  ;;  %v13103_v31 = vmul.f32 %v12812_v11, %v677_v27  ;;  %v14251_v42 = vld [vmem:[#allocation77_spill] sm:$0xff]  ;;  %v13115_v33 = vmul.f32 %v14254_v23, %v683_v37  ;;  %v14261_v23 = vld [vmem:[#allocation78_spill] sm:$0xff] }
 0x5be   : > { %v7108_v21 = vpop.eup %7107  ;;  %v13082_v58 = vmul.f32 0.25, %v7106_v28  ;;  %v13106_v28 = vmul.f32 %v14251_v42, %v684_v12  ;;  %v13121_v55 = vmul.f32 %v14256_v6, %v686_v14  ;;  %v6161_v11 = vsel %vm6129_vm3, %v13097_v20, 0.0  ;;  %v14257_v27 = vld [vmem:[#allocation81_spill] sm:$0xff]  ;;  %v14258_v12 = vld [vmem:[#allocation95_spill] sm:$0xff]  ;;  %v14260_v14 = vld [vmem:[#allocation70_spill] sm:$0xff] }
 0x5bf   : > { %v13047_v63 = vpop.permute.xlu2 %6043  ;;  %v7110_v15 = vpop.eup %7109  ;;  %v13077_v54 = vmul.f32 %v12849_v47, %v690_v57  ;;  %v693_v39 = vmul.f32 0.25, %v7108_v21  ;;  %v13118_v57 = vmul.f32 %v14255_v17, %v682_v30  ;;  %v14259_v30 = vld [vmem:[#allocation86_spill] sm:$0xff]  ;;  %v6193_v60 = vpack.c.bf16 %v6161_v11, %v6161_v11  ;;  %v14262_v17 = vld [vmem:[#allocation36_spill] sm:$0xff] }
 0x5c0   : > { %6244 = vperm.xlu2 %7047, %v12874_v35   ;;  %v685_v35 = vmul.f32 0.25, %v7092_v48  ;;  %v7112_v56 = vpop.eup %7111  ;;  %v696_v10 = vmul.f32 0.25, %v7110_v15  ;;  %v14253_v15 = vld [vmem:[#allocation33_spill] sm:$0xff]  ;;  %v6158_v9 = vsel %vm6126_vm10, %v13106_v28, 0.0  ;;  %v13178_v11 = vmul.f32 %v14263_v50, %v13065_v3  ;;  %v14267_v50 = vld [vmem:[#allocation90_spill] sm:$0xff] }
 0x5c1   : > { %6262 = vperm.xlu0 %7048, %v12897_v59   ;;  %v689_v59 = vmul.f32 0.25, %v13021_v4  ;;  %v13068_v4 = vmul.f32 0.25, %v13027_v40  ;;  %v6068_v48 = vpop.permute.xlu1 %6067  ;;  %v699_v41 = vmul.f32 0.25, %v7112_v56  ;;  %6274 = vperm.xlu1 %7053, %v14253_v15   ;;  %v13133_v2 = vmul.f32 %v14258_v12, %v693_v39 }
 0x5c2   : > { %v6065_v40 = vpop.permute.xlu0 %6064  ;;  %vm6132_vm7 = vcmp.eq.s32.totalorder %v13073_v34, %v6068_v48  ;;  %v13136_v48 = vmul.f32 %v14259_v30, %v688_v22  ;;  %v6160_v22 = vsel %vm6128_vm12, %v13121_v55, 0.0  ;;  %v6449_v15 = vunpack.c.l.b16 %v6193_v60 }
 0x5c3   : > { %v13080_v36 = vmul.f32 %v12877_v1, %v689_v59  ;;  %vm6131_vm9 = vcmp.eq.s32.totalorder %v13073_v34, %v6065_v40  ;;  %v6164_v1 = vsel %vm6132_vm7, %v13077_v54, 0.0  ;;  %v14252_v59 = vld [vmem:[#allocation30_spill] sm:$0xff]  ;;  %v13112_v53 = vpop.eup %7113  ;;  %v13139_v40 = vmul.f32 %v14260_v14, %v692_v0 }
 0x5c4   : > { %v6196_v43 = vpack.c.bf16 %v6164_v1, %v6164_v1  ;;  %v13109_v21 = vmul.f32 %v14252_v59, %v680_v13  ;;  %v13128_v13 = vmul.f32 %v14257_v27, %v685_v35  ;;  %v6157_v59 = vsel %vm6125_vm1, %v13115_v33, 0.0  ;;  %v14264_v27 = vld [vmem:[#allocation83_spill] sm:$0xff] }
 0x5c5   : > { %v6163_v47 = vsel %vm6131_vm9, %v13080_v36, 0.0  ;;  %v13174_v6 = vmul.f32 %v14262_v17, %v696_v10  ;;  %vm6124_vm4 = vcmp.eq.s32.totalorder %v13073_v34, %v13047_v63  ;;  %v7162_v17 = vld [vmem:[%s12550_s14] sm:$0xff]  ;;  %v14268_v63 = vld [vmem:[#allocation38_spill] sm:$0xff]  ;;  %vm6118_vm1 = vcmp.eq.s32.totalorder %v13073_v34, %v13018_v52 }
 0x5c6   : > { %v6195_v25 = vpack.c.bf16 %v6163_v47, %v6163_v47  ;;  %v6452_v37 = vunpack.c.l.b16 %v6196_v43  ;;  %v13195_v3 = vsel %vm6122_vm0, %v13109_v21, 0.0  ;;  %7115 = vpow2.f32 %v13050_v46 }
 0x5c7   : > { %v6053_v16 = vpop.permute.xlu2 %6052  ;;  %v6186_v51 = vpack.c.bf16 %v13195_v3, %v13195_v3 }
 0x5c8   : > { %6295 = vperm.xlu2 %7047, %v6014_v29   ;;  %v6451_v56 = vunpack.c.l.b16 %v6195_v25  ;;  %vm6127_vm14 = vcmp.eq.s32.totalorder %v13073_v34, %v6053_v16  ;;  %v6155_v25 = vsel %vm6123_vm6, %v13100_v19, 0.0  ;;  %v6192_v16 = vpack.c.bf16 %v6160_v22, %v6160_v22 }
 0x5c9   : > { %v6077_v5 = vpop.permute.xlu1 %6076  ;;  %v6159_v43 = vsel %vm6127_vm14, %v13128_v13, 0.0  ;;  %6223 = vperm.xlu1 %7053, %v14261_v23   ;;  %v6187_v10 = vpack.c.bf16 %v6155_v25, %v6155_v25 }
 0x5ca   : > { %v6074_v35 = vpop.permute.xlu0 %6073  ;;  %v6476_v1 = vpack.c.b16 %v6452_v37, %v6451_v56  ;;  %vm6135_vm8 = vcmp.eq.s32.totalorder %v13073_v34, %v6077_v5  ;;  %v13181_v56 = vmul.f32 %v14264_v27, %v699_v41  ;;  %v14265_v37 = vld [vmem:[#allocation97_spill] sm:$0xff]  ;;  %v6191_v26 = vpack.c.bf16 %v6159_v43, %v6159_v43 }
 0x5cb   : > { %vm6134_vm15 = vcmp.eq.s32.totalorder %v13073_v34, %v6074_v35  ;;  %v13155_v0 = vsel %vm6135_vm8, %v13133_v2, 0.0  ;;  %v13185_v12 = vmul.f32 %v14265_v37, %v13060_v8  ;;  %v6189_v41 = vpack.c.bf16 %v6157_v59, %v6157_v59 }
 0x5cc   : > { %v6166_v47 = vsel %vm6134_vm15, %v13139_v40, 0.0  ;;  %6650 = vmatpush.bf16.msra.mxu0 %v6476_v1  ;;  %v6448_v8 = vunpack.c.l.b16 %v6192_v16  ;;  %v6447_v38 = vunpack.c.l.b16 %v6191_v26  ;;  %v13218_v27 = vmul.f32 %v14267_v50, %v13082_v58  ;;  %v14269_v26 = vld [vmem:[#allocation65_spill] sm:$0xff] }
 0x5cd   : > { %v6198_v14 = vpack.c.bf16 %v6166_v47, %v6166_v47  ;;  %v6156_v47 = vsel %vm6124_vm4, %v13118_v57, 0.0  ;;  %v6151_v58 = vsel %vm6119_vm2, %v13103_v31, 0.0  ;;  %v14273_v50 = vld [vmem:[#allocation69_spill] sm:$0xff] }
 0x5ce   : > { %v6474_v23 = vpack.c.b16 %v6448_v8, %v6447_v38  ;;  %v6188_v8 = vpack.c.bf16 %v6156_v47, %v6156_v47 }
 0x5cf   : > { %v6062_v39 = vpop.permute.xlu2 %6061  ;;  %v13213_v16 = vunpack.c.l.b16 %v6198_v14 }
 0x5d0   : > { %vm6130_vm5 = vcmp.eq.s32.totalorder %v13073_v34, %v6062_v39  ;;  %7052 = vset.pattern.permute.xlu2 %v13868_v45 }
 0x5d1   : > { %v6162_v45 = vsel %vm6130_vm5, %v13136_v48, 0.0  ;;  %6103 = vperm.xlu2 %7052, %v6014_v29   ;;  %v6190_v29 = vpack.c.bf16 %v6158_v9, %v6158_v9  ;;  %v6086_v5 = vpop.permute.xlu1 %6085  ;;  %6214 = vperm.xlu1 %7053, %v7162_v17   ;;  %v14272_v17 = vld [vmem:[#allocation62_spill] sm:$0xff] }
 0x5d2   : > { %v6194_v42 = vpack.c.bf16 %v6162_v45, %v6162_v45  ;;  %v6083_v35 = vpop.permute.xlu0 %6082  ;;  %vm6138_vm7 = vcmp.eq.s32.totalorder %v13073_v34, %v6086_v5  ;;  %v6199_v5 = vpack.c.bf16 %v13155_v0, %v13155_v0 }
 0x5d3   : > { %v6446_v1 = vunpack.c.l.b16 %v6190_v29  ;;  %vm6137_vm9 = vcmp.eq.s32.totalorder %v13073_v34, %v6083_v35  ;;  %v6170_v22 = vsel %vm6138_vm7, %v13174_v6, 0.0  ;;  %v13222_v29 = vmul.f32 %v14268_v63, %v13062_v24 }
 0x5d4   : > { %v6450_v30 = vunpack.c.l.b16 %v6194_v42  ;;  %v6169_v9 = vsel %vm6137_vm9, %v13185_v12, 0.0  ;;  %v6202_v25 = vpack.c.bf16 %v6170_v22, %v6170_v22  ;;  %v6445_v42 = vunpack.c.l.b16 %v6189_v41  ;;  %v14270_v41 = vld [vmem:[#allocation98_spill] sm:$0xff] }
 0x5d5   : > { %v6201_v45 = vpack.c.bf16 %v6169_v9, %v6169_v9  ;;  %vm6117_vm12 = vcmp.eq.s32.totalorder %v13073_v34, %v14270_v41  ;;  %v6152_v24 = vsel %vm6120_vm13, %v13094_v44, 0.0  ;;  %v13267_v63 = vmul.f32 %v14273_v50, %v13068_v4 }
 0x5d6   : > { %v6475_v60 = vpack.c.b16 %v6450_v30, %v6449_v15  ;;  %v14266_v15 = vld [vmem:[#allocation94_spill] sm:$0xff]  ;;  %v6153_v30 = vsel %vm6121_vm11, %v14269_v26, 0.0  ;;  %v6473_v35 = vpack.c.b16 %v6446_v1, %v6445_v42  ;;  %v6149_v32 = vsel %vm6117_vm12, %v13085_v61, 0.0 }
 0x5d7   : > { %v6071_v39 = vpop.permute.xlu2 %6070  ;;  %v13226_v37 = vunpack.c.l.b16 %v6201_v45  ;;  %v6185_v9 = vpack.c.bf16 %v6153_v30, %v6153_v30  ;;  %v6184_v1 = vpack.c.bf16 %v6152_v24, %v6152_v24  ;;  %v6442_v45 = vunpack.c.l.b16 %v6186_v51 }
 0x5d8   : > { %vm6133_vm3 = vcmp.eq.s32.totalorder %v13073_v34, %v6071_v39  ;;  %6651 = vmatpush.bf16.msra.mxu0 %v6475_v60  ;;  %v6443_v60 = vunpack.c.l.b16 %v6187_v10  ;;  %v6444_v10 = vunpack.c.l.b16 %v6188_v8  ;;  %v697_v8 = vmul.f32 0.25, %v13112_v53 }
 0x5d9   : > { %v6165_v43 = vsel %vm6133_vm3, %v13178_v11, 0.0  ;;  %7054 = vset.pattern.permute.xlu2 %v14242_v49  ;;  %v13224_v49 = vunpack.c.l.b16 %v6202_v25  ;;  %v6095_v39 = vpop.permute.xlu1 %6094  ;;  %6265 = vperm.xlu1 %7053, %v14272_v17   ;;  %v6441_v30 = vunpack.c.l.b16 %v6185_v9  ;;  %v6150_v24 = vsel %vm6118_vm1, %v13267_v63, 0.0 }
 0x5da   : > { %v6197_v59 = vpack.c.bf16 %v6165_v43, %v6165_v43  ;;  %6286 = vperm.xlu2 %7054, %v14266_v15   ;;  %v6092_v38 = vpop.permute.xlu0 %6091  ;;  %vm6141_vm10 = vcmp.eq.s32.totalorder %v13073_v34, %v6095_v39  ;;  %v6183_v43 = vpack.c.bf16 %v6151_v58, %v6151_v58  ;;  %v13262_v15 = vunpack.c.l.b16 %v6199_v5 }
 0x5db   : > { %v6479_v22 = vpack.c.b16 %v13224_v49, %v13226_v37  ;;  %vm6140_vm14 = vcmp.eq.s32.totalorder %v13073_v34, %v6092_v38  ;;  %v6173_v0 = vsel %vm6141_vm10, %v13181_v56, 0.0  ;;  %v6181_v58 = vpack.c.bf16 %v6149_v32, %v6149_v32  ;;  %v14274_v38 = vld [vmem:[#allocation71_spill] sm:$0xff]  ;;  %v7116_v32 = vpop.eup %7115 }
 0x5dc   : > { %v13234_v14 = vunpack.c.l.b16 %v6197_v59  ;;  %6652 = vmatpush.bf16.msra.mxu0 %v6474_v23  ;;  %v6172_v3 = vsel %vm6140_vm14, %v13222_v29, 0.0  ;;  %v14271_v59 = vld [vmem:[#allocation66_spill] sm:$0xff]  ;;  %v6472_v23 = vpack.c.b16 %v6444_v10, %v6443_v60  ;;  %v6440_v60 = vunpack.c.l.b16 %v6184_v1 }
 0x5dd   : > { %v6439_v51 = vunpack.c.l.b16 %v6183_v43  ;;  %v6204_v5 = vpack.c.bf16 %v6172_v3, %v6172_v3  ;;  %v13280_v9 = vmul.f32 %v14274_v38, %v697_v8  ;;  %v6182_v53 = vpack.c.bf16 %v6150_v24, %v6150_v24  ;;  %v14275_v3 = vld [vmem:[#allocation68_spill] sm:$0xff] }
 0x5de   : > { %v6437_v10 = vunpack.c.l.b16 %v6181_v58  ;;  %v700_v50 = vmul.f32 0.25, %v7116_v32  ;;  %v14277_v58 = vld [vmem:[#allocation87_spill] sm:$0xff] }
 0x5df   : > { %v6080_v47 = vpop.permute.xlu2 %6079  ;;  %v13285_v43 = vunpack.c.l.b16 %v6204_v5 }
 0x5e0   : > { %vm6136_vm6 = vcmp.eq.s32.totalorder %v13073_v34, %v6080_v47  ;;  %6653 = vmatpush.bf16.msra.mxu0 %v6473_v35  ;;  %v6471_v35 = vpack.c.b16 %v6442_v45, %v6441_v30  ;;  %v7163_v45 = vld [vmem:[%s13471_s3] ss:$0 sm:$0xff]  ;;  %v6205_v30 = vpack.c.bf16 %v6173_v0, %v6173_v0  ;;  %v13296_v5 = vmul.f32 %v14277_v58, %v700_v50  ;;  %v14278_v0 = vld [vmem:[#allocation85_spill] sm:$0xff] }
 0x5e1   : > { %v6168_v25 = vsel %vm6136_vm6, %v13218_v27, 0.0  ;;  %v6260_v39 = vpop.permute.xlu1 %6259 }
 0x5e2   : > { %v6200_v42 = vpack.c.bf16 %v6168_v25, %v6168_v25  ;;  %6235 = vperm.xlu2 %7054, %v14271_v59   ;;  %v6116_v4 = vpop.permute.xlu0 %6115  ;;  %v6470_v25 = vpack.c.b16 %v6440_v60, %v6439_v51  ;;  %vm6324_vm0 = vcmp.eq.s32.totalorder %v13073_v34, %v6260_v39 }
 0x5e3   : > { %vm6148_vm4 = vcmp.eq.s32.totalorder %v13073_v34, %v6116_v4 }
 0x5e4   : > { %v13270_v41 = vunpack.c.l.b16 %v6200_v42  ;;  %6654 = vmatpush.bf16.msra.mxu0 %v6472_v23  ;;  %v14276_v42 = vld [vmem:[#allocation63_spill] sm:$0xff]  ;;  %v6438_v23 = vunpack.c.l.b16 %v6182_v53 }
 0x5e5   : > { %v544_v59 = vsub.f32 %v14276_v42, %v7163_v45 }
 0x5e6   : > { %v6469_v8 = vpack.c.b16 %v6438_v23, %v6437_v10 }
 0x5e7   : > { %v6089_v47 = vpop.permute.xlu2 %6088 }
 0x5e8   : > { %vm6139_vm8 = vcmp.eq.s32.totalorder %v13073_v34, %v6089_v47  ;;  %6655 = vmatpush.bf16.msra.mxu0 %v6471_v35  ;;  %v576_v35 = vmul.f32 -1970.0, %v544_v59 }
 0x5e9   : > { %v6171_v52 = vsel %vm6139_vm8, %v13280_v9, 0.0  ;;  %v6308_v38 = vpop.permute.xlu1 %6307 }
 0x5ea   : > { %v6203_v1 = vpack.c.bf16 %v6171_v52, %v6171_v52  ;;  %6226 = vperm.xlu2 %7054, %v14275_v3   ;;  %v6107_v51 = vpop.permute.xlu0 %6106  ;;  %vm6340_vm5 = vcmp.eq.s32.totalorder %v13073_v34, %v6308_v38  ;;  %v13302_v52 = vunpack.c.l.b16 %v6205_v30  ;;  %v608_v32 = vmul.f32 %v576_v35, %v544_v59 }
 0x5eb   : > { %v6356_v3 = vsel %vm6324_vm0, %v13077_v54, 0.0  ;;  %vm6145_vm9 = vcmp.eq.s32.totalorder %v13073_v34, %v6107_v51 }
 0x5ec   : > { %v13291_v17 = vunpack.c.l.b16 %v6203_v1  ;;  %6656 = vmatpush.bf16.msra.mxu0 %v6470_v25  ;;  %v6372_v1 = vsel %vm6340_vm5, %v12961_v7, 0.0  ;;  %v669_v50 = vmul.f32 1.442695, %v608_v32  ;;  %v6388_v39 = vpack.c.bf16 %v6356_v3, %v6356_v3 }
 0x5ed   : > { %v6404_v42 = vpack.c.bf16 %v6372_v1, %v6372_v1 }
 0x5ee   : > { %v6480_v24 = vpack.c.b16 %v13285_v43, %v13291_v17  ;;  %7117 = vpow2.f32 %v669_v50  ;;  %v6548_v32 = vunpack.c.l.b16 %v6388_v39 }
 0x5ef   : > { %v6098_v60 = vpop.permute.xlu2 %6097  ;;  %v6564_v38 = vunpack.c.l.b16 %v6404_v42  ;;  %v7165_v42 = vld [vmem:[%s12550_s14 + $0x8] sm:$0xff] }
 0x5f0   : > { %vm6142_vm15 = vcmp.eq.s32.totalorder %v13073_v34, %v6098_v60  ;;  %6657 = vmatpush.bf16.msra.mxu0 %v6469_v8  ;;  %v7164_v60 = vld [vmem:[%s12550_s14 + $0x90] sm:$0xff]  ;;  %s6973_s14 = smul.u32 24, %s7236_s21 }
 0x5f1   : > { %v6174_v47 = vsel %vm6142_vm15, %v13296_v5, 0.0  ;;  %v6251_v58 = vpop.permute.xlu1 %6250 }
 0x5f2   : > { %v6206_v53 = vpack.c.bf16 %v6174_v47, %v6174_v47  ;;  %6277 = vperm.xlu2 %7054, %v14278_v0   ;;  %v6180_v47 = vsel %vm6148_vm4, %v12961_v7, 0.0  ;;  %vm6321_vm7 = vcmp.eq.s32.totalorder %v13073_v34, %v6251_v58  ;;  %s6742_s17 = scalar_lea.hbm %s13473_s5, %s6973_s14 }
 0x5f3   : > { %v6257_v23 = vpop.permute.xlu0 %6256  ;;  %s6745_s25 = sshll.u32 %s6742_s17, 4  ;;  %s6746_s25 = int_to_ptr.hbm [resolvable:$true] %s6745_s25 }
 0x5f4   : > { %v13305_v10 = vunpack.c.l.b16 %v6206_v53  ;;  %vm6323_vm13 = vcmp.eq.s32.totalorder %v13073_v34, %v6257_v23  ;;  %v6212_v23 = vpack.c.bf16 %v6180_v47, %v6180_v47  ;;  %v7118_v4 = vpop.eup %7117  ;;  %v14281_v47 = vld [vmem:[#allocation99_spill] sm:$0xff]  ;;  %s7180_s21 = sshra.s32 %s6746_s25, 4  ;;  %s7181_s21 = int_to_ptr.hbm [resolvable:$true] %s7180_s21 }
 0x5f5   : > { %v6355_v59 = vsel %vm6323_vm13, %v13080_v36, 0.0  ;;  %s7182_s29 = scalar_lea.hbm %s7181_s21, 24  ;;  %p7187_p2 = scmp.lt.s32.totalorder %s7181_s21, %s13473_s5 }
 0x5f6   : > { %v6481_v25 = vpack.c.b16 %v13305_v10, %v13302_v52  ;;  %v6387_v54 = vpack.c.bf16 %v6355_v59, %v6355_v59  ;;  %v6468_v39 = vunpack.c.l.b16 %v6212_v23  ;;  %p7183_p13 = scmp.ne.s32.totalorder %s7181_s21, %s7182_s29  ;;  %p7188_p3 = scmp.lt.s32.totalorder %s7186_s9, %s7182_s29 }
 0x5f8   : > { %v6305_v8 = vpop.permute.xlu2 %6304  ;;  %v6547_v0 = vunpack.c.l.b16 %v6387_v54  ;;  %v6353_v54 = vsel %vm6321_vm7, %v13097_v20, 0.0  ;;  %p7184_p0 = pnand %p7183_p13, %p7327_p4  ;;  %p7189_p5 = por %p7188_p3, %p7187_p2 }
 0x5f9   : > { %vm6339_vm2 = vcmp.eq.s32.totalorder %v13073_v34, %v6305_v8  ;;  %v6299_v36 = vpop.permute.xlu1 %6298  ;;  %v14279_v8 = vld [vmem:[#allocation61_spill] sm:$0xff] }
 0x5fa   : > { %v6371_v30 = vsel %vm6339_vm2, %v12986_v62, 0.0  ;;  %6268 = vperm.xlu2 %7054, %v7164_v60   ;;  %v6572_v3 = vpack.c.b16 %v6548_v32, %v6547_v0  ;;  %v541_v18 = vsub.f32 %v14279_v8, %v7163_v45  ;;  %v704_v60 = vmul.f32 0.25, %v7118_v4  ;;  %p7185_p1 = pneg %p7184_p0 }
 0x5fb   : > { %v6403_v35 = vpack.c.bf16 %v6371_v30, %v6371_v30  ;;  %v6248_v30 = vpop.permute.xlu0 %6247  ;;  %vm6337_vm10 = vcmp.eq.s32.totalorder %v13073_v34, %v6299_v36 }
 0x5fc   : > { %6686 = vmatpush.bf16.msra.mxu2 %v6572_v3  ;;  %v573_v59 = vmul.f32 -1970.0, %v541_v18  ;;  %vm6320_vm6 = vcmp.eq.s32.totalorder %v13073_v34, %v6248_v30  ;;  %v14282_v30 = vld [vmem:[#allocation82_spill] sm:$0xff]  ;;  %p7190_p6 = pnand %p7189_p5, %p7185_p1 }
 0x5fd   : > { %v6563_v53 = vunpack.c.l.b16 %v6403_v35  ;;  %v14280_v35 = vld [vmem:[#allocation92_spill] sm:$0xff] }
 0x5fe   : > { %v605_v32 = vmul.f32 %v573_v59, %v541_v18  ;;  %v6369_v18 = vsel %vm6337_vm10, %v14280_v35, 0.0 }
 0x5ff   : > { %v6580_v1 = vpack.c.b16 %v6564_v38, %v6563_v53  ;;  %v6177_v38 = vsel %vm6145_vm9, %v14280_v35, 0.0 }
 0x600   : > { %v663_v23 = vmul.f32 1.442695, %v605_v32 }
 0x601   : > { %v6113_v46 = vpop.permute.xlu2 %6112  ;;  %6704 = vmatpush.bf16.msra.mxu3 %v6580_v1  ;;  %v6110_v0 = vpop.permute.xlu1 %6109  ;;  %v6209_v1 = vpack.c.bf16 %v6177_v38, %v6177_v38 }
 0x602   : > { %vm6147_vm11 = vcmp.eq.s32.totalorder %v13073_v34, %v6113_v46  ;;  %6217 = vperm.xlu2 %7054, %v7165_v42   ;;  %v5984_v46 = vmul.f32 %v14281_v47, %v704_v60  ;;  %vm6146_vm3 = vcmp.eq.s32.totalorder %v13073_v34, %v6110_v0  ;;  %7119 = vpow2.f32 %v663_v23 }
 0x603   : > { %v6179_v50 = vsel %vm6147_vm11, %v12986_v62, 0.0  ;;  %v6385_v62 = vpack.c.bf16 %v6353_v54, %v6353_v54  ;;  %v6401_v60 = vpack.c.bf16 %v6369_v18, %v6369_v18 }
 0x604   : > { %v6211_v7 = vpack.c.bf16 %v6179_v50, %v6179_v50  ;;  %v6178_v51 = vsel %vm6146_vm3, %v5984_v46, 0.0  ;;  %v6465_v50 = vunpack.c.l.b16 %v6209_v1 }
 0x605   : > { %v6210_v3 = vpack.c.bf16 %v6178_v51, %v6178_v51  ;;  %v6545_v4 = vunpack.c.l.b16 %v6385_v62  ;;  %v6561_v47 = vunpack.c.l.b16 %v6401_v60  ;;  %v14283_v60 = vld [vmem:[#allocation96_spill] sm:$0xff] }
 0x606   : > { %v6467_v45 = vunpack.c.l.b16 %v6211_v7 }
 0x607   : > { %v6466_v42 = vunpack.c.l.b16 %v6210_v3 }
 0x608   : > { %v6484_v53 = vpack.c.b16 %v6468_v39, %v6467_v45  ;;  %v6239_v39 = vpop.permute.xlu0 %6238  ;;  %v7120_v35 = vpop.eup %7119 }
 0x609   : > { %v6483_v59 = vpack.c.b16 %v6466_v42, %v6465_v50  ;;  %v6293_v38 = vpop.permute.xlu1 %6292  ;;  %v701_v1 = vmul.f32 0.25, %v7120_v35  ;;  %vm6317_vm15 = vcmp.eq.s32.totalorder %v13073_v34, %v6239_v39 }
 0x60a   : > { %v6254_v58 = vpop.permute.xlu2 %6253  ;;  %6668 = vmatpush.bf16.msra.mxu1 %v6484_v53  ;;  %v6352_v53 = vsel %vm6320_vm6, %v13121_v55, 0.0  ;;  %vm6335_vm8 = vcmp.eq.s32.totalorder %v13073_v34, %v6293_v38 }
 0x60b   : > { %vm6322_vm12 = vcmp.eq.s32.totalorder %v13073_v34, %v6254_v58  ;;  %v6384_v32 = vpack.c.bf16 %v6352_v53, %v6352_v53 }
 0x60c   : > { %v6354_v20 = vsel %vm6322_vm12, %v13136_v48, 0.0 }
 0x60d   : > { %v6386_v8 = vpack.c.bf16 %v6354_v20, %v6354_v20  ;;  %v5981_v20 = vmul.f32 %v14282_v30, %v701_v1 }
 0x60e   : > { %6669 = vmatpush.bf16.msra.mxu1 %v6483_v59 }
 0x60f   : > { %v6546_v7 = vunpack.c.l.b16 %v6386_v8  ;;  %v6544_v8 = vunpack.c.l.b16 %v6384_v32  ;;  %v6367_v55 = vsel %vm6335_vm8, %v5981_v20, 0.0 }
 0x610   : > { %v6290_v58 = vpop.permute.xlu0 %6289  ;;  %v6399_v50 = vpack.c.bf16 %v6367_v55, %v6367_v55 }
 0x611   : > { %v6571_v45 = vpack.c.b16 %v6546_v7, %v6545_v4  ;;  %v6101_v3 = vpop.permute.xlu1 %6100  ;;  %v6349_v7 = vsel %vm6317_vm15, %v13115_v33, 0.0  ;;  %vm6334_vm4 = vcmp.eq.s32.totalorder %v13073_v34, %v6290_v58 }
 0x612   : > { %v6302_v54 = vpop.permute.xlu2 %6301  ;;  %vm6143_vm0 = vcmp.eq.s32.totalorder %v13073_v34, %v6101_v3  ;;  %v6381_v38 = vpack.c.bf16 %v6349_v7, %v6349_v7 }
 0x613   : > { %vm6338_vm14 = vcmp.eq.s32.totalorder %v13073_v34, %v6302_v54  ;;  %6687 = vmatpush.bf16.msra.mxu2 %v6571_v45 }
 0x614   : > { %v6370_v48 = vsel %vm6338_vm14, %v5984_v46, 0.0  ;;  %v6541_v33 = vunpack.c.l.b16 %v6381_v38 }
 0x615   : > { %v6402_v36 = vpack.c.bf16 %v6370_v48, %v6370_v48  ;;  %v6559_v48 = vunpack.c.l.b16 %v6399_v50 }
 0x617   : > { %v6562_v0 = vunpack.c.l.b16 %v6402_v36 }
 0x618   : > { %v6281_v59 = vpop.permute.xlu0 %6280 }
 0x619   : > { %v6579_v62 = vpack.c.b16 %v6562_v0, %v6561_v47  ;;  %v6175_v47 = vsel %vm6143_vm0, %v5981_v20, 0.0  ;;  %vm6331_vm11 = vcmp.eq.s32.totalorder %v13073_v34, %v6281_v59 }
 0x61a   : > { %v6245_v51 = vpop.permute.xlu2 %6244  ;;  %v6207_v32 = vpack.c.bf16 %v6175_v47, %v6175_v47 }
 0x61b   : > { %vm6319_vm1 = vcmp.eq.s32.totalorder %v13073_v34, %v6245_v51  ;;  %6705 = vmatpush.bf16.msra.mxu3 %v6579_v62 }
 0x61c   : > { %v6351_v46 = vsel %vm6319_vm1, %v13128_v13, 0.0  ;;  %v6242_v13 = vpop.permute.xlu1 %6241 }
 0x61d   : > { %v6383_v23 = vpack.c.bf16 %v6351_v46, %v6351_v46  ;;  %vm6318_vm13 = vcmp.eq.s32.totalorder %v13073_v34, %v6242_v13 }
 0x61e   : > { %v6350_v39 = vsel %vm6318_vm13, %v13106_v28, 0.0  ;;  %v6463_v28 = vunpack.c.l.b16 %v6207_v32  ;;  %v14285_v32 = vpack.c.b16 %v13213_v16, %v13234_v14 }
 0x61f   : > { %v6543_v4 = vunpack.c.l.b16 %v6383_v23  ;;  %v6382_v53 = vpack.c.bf16 %v6350_v39, %v6350_v39  ;;  %v6366_v23 = vsel %vm6334_vm4, %v13296_v5, 0.0 }
 0x620   : > { %v6230_v30 = vpop.permute.xlu0 %6229 }
 0x621   : > { %v6570_v42 = vpack.c.b16 %v6544_v8, %v6543_v4  ;;  %v6542_v0 = vunpack.c.l.b16 %v6382_v53  ;;  %v6363_v8 = vsel %vm6331_vm11, %v13280_v9, 0.0  ;;  %v6398_v4 = vpack.c.bf16 %v6366_v23, %v6366_v23 }
 0x622   : > { %v6296_v18 = vpop.permute.xlu2 %6295  ;;  %vm6314_vm10 = vcmp.eq.s32.totalorder %v13073_v34, %v6230_v30 }
 0x623   : > { %vm6336_vm5 = vcmp.eq.s32.totalorder %v13073_v34, %v6296_v18  ;;  %6688 = vmatpush.bf16.msra.mxu2 %v6570_v42  ;;  %v6569_v1 = vpack.c.b16 %v6542_v0, %v6541_v33  ;;  %v6395_v18 = vpack.c.bf16 %v6363_v8, %v6363_v8  ;;  %v6346_v47 = vsel %vm6314_vm10, %v13109_v21, 0.0 }
 0x624   : > { %v6368_v45 = vsel %vm6336_vm5, %v14283_v60, 0.0  ;;  %v6233_v51 = vpop.permute.xlu1 %6232  ;;  %v14284_v33 = vpack.c.b16 %v13270_v41, %v13262_v15  ;;  %v6603_v21 = vlaneseq  ;;  %v13385_v41 = vld [vmem:[%s308_s10] sm:$0xf] }
 0x625   : > { %v6400_v54 = vpack.c.bf16 %v6368_v45, %v6368_v45  ;;  %vm6315_vm9 = vcmp.eq.s32.totalorder %v13073_v34, %v6233_v51  ;;  %v6558_v45 = vunpack.c.l.b16 %v6398_v4  ;;  %v6599_v51 = vperm.slane %v13385_v41, 2 }
 0x626   : > { %v13387_v0 = vshrl.u32 %v6603_v21, 7 }
 0x627   : > { %v6560_v36 = vunpack.c.l.b16 %v6400_v54  ;;  %6689 = vmatpush.bf16.msra.mxu2 %v6569_v1  ;;  %v6555_v54 = vunpack.c.l.b16 %v6395_v18  ;;  %v6598_v1 = vperm.slane %v13385_v41, 0 }
 0x628   : > { %v6221_v59 = vpop.permute.xlu0 %6220  ;;  %v13396_v30 = vadd.s32 8, %v13387_v0 }
 0x629   : > { %v6578_v35 = vpack.c.b16 %v6560_v36, %v6559_v48  ;;  %vm6311_vm14 = vcmp.eq.s32.totalorder %v13073_v34, %v6221_v59 }
 0x62b   : > { %v6104_v62 = vpop.permute.xlu2 %6103  ;;  %6706 = vmatpush.bf16.msra.mxu3 %v6578_v35 }
 0x62c   : > { %vm6144_vm2 = vcmp.eq.s32.totalorder %v13073_v34, %v6104_v62  ;;  %v6284_v50 = vpop.permute.xlu1 %6283 }
 0x62d   : > { %v6176_v3 = vsel %vm6144_vm2, %v14283_v60, 0.0  ;;  %vm6332_vm3 = vcmp.eq.s32.totalorder %v13073_v34, %v6284_v50  ;;  %v6347_v60 = vsel %vm6315_vm9, %v13100_v19, 0.0 }
 0x62e   : > { %v6208_v46 = vpack.c.bf16 %v6176_v3, %v6176_v3  ;;  %v6364_v7 = vsel %vm6332_vm3, %v13222_v29, 0.0  ;;  %v6379_v39 = vpack.c.bf16 %v6347_v60, %v6347_v60 }
 0x62f   : > { %v6396_v9 = vpack.c.bf16 %v6364_v7, %v6364_v7 }
 0x630   : > { %v6464_v20 = vunpack.c.l.b16 %v6208_v46  ;;  %v6539_v10 = vunpack.c.l.b16 %v6379_v39  ;;  %v6272_v43 = vpop.permute.xlu0 %6271  ;;  %v6611_v46 = vperm.slane %v6598_v1, 0 }
 0x631   : > { %v6556_v38 = vunpack.c.l.b16 %v6396_v9  ;;  %vm6328_vm11 = vcmp.eq.s32.totalorder %v13073_v34, %v6272_v43 }
 0x632   : > { %v6482_v55 = vpack.c.b16 %v6464_v20, %v6463_v28  ;;  %v6612_v28 = vperm.slane %v6599_v51, 0  ;;  %vm6615_vm15 = vcmp.eq.s32.totalorder %v13387_v0, %v6611_v46  ;;  %vm6619_vm5 = vcmp.eq.s32.totalorder %v13396_v30, %v6611_v46 }
 0x633   : > { %vm6953_vm4 = vmpackc.low %vm6619_vm5, %vm6615_vm15  ;;  %v6360_v7 = vsel %vm6328_vm11, %v13218_v27, 0.0  ;;  %v6601_v27 = vperm.slane %v13385_v41, 3 }
 0x634   : > { %v6287_v42 = vpop.permute.xlu2 %6286  ;;  %6670 = vmatpush.bf16.msra.mxu1 %v6482_v55  ;;  %v6275_v29 = vpop.permute.xlu1 %6274  ;;  %vm6616_vm0 = vcmp.eq.s32.totalorder %v13387_v0, %v6612_v28  ;;  %vm6620_vm13 = vcmp.eq.s32.totalorder %v13396_v30, %v6612_v28 }
 0x635   : > { %vm6333_vm7 = vcmp.eq.s32.totalorder %v13073_v34, %v6287_v42  ;;  %vm6329_vm1 = vcmp.eq.s32.totalorder %v13073_v34, %v6275_v29  ;;  %v7254_v42 = vmov 1.0|1.0  }
 0x636   : > { %v6365_v58 = vsel %vm6333_vm7, %v13181_v56, 0.0  ;;  %v6576_v56 = vpack.c.b16 %v6556_v38, %v6555_v54  ;;  %v6361_v62 = vsel %vm6329_vm1, %v13185_v12, 0.0  ;;  %6954 = vmatmul.msk.bf16.vlgmr.msra.gmra.mxu0 %vm6953_vm4, %v7254_v42  ;;  %vm6957_vm7 = vmpackc.low %vm6620_vm13, %vm6616_vm0 }
 0x637   : > { %v6397_v5 = vpack.c.bf16 %v6365_v58, %v6365_v58  ;;  %v6393_v55 = vpack.c.bf16 %v6361_v62, %v6361_v62 }
 0x638   : > { %6671 = vmatpush.bf16.msra.mxu1 %v6481_v25  ;;  %v6263_v23 = vpop.permute.xlu0 %6262 }
 0x639   : > { %v6557_v13 = vunpack.c.l.b16 %v6397_v5  ;;  %vm6325_vm9 = vcmp.eq.s32.totalorder %v13073_v34, %v6263_v23  ;;  %v6553_v18 = vunpack.c.l.b16 %v6393_v55 }
 0x63a   : > { %v6357_v5 = vsel %vm6325_vm9, %v13178_v11, 0.0  ;;  %v6606_v11 = vadd.s32 16, %v13387_v0 }
 0x63b   : > { %v6577_v48 = vpack.c.b16 %v6558_v45, %v6557_v13  ;;  %v6389_v45 = vpack.c.bf16 %v6357_v5, %v6357_v5 }
 0x63c   : > { %v6236_v36 = vpop.permute.xlu2 %6235  ;;  %6672 = vmatpush.bf16.msra.mxu1 %v6480_v24  ;;  %v6378_v24 = vpack.c.bf16 %v6346_v47, %v6346_v47  ;;  %v6224_v35 = vpop.permute.xlu1 %6223 }
 0x63d   : > { %vm6316_vm12 = vcmp.eq.s32.totalorder %v13073_v34, %v6236_v36  ;;  %6707 = vmatpush.bf16.msra.mxu3 %v6577_v48  ;;  %vm6312_vm8 = vcmp.eq.s32.totalorder %v13073_v34, %v6224_v35  ;;  %v6549_v29 = vunpack.c.l.b16 %v6389_v45 }
 0x63e   : > { %v6348_v19 = vsel %vm6316_vm12, %v13118_v57, 0.0  ;;  %v6343_v57 = vsel %vm6311_vm14, %v13103_v31, 0.0  ;;  %v6344_v31 = vsel %vm6312_vm8, %v13094_v44, 0.0  ;;  %vm6623_vm14 = vcmp.eq.s32.totalorder %v6606_v11, %v6611_v46 }
 0x63f   : > { %v6380_v52 = vpack.c.bf16 %v6348_v19, %v6348_v19  ;;  %v6376_v15 = vpack.c.bf16 %v6344_v31, %v6344_v31  ;;  %vm6955_vm1 = vmpackc.low %vm6623_vm14, %vm6623_vm14 }
 0x640   : > { %6673 = vmatpush.bf16.msra.mxu1 %v6479_v22  ;;  %v6375_v22 = vpack.c.bf16 %v6343_v57, %v6343_v57 }
 0x641   : > { %v6540_v25 = vunpack.c.l.b16 %v6380_v52  ;;  %6708 = vmatpush.bf16.msra.mxu3 %v6576_v56  ;;  %v6536_v44 = vunpack.c.l.b16 %v6376_v15  ;;  %v6600_v52 = vperm.slane %v13385_v41, 1 }
 0x642   : > { %v6535_v20 = vunpack.c.l.b16 %v6375_v22 }
 0x643   : > { %v6568_v17 = vpack.c.b16 %v6540_v25, %v6539_v10  ;;  %v6614_v10 = vperm.slane %v6601_v27, 0 }
 0x644   : > { %v6227_v53 = vpop.permute.xlu2 %6226  ;;  %6674 = vmatpush.bf16.msra.mxu1 %v14284_v33  ;;  %v6215_v14 = vpop.permute.xlu1 %6214  ;;  %v6566_v12 = vpack.c.b16 %v6536_v44, %v6535_v20 }
 0x645   : > { %vm6313_vm6 = vcmp.eq.s32.totalorder %v13073_v34, %v6227_v53  ;;  %6690 = vmatpush.bf16.msra.mxu2 %v6568_v17  ;;  %vm6309_vm12 = vcmp.eq.s32.totalorder %v13073_v34, %v6215_v14  ;;  %vm6618_vm5 = vcmp.eq.s32.totalorder %v13387_v0, %v6614_v10  ;;  %vm6622_vm0 = vcmp.eq.s32.totalorder %v13396_v30, %v6614_v10 }
 0x646   : > { %v6345_v49 = vsel %vm6313_vm6, %v14269_v26, 0.0  ;;  %v6538_v26 = vunpack.c.l.b16 %v6378_v24  ;;  %v6341_v56 = vsel %vm6309_vm12, %v13085_v61, 0.0  ;;  %vm6624_vm6 = vcmp.eq.s32.totalorder %v6606_v11, %v6612_v28  ;;  %6956 = vmatmul.msk.bf16.gmra.mxu0 %vm6955_vm1, %v7254_v42  ;;  %vm6965_vm13 = vmpackc.low %vm6622_vm0, %vm6618_vm5 }
 0x647   : > { %v6377_v37 = vpack.c.bf16 %v6345_v49, %v6345_v49  ;;  %v6373_v25 = vpack.c.bf16 %v6341_v56, %v6341_v56  ;;  %vm6959_vm8 = vmpackc.low %vm6624_vm6, %vm6624_vm6  ;;  %v6613_v61 = vperm.slane %v6600_v52, 0 }
 0x648   : > { %6675 = vmatpush.bf16.msra.mxu1 %v14285_v32 }
 0x649   : > { %v6537_v3 = vunpack.c.l.b16 %v6377_v37  ;;  %v6533_v24 = vunpack.c.l.b16 %v6373_v25  ;;  %vm6621_vm4 = vcmp.eq.s32.totalorder %v13396_v30, %v6613_v61 }
 0x64b   : > { %v6567_v8 = vpack.c.b16 %v6538_v26, %v6537_v3  ;;  %6958 = vmatmul.msk.bf16.vlgmr.msra.gmra.mxu1 %vm6957_vm7, %v7254_v42  ;;  %vm6626_vm7 = vcmp.eq.s32.totalorder %v6606_v11, %v6614_v10 }
 0x64c   : > { %v6278_v16 = vpop.permute.xlu2 %6277  ;;  %v6266_v60 = vpop.permute.xlu1 %6265  ;;  %vm6967_vm9 = vmpackc.low %vm6626_vm7, %vm6626_vm7 }
 0x64d   : > { %vm6330_vm2 = vcmp.eq.s32.totalorder %v13073_v34, %v6278_v16  ;;  %6691 = vmatpush.bf16.msra.mxu2 %v6567_v8  ;;  %vm6326_vm10 = vcmp.eq.s32.totalorder %v13073_v34, %v6266_v60 }
 0x64e   : > { %v6362_v4 = vsel %vm6330_vm2, %v13174_v6, 0.0  ;;  %v6392_v6 = vpack.c.bf16 %v6360_v7, %v6360_v7  ;;  %v6358_v54 = vsel %vm6326_vm10, %v13139_v40, 0.0  ;;  %vm6617_vm2 = vcmp.eq.s32.totalorder %v13387_v0, %v6613_v61 }
 0x64f   : > { %v6394_v50 = vpack.c.bf16 %v6362_v4, %v6362_v4  ;;  %v6390_v48 = vpack.c.bf16 %v6358_v54, %v6358_v54  ;;  %vm6961_vm11 = vmpackc.low %vm6621_vm4, %vm6617_vm2 }
 0x650   : > { %v6552_v39 = vunpack.c.l.b16 %v6392_v6 }
 0x651   : > { %v6554_v58 = vunpack.c.l.b16 %v6394_v50  ;;  %6692 = vmatpush.bf16.msra.mxu2 %v6566_v12  ;;  %v6550_v19 = vunpack.c.l.b16 %v6390_v48 }
 0x653   : > { %v6575_v59 = vpack.c.b16 %v6554_v58, %v6553_v18  ;;  %v6573_v40 = vpack.c.b16 %v6550_v19, %v6549_v29 }
 0x654   : > { %v6269_v9 = vpop.permute.xlu2 %6268 }
 0x655   : > { %vm6327_vm3 = vcmp.eq.s32.totalorder %v13073_v34, %v6269_v9  ;;  %6709 = vmatpush.bf16.msra.mxu3 %v6575_v59 }
 0x656   : > { %v6359_v13 = vsel %vm6327_vm3, %v13133_v2, 0.0  ;;  %vm6625_vm3 = vcmp.eq.s32.totalorder %v6606_v11, %v6613_v61 }
 0x657   : > { %v6391_v38 = vpack.c.bf16 %v6359_v13, %v6359_v13  ;;  %vm6963_vm12 = vmpackc.low %vm6625_vm3, %vm6625_vm3 }
 0x659   : > { %v6551_v36 = vunpack.c.l.b16 %v6391_v38 }
 0x65b   : > { %v6574_v2 = vpack.c.b16 %v6552_v39, %v6551_v36  ;;  %6960 = vmatmul.msk.bf16.gmra.mxu1 %vm6959_vm8, %v7254_v42 }
 0x65c   : > { %v6218_v47 = vpop.permute.xlu2 %6217 }
 0x65d   : > { %vm6310_vm15 = vcmp.eq.s32.totalorder %v13073_v34, %v6218_v47  ;;  %6710 = vmatpush.bf16.msra.mxu3 %v6574_v2 }
 0x65e   : > { %v6342_v43 = vsel %vm6310_vm15, %v13267_v63, 0.0 }
 0x65f   : > { %v6374_v17 = vpack.c.bf16 %v6342_v43, %v6342_v43 }
 0x661   : > { %v6534_v53 = vunpack.c.l.b16 %v6374_v17  ;;  %6711 = vmatpush.bf16.msra.mxu3 %v6573_v40 }
 0x663   : > { %v6565_v34 = vpack.c.b16 %v6534_v53, %v6533_v24 }
 0x664   : > { %6966 = vmatmul.msk.bf16.vlgmr.msra.gmra.mxu3 %vm6965_vm13, %v7254_v42 }
 0x665   : > { %6693 = vmatpush.bf16.msra.mxu2 %v6565_v34 }
 0x668   : > { %6962 = vmatmul.msk.bf16.vlgmr.msra.gmra.mxu2 %vm6961_vm11, %v7254_v42 }
 0x674   : > { %6968 = vmatmul.msk.bf16.gmra.mxu3 %vm6967_vm9, %v7254_v42 }
 0x678   : > { %6964 = vmatmul.msk.bf16.gmra.mxu2 %vm6963_vm12, %v7254_v42 }
 0x6b3   : > { %v6659_v63 = vpop.f32.mrf.mxu0 }
 0x6bb   : > { %v6661_v33 = vpop.f32.mrf.mxu0 }
 0x6c3   : > { %v6664_v21 = vpop.f32.mrf.mxu0 }
 0x6c8   : > { %v6677_v57 = vpop.f32.mrf.mxu1 }
 0x6c9   : > { %v6678_v15 = vadd.f32 %v6677_v57, %v6659_v63 }
 0x6cb   : > { %v6666_v31 = vpop.f32.mrf.mxu0 }
 0x6d0   : > { %v6679_v35 = vpop.f32.mrf.mxu1 }
 0x6d1   : > { %v6680_v1 = vadd.f32 %v6679_v35, %v6661_v33 }
 0x6d8   : > { %v6682_v49 = vpop.f32.mrf.mxu1 }
 0x6d9   : > { %v6683_v30 = vadd.f32 %v6682_v49, %v6664_v21 }
 0x6e0   : > { %v6684_v37 = vpop.f32.mrf.mxu1 }
 0x6e7   : > { %v6713_v22 = vpop.f32.mrf.mxu3 }
 0x6eb   : > { %v6695_v41 = vpop.f32.mrf.mxu2 }
 0x6ec   : > { %v6696_v0 = vadd.f32 %v6695_v41, %v6678_v15 }
 0x6ee   : > { %v6714_v32 = vadd.f32 %v6713_v22, %v6696_v0 }
 0x6ef   : > { %v6715_v62 = vpop.f32.mrf.mxu3 }
 0x6f0   : > { %6725 = vst [vmem:[%s286_s13] sm:$0xff] %v6714_v32 }
 0x6f3   : > { %v6697_v51 = vpop.f32.mrf.mxu2 }
 0x6f4   : > { %v6698_v26 = vadd.f32 %v6697_v51, %v6680_v1 }
 0x6f6   : > { %v6716_v3 = vadd.f32 %v6715_v62, %v6698_v26 }
 0x6f7   : > { %v6718_v44 = vpop.f32.mrf.mxu3 }
 0x6f8   : > { %6726 = vst [vmem:[%s286_s13 + $0x8] sm:$0xff] %v6716_v3 }
 0x6fb   : > { %v6700_v46 = vpop.f32.mrf.mxu2 }
 0x6fc   : > { %v6701_v28 = vadd.f32 %v6700_v46, %v6683_v30 }
 0x6fe   : > { %v6719_v20 = vadd.f32 %v6718_v44, %v6701_v28 }
 0x6ff   : > { %v6720_v23 = vpop.f32.mrf.mxu3 }
 0x700   : > { %6727 = vst [vmem:[%s286_s13 + $0x10] sm:$0xff] %v6719_v20 }
 0x703   : > { %v6702_v8 = vpop.f32.mrf.mxu2 }
 0x704   : > { %7193 = shalt.err (!%p7190_p6)
}
 0x705   : > { %s7255_s11 = smov 128   ;;  %s7256_s13 = smov 8  }
 0x706   : > { %6974 = dma.vmem_to_hbm [thread:$0]  (%p7327_p4), %s6744_s24, 384, %s6746_s25, %s6729_s27, %s7255_s11, %s7255_s11, %s7256_s13  }
 0x707 PF: > { %p6980_p7 = scmp.ge.s32.totalorder %s7244_s23, 2  ;;  %s6760_s14 = sand.u32 1, %s7224_s18  }
 0x708   : > { %s6761_s15 = scalar_lea.sflag [#allocation3], %s6760_s14 }
 0x709   : > { %p6977_p9 = pnand %p6980_p7, %p7334_p8 }
 0x70b   : > { %p6978_p10 = pneg %p6977_p9 }
 0x70d   : > { %7219 = dma.done.wait (%p6978_p10), %s6761_s15, 384  }
 0x70e   : > { %7221 = vsyncadd (%p6978_p10), %s6761_s15, 4294966912  ;;  %s18_s23 = sadd.s32 1, %s7244_s23   ;;  %s14286_s18 = smov %s7228_s19 }
 0x70f   : > { %p15_p11 = scmp.ge.s32.totalorder %s18_s23, 4   ;;  %s14287_s19 = smov %s7232_s20 }
 0x710   : > { %s14288_s20 = smov %s7340_s6  ;;  %s14289_s21 = smov %s7240_s22 }
 0x711   : > { %s14290_s22 = smov %s14292_s26  ;;  %17 = sbr.rel (!%p15_p11) target bundleno = 4 (0x4), region = 85 }
 0x716   :  { %6767 = vsyncpa [#allocation3], 1 }
 0x717   :  { %6769 = vsyncpa [#allocation3 + $0x1], 1 }

</bundles_post_ra>
